<compile_context>
chip_gen: v7x
topology: tpu7x:2x2x1
jax: 0.10.0
libtpu: 0.0.40
codegen_flags: <defaults>
</compile_context>

<pallas_src>
import functools
import math

import jax
import jax.numpy as jnp
from jax.experimental import pallas as pl
from jax.experimental.pallas import tpu as pltpu


COMPUTE_DTYPE = jnp.bfloat16      # MXU operand dtype (accumulation stays f32)


# ----------------------------- Pallas kernel -------------------------------

def _conv3d_bn_act_kernel(*refs, k, cin, cout, hw_out, hw_offsets, act,
                          fuse_skip, skip_delta):
    """One (batch, time) step of a 'same' 3-D conv + folded BN + activation.

    refs = [x_tap_0 .. x_tap_{k-1}] (+ [skip]) + [w, scale, shift] + [out] + [build]
      x_tap_kd : (1, 1, cin, hw_in)   padded input, time slice t + kd      (bf16)
      skip     : (1, 1, cout, hw_in)  residual-skip source slice (t + 1)   (bf16)
      w        : (k, cout, k*k*cin)   weights, temporal-tap major          (bf16)
      scale    : (cout, 1), shift : (cout, 1)   folded BN affine            (f32)
      out      : (1, 1, cout, hw_out)                                       (f32)
      build    : VMEM scratch (k*k*cin, hw_out)                             (bf16)
    """
    tap_refs = refs[:k]
    pos = k
    skip_ref = None
    if fuse_skip:
        skip_ref = refs[pos]
        pos += 1
    w_ref, scale_ref, shift_ref = refs[pos], refs[pos + 1], refs[pos + 2]
    o_ref = refs[pos + 3]
    build_ref = refs[pos + 4]

    acc = jnp.zeros((cout, hw_out), jnp.float32)
    for kd in range(k):
        # Gather the k*k in-plane taps of time slice (t + kd) into VMEM scratch
        # (rows = (kh, kw, cin)); then one MXU matmul per temporal tap.
        x_kd = tap_refs[kd][0, 0, :, :]                      # (cin, hw_in)
        for ti, off in enumerate(hw_offsets):
            build_ref[ti * cin:(ti + 1) * cin, :] = x_kd[:, off:off + hw_out]
        acc = acc + jnp.dot(w_ref[kd], build_ref[...],
                            preferred_element_type=jnp.float32)

    y = acc * scale_ref[...] + shift_ref[...]                # (cout, 1) broadcasts
    if fuse_skip:                                            # residual add fused
        y = y + skip_ref[0, 0, :, skip_delta:skip_delta + hw_out].astype(jnp.float32)
    if act == "relu":
        y = jnp.maximum(y, 0.0)
    elif act == "tanh":
        y = jnp.tanh(y)
    o_ref[0, 0, :, :] = y.astype(o_ref.dtype)


# ------------------------------- glue / ops --------------------------------

def _pad_and_flatten(x, k, pad_mode):
    """x: (N, T, C, H, W) -> padded, spatially-flattened conv input.

    Returns xf: (N, Tp, C, Hp*Wp + tail) in COMPUTE_DTYPE, plus (Hp, Wp).
    The zero tail is only ever read for discarded (out-of-plane) output columns.
    """
    N, T, C, H, W = x.shape
    p = k // 2
    xp = jnp.pad(x, ((0, 0), (p, p), (0, 0), (p, p), (p, p)), mode=pad_mode)
    Tp, Hp, Wp = T + 2 * p, H + 2 * p, W + 2 * p
    xf = xp.reshape(N, Tp, C, Hp * Wp)
    tail = (k - 1) * (Wp + 1)
    xf = jnp.pad(xf, ((0, 0), (0, 0), (0, 0), (0, tail)))
    return xf.astype(COMPUTE_DTYPE), (Hp, Wp)


def _extract_valid(y, Hp, Wp, H, W):
    """(N, T, C, Hp*Wp) -> (N, T, C, H, W): keep only valid conv outputs."""
    N, T, C, _ = y.shape
    return y.reshape(N, T, C, Hp, Wp)[:, :, :, :H, :W]


def _conv3d_bn_act(xf, geom, T, params, *, ksize, act, skip=None):
    """Fused conv3d + BN(affine) + activation (+ optional residual add+ReLU).

    xf   : (N, Tp, Cin, hw_in) padded/flattened input (COMPUTE_DTYPE)
    geom : (Hp, Wp) of the padded plane
    skip : None or (skip_xf, t_offset, flat_offset) for fused residual add+ReLU
    Returns (N, T, Cout, Hp*Wp) float32 (caller slices the valid region).
    """
    N, Tp, cin, hw_in = xf.shape
    Hp, Wp = geom
    hw_out = Hp * Wp
    k = ksize
    w = params["w"]                                  # (k, cout, k*k*cin) bf16
    cout = w.shape[1]
    hw_offsets = tuple(kh * Wp + kw for kh in range(k) for kw in range(k))

    grid = (N, T)

    in_specs = []
    operands = []
    for kd in range(k):                              # k time-shifted views
        in_specs.append(pl.BlockSpec((1, 1, cin, hw_in),
                                     lambda n, t, kd=kd: (n, t + kd, 0, 0)))
        operands.append(xf)

    fuse_skip = skip is not None
    skip_delta = 0
    if fuse_skip:
        skip_xf, skip_t_off, skip_delta = skip
        _, _, c_skip, hw_in_s = skip_xf.shape
        in_specs.append(pl.BlockSpec((1, 1, c_skip, hw_in_s),
                                     lambda n, t, o=skip_t_off: (n, t + o, 0, 0)))
        operands.append(skip_xf)

    in_specs += [
        pl.BlockSpec((k, cout, k * k * cin), lambda n, t: (0, 0, 0)),
        pl.BlockSpec((cout, 1), lambda n, t: (0, 0)),
        pl.BlockSpec((cout, 1), lambda n, t: (0, 0)),
    ]
    operands += [w, params["scale"], params["shift"]]

    kernel = functools.partial(
        _conv3d_bn_act_kernel, k=k, cin=cin, cout=cout, hw_out=hw_out,
        hw_offsets=hw_offsets, act=act, fuse_skip=fuse_skip,
        skip_delta=skip_delta)

    flops = 2 * N * T * hw_out * (k ** 3) * cin * cout
    bytes_accessed = (k * N * T * cin * hw_in * xf.dtype.itemsize
                      + N * T * cout * hw_out * 4
                      + int(w.size) * w.dtype.itemsize)
    transcendentals = N * T * hw_out * cout if act == "tanh" else 0

    return pl.pallas_call(
        kernel,
        out_shape=jax.ShapeDtypeStruct((N, T, cout, hw_out), jnp.float32),
        grid=grid,
        in_specs=in_specs,
        out_specs=pl.BlockSpec((1, 1, cout, hw_out), lambda n, t: (n, t, 0, 0)),
        scratch_shapes=[pltpu.VMEM((k * k * cin, hw_out), COMPUTE_DTYPE)],
        compiler_params=pltpu.CompilerParams(
            dimension_semantics=("parallel", "parallel"),
            vmem_limit_bytes=32 * 1024 * 1024),
        cost_estimate=pl.CostEstimate(flops=flops,
                                      transcendentals=transcendentals,
                                      bytes_accessed=bytes_accessed),
    )(*operands)


def conv_bn_act(x, params, *, ksize, pad_mode, act):
    """x: (N, T, C, H, W) f32 -> (N, T, Cout, H, W) f32 ('same' conv, stride 1)."""
    N, T, C, H, W = x.shape
    xf, (Hp, Wp) = _pad_and_flatten(x, ksize, pad_mode)
    y = _conv3d_bn_act(xf, (Hp, Wp), T, params, ksize=ksize, act=act)
    return _extract_valid(y, Hp, Wp, H, W)


def residual_block(x, p):
    # TODO(synk): ResidualBlock source not included in model.py; implemented the
    # standard conv3x3x3->BN->ReLU->conv3x3x3->BN + identity skip -> ReLU variant.
    N, T, C, H, W = x.shape
    k = 3
    xf, (Hp, Wp) = _pad_and_flatten(x, k, "constant")        # zeros padding
    h = _conv3d_bn_act(xf, (Hp, Wp), T, p["c1"], ksize=k, act="relu")
    h = _extract_valid(h, Hp, Wp, H, W)
    hf, _ = _pad_and_flatten(h, k, "constant")
    # Second conv: residual add + ReLU fused into the epilogue; the skip values
    # are read from conv1's padded buffer at (t + 1, hw + Wp + 1).
    out = _conv3d_bn_act(hf, (Hp, Wp), T, p["c2"], ksize=k, act="relu",
                         skip=(xf, 1, Wp + 1))
    return _extract_valid(out, Hp, Wp, H, W)


def decoder_video_forward(params, rppg_feat, id_feat, domain_feat):
    """Inputs/outputs use the PyTorch NCDHW convention; internals are (N,T,C,H,W)."""
    x = jnp.concatenate([rppg_feat, id_feat, domain_feat], axis=1)   # (N, C, T, H, W)
    x = jnp.transpose(x, (0, 2, 1, 3, 4))                            # (N, T, C, H, W)

    feat = conv_bn_act(x, params["conv3d"], ksize=5, pad_mode="edge", act="relu")
    feat = residual_block(feat, params["res1"])
    feat = residual_block(feat, params["res2"])
    video = conv_bn_act(feat, params["decode"], ksize=5, pad_mode="edge", act="tanh")

    feat_out = jnp.transpose(feat, (0, 2, 1, 3, 4)).astype(jnp.float32)
    video_out = jnp.transpose(video, (0, 2, 1, 3, 4)).astype(jnp.float32)
    return feat_out, video_out


# --------------------------- deterministic params ---------------------------

def _fold_conv_bn(w_torch, b, gamma, beta, rmean, rvar, eps=1e-5):
    """PyTorch Conv3d weight (Cout, Cin, kD, kH, kW) + eval-mode BN -> kernel params.

    Kernel weight layout: w[kd, o, (kh*k + kw)*Cin + c] == w_torch[o, c, kd, kh, kw].
    """
    cout, cin, k, _, _ = w_torch.shape
    wk = jnp.transpose(w_torch, (2, 3, 4, 1, 0)).reshape(k, k * k * cin, cout)
    wk = jnp.transpose(wk, (0, 2, 1))                        # (k, Cout, k*k*Cin)
    scale = gamma / jnp.sqrt(rvar + eps)                     # eval-mode BN folding
    shift = beta + (b - rmean) * scale
    return {"w": wk.astype(COMPUTE_DTYPE),
            "scale": scale.reshape(cout, 1).astype(jnp.float32),
            "shift": shift.reshape(cout, 1).astype(jnp.float32)}


def _make_conv_bn(key, cin, cout, k, conv_bias=True):
    ks = jax.random.split(key, 6)
    fan_in = k * k * k * cin
    w = jax.random.normal(ks[0], (cout, cin, k, k, k), jnp.float32) / math.sqrt(fan_in)
    b = (0.05 * jax.random.normal(ks[1], (cout,), jnp.float32)
         if conv_bias else jnp.zeros((cout,), jnp.float32))
    gamma = 1.0 + 0.1 * jax.random.normal(ks[2], (cout,), jnp.float32)
    beta = 0.1 * jax.random.normal(ks[3], (cout,), jnp.float32)
    rmean = 0.1 * jax.random.normal(ks[4], (cout,), jnp.float32)
    rvar = 1.0 + 0.1 * jnp.abs(jax.random.normal(ks[5], (cout,), jnp.float32))
    return _fold_conv_bn(w, b, gamma, beta, rmean, rvar)


def init_params(key, in_ch, out_ch):
    ks = jax.random.split(key, 6)
    return {
        "conv3d": _make_conv_bn(ks[0], in_ch, out_ch, 5, conv_bias=True),
        "res1": {"c1": _make_conv_bn(ks[1], out_ch, out_ch, 3, conv_bias=False),
                 "c2": _make_conv_bn(ks[2], out_ch, out_ch, 3, conv_bias=False)},
        "res2": {"c1": _make_conv_bn(ks[3], out_ch, out_ch, 3, conv_bias=False),
                 "c2": _make_conv_bn(ks[4], out_ch, out_ch, 3, conv_bias=False)},
        "decode": _make_conv_bn(ks[5], out_ch, 3, 5, conv_bias=True),
    }


# ---------------------------------- main ------------------------------------

if __name__ == "__main__":
    key = jax.random.PRNGKey(0)
    N, T, H, W = 2, 4, 8, 8
    c_rppg, c_id, c_dom = 2, 1, 1
    in_ch = c_rppg + c_id + c_dom                      # 4
    out_ch = 8

    k_in, k_p = jax.random.split(key)
    k1, k2, k3 = jax.random.split(k_in, 3)
    rppg_feat = jax.random.normal(k1, (N, c_rppg, T, H, W), jnp.float32)
    id_feat = jax.random.normal(k2, (N, c_id, T, H, W), jnp.float32)
    domain_feat = jax.random.normal(k3, (N, c_dom, T, H, W), jnp.float32)

    params = init_params(k_p, in_ch, out_ch)

    fwd = jax.jit(decoder_video_forward)
    feat, video = fwd(params, rppg_feat, id_feat, domain_feat)
    jax.block_until_ready((feat, video))

    assert feat.shape == (N, out_ch, T, H, W)
    assert video.shape == (N, 3, T, H, W)
    assert bool(jnp.isfinite(feat).all()) and bool(jnp.isfinite(video).all())
    print("KERNEL_OK")
</pallas_src>

<mosaic_0001>
module attributes {stable_mosaic.version = 11 : i64} {
  func.func @_conv3d_bn_act_kernel(%arg0: i32, %arg1: i32, %arg2: memref<1x1x4x196xbf16, #tpu.memory_space<vmem>>, %arg3: memref<1x1x4x196xbf16, #tpu.memory_space<vmem>>, %arg4: memref<1x1x4x196xbf16, #tpu.memory_space<vmem>>, %arg5: memref<1x1x4x196xbf16, #tpu.memory_space<vmem>>, %arg6: memref<1x1x4x196xbf16, #tpu.memory_space<vmem>>, %arg7: memref<5x8x100xbf16, #tpu.memory_space<vmem>>, %arg8: memref<8x1xf32, #tpu.memory_space<vmem>>, %arg9: memref<8x1xf32, #tpu.memory_space<vmem>>, %arg10: memref<1x1x8x144xf32, #tpu.memory_space<vmem>>, %arg11: memref<100x144xbf16, #tpu.memory_space<vmem>>) attributes {dimension_semantics = [#tpu.dimension_semantics<parallel>, #tpu.dimension_semantics<parallel>], iteration_bounds = array<i64: 2, 4>, scalar_prefetch = 0 : i64, scratch_operands = 1 : i64, tpu.core_type = #tpu.core_type<tc>, window_params = [{transform_indices = @transform_0, window_bounds = array<i64: 1, 1, 4, 196>}, {transform_indices = @transform_1, window_bounds = array<i64: 1, 1, 4, 196>}, {transform_indices = @transform_2, window_bounds = array<i64: 1, 1, 4, 196>}, {transform_indices = @transform_3, window_bounds = array<i64: 1, 1, 4, 196>}, {transform_indices = @transform_4, window_bounds = array<i64: 1, 1, 4, 196>}, {pipeline_mode = #tpu.pipeline_mode<synchronous>, transform_indices = @transform_5, window_bounds = array<i64: 5, 8, 100>}, {pipeline_mode = #tpu.pipeline_mode<synchronous>, transform_indices = @transform_6, window_bounds = array<i64: 8, 1>}, {pipeline_mode = #tpu.pipeline_mode<synchronous>, transform_indices = @transform_7, window_bounds = array<i64: 8, 1>}, {transform_indices = @transform_8, window_bounds = array<i64: 1, 1, 8, 144>}]} {
    %cst = arith.constant 0.000000e+00 : f32
    %0 = vector.broadcast %cst : f32 to vector<8x144xf32>
    %c0 = arith.constant 0 : index
    %c0_0 = arith.constant 0 : index
    %c0_1 = arith.constant 0 : index
    %c0_2 = arith.constant 0 : index
    %1 = vector.load %arg2[%c0, %c0_0, %c0_1, %c0_2] : memref<1x1x4x196xbf16, #tpu.memory_space<vmem>>, vector<1x1x4x196xbf16>
    %2 = vector.shape_cast %1 : vector<1x1x4x196xbf16> to vector<4x196xbf16>
    %3 = vector.extract_strided_slice %2 {offsets = [0, 0], sizes = [4, 144], strides = [1, 1]} : vector<4x196xbf16> to vector<4x144xbf16>
    %c0_3 = arith.constant 0 : index
    %c0_4 = arith.constant 0 : index
    %4 = vector.load %arg11[%c0_3, %c0_4] : memref<100x144xbf16, #tpu.memory_space<vmem>>, vector<4x144xbf16>
    tpu.vector_store %arg11[%c0_3, %c0_4], %3 {strides = array<i32>} : memref<100x144xbf16, #tpu.memory_space<vmem>>, vector<4x144xbf16>,
    %5 = vector.extract_strided_slice %2 {offsets = [0, 1], sizes = [4, 144], strides = [1, 1]} : vector<4x196xbf16> to vector<4x144xbf16>
    %c4 = arith.constant 4 : index
    %c0_5 = arith.constant 0 : index
    %6 = vector.load %arg11[%c4, %c0_5] : memref<100x144xbf16, #tpu.memory_space<vmem>>, vector<4x144xbf16>
    tpu.vector_store %arg11[%c4, %c0_5], %5 {strides = array<i32>} : memref<100x144xbf16, #tpu.memory_space<vmem>>, vector<4x144xbf16>,
    %7 = vector.extract_strided_slice %2 {offsets = [0, 2], sizes = [4, 144], strides = [1, 1]} : vector<4x196xbf16> to vector<4x144xbf16>
    %c8 = arith.constant 8 : index
    %c0_6 = arith.constant 0 : index
    %8 = vector.load %arg11[%c8, %c0_6] : memref<100x144xbf16, #tpu.memory_space<vmem>>, vector<4x144xbf16>
    tpu.vector_store %arg11[%c8, %c0_6], %7 {strides = array<i32>} : memref<100x144xbf16, #tpu.memory_space<vmem>>, vector<4x144xbf16>,
    %9 = vector.extract_strided_slice %2 {offsets = [0, 3], sizes = [4, 144], strides = [1, 1]} : vector<4x196xbf16> to vector<4x144xbf16>
    %c12 = arith.constant 12 : index
    %c0_7 = arith.constant 0 : index
    %10 = vector.load %arg11[%c12, %c0_7] : memref<100x144xbf16, #tpu.memory_space<vmem>>, vector<4x144xbf16>
    tpu.vector_store %arg11[%c12, %c0_7], %9 {strides = array<i32>} : memref<100x144xbf16, #tpu.memory_space<vmem>>, vector<4x144xbf16>,
    %11 = vector.extract_strided_slice %2 {offsets = [0, 4], sizes = [4, 144], strides = [1, 1]} : vector<4x196xbf16> to vector<4x144xbf16>
    %c16 = arith.constant 16 : index
    %c0_8 = arith.constant 0 : index
    %12 = vector.load %arg11[%c16, %c0_8] : memref<100x144xbf16, #tpu.memory_space<vmem>>, vector<4x144xbf16>
    tpu.vector_store %arg11[%c16, %c0_8], %11 {strides = array<i32>} : memref<100x144xbf16, #tpu.memory_space<vmem>>, vector<4x144xbf16>,
    %13 = vector.extract_strided_slice %2 {offsets = [0, 12], sizes = [4, 144], strides = [1, 1]} : vector<4x196xbf16> to vector<4x144xbf16>
    %c20 = arith.constant 20 : index
    %c0_9 = arith.constant 0 : index
    %14 = vector.load %arg11[%c20, %c0_9] : memref<100x144xbf16, #tpu.memory_space<vmem>>, vector<4x144xbf16>
    tpu.vector_store %arg11[%c20, %c0_9], %13 {strides = array<i32>} : memref<100x144xbf16, #tpu.memory_space<vmem>>, vector<4x144xbf16>,
    %15 = vector.extract_strided_slice %2 {offsets = [0, 13], sizes = [4, 144], strides = [1, 1]} : vector<4x196xbf16> to vector<4x144xbf16>
    %c24 = arith.constant 24 : index
    %c0_10 = arith.constant 0 : index
    %16 = vector.load %arg11[%c24, %c0_10] : memref<100x144xbf16, #tpu.memory_space<vmem>>, vector<4x144xbf16>
    tpu.vector_store %arg11[%c24, %c0_10], %15 {strides = array<i32>} : memref<100x144xbf16, #tpu.memory_space<vmem>>, vector<4x144xbf16>,
    %17 = vector.extract_strided_slice %2 {offsets = [0, 14], sizes = [4, 144], strides = [1, 1]} : vector<4x196xbf16> to vector<4x144xbf16>
    %c28 = arith.constant 28 : index
    %c0_11 = arith.constant 0 : index
    %18 = vector.load %arg11[%c28, %c0_11] : memref<100x144xbf16, #tpu.memory_space<vmem>>, vector<4x144xbf16>
    tpu.vector_store %arg11[%c28, %c0_11], %17 {strides = array<i32>} : memref<100x144xbf16, #tpu.memory_space<vmem>>, vector<4x144xbf16>,
    %19 = vector.extract_strided_slice %2 {offsets = [0, 15], sizes = [4, 144], strides = [1, 1]} : vector<4x196xbf16> to vector<4x144xbf16>
    %c32 = arith.constant 32 : index
    %c0_12 = arith.constant 0 : index
    %20 = vector.load %arg11[%c32, %c0_12] : memref<100x144xbf16, #tpu.memory_space<vmem>>, vector<4x144xbf16>
    tpu.vector_store %arg11[%c32, %c0_12], %19 {strides = array<i32>} : memref<100x144xbf16, #tpu.memory_space<vmem>>, vector<4x144xbf16>,
    %21 = vector.extract_strided_slice %2 {offsets = [0, 16], sizes = [4, 144], strides = [1, 1]} : vector<4x196xbf16> to vector<4x144xbf16>
    %c36 = arith.constant 36 : index
    %c0_13 = arith.constant 0 : index
    %22 = vector.load %arg11[%c36, %c0_13] : memref<100x144xbf16, #tpu.memory_space<vmem>>, vector<4x144xbf16>
    tpu.vector_store %arg11[%c36, %c0_13], %21 {strides = array<i32>} : memref<100x144xbf16, #tpu.memory_space<vmem>>, vector<4x144xbf16>,
    %23 = vector.extract_strided_slice %2 {offsets = [0, 24], sizes = [4, 144], strides = [1, 1]} : vector<4x196xbf16> to vector<4x144xbf16>
    %c40 = arith.constant 40 : index
    %c0_14 = arith.constant 0 : index
    %24 = vector.load %arg11[%c40, %c0_14] : memref<100x144xbf16, #tpu.memory_space<vmem>>, vector<4x144xbf16>
    tpu.vector_store %arg11[%c40, %c0_14], %23 {strides = array<i32>} : memref<100x144xbf16, #tpu.memory_space<vmem>>, vector<4x144xbf16>,
    %25 = vector.extract_strided_slice %2 {offsets = [0, 25], sizes = [4, 144], strides = [1, 1]} : vector<4x196xbf16> to vector<4x144xbf16>
    %c44 = arith.constant 44 : index
    %c0_15 = arith.constant 0 : index
    %26 = vector.load %arg11[%c44, %c0_15] : memref<100x144xbf16, #tpu.memory_space<vmem>>, vector<4x144xbf16>
    tpu.vector_store %arg11[%c44, %c0_15], %25 {strides = array<i32>} : memref<100x144xbf16, #tpu.memory_space<vmem>>, vector<4x144xbf16>,
    %27 = vector.extract_strided_slice %2 {offsets = [0, 26], sizes = [4, 144], strides = [1, 1]} : vector<4x196xbf16> to vector<4x144xbf16>
    %c48 = arith.constant 48 : index
    %c0_16 = arith.constant 0 : index
    %28 = vector.load %arg11[%c48, %c0_16] : memref<100x144xbf16, #tpu.memory_space<vmem>>, vector<4x144xbf16>
    tpu.vector_store %arg11[%c48, %c0_16], %27 {strides = array<i32>} : memref<100x144xbf16, #tpu.memory_space<vmem>>, vector<4x144xbf16>,
    %29 = vector.extract_strided_slice %2 {offsets = [0, 27], sizes = [4, 144], strides = [1, 1]} : vector<4x196xbf16> to vector<4x144xbf16>
    %c52 = arith.constant 52 : index
    %c0_17 = arith.constant 0 : index
    %30 = vector.load %arg11[%c52, %c0_17] : memref<100x144xbf16, #tpu.memory_space<vmem>>, vector<4x144xbf16>
    tpu.vector_store %arg11[%c52, %c0_17], %29 {strides = array<i32>} : memref<100x144xbf16, #tpu.memory_space<vmem>>, vector<4x144xbf16>,
    %31 = vector.extract_strided_slice %2 {offsets = [0, 28], sizes = [4, 144], strides = [1, 1]} : vector<4x196xbf16> to vector<4x144xbf16>
    %c56 = arith.constant 56 : index
    %c0_18 = arith.constant 0 : index
    %32 = vector.load %arg11[%c56, %c0_18] : memref<100x144xbf16, #tpu.memory_space<vmem>>, vector<4x144xbf16>
    tpu.vector_store %arg11[%c56, %c0_18], %31 {strides = array<i32>} : memref<100x144xbf16, #tpu.memory_space<vmem>>, vector<4x144xbf16>,
    %33 = vector.extract_strided_slice %2 {offsets = [0, 36], sizes = [4, 144], strides = [1, 1]} : vector<4x196xbf16> to vector<4x144xbf16>
    %c60 = arith.constant 60 : index
    %c0_19 = arith.constant 0 : index
    %34 = vector.load %arg11[%c60, %c0_19] : memref<100x144xbf16, #tpu.memory_space<vmem>>, vector<4x144xbf16>
    tpu.vector_store %arg11[%c60, %c0_19], %33 {strides = array<i32>} : memref<100x144xbf16, #tpu.memory_space<vmem>>, vector<4x144xbf16>,
    %35 = vector.extract_strided_slice %2 {offsets = [0, 37], sizes = [4, 144], strides = [1, 1]} : vector<4x196xbf16> to vector<4x144xbf16>
    %c64 = arith.constant 64 : index
    %c0_20 = arith.constant 0 : index
    %36 = vector.load %arg11[%c64, %c0_20] : memref<100x144xbf16, #tpu.memory_space<vmem>>, vector<4x144xbf16>
    tpu.vector_store %arg11[%c64, %c0_20], %35 {strides = array<i32>} : memref<100x144xbf16, #tpu.memory_space<vmem>>, vector<4x144xbf16>,
    %37 = vector.extract_strided_slice %2 {offsets = [0, 38], sizes = [4, 144], strides = [1, 1]} : vector<4x196xbf16> to vector<4x144xbf16>
    %c68 = arith.constant 68 : index
    %c0_21 = arith.constant 0 : index
    %38 = vector.load %arg11[%c68, %c0_21] : memref<100x144xbf16, #tpu.memory_space<vmem>>, vector<4x144xbf16>
    tpu.vector_store %arg11[%c68, %c0_21], %37 {strides = array<i32>} : memref<100x144xbf16, #tpu.memory_space<vmem>>, vector<4x144xbf16>,
    %39 = vector.extract_strided_slice %2 {offsets = [0, 39], sizes = [4, 144], strides = [1, 1]} : vector<4x196xbf16> to vector<4x144xbf16>
    %c72 = arith.constant 72 : index
    %c0_22 = arith.constant 0 : index
    %40 = vector.load %arg11[%c72, %c0_22] : memref<100x144xbf16, #tpu.memory_space<vmem>>, vector<4x144xbf16>
    tpu.vector_store %arg11[%c72, %c0_22], %39 {strides = array<i32>} : memref<100x144xbf16, #tpu.memory_space<vmem>>, vector<4x144xbf16>,
    %41 = vector.extract_strided_slice %2 {offsets = [0, 40], sizes = [4, 144], strides = [1, 1]} : vector<4x196xbf16> to vector<4x144xbf16>
    %c76 = arith.constant 76 : index
    %c0_23 = arith.constant 0 : index
    %42 = vector.load %arg11[%c76, %c0_23] : memref<100x144xbf16, #tpu.memory_space<vmem>>, vector<4x144xbf16>
    tpu.vector_store %arg11[%c76, %c0_23], %41 {strides = array<i32>} : memref<100x144xbf16, #tpu.memory_space<vmem>>, vector<4x144xbf16>,
    %43 = vector.extract_strided_slice %2 {offsets = [0, 48], sizes = [4, 144], strides = [1, 1]} : vector<4x196xbf16> to vector<4x144xbf16>
    %c80 = arith.constant 80 : index
    %c0_24 = arith.constant 0 : index
    %44 = vector.load %arg11[%c80, %c0_24] : memref<100x144xbf16, #tpu.memory_space<vmem>>, vector<4x144xbf16>
    tpu.vector_store %arg11[%c80, %c0_24], %43 {strides = array<i32>} : memref<100x144xbf16, #tpu.memory_space<vmem>>, vector<4x144xbf16>,
    %45 = vector.extract_strided_slice %2 {offsets = [0, 49], sizes = [4, 144], strides = [1, 1]} : vector<4x196xbf16> to vector<4x144xbf16>
    %c84 = arith.constant 84 : index
    %c0_25 = arith.constant 0 : index
    %46 = vector.load %arg11[%c84, %c0_25] : memref<100x144xbf16, #tpu.memory_space<vmem>>, vector<4x144xbf16>
    tpu.vector_store %arg11[%c84, %c0_25], %45 {strides = array<i32>} : memref<100x144xbf16, #tpu.memory_space<vmem>>, vector<4x144xbf16>,
    %47 = vector.extract_strided_slice %2 {offsets = [0, 50], sizes = [4, 144], strides = [1, 1]} : vector<4x196xbf16> to vector<4x144xbf16>
    %c88 = arith.constant 88 : index
    %c0_26 = arith.constant 0 : index
    %48 = vector.load %arg11[%c88, %c0_26] : memref<100x144xbf16, #tpu.memory_space<vmem>>, vector<4x144xbf16>
    tpu.vector_store %arg11[%c88, %c0_26], %47 {strides = array<i32>} : memref<100x144xbf16, #tpu.memory_space<vmem>>, vector<4x144xbf16>,
    %49 = vector.extract_strided_slice %2 {offsets = [0, 51], sizes = [4, 144], strides = [1, 1]} : vector<4x196xbf16> to vector<4x144xbf16>
    %c92 = arith.constant 92 : index
    %c0_27 = arith.constant 0 : index
    %50 = vector.load %arg11[%c92, %c0_27] : memref<100x144xbf16, #tpu.memory_space<vmem>>, vector<4x144xbf16>
    tpu.vector_store %arg11[%c92, %c0_27], %49 {strides = array<i32>} : memref<100x144xbf16, #tpu.memory_space<vmem>>, vector<4x144xbf16>,
    %51 = vector.extract_strided_slice %2 {offsets = [0, 52], sizes = [4, 144], strides = [1, 1]} : vector<4x196xbf16> to vector<4x144xbf16>
    %c96 = arith.constant 96 : index
    %c0_28 = arith.constant 0 : index
    %52 = vector.load %arg11[%c96, %c0_28] : memref<100x144xbf16, #tpu.memory_space<vmem>>, vector<4x144xbf16>
    tpu.vector_store %arg11[%c96, %c0_28], %51 {strides = array<i32>} : memref<100x144xbf16, #tpu.memory_space<vmem>>, vector<4x144xbf16>,
    %c0_29 = arith.constant 0 : index
    %c0_30 = arith.constant 0 : index
    %c0_31 = arith.constant 0 : index
    %53 = vector.load %arg7[%c0_29, %c0_30, %c0_31] : memref<5x8x100xbf16, #tpu.memory_space<vmem>>, vector<1x8x100xbf16>
    %54 = vector.shape_cast %53 : vector<1x8x100xbf16> to vector<8x100xbf16>
    %c0_32 = arith.constant 0 : index
    %c0_33 = arith.constant 0 : index
    %55 = vector.load %arg11[%c0_32, %c0_33] : memref<100x144xbf16, #tpu.memory_space<vmem>>, vector<100x144xbf16>
    %cst_34 = arith.constant dense<0.000000e+00> : vector<8x144xf32>
    %56 = tpu.matmul %54, %55, %cst_34 {dimension_numbers = #tpu.dot_dimension_numbers<[1], [0], [0], [1], [0, 0, 1, 1], [], []>} : vector<8x100xbf16>, vector<100x144xbf16>, vector<8x144xf32> -> vector<8x144xf32>
    %57 = arith.addf %0, %56 : vector<8x144xf32>
    %c0_35 = arith.constant 0 : index
    %c0_36 = arith.constant 0 : index
    %c0_37 = arith.constant 0 : index
    %c0_38 = arith.constant 0 : index
    %58 = vector.load %arg3[%c0_35, %c0_36, %c0_37, %c0_38] : memref<1x1x4x196xbf16, #tpu.memory_space<vmem>>, vector<1x1x4x196xbf16>
    %59 = vector.shape_cast %58 : vector<1x1x4x196xbf16> to vector<4x196xbf16>
    %60 = vector.extract_strided_slice %59 {offsets = [0, 0], sizes = [4, 144], strides = [1, 1]} : vector<4x196xbf16> to vector<4x144xbf16>
    %c0_39 = arith.constant 0 : index
    %c0_40 = arith.constant 0 : index
    %61 = vector.load %arg11[%c0_39, %c0_40] : memref<100x144xbf16, #tpu.memory_space<vmem>>, vector<4x144xbf16>
    tpu.vector_store %arg11[%c0_39, %c0_40], %60 {strides = array<i32>} : memref<100x144xbf16, #tpu.memory_space<vmem>>, vector<4x144xbf16>,
    %62 = vector.extract_strided_slice %59 {offsets = [0, 1], sizes = [4, 144], strides = [1, 1]} : vector<4x196xbf16> to vector<4x144xbf16>
    %c4_41 = arith.constant 4 : index
    %c0_42 = arith.constant 0 : index
    %63 = vector.load %arg11[%c4_41, %c0_42] : memref<100x144xbf16, #tpu.memory_space<vmem>>, vector<4x144xbf16>
    tpu.vector_store %arg11[%c4_41, %c0_42], %62 {strides = array<i32>} : memref<100x144xbf16, #tpu.memory_space<vmem>>, vector<4x144xbf16>,
    %64 = vector.extract_strided_slice %59 {offsets = [0, 2], sizes = [4, 144], strides = [1, 1]} : vector<4x196xbf16> to vector<4x144xbf16>
    %c8_43 = arith.constant 8 : index
    %c0_44 = arith.constant 0 : index
    %65 = vector.load %arg11[%c8_43, %c0_44] : memref<100x144xbf16, #tpu.memory_space<vmem>>, vector<4x144xbf16>
    tpu.vector_store %arg11[%c8_43, %c0_44], %64 {strides = array<i32>} : memref<100x144xbf16, #tpu.memory_space<vmem>>, vector<4x144xbf16>,
    %66 = vector.extract_strided_slice %59 {offsets = [0, 3], sizes = [4, 144], strides = [1, 1]} : vector<4x196xbf16> to vector<4x144xbf16>
    %c12_45 = arith.constant 12 : index
    %c0_46 = arith.constant 0 : index
    %67 = vector.load %arg11[%c12_45, %c0_46] : memref<100x144xbf16, #tpu.memory_space<vmem>>, vector<4x144xbf16>
    tpu.vector_store %arg11[%c12_45, %c0_46], %66 {strides = array<i32>} : memref<100x144xbf16, #tpu.memory_space<vmem>>, vector<4x144xbf16>,
    %68 = vector.extract_strided_slice %59 {offsets = [0, 4], sizes = [4, 144], strides = [1, 1]} : vector<4x196xbf16> to vector<4x144xbf16>
    %c16_47 = arith.constant 16 : index
    %c0_48 = arith.constant 0 : index
    %69 = vector.load %arg11[%c16_47, %c0_48] : memref<100x144xbf16, #tpu.memory_space<vmem>>, vector<4x144xbf16>
    tpu.vector_store %arg11[%c16_47, %c0_48], %68 {strides = array<i32>} : memref<100x144xbf16, #tpu.memory_space<vmem>>, vector<4x144xbf16>,
    %70 = vector.extract_strided_slice %59 {offsets = [0, 12], sizes = [4, 144], strides = [1, 1]} : vector<4x196xbf16> to vector<4x144xbf16>
    %c20_49 = arith.constant 20 : index
    %c0_50 = arith.constant 0 : index
    %71 = vector.load %arg11[%c20_49, %c0_50] : memref<100x144xbf16, #tpu.memory_space<vmem>>, vector<4x144xbf16>
    tpu.vector_store %arg11[%c20_49, %c0_50], %70 {strides = array<i32>} : memref<100x144xbf16, #tpu.memory_space<vmem>>, vector<4x144xbf16>,
    %72 = vector.extract_strided_slice %59 {offsets = [0, 13], sizes = [4, 144], strides = [1, 1]} : vector<4x196xbf16> to vector<4x144xbf16>
    %c24_51 = arith.constant 24 : index
    %c0_52 = arith.constant 0 : index
    %73 = vector.load %arg11[%c24_51, %c0_52] : memref<100x144xbf16, #tpu.memory_space<vmem>>, vector<4x144xbf16>
    tpu.vector_store %arg11[%c24_51, %c0_52], %72 {strides = array<i32>} : memref<100x144xbf16, #tpu.memory_space<vmem>>, vector<4x144xbf16>,
    %74 = vector.extract_strided_slice %59 {offsets = [0, 14], sizes = [4, 144], strides = [1, 1]} : vector<4x196xbf16> to vector<4x144xbf16>
    %c28_53 = arith.constant 28 : index
    %c0_54 = arith.constant 0 : index
    %75 = vector.load %arg11[%c28_53, %c0_54] : memref<100x144xbf16, #tpu.memory_space<vmem>>, vector<4x144xbf16>
    tpu.vector_store %arg11[%c28_53, %c0_54], %74 {strides = array<i32>} : memref<100x144xbf16, #tpu.memory_space<vmem>>, vector<4x144xbf16>,
    %76 = vector.extract_strided_slice %59 {offsets = [0, 15], sizes = [4, 144], strides = [1, 1]} : vector<4x196xbf16> to vector<4x144xbf16>
    %c32_55 = arith.constant 32 : index
    %c0_56 = arith.constant 0 : index
    %77 = vector.load %arg11[%c32_55, %c0_56] : memref<100x144xbf16, #tpu.memory_space<vmem>>, vector<4x144xbf16>
    tpu.vector_store %arg11[%c32_55, %c0_56], %76 {strides = array<i32>} : memref<100x144xbf16, #tpu.memory_space<vmem>>, vector<4x144xbf16>,
    %78 = vector.extract_strided_slice %59 {offsets = [0, 16], sizes = [4, 144], strides = [1, 1]} : vector<4x196xbf16> to vector<4x144xbf16>
    %c36_57 = arith.constant 36 : index
    %c0_58 = arith.constant 0 : index
    %79 = vector.load %arg11[%c36_57, %c0_58] : memref<100x144xbf16, #tpu.memory_space<vmem>>, vector<4x144xbf16>
    tpu.vector_store %arg11[%c36_57, %c0_58], %78 {strides = array<i32>} : memref<100x144xbf16, #tpu.memory_space<vmem>>, vector<4x144xbf16>,
    %80 = vector.extract_strided_slice %59 {offsets = [0, 24], sizes = [4, 144], strides = [1, 1]} : vector<4x196xbf16> to vector<4x144xbf16>
    %c40_59 = arith.constant 40 : index
    %c0_60 = arith.constant 0 : index
    %81 = vector.load %arg11[%c40_59, %c0_60] : memref<100x144xbf16, #tpu.memory_space<vmem>>, vector<4x144xbf16>
    tpu.vector_store %arg11[%c40_59, %c0_60], %80 {strides = array<i32>} : memref<100x144xbf16, #tpu.memory_space<vmem>>, vector<4x144xbf16>,
    %82 = vector.extract_strided_slice %59 {offsets = [0, 25], sizes = [4, 144], strides = [1, 1]} : vector<4x196xbf16> to vector<4x144xbf16>
    %c44_61 = arith.constant 44 : index
    %c0_62 = arith.constant 0 : index
    %83 = vector.load %arg11[%c44_61, %c0_62] : memref<100x144xbf16, #tpu.memory_space<vmem>>, vector<4x144xbf16>
    tpu.vector_store %arg11[%c44_61, %c0_62], %82 {strides = array<i32>} : memref<100x144xbf16, #tpu.memory_space<vmem>>, vector<4x144xbf16>,
    %84 = vector.extract_strided_slice %59 {offsets = [0, 26], sizes = [4, 144], strides = [1, 1]} : vector<4x196xbf16> to vector<4x144xbf16>
    %c48_63 = arith.constant 48 : index
    %c0_64 = arith.constant 0 : index
    %85 = vector.load %arg11[%c48_63, %c0_64] : memref<100x144xbf16, #tpu.memory_space<vmem>>, vector<4x144xbf16>
    tpu.vector_store %arg11[%c48_63, %c0_64], %84 {strides = array<i32>} : memref<100x144xbf16, #tpu.memory_space<vmem>>, vector<4x144xbf16>,
    %86 = vector.extract_strided_slice %59 {offsets = [0, 27], sizes = [4, 144], strides = [1, 1]} : vector<4x196xbf16> to vector<4x144xbf16>
    %c52_65 = arith.constant 52 : index
    %c0_66 = arith.constant 0 : index
    %87 = vector.load %arg11[%c52_65, %c0_66] : memref<100x144xbf16, #tpu.memory_space<vmem>>, vector<4x144xbf16>
    tpu.vector_store %arg11[%c52_65, %c0_66], %86 {strides = array<i32>} : memref<100x144xbf16, #tpu.memory_space<vmem>>, vector<4x144xbf16>,
    %88 = vector.extract_strided_slice %59 {offsets = [0, 28], sizes = [4, 144], strides = [1, 1]} : vector<4x196xbf16> to vector<4x144xbf16>
    %c56_67 = arith.constant 56 : index
    %c0_68 = arith.constant 0 : index
    %89 = vector.load %arg11[%c56_67, %c0_68] : memref<100x144xbf16, #tpu.memory_space<vmem>>, vector<4x144xbf16>
    tpu.vector_store %arg11[%c56_67, %c0_68], %88 {strides = array<i32>} : memref<100x144xbf16, #tpu.memory_space<vmem>>, vector<4x144xbf16>,
    %90 = vector.extract_strided_slice %59 {offsets = [0, 36], sizes = [4, 144], strides = [1, 1]} : vector<4x196xbf16> to vector<4x144xbf16>
    %c60_69 = arith.constant 60 : index
    %c0_70 = arith.constant 0 : index
    %91 = vector.load %arg11[%c60_69, %c0_70] : memref<100x144xbf16, #tpu.memory_space<vmem>>, vector<4x144xbf16>
    tpu.vector_store %arg11[%c60_69, %c0_70], %90 {strides = array<i32>} : memref<100x144xbf16, #tpu.memory_space<vmem>>, vector<4x144xbf16>,
    %92 = vector.extract_strided_slice %59 {offsets = [0, 37], sizes = [4, 144], strides = [1, 1]} : vector<4x196xbf16> to vector<4x144xbf16>
    %c64_71 = arith.constant 64 : index
    %c0_72 = arith.constant 0 : index
    %93 = vector.load %arg11[%c64_71, %c0_72] : memref<100x144xbf16, #tpu.memory_space<vmem>>, vector<4x144xbf16>
    tpu.vector_store %arg11[%c64_71, %c0_72], %92 {strides = array<i32>} : memref<100x144xbf16, #tpu.memory_space<vmem>>, vector<4x144xbf16>,
    %94 = vector.extract_strided_slice %59 {offsets = [0, 38], sizes = [4, 144], strides = [1, 1]} : vector<4x196xbf16> to vector<4x144xbf16>
    %c68_73 = arith.constant 68 : index
    %c0_74 = arith.constant 0 : index
    %95 = vector.load %arg11[%c68_73, %c0_74] : memref<100x144xbf16, #tpu.memory_space<vmem>>, vector<4x144xbf16>
    tpu.vector_store %arg11[%c68_73, %c0_74], %94 {strides = array<i32>} : memref<100x144xbf16, #tpu.memory_space<vmem>>, vector<4x144xbf16>,
    %96 = vector.extract_strided_slice %59 {offsets = [0, 39], sizes = [4, 144], strides = [1, 1]} : vector<4x196xbf16> to vector<4x144xbf16>
    %c72_75 = arith.constant 72 : index
    %c0_76 = arith.constant 0 : index
    %97 = vector.load %arg11[%c72_75, %c0_76] : memref<100x144xbf16, #tpu.memory_space<vmem>>, vector<4x144xbf16>
    tpu.vector_store %arg11[%c72_75, %c0_76], %96 {strides = array<i32>} : memref<100x144xbf16, #tpu.memory_space<vmem>>, vector<4x144xbf16>,
    %98 = vector.extract_strided_slice %59 {offsets = [0, 40], sizes = [4, 144], strides = [1, 1]} : vector<4x196xbf16> to vector<4x144xbf16>
    %c76_77 = arith.constant 76 : index
    %c0_78 = arith.constant 0 : index
    %99 = vector.load %arg11[%c76_77, %c0_78] : memref<100x144xbf16, #tpu.memory_space<vmem>>, vector<4x144xbf16>
    tpu.vector_store %arg11[%c76_77, %c0_78], %98 {strides = array<i32>} : memref<100x144xbf16, #tpu.memory_space<vmem>>, vector<4x144xbf16>,
    %100 = vector.extract_strided_slice %59 {offsets = [0, 48], sizes = [4, 144], strides = [1, 1]} : vector<4x196xbf16> to vector<4x144xbf16>
    %c80_79 = arith.constant 80 : index
    %c0_80 = arith.constant 0 : index
    %101 = vector.load %arg11[%c80_79, %c0_80] : memref<100x144xbf16, #tpu.memory_space<vmem>>, vector<4x144xbf16>
    tpu.vector_store %arg11[%c80_79, %c0_80], %100 {strides = array<i32>} : memref<100x144xbf16, #tpu.memory_space<vmem>>, vector<4x144xbf16>,
    %102 = vector.extract_strided_slice %59 {offsets = [0, 49], sizes = [4, 144], strides = [1, 1]} : vector<4x196xbf16> to vector<4x144xbf16>
    %c84_81 = arith.constant 84 : index
    %c0_82 = arith.constant 0 : index
    %103 = vector.load %arg11[%c84_81, %c0_82] : memref<100x144xbf16, #tpu.memory_space<vmem>>, vector<4x144xbf16>
    tpu.vector_store %arg11[%c84_81, %c0_82], %102 {strides = array<i32>} : memref<100x144xbf16, #tpu.memory_space<vmem>>, vector<4x144xbf16>,
    %104 = vector.extract_strided_slice %59 {offsets = [0, 50], sizes = [4, 144], strides = [1, 1]} : vector<4x196xbf16> to vector<4x144xbf16>
    %c88_83 = arith.constant 88 : index
    %c0_84 = arith.constant 0 : index
    %105 = vector.load %arg11[%c88_83, %c0_84] : memref<100x144xbf16, #tpu.memory_space<vmem>>, vector<4x144xbf16>
    tpu.vector_store %arg11[%c88_83, %c0_84], %104 {strides = array<i32>} : memref<100x144xbf16, #tpu.memory_space<vmem>>, vector<4x144xbf16>,
    %106 = vector.extract_strided_slice %59 {offsets = [0, 51], sizes = [4, 144], strides = [1, 1]} : vector<4x196xbf16> to vector<4x144xbf16>
    %c92_85 = arith.constant 92 : index
    %c0_86 = arith.constant 0 : index
    %107 = vector.load %arg11[%c92_85, %c0_86] : memref<100x144xbf16, #tpu.memory_space<vmem>>, vector<4x144xbf16>
    tpu.vector_store %arg11[%c92_85, %c0_86], %106 {strides = array<i32>} : memref<100x144xbf16, #tpu.memory_space<vmem>>, vector<4x144xbf16>,
    %108 = vector.extract_strided_slice %59 {offsets = [0, 52], sizes = [4, 144], strides = [1, 1]} : vector<4x196xbf16> to vector<4x144xbf16>
    %c96_87 = arith.constant 96 : index
    %c0_88 = arith.constant 0 : index
    %109 = vector.load %arg11[%c96_87, %c0_88] : memref<100x144xbf16, #tpu.memory_space<vmem>>, vector<4x144xbf16>
    tpu.vector_store %arg11[%c96_87, %c0_88], %108 {strides = array<i32>} : memref<100x144xbf16, #tpu.memory_space<vmem>>, vector<4x144xbf16>,
    %c1 = arith.constant 1 : index
    %c0_89 = arith.constant 0 : index
    %c0_90 = arith.constant 0 : index
    %110 = vector.load %arg7[%c1, %c0_89, %c0_90] : memref<5x8x100xbf16, #tpu.memory_space<vmem>>, vector<1x8x100xbf16>
    %111 = vector.shape_cast %110 : vector<1x8x100xbf16> to vector<8x100xbf16>
    %c0_91 = arith.constant 0 : index
    %c0_92 = arith.constant 0 : index
    %112 = vector.load %arg11[%c0_91, %c0_92] : memref<100x144xbf16, #tpu.memory_space<vmem>>, vector<100x144xbf16>
    %cst_93 = arith.constant dense<0.000000e+00> : vector<8x144xf32>
    %113 = tpu.matmul %111, %112, %cst_93 {dimension_numbers = #tpu.dot_dimension_numbers<[1], [0], [0], [1], [0, 0, 1, 1], [], []>} : vector<8x100xbf16>, vector<100x144xbf16>, vector<8x144xf32> -> vector<8x144xf32>
    %114 = arith.addf %57, %113 : vector<8x144xf32>
    %c0_94 = arith.constant 0 : index
    %c0_95 = arith.constant 0 : index
    %c0_96 = arith.constant 0 : index
    %c0_97 = arith.constant 0 : index
    %115 = vector.load %arg4[%c0_94, %c0_95, %c0_96, %c0_97] : memref<1x1x4x196xbf16, #tpu.memory_space<vmem>>, vector<1x1x4x196xbf16>
    %116 = vector.shape_cast %115 : vector<1x1x4x196xbf16> to vector<4x196xbf16>
    %117 = vector.extract_strided_slice %116 {offsets = [0, 0], sizes = [4, 144], strides = [1, 1]} : vector<4x196xbf16> to vector<4x144xbf16>
    %c0_98 = arith.constant 0 : index
    %c0_99 = arith.constant 0 : index
    %118 = vector.load %arg11[%c0_98, %c0_99] : memref<100x144xbf16, #tpu.memory_space<vmem>>, vector<4x144xbf16>
    tpu.vector_store %arg11[%c0_98, %c0_99], %117 {strides = array<i32>} : memref<100x144xbf16, #tpu.memory_space<vmem>>, vector<4x144xbf16>,
    %119 = vector.extract_strided_slice %116 {offsets = [0, 1], sizes = [4, 144], strides = [1, 1]} : vector<4x196xbf16> to vector<4x144xbf16>
    %c4_100 = arith.constant 4 : index
    %c0_101 = arith.constant 0 : index
    %120 = vector.load %arg11[%c4_100, %c0_101] : memref<100x144xbf16, #tpu.memory_space<vmem>>, vector<4x144xbf16>
    tpu.vector_store %arg11[%c4_100, %c0_101], %119 {strides = array<i32>} : memref<100x144xbf16, #tpu.memory_space<vmem>>, vector<4x144xbf16>,
    %121 = vector.extract_strided_slice %116 {offsets = [0, 2], sizes = [4, 144], strides = [1, 1]} : vector<4x196xbf16> to vector<4x144xbf16>
    %c8_102 = arith.constant 8 : index
    %c0_103 = arith.constant 0 : index
    %122 = vector.load %arg11[%c8_102, %c0_103] : memref<100x144xbf16, #tpu.memory_space<vmem>>, vector<4x144xbf16>
    tpu.vector_store %arg11[%c8_102, %c0_103], %121 {strides = array<i32>} : memref<100x144xbf16, #tpu.memory_space<vmem>>, vector<4x144xbf16>,
    %123 = vector.extract_strided_slice %116 {offsets = [0, 3], sizes = [4, 144], strides = [1, 1]} : vector<4x196xbf16> to vector<4x144xbf16>
    %c12_104 = arith.constant 12 : index
    %c0_105 = arith.constant 0 : index
    %124 = vector.load %arg11[%c12_104, %c0_105] : memref<100x144xbf16, #tpu.memory_space<vmem>>, vector<4x144xbf16>
    tpu.vector_store %arg11[%c12_104, %c0_105], %123 {strides = array<i32>} : memref<100x144xbf16, #tpu.memory_space<vmem>>, vector<4x144xbf16>,
    %125 = vector.extract_strided_slice %116 {offsets = [0, 4], sizes = [4, 144], strides = [1, 1]} : vector<4x196xbf16> to vector<4x144xbf16>
    %c16_106 = arith.constant 16 : index
    %c0_107 = arith.constant 0 : index
    %126 = vector.load %arg11[%c16_106, %c0_107] : memref<100x144xbf16, #tpu.memory_space<vmem>>, vector<4x144xbf16>
    tpu.vector_store %arg11[%c16_106, %c0_107], %125 {strides = array<i32>} : memref<100x144xbf16, #tpu.memory_space<vmem>>, vector<4x144xbf16>,
    %127 = vector.extract_strided_slice %116 {offsets = [0, 12], sizes = [4, 144], strides = [1, 1]} : vector<4x196xbf16> to vector<4x144xbf16>
    %c20_108 = arith.constant 20 : index
    %c0_109 = arith.constant 0 : index
    %128 = vector.load %arg11[%c20_108, %c0_109] : memref<100x144xbf16, #tpu.memory_space<vmem>>, vector<4x144xbf16>
    tpu.vector_store %arg11[%c20_108, %c0_109], %127 {strides = array<i32>} : memref<100x144xbf16, #tpu.memory_space<vmem>>, vector<4x144xbf16>,
    %129 = vector.extract_strided_slice %116 {offsets = [0, 13], sizes = [4, 144], strides = [1, 1]} : vector<4x196xbf16> to vector<4x144xbf16>
    %c24_110 = arith.constant 24 : index
    %c0_111 = arith.constant 0 : index
    %130 = vector.load %arg11[%c24_110, %c0_111] : memref<100x144xbf16, #tpu.memory_space<vmem>>, vector<4x144xbf16>
    tpu.vector_store %arg11[%c24_110, %c0_111], %129 {strides = array<i32>} : memref<100x144xbf16, #tpu.memory_space<vmem>>, vector<4x144xbf16>,
    %131 = vector.extract_strided_slice %116 {offsets = [0, 14], sizes = [4, 144], strides = [1, 1]} : vector<4x196xbf16> to vector<4x144xbf16>
    %c28_112 = arith.constant 28 : index
    %c0_113 = arith.constant 0 : index
    %132 = vector.load %arg11[%c28_112, %c0_113] : memref<100x144xbf16, #tpu.memory_space<vmem>>, vector<4x144xbf16>
    tpu.vector_store %arg11[%c28_112, %c0_113], %131 {strides = array<i32>} : memref<100x144xbf16, #tpu.memory_space<vmem>>, vector<4x144xbf16>,
    %133 = vector.extract_strided_slice %116 {offsets = [0, 15], sizes = [4, 144], strides = [1, 1]} : vector<4x196xbf16> to vector<4x144xbf16>
    %c32_114 = arith.constant 32 : index
    %c0_115 = arith.constant 0 : index
    %134 = vector.load %arg11[%c32_114, %c0_115] : memref<100x144xbf16, #tpu.memory_space<vmem>>, vector<4x144xbf16>
    tpu.vector_store %arg11[%c32_114, %c0_115], %133 {strides = array<i32>} : memref<100x144xbf16, #tpu.memory_space<vmem>>, vector<4x144xbf16>,
    %135 = vector.extract_strided_slice %116 {offsets = [0, 16], sizes = [4, 144], strides = [1, 1]} : vector<4x196xbf16> to vector<4x144xbf16>
    %c36_116 = arith.constant 36 : index
    %c0_117 = arith.constant 0 : index
    %136 = vector.load %arg11[%c36_116, %c0_117] : memref<100x144xbf16, #tpu.memory_space<vmem>>, vector<4x144xbf16>
    tpu.vector_store %arg11[%c36_116, %c0_117], %135 {strides = array<i32>} : memref<100x144xbf16, #tpu.memory_space<vmem>>, vector<4x144xbf16>,
    %137 = vector.extract_strided_slice %116 {offsets = [0, 24], sizes = [4, 144], strides = [1, 1]} : vector<4x196xbf16> to vector<4x144xbf16>
    %c40_118 = arith.constant 40 : index
    %c0_119 = arith.constant 0 : index
    %138 = vector.load %arg11[%c40_118, %c0_119] : memref<100x144xbf16, #tpu.memory_space<vmem>>, vector<4x144xbf16>
    tpu.vector_store %arg11[%c40_118, %c0_119], %137 {strides = array<i32>} : memref<100x144xbf16, #tpu.memory_space<vmem>>, vector<4x144xbf16>,
    %139 = vector.extract_strided_slice %116 {offsets = [0, 25], sizes = [4, 144], strides = [1, 1]} : vector<4x196xbf16> to vector<4x144xbf16>
    %c44_120 = arith.constant 44 : index
    %c0_121 = arith.constant 0 : index
    %140 = vector.load %arg11[%c44_120, %c0_121] : memref<100x144xbf16, #tpu.memory_space<vmem>>, vector<4x144xbf16>
    tpu.vector_store %arg11[%c44_120, %c0_121], %139 {strides = array<i32>} : memref<100x144xbf16, #tpu.memory_space<vmem>>, vector<4x144xbf16>,
    %141 = vector.extract_strided_slice %116 {offsets = [0, 26], sizes = [4, 144], strides = [1, 1]} : vector<4x196xbf16> to vector<4x144xbf16>
    %c48_122 = arith.constant 48 : index
    %c0_123 = arith.constant 0 : index
    %142 = vector.load %arg11[%c48_122, %c0_123] : memref<100x144xbf16, #tpu.memory_space<vmem>>, vector<4x144xbf16>
    tpu.vector_store %arg11[%c48_122, %c0_123], %141 {strides = array<i32>} : memref<100x144xbf16, #tpu.memory_space<vmem>>, vector<4x144xbf16>,
    %143 = vector.extract_strided_slice %116 {offsets = [0, 27], sizes = [4, 144], strides = [1, 1]} : vector<4x196xbf16> to vector<4x144xbf16>
    %c52_124 = arith.constant 52 : index
    %c0_125 = arith.constant 0 : index
    %144 = vector.load %arg11[%c52_124, %c0_125] : memref<100x144xbf16, #tpu.memory_space<vmem>>, vector<4x144xbf16>
    tpu.vector_store %arg11[%c52_124, %c0_125], %143 {strides = array<i32>} : memref<100x144xbf16, #tpu.memory_space<vmem>>, vector<4x144xbf16>,
    %145 = vector.extract_strided_slice %116 {offsets = [0, 28], sizes = [4, 144], strides = [1, 1]} : vector<4x196xbf16> to vector<4x144xbf16>
    %c56_126 = arith.constant 56 : index
    %c0_127 = arith.constant 0 : index
    %146 = vector.load %arg11[%c56_126, %c0_127] : memref<100x144xbf16, #tpu.memory_space<vmem>>, vector<4x144xbf16>
    tpu.vector_store %arg11[%c56_126, %c0_127], %145 {strides = array<i32>} : memref<100x144xbf16, #tpu.memory_space<vmem>>, vector<4x144xbf16>,
    %147 = vector.extract_strided_slice %116 {offsets = [0, 36], sizes = [4, 144], strides = [1, 1]} : vector<4x196xbf16> to vector<4x144xbf16>
    %c60_128 = arith.constant 60 : index
    %c0_129 = arith.constant 0 : index
    %148 = vector.load %arg11[%c60_128, %c0_129] : memref<100x144xbf16, #tpu.memory_space<vmem>>, vector<4x144xbf16>
    tpu.vector_store %arg11[%c60_128, %c0_129], %147 {strides = array<i32>} : memref<100x144xbf16, #tpu.memory_space<vmem>>, vector<4x144xbf16>,
    %149 = vector.extract_strided_slice %116 {offsets = [0, 37], sizes = [4, 144], strides = [1, 1]} : vector<4x196xbf16> to vector<4x144xbf16>
    %c64_130 = arith.constant 64 : index
    %c0_131 = arith.constant 0 : index
    %150 = vector.load %arg11[%c64_130, %c0_131] : memref<100x144xbf16, #tpu.memory_space<vmem>>, vector<4x144xbf16>
    tpu.vector_store %arg11[%c64_130, %c0_131], %149 {strides = array<i32>} : memref<100x144xbf16, #tpu.memory_space<vmem>>, vector<4x144xbf16>,
    %151 = vector.extract_strided_slice %116 {offsets = [0, 38], sizes = [4, 144], strides = [1, 1]} : vector<4x196xbf16> to vector<4x144xbf16>
    %c68_132 = arith.constant 68 : index
    %c0_133 = arith.constant 0 : index
    %152 = vector.load %arg11[%c68_132, %c0_133] : memref<100x144xbf16, #tpu.memory_space<vmem>>, vector<4x144xbf16>
    tpu.vector_store %arg11[%c68_132, %c0_133], %151 {strides = array<i32>} : memref<100x144xbf16, #tpu.memory_space<vmem>>, vector<4x144xbf16>,
    %153 = vector.extract_strided_slice %116 {offsets = [0, 39], sizes = [4, 144], strides = [1, 1]} : vector<4x196xbf16> to vector<4x144xbf16>
    %c72_134 = arith.constant 72 : index
    %c0_135 = arith.constant 0 : index
    %154 = vector.load %arg11[%c72_134, %c0_135] : memref<100x144xbf16, #tpu.memory_space<vmem>>, vector<4x144xbf16>
    tpu.vector_store %arg11[%c72_134, %c0_135], %153 {strides = array<i32>} : memref<100x144xbf16, #tpu.memory_space<vmem>>, vector<4x144xbf16>,
    %155 = vector.extract_strided_slice %116 {offsets = [0, 40], sizes = [4, 144], strides = [1, 1]} : vector<4x196xbf16> to vector<4x144xbf16>
    %c76_136 = arith.constant 76 : index
    %c0_137 = arith.constant 0 : index
    %156 = vector.load %arg11[%c76_136, %c0_137] : memref<100x144xbf16, #tpu.memory_space<vmem>>, vector<4x144xbf16>
    tpu.vector_store %arg11[%c76_136, %c0_137], %155 {strides = array<i32>} : memref<100x144xbf16, #tpu.memory_space<vmem>>, vector<4x144xbf16>,
    %157 = vector.extract_strided_slice %116 {offsets = [0, 48], sizes = [4, 144], strides = [1, 1]} : vector<4x196xbf16> to vector<4x144xbf16>
    %c80_138 = arith.constant 80 : index
    %c0_139 = arith.constant 0 : index
    %158 = vector.load %arg11[%c80_138, %c0_139] : memref<100x144xbf16, #tpu.memory_space<vmem>>, vector<4x144xbf16>
    tpu.vector_store %arg11[%c80_138, %c0_139], %157 {strides = array<i32>} : memref<100x144xbf16, #tpu.memory_space<vmem>>, vector<4x144xbf16>,
    %159 = vector.extract_strided_slice %116 {offsets = [0, 49], sizes = [4, 144], strides = [1, 1]} : vector<4x196xbf16> to vector<4x144xbf16>
    %c84_140 = arith.constant 84 : index
    %c0_141 = arith.constant 0 : index
    %160 = vector.load %arg11[%c84_140, %c0_141] : memref<100x144xbf16, #tpu.memory_space<vmem>>, vector<4x144xbf16>
    tpu.vector_store %arg11[%c84_140, %c0_141], %159 {strides = array<i32>} : memref<100x144xbf16, #tpu.memory_space<vmem>>, vector<4x144xbf16>,
    %161 = vector.extract_strided_slice %116 {offsets = [0, 50], sizes = [4, 144], strides = [1, 1]} : vector<4x196xbf16> to vector<4x144xbf16>
    %c88_142 = arith.constant 88 : index
    %c0_143 = arith.constant 0 : index
    %162 = vector.load %arg11[%c88_142, %c0_143] : memref<100x144xbf16, #tpu.memory_space<vmem>>, vector<4x144xbf16>
    tpu.vector_store %arg11[%c88_142, %c0_143], %161 {strides = array<i32>} : memref<100x144xbf16, #tpu.memory_space<vmem>>, vector<4x144xbf16>,
    %163 = vector.extract_strided_slice %116 {offsets = [0, 51], sizes = [4, 144], strides = [1, 1]} : vector<4x196xbf16> to vector<4x144xbf16>
    %c92_144 = arith.constant 92 : index
    %c0_145 = arith.constant 0 : index
    %164 = vector.load %arg11[%c92_144, %c0_145] : memref<100x144xbf16, #tpu.memory_space<vmem>>, vector<4x144xbf16>
    tpu.vector_store %arg11[%c92_144, %c0_145], %163 {strides = array<i32>} : memref<100x144xbf16, #tpu.memory_space<vmem>>, vector<4x144xbf16>,
    %165 = vector.extract_strided_slice %116 {offsets = [0, 52], sizes = [4, 144], strides = [1, 1]} : vector<4x196xbf16> to vector<4x144xbf16>
    %c96_146 = arith.constant 96 : index
    %c0_147 = arith.constant 0 : index
    %166 = vector.load %arg11[%c96_146, %c0_147] : memref<100x144xbf16, #tpu.memory_space<vmem>>, vector<4x144xbf16>
    tpu.vector_store %arg11[%c96_146, %c0_147], %165 {strides = array<i32>} : memref<100x144xbf16, #tpu.memory_space<vmem>>, vector<4x144xbf16>,
    %c2 = arith.constant 2 : index
    %c0_148 = arith.constant 0 : index
    %c0_149 = arith.constant 0 : index
    %167 = vector.load %arg7[%c2, %c0_148, %c0_149] : memref<5x8x100xbf16, #tpu.memory_space<vmem>>, vector<1x8x100xbf16>
    %168 = vector.shape_cast %167 : vector<1x8x100xbf16> to vector<8x100xbf16>
    %c0_150 = arith.constant 0 : index
    %c0_151 = arith.constant 0 : index
    %169 = vector.load %arg11[%c0_150, %c0_151] : memref<100x144xbf16, #tpu.memory_space<vmem>>, vector<100x144xbf16>
    %cst_152 = arith.constant dense<0.000000e+00> : vector<8x144xf32>
    %170 = tpu.matmul %168, %169, %cst_152 {dimension_numbers = #tpu.dot_dimension_numbers<[1], [0], [0], [1], [0, 0, 1, 1], [], []>} : vector<8x100xbf16>, vector<100x144xbf16>, vector<8x144xf32> -> vector<8x144xf32>
    %171 = arith.addf %114, %170 : vector<8x144xf32>
    %c0_153 = arith.constant 0 : index
    %c0_154 = arith.constant 0 : index
    %c0_155 = arith.constant 0 : index
    %c0_156 = arith.constant 0 : index
    %172 = vector.load %arg5[%c0_153, %c0_154, %c0_155, %c0_156] : memref<1x1x4x196xbf16, #tpu.memory_space<vmem>>, vector<1x1x4x196xbf16>
    %173 = vector.shape_cast %172 : vector<1x1x4x196xbf16> to vector<4x196xbf16>
    %174 = vector.extract_strided_slice %173 {offsets = [0, 0], sizes = [4, 144], strides = [1, 1]} : vector<4x196xbf16> to vector<4x144xbf16>
    %c0_157 = arith.constant 0 : index
    %c0_158 = arith.constant 0 : index
    %175 = vector.load %arg11[%c0_157, %c0_158] : memref<100x144xbf16, #tpu.memory_space<vmem>>, vector<4x144xbf16>
    tpu.vector_store %arg11[%c0_157, %c0_158], %174 {strides = array<i32>} : memref<100x144xbf16, #tpu.memory_space<vmem>>, vector<4x144xbf16>,
    %176 = vector.extract_strided_slice %173 {offsets = [0, 1], sizes = [4, 144], strides = [1, 1]} : vector<4x196xbf16> to vector<4x144xbf16>
    %c4_159 = arith.constant 4 : index
    %c0_160 = arith.constant 0 : index
    %177 = vector.load %arg11[%c4_159, %c0_160] : memref<100x144xbf16, #tpu.memory_space<vmem>>, vector<4x144xbf16>
    tpu.vector_store %arg11[%c4_159, %c0_160], %176 {strides = array<i32>} : memref<100x144xbf16, #tpu.memory_space<vmem>>, vector<4x144xbf16>,
    %178 = vector.extract_strided_slice %173 {offsets = [0, 2], sizes = [4, 144], strides = [1, 1]} : vector<4x196xbf16> to vector<4x144xbf16>
    %c8_161 = arith.constant 8 : index
    %c0_162 = arith.constant 0 : index
    %179 = vector.load %arg11[%c8_161, %c0_162] : memref<100x144xbf16, #tpu.memory_space<vmem>>, vector<4x144xbf16>
    tpu.vector_store %arg11[%c8_161, %c0_162], %178 {strides = array<i32>} : memref<100x144xbf16, #tpu.memory_space<vmem>>, vector<4x144xbf16>,
    %180 = vector.extract_strided_slice %173 {offsets = [0, 3], sizes = [4, 144], strides = [1, 1]} : vector<4x196xbf16> to vector<4x144xbf16>
    %c12_163 = arith.constant 12 : index
    %c0_164 = arith.constant 0 : index
    %181 = vector.load %arg11[%c12_163, %c0_164] : memref<100x144xbf16, #tpu.memory_space<vmem>>, vector<4x144xbf16>
    tpu.vector_store %arg11[%c12_163, %c0_164], %180 {strides = array<i32>} : memref<100x144xbf16, #tpu.memory_space<vmem>>, vector<4x144xbf16>,
    %182 = vector.extract_strided_slice %173 {offsets = [0, 4], sizes = [4, 144], strides = [1, 1]} : vector<4x196xbf16> to vector<4x144xbf16>
    %c16_165 = arith.constant 16 : index
    %c0_166 = arith.constant 0 : index
    %183 = vector.load %arg11[%c16_165, %c0_166] : memref<100x144xbf16, #tpu.memory_space<vmem>>, vector<4x144xbf16>
    tpu.vector_store %arg11[%c16_165, %c0_166], %182 {strides = array<i32>} : memref<100x144xbf16, #tpu.memory_space<vmem>>, vector<4x144xbf16>,
    %184 = vector.extract_strided_slice %173 {offsets = [0, 12], sizes = [4, 144], strides = [1, 1]} : vector<4x196xbf16> to vector<4x144xbf16>
    %c20_167 = arith.constant 20 : index
    %c0_168 = arith.constant 0 : index
    %185 = vector.load %arg11[%c20_167, %c0_168] : memref<100x144xbf16, #tpu.memory_space<vmem>>, vector<4x144xbf16>
    tpu.vector_store %arg11[%c20_167, %c0_168], %184 {strides = array<i32>} : memref<100x144xbf16, #tpu.memory_space<vmem>>, vector<4x144xbf16>,
    %186 = vector.extract_strided_slice %173 {offsets = [0, 13], sizes = [4, 144], strides = [1, 1]} : vector<4x196xbf16> to vector<4x144xbf16>
    %c24_169 = arith.constant 24 : index
    %c0_170 = arith.constant 0 : index
    %187 = vector.load %arg11[%c24_169, %c0_170] : memref<100x144xbf16, #tpu.memory_space<vmem>>, vector<4x144xbf16>
    tpu.vector_store %arg11[%c24_169, %c0_170], %186 {strides = array<i32>} : memref<100x144xbf16, #tpu.memory_space<vmem>>, vector<4x144xbf16>,
    %188 = vector.extract_strided_slice %173 {offsets = [0, 14], sizes = [4, 144], strides = [1, 1]} : vector<4x196xbf16> to vector<4x144xbf16>
    %c28_171 = arith.constant 28 : index
    %c0_172 = arith.constant 0 : index
    %189 = vector.load %arg11[%c28_171, %c0_172] : memref<100x144xbf16, #tpu.memory_space<vmem>>, vector<4x144xbf16>
    tpu.vector_store %arg11[%c28_171, %c0_172], %188 {strides = array<i32>} : memref<100x144xbf16, #tpu.memory_space<vmem>>, vector<4x144xbf16>,
    %190 = vector.extract_strided_slice %173 {offsets = [0, 15], sizes = [4, 144], strides = [1, 1]} : vector<4x196xbf16> to vector<4x144xbf16>
    %c32_173 = arith.constant 32 : index
    %c0_174 = arith.constant 0 : index
    %191 = vector.load %arg11[%c32_173, %c0_174] : memref<100x144xbf16, #tpu.memory_space<vmem>>, vector<4x144xbf16>
    tpu.vector_store %arg11[%c32_173, %c0_174], %190 {strides = array<i32>} : memref<100x144xbf16, #tpu.memory_space<vmem>>, vector<4x144xbf16>,
    %192 = vector.extract_strided_slice %173 {offsets = [0, 16], sizes = [4, 144], strides = [1, 1]} : vector<4x196xbf16> to vector<4x144xbf16>
    %c36_175 = arith.constant 36 : index
    %c0_176 = arith.constant 0 : index
    %193 = vector.load %arg11[%c36_175, %c0_176] : memref<100x144xbf16, #tpu.memory_space<vmem>>, vector<4x144xbf16>
    tpu.vector_store %arg11[%c36_175, %c0_176], %192 {strides = array<i32>} : memref<100x144xbf16, #tpu.memory_space<vmem>>, vector<4x144xbf16>,
    %194 = vector.extract_strided_slice %173 {offsets = [0, 24], sizes = [4, 144], strides = [1, 1]} : vector<4x196xbf16> to vector<4x144xbf16>
    %c40_177 = arith.constant 40 : index
    %c0_178 = arith.constant 0 : index
    %195 = vector.load %arg11[%c40_177, %c0_178] : memref<100x144xbf16, #tpu.memory_space<vmem>>, vector<4x144xbf16>
    tpu.vector_store %arg11[%c40_177, %c0_178], %194 {strides = array<i32>} : memref<100x144xbf16, #tpu.memory_space<vmem>>, vector<4x144xbf16>,
    %196 = vector.extract_strided_slice %173 {offsets = [0, 25], sizes = [4, 144], strides = [1, 1]} : vector<4x196xbf16> to vector<4x144xbf16>
    %c44_179 = arith.constant 44 : index
    %c0_180 = arith.constant 0 : index
    %197 = vector.load %arg11[%c44_179, %c0_180] : memref<100x144xbf16, #tpu.memory_space<vmem>>, vector<4x144xbf16>
    tpu.vector_store %arg11[%c44_179, %c0_180], %196 {strides = array<i32>} : memref<100x144xbf16, #tpu.memory_space<vmem>>, vector<4x144xbf16>,
    %198 = vector.extract_strided_slice %173 {offsets = [0, 26], sizes = [4, 144], strides = [1, 1]} : vector<4x196xbf16> to vector<4x144xbf16>
    %c48_181 = arith.constant 48 : index
    %c0_182 = arith.constant 0 : index
    %199 = vector.load %arg11[%c48_181, %c0_182] : memref<100x144xbf16, #tpu.memory_space<vmem>>, vector<4x144xbf16>
    tpu.vector_store %arg11[%c48_181, %c0_182], %198 {strides = array<i32>} : memref<100x144xbf16, #tpu.memory_space<vmem>>, vector<4x144xbf16>,
    %200 = vector.extract_strided_slice %173 {offsets = [0, 27], sizes = [4, 144], strides = [1, 1]} : vector<4x196xbf16> to vector<4x144xbf16>
    %c52_183 = arith.constant 52 : index
    %c0_184 = arith.constant 0 : index
    %201 = vector.load %arg11[%c52_183, %c0_184] : memref<100x144xbf16, #tpu.memory_space<vmem>>, vector<4x144xbf16>
    tpu.vector_store %arg11[%c52_183, %c0_184], %200 {strides = array<i32>} : memref<100x144xbf16, #tpu.memory_space<vmem>>, vector<4x144xbf16>,
    %202 = vector.extract_strided_slice %173 {offsets = [0, 28], sizes = [4, 144], strides = [1, 1]} : vector<4x196xbf16> to vector<4x144xbf16>
    %c56_185 = arith.constant 56 : index
    %c0_186 = arith.constant 0 : index
    %203 = vector.load %arg11[%c56_185, %c0_186] : memref<100x144xbf16, #tpu.memory_space<vmem>>, vector<4x144xbf16>
    tpu.vector_store %arg11[%c56_185, %c0_186], %202 {strides = array<i32>} : memref<100x144xbf16, #tpu.memory_space<vmem>>, vector<4x144xbf16>,
    %204 = vector.extract_strided_slice %173 {offsets = [0, 36], sizes = [4, 144], strides = [1, 1]} : vector<4x196xbf16> to vector<4x144xbf16>
    %c60_187 = arith.constant 60 : index
    %c0_188 = arith.constant 0 : index
    %205 = vector.load %arg11[%c60_187, %c0_188] : memref<100x144xbf16, #tpu.memory_space<vmem>>, vector<4x144xbf16>
    tpu.vector_store %arg11[%c60_187, %c0_188], %204 {strides = array<i32>} : memref<100x144xbf16, #tpu.memory_space<vmem>>, vector<4x144xbf16>,
    %206 = vector.extract_strided_slice %173 {offsets = [0, 37], sizes = [4, 144], strides = [1, 1]} : vector<4x196xbf16> to vector<4x144xbf16>
    %c64_189 = arith.constant 64 : index
    %c0_190 = arith.constant 0 : index
    %207 = vector.load %arg11[%c64_189, %c0_190] : memref<100x144xbf16, #tpu.memory_space<vmem>>, vector<4x144xbf16>
    tpu.vector_store %arg11[%c64_189, %c0_190], %206 {strides = array<i32>} : memref<100x144xbf16, #tpu.memory_space<vmem>>, vector<4x144xbf16>,
    %208 = vector.extract_strided_slice %173 {offsets = [0, 38], sizes = [4, 144], strides = [1, 1]} : vector<4x196xbf16> to vector<4x144xbf16>
    %c68_191 = arith.constant 68 : index
    %c0_192 = arith.constant 0 : index
    %209 = vector.load %arg11[%c68_191, %c0_192] : memref<100x144xbf16, #tpu.memory_space<vmem>>, vector<4x144xbf16>
    tpu.vector_store %arg11[%c68_191, %c0_192], %208 {strides = array<i32>} : memref<100x144xbf16, #tpu.memory_space<vmem>>, vector<4x144xbf16>,
    %210 = vector.extract_strided_slice %173 {offsets = [0, 39], sizes = [4, 144], strides = [1, 1]} : vector<4x196xbf16> to vector<4x144xbf16>
    %c72_193 = arith.constant 72 : index
    %c0_194 = arith.constant 0 : index
    %211 = vector.load %arg11[%c72_193, %c0_194] : memref<100x144xbf16, #tpu.memory_space<vmem>>, vector<4x144xbf16>
    tpu.vector_store %arg11[%c72_193, %c0_194], %210 {strides = array<i32>} : memref<100x144xbf16, #tpu.memory_space<vmem>>, vector<4x144xbf16>,
    %212 = vector.extract_strided_slice %173 {offsets = [0, 40], sizes = [4, 144], strides = [1, 1]} : vector<4x196xbf16> to vector<4x144xbf16>
    %c76_195 = arith.constant 76 : index
    %c0_196 = arith.constant 0 : index
    %213 = vector.load %arg11[%c76_195, %c0_196] : memref<100x144xbf16, #tpu.memory_space<vmem>>, vector<4x144xbf16>
    tpu.vector_store %arg11[%c76_195, %c0_196], %212 {strides = array<i32>} : memref<100x144xbf16, #tpu.memory_space<vmem>>, vector<4x144xbf16>,
    %214 = vector.extract_strided_slice %173 {offsets = [0, 48], sizes = [4, 144], strides = [1, 1]} : vector<4x196xbf16> to vector<4x144xbf16>
    %c80_197 = arith.constant 80 : index
    %c0_198 = arith.constant 0 : index
    %215 = vector.load %arg11[%c80_197, %c0_198] : memref<100x144xbf16, #tpu.memory_space<vmem>>, vector<4x144xbf16>
    tpu.vector_store %arg11[%c80_197, %c0_198], %214 {strides = array<i32>} : memref<100x144xbf16, #tpu.memory_space<vmem>>, vector<4x144xbf16>,
    %216 = vector.extract_strided_slice %173 {offsets = [0, 49], sizes = [4, 144], strides = [1, 1]} : vector<4x196xbf16> to vector<4x144xbf16>
    %c84_199 = arith.constant 84 : index
    %c0_200 = arith.constant 0 : index
    %217 = vector.load %arg11[%c84_199, %c0_200] : memref<100x144xbf16, #tpu.memory_space<vmem>>, vector<4x144xbf16>
    tpu.vector_store %arg11[%c84_199, %c0_200], %216 {strides = array<i32>} : memref<100x144xbf16, #tpu.memory_space<vmem>>, vector<4x144xbf16>,
    %218 = vector.extract_strided_slice %173 {offsets = [0, 50], sizes = [4, 144], strides = [1, 1]} : vector<4x196xbf16> to vector<4x144xbf16>
    %c88_201 = arith.constant 88 : index
    %c0_202 = arith.constant 0 : index
    %219 = vector.load %arg11[%c88_201, %c0_202] : memref<100x144xbf16, #tpu.memory_space<vmem>>, vector<4x144xbf16>
    tpu.vector_store %arg11[%c88_201, %c0_202], %218 {strides = array<i32>} : memref<100x144xbf16, #tpu.memory_space<vmem>>, vector<4x144xbf16>,
    %220 = vector.extract_strided_slice %173 {offsets = [0, 51], sizes = [4, 144], strides = [1, 1]} : vector<4x196xbf16> to vector<4x144xbf16>
    %c92_203 = arith.constant 92 : index
    %c0_204 = arith.constant 0 : index
    %221 = vector.load %arg11[%c92_203, %c0_204] : memref<100x144xbf16, #tpu.memory_space<vmem>>, vector<4x144xbf16>
    tpu.vector_store %arg11[%c92_203, %c0_204], %220 {strides = array<i32>} : memref<100x144xbf16, #tpu.memory_space<vmem>>, vector<4x144xbf16>,
    %222 = vector.extract_strided_slice %173 {offsets = [0, 52], sizes = [4, 144], strides = [1, 1]} : vector<4x196xbf16> to vector<4x144xbf16>
    %c96_205 = arith.constant 96 : index
    %c0_206 = arith.constant 0 : index
    %223 = vector.load %arg11[%c96_205, %c0_206] : memref<100x144xbf16, #tpu.memory_space<vmem>>, vector<4x144xbf16>
    tpu.vector_store %arg11[%c96_205, %c0_206], %222 {strides = array<i32>} : memref<100x144xbf16, #tpu.memory_space<vmem>>, vector<4x144xbf16>,
    %c3 = arith.constant 3 : index
    %c0_207 = arith.constant 0 : index
    %c0_208 = arith.constant 0 : index
    %224 = vector.load %arg7[%c3, %c0_207, %c0_208] : memref<5x8x100xbf16, #tpu.memory_space<vmem>>, vector<1x8x100xbf16>
    %225 = vector.shape_cast %224 : vector<1x8x100xbf16> to vector<8x100xbf16>
    %c0_209 = arith.constant 0 : index
    %c0_210 = arith.constant 0 : index
    %226 = vector.load %arg11[%c0_209, %c0_210] : memref<100x144xbf16, #tpu.memory_space<vmem>>, vector<100x144xbf16>
    %cst_211 = arith.constant dense<0.000000e+00> : vector<8x144xf32>
    %227 = tpu.matmul %225, %226, %cst_211 {dimension_numbers = #tpu.dot_dimension_numbers<[1], [0], [0], [1], [0, 0, 1, 1], [], []>} : vector<8x100xbf16>, vector<100x144xbf16>, vector<8x144xf32> -> vector<8x144xf32>
    %228 = arith.addf %171, %227 : vector<8x144xf32>
    %c0_212 = arith.constant 0 : index
    %c0_213 = arith.constant 0 : index
    %c0_214 = arith.constant 0 : index
    %c0_215 = arith.constant 0 : index
    %229 = vector.load %arg6[%c0_212, %c0_213, %c0_214, %c0_215] : memref<1x1x4x196xbf16, #tpu.memory_space<vmem>>, vector<1x1x4x196xbf16>
    %230 = vector.shape_cast %229 : vector<1x1x4x196xbf16> to vector<4x196xbf16>
    %231 = vector.extract_strided_slice %230 {offsets = [0, 0], sizes = [4, 144], strides = [1, 1]} : vector<4x196xbf16> to vector<4x144xbf16>
    %c0_216 = arith.constant 0 : index
    %c0_217 = arith.constant 0 : index
    %232 = vector.load %arg11[%c0_216, %c0_217] : memref<100x144xbf16, #tpu.memory_space<vmem>>, vector<4x144xbf16>
    tpu.vector_store %arg11[%c0_216, %c0_217], %231 {strides = array<i32>} : memref<100x144xbf16, #tpu.memory_space<vmem>>, vector<4x144xbf16>,
    %233 = vector.extract_strided_slice %230 {offsets = [0, 1], sizes = [4, 144], strides = [1, 1]} : vector<4x196xbf16> to vector<4x144xbf16>
    %c4_218 = arith.constant 4 : index
    %c0_219 = arith.constant 0 : index
    %234 = vector.load %arg11[%c4_218, %c0_219] : memref<100x144xbf16, #tpu.memory_space<vmem>>, vector<4x144xbf16>
    tpu.vector_store %arg11[%c4_218, %c0_219], %233 {strides = array<i32>} : memref<100x144xbf16, #tpu.memory_space<vmem>>, vector<4x144xbf16>,
    %235 = vector.extract_strided_slice %230 {offsets = [0, 2], sizes = [4, 144], strides = [1, 1]} : vector<4x196xbf16> to vector<4x144xbf16>
    %c8_220 = arith.constant 8 : index
    %c0_221 = arith.constant 0 : index
    %236 = vector.load %arg11[%c8_220, %c0_221] : memref<100x144xbf16, #tpu.memory_space<vmem>>, vector<4x144xbf16>
    tpu.vector_store %arg11[%c8_220, %c0_221], %235 {strides = array<i32>} : memref<100x144xbf16, #tpu.memory_space<vmem>>, vector<4x144xbf16>,
    %237 = vector.extract_strided_slice %230 {offsets = [0, 3], sizes = [4, 144], strides = [1, 1]} : vector<4x196xbf16> to vector<4x144xbf16>
    %c12_222 = arith.constant 12 : index
    %c0_223 = arith.constant 0 : index
    %238 = vector.load %arg11[%c12_222, %c0_223] : memref<100x144xbf16, #tpu.memory_space<vmem>>, vector<4x144xbf16>
    tpu.vector_store %arg11[%c12_222, %c0_223], %237 {strides = array<i32>} : memref<100x144xbf16, #tpu.memory_space<vmem>>, vector<4x144xbf16>,
    %239 = vector.extract_strided_slice %230 {offsets = [0, 4], sizes = [4, 144], strides = [1, 1]} : vector<4x196xbf16> to vector<4x144xbf16>
    %c16_224 = arith.constant 16 : index
    %c0_225 = arith.constant 0 : index
    %240 = vector.load %arg11[%c16_224, %c0_225] : memref<100x144xbf16, #tpu.memory_space<vmem>>, vector<4x144xbf16>
    tpu.vector_store %arg11[%c16_224, %c0_225], %239 {strides = array<i32>} : memref<100x144xbf16, #tpu.memory_space<vmem>>, vector<4x144xbf16>,
    %241 = vector.extract_strided_slice %230 {offsets = [0, 12], sizes = [4, 144], strides = [1, 1]} : vector<4x196xbf16> to vector<4x144xbf16>
    %c20_226 = arith.constant 20 : index
    %c0_227 = arith.constant 0 : index
    %242 = vector.load %arg11[%c20_226, %c0_227] : memref<100x144xbf16, #tpu.memory_space<vmem>>, vector<4x144xbf16>
    tpu.vector_store %arg11[%c20_226, %c0_227], %241 {strides = array<i32>} : memref<100x144xbf16, #tpu.memory_space<vmem>>, vector<4x144xbf16>,
    %243 = vector.extract_strided_slice %230 {offsets = [0, 13], sizes = [4, 144], strides = [1, 1]} : vector<4x196xbf16> to vector<4x144xbf16>
    %c24_228 = arith.constant 24 : index
    %c0_229 = arith.constant 0 : index
    %244 = vector.load %arg11[%c24_228, %c0_229] : memref<100x144xbf16, #tpu.memory_space<vmem>>, vector<4x144xbf16>
    tpu.vector_store %arg11[%c24_228, %c0_229], %243 {strides = array<i32>} : memref<100x144xbf16, #tpu.memory_space<vmem>>, vector<4x144xbf16>,
    %245 = vector.extract_strided_slice %230 {offsets = [0, 14], sizes = [4, 144], strides = [1, 1]} : vector<4x196xbf16> to vector<4x144xbf16>
    %c28_230 = arith.constant 28 : index
    %c0_231 = arith.constant 0 : index
    %246 = vector.load %arg11[%c28_230, %c0_231] : memref<100x144xbf16, #tpu.memory_space<vmem>>, vector<4x144xbf16>
    tpu.vector_store %arg11[%c28_230, %c0_231], %245 {strides = array<i32>} : memref<100x144xbf16, #tpu.memory_space<vmem>>, vector<4x144xbf16>,
    %247 = vector.extract_strided_slice %230 {offsets = [0, 15], sizes = [4, 144], strides = [1, 1]} : vector<4x196xbf16> to vector<4x144xbf16>
    %c32_232 = arith.constant 32 : index
    %c0_233 = arith.constant 0 : index
    %248 = vector.load %arg11[%c32_232, %c0_233] : memref<100x144xbf16, #tpu.memory_space<vmem>>, vector<4x144xbf16>
    tpu.vector_store %arg11[%c32_232, %c0_233], %247 {strides = array<i32>} : memref<100x144xbf16, #tpu.memory_space<vmem>>, vector<4x144xbf16>,
    %249 = vector.extract_strided_slice %230 {offsets = [0, 16], sizes = [4, 144], strides = [1, 1]} : vector<4x196xbf16> to vector<4x144xbf16>
    %c36_234 = arith.constant 36 : index
    %c0_235 = arith.constant 0 : index
    %250 = vector.load %arg11[%c36_234, %c0_235] : memref<100x144xbf16, #tpu.memory_space<vmem>>, vector<4x144xbf16>
    tpu.vector_store %arg11[%c36_234, %c0_235], %249 {strides = array<i32>} : memref<100x144xbf16, #tpu.memory_space<vmem>>, vector<4x144xbf16>,
    %251 = vector.extract_strided_slice %230 {offsets = [0, 24], sizes = [4, 144], strides = [1, 1]} : vector<4x196xbf16> to vector<4x144xbf16>
    %c40_236 = arith.constant 40 : index
    %c0_237 = arith.constant 0 : index
    %252 = vector.load %arg11[%c40_236, %c0_237] : memref<100x144xbf16, #tpu.memory_space<vmem>>, vector<4x144xbf16>
    tpu.vector_store %arg11[%c40_236, %c0_237], %251 {strides = array<i32>} : memref<100x144xbf16, #tpu.memory_space<vmem>>, vector<4x144xbf16>,
    %253 = vector.extract_strided_slice %230 {offsets = [0, 25], sizes = [4, 144], strides = [1, 1]} : vector<4x196xbf16> to vector<4x144xbf16>
    %c44_238 = arith.constant 44 : index
    %c0_239 = arith.constant 0 : index
    %254 = vector.load %arg11[%c44_238, %c0_239] : memref<100x144xbf16, #tpu.memory_space<vmem>>, vector<4x144xbf16>
    tpu.vector_store %arg11[%c44_238, %c0_239], %253 {strides = array<i32>} : memref<100x144xbf16, #tpu.memory_space<vmem>>, vector<4x144xbf16>,
    %255 = vector.extract_strided_slice %230 {offsets = [0, 26], sizes = [4, 144], strides = [1, 1]} : vector<4x196xbf16> to vector<4x144xbf16>
    %c48_240 = arith.constant 48 : index
    %c0_241 = arith.constant 0 : index
    %256 = vector.load %arg11[%c48_240, %c0_241] : memref<100x144xbf16, #tpu.memory_space<vmem>>, vector<4x144xbf16>
    tpu.vector_store %arg11[%c48_240, %c0_241], %255 {strides = array<i32>} : memref<100x144xbf16, #tpu.memory_space<vmem>>, vector<4x144xbf16>,
    %257 = vector.extract_strided_slice %230 {offsets = [0, 27], sizes = [4, 144], strides = [1, 1]} : vector<4x196xbf16> to vector<4x144xbf16>
    %c52_242 = arith.constant 52 : index
    %c0_243 = arith.constant 0 : index
    %258 = vector.load %arg11[%c52_242, %c0_243] : memref<100x144xbf16, #tpu.memory_space<vmem>>, vector<4x144xbf16>
    tpu.vector_store %arg11[%c52_242, %c0_243], %257 {strides = array<i32>} : memref<100x144xbf16, #tpu.memory_space<vmem>>, vector<4x144xbf16>,
    %259 = vector.extract_strided_slice %230 {offsets = [0, 28], sizes = [4, 144], strides = [1, 1]} : vector<4x196xbf16> to vector<4x144xbf16>
    %c56_244 = arith.constant 56 : index
    %c0_245 = arith.constant 0 : index
    %260 = vector.load %arg11[%c56_244, %c0_245] : memref<100x144xbf16, #tpu.memory_space<vmem>>, vector<4x144xbf16>
    tpu.vector_store %arg11[%c56_244, %c0_245], %259 {strides = array<i32>} : memref<100x144xbf16, #tpu.memory_space<vmem>>, vector<4x144xbf16>,
    %261 = vector.extract_strided_slice %230 {offsets = [0, 36], sizes = [4, 144], strides = [1, 1]} : vector<4x196xbf16> to vector<4x144xbf16>
    %c60_246 = arith.constant 60 : index
    %c0_247 = arith.constant 0 : index
    %262 = vector.load %arg11[%c60_246, %c0_247] : memref<100x144xbf16, #tpu.memory_space<vmem>>, vector<4x144xbf16>
    tpu.vector_store %arg11[%c60_246, %c0_247], %261 {strides = array<i32>} : memref<100x144xbf16, #tpu.memory_space<vmem>>, vector<4x144xbf16>,
    %263 = vector.extract_strided_slice %230 {offsets = [0, 37], sizes = [4, 144], strides = [1, 1]} : vector<4x196xbf16> to vector<4x144xbf16>
    %c64_248 = arith.constant 64 : index
    %c0_249 = arith.constant 0 : index
    %264 = vector.load %arg11[%c64_248, %c0_249] : memref<100x144xbf16, #tpu.memory_space<vmem>>, vector<4x144xbf16>
    tpu.vector_store %arg11[%c64_248, %c0_249], %263 {strides = array<i32>} : memref<100x144xbf16, #tpu.memory_space<vmem>>, vector<4x144xbf16>,
    %265 = vector.extract_strided_slice %230 {offsets = [0, 38], sizes = [4, 144], strides = [1, 1]} : vector<4x196xbf16> to vector<4x144xbf16>
    %c68_250 = arith.constant 68 : index
    %c0_251 = arith.constant 0 : index
    %266 = vector.load %arg11[%c68_250, %c0_251] : memref<100x144xbf16, #tpu.memory_space<vmem>>, vector<4x144xbf16>
    tpu.vector_store %arg11[%c68_250, %c0_251], %265 {strides = array<i32>} : memref<100x144xbf16, #tpu.memory_space<vmem>>, vector<4x144xbf16>,
    %267 = vector.extract_strided_slice %230 {offsets = [0, 39], sizes = [4, 144], strides = [1, 1]} : vector<4x196xbf16> to vector<4x144xbf16>
    %c72_252 = arith.constant 72 : index
    %c0_253 = arith.constant 0 : index
    %268 = vector.load %arg11[%c72_252, %c0_253] : memref<100x144xbf16, #tpu.memory_space<vmem>>, vector<4x144xbf16>
    tpu.vector_store %arg11[%c72_252, %c0_253], %267 {strides = array<i32>} : memref<100x144xbf16, #tpu.memory_space<vmem>>, vector<4x144xbf16>,
    %269 = vector.extract_strided_slice %230 {offsets = [0, 40], sizes = [4, 144], strides = [1, 1]} : vector<4x196xbf16> to vector<4x144xbf16>
    %c76_254 = arith.constant 76 : index
    %c0_255 = arith.constant 0 : index
    %270 = vector.load %arg11[%c76_254, %c0_255] : memref<100x144xbf16, #tpu.memory_space<vmem>>, vector<4x144xbf16>
    tpu.vector_store %arg11[%c76_254, %c0_255], %269 {strides = array<i32>} : memref<100x144xbf16, #tpu.memory_space<vmem>>, vector<4x144xbf16>,
    %271 = vector.extract_strided_slice %230 {offsets = [0, 48], sizes = [4, 144], strides = [1, 1]} : vector<4x196xbf16> to vector<4x144xbf16>
    %c80_256 = arith.constant 80 : index
    %c0_257 = arith.constant 0 : index
    %272 = vector.load %arg11[%c80_256, %c0_257] : memref<100x144xbf16, #tpu.memory_space<vmem>>, vector<4x144xbf16>
    tpu.vector_store %arg11[%c80_256, %c0_257], %271 {strides = array<i32>} : memref<100x144xbf16, #tpu.memory_space<vmem>>, vector<4x144xbf16>,
    %273 = vector.extract_strided_slice %230 {offsets = [0, 49], sizes = [4, 144], strides = [1, 1]} : vector<4x196xbf16> to vector<4x144xbf16>
    %c84_258 = arith.constant 84 : index
    %c0_259 = arith.constant 0 : index
    %274 = vector.load %arg11[%c84_258, %c0_259] : memref<100x144xbf16, #tpu.memory_space<vmem>>, vector<4x144xbf16>
    tpu.vector_store %arg11[%c84_258, %c0_259], %273 {strides = array<i32>} : memref<100x144xbf16, #tpu.memory_space<vmem>>, vector<4x144xbf16>,
    %275 = vector.extract_strided_slice %230 {offsets = [0, 50], sizes = [4, 144], strides = [1, 1]} : vector<4x196xbf16> to vector<4x144xbf16>
    %c88_260 = arith.constant 88 : index
    %c0_261 = arith.constant 0 : index
    %276 = vector.load %arg11[%c88_260, %c0_261] : memref<100x144xbf16, #tpu.memory_space<vmem>>, vector<4x144xbf16>
    tpu.vector_store %arg11[%c88_260, %c0_261], %275 {strides = array<i32>} : memref<100x144xbf16, #tpu.memory_space<vmem>>, vector<4x144xbf16>,
    %277 = vector.extract_strided_slice %230 {offsets = [0, 51], sizes = [4, 144], strides = [1, 1]} : vector<4x196xbf16> to vector<4x144xbf16>
    %c92_262 = arith.constant 92 : index
    %c0_263 = arith.constant 0 : index
    %278 = vector.load %arg11[%c92_262, %c0_263] : memref<100x144xbf16, #tpu.memory_space<vmem>>, vector<4x144xbf16>
    tpu.vector_store %arg11[%c92_262, %c0_263], %277 {strides = array<i32>} : memref<100x144xbf16, #tpu.memory_space<vmem>>, vector<4x144xbf16>,
    %279 = vector.extract_strided_slice %230 {offsets = [0, 52], sizes = [4, 144], strides = [1, 1]} : vector<4x196xbf16> to vector<4x144xbf16>
    %c96_264 = arith.constant 96 : index
    %c0_265 = arith.constant 0 : index
    %280 = vector.load %arg11[%c96_264, %c0_265] : memref<100x144xbf16, #tpu.memory_space<vmem>>, vector<4x144xbf16>
    tpu.vector_store %arg11[%c96_264, %c0_265], %279 {strides = array<i32>} : memref<100x144xbf16, #tpu.memory_space<vmem>>, vector<4x144xbf16>,
    %c4_266 = arith.constant 4 : index
    %c0_267 = arith.constant 0 : index
    %c0_268 = arith.constant 0 : index
    %281 = vector.load %arg7[%c4_266, %c0_267, %c0_268] : memref<5x8x100xbf16, #tpu.memory_space<vmem>>, vector<1x8x100xbf16>
    %282 = vector.shape_cast %281 : vector<1x8x100xbf16> to vector<8x100xbf16>
    %c0_269 = arith.constant 0 : index
    %c0_270 = arith.constant 0 : index
    %283 = vector.load %arg11[%c0_269, %c0_270] : memref<100x144xbf16, #tpu.memory_space<vmem>>, vector<100x144xbf16>
    %cst_271 = arith.constant dense<0.000000e+00> : vector<8x144xf32>
    %284 = tpu.matmul %282, %283, %cst_271 {dimension_numbers = #tpu.dot_dimension_numbers<[1], [0], [0], [1], [0, 0, 1, 1], [], []>} : vector<8x100xbf16>, vector<100x144xbf16>, vector<8x144xf32> -> vector<8x144xf32>
    %285 = arith.addf %228, %284 : vector<8x144xf32>
    %c0_272 = arith.constant 0 : index
    %c0_273 = arith.constant 0 : index
    %286 = vector.load %arg8[%c0_272, %c0_273] : memref<8x1xf32, #tpu.memory_space<vmem>>, vector<8x1xf32>
    %287 = vector.broadcast %286 : vector<8x1xf32> to vector<8x144xf32>
    %288 = arith.mulf %285, %287 : vector<8x144xf32>
    %c0_274 = arith.constant 0 : index
    %c0_275 = arith.constant 0 : index
    %289 = vector.load %arg9[%c0_274, %c0_275] : memref<8x1xf32, #tpu.memory_space<vmem>>, vector<8x1xf32>
    %290 = vector.broadcast %289 : vector<8x1xf32> to vector<8x144xf32>
    %291 = arith.addf %288, %290 : vector<8x144xf32>
    %cst_276 = arith.constant 0.000000e+00 : f32
    %292 = vector.broadcast %cst_276 : f32 to vector<8x144xf32>
    %293 = arith.maximumf %291, %292 : vector<8x144xf32>
    %c0_277 = arith.constant 0 : index
    %c0_278 = arith.constant 0 : index
    %c0_279 = arith.constant 0 : index
    %c0_280 = arith.constant 0 : index
    %294 = vector.load %arg10[%c0_277, %c0_278, %c0_279, %c0_280] : memref<1x1x8x144xf32, #tpu.memory_space<vmem>>, vector<1x1x8x144xf32>
    %295 = vector.shape_cast %294 : vector<1x1x8x144xf32> to vector<8x144xf32>
    %296 = vector.shape_cast %293 : vector<8x144xf32> to vector<1x1x8x144xf32>
    tpu.vector_store %arg10[%c0_277, %c0_278, %c0_279, %c0_280], %296 {strides = array<i32>} : memref<1x1x8x144xf32, #tpu.memory_space<vmem>>, vector<1x1x8x144xf32>,
    return
  }
  func.func @transform_0(%arg0: i32, %arg1: i32) -> (i32, i32, i32, i32) {
    %c0_i32 = arith.constant 0 : i32
    %0 = arith.addi %arg1, %c0_i32 : i32
    %c0_i32_0 = arith.constant 0 : i32
    %c0_i32_1 = arith.constant 0 : i32
    %c0_i32_2 = arith.constant 0 : i32
    return %arg0, %0, %c0_i32_0, %c0_i32_1 : i32, i32, i32, i32
  }
  func.func @transform_1(%arg0: i32, %arg1: i32) -> (i32, i32, i32, i32) {
    %c1_i32 = arith.constant 1 : i32
    %0 = arith.addi %arg1, %c1_i32 : i32
    %c0_i32 = arith.constant 0 : i32
    %c0_i32_0 = arith.constant 0 : i32
    %c0_i32_1 = arith.constant 0 : i32
    return %arg0, %0, %c0_i32, %c0_i32_0 : i32, i32, i32, i32
  }
  func.func @transform_2(%arg0: i32, %arg1: i32) -> (i32, i32, i32, i32) {
    %c2_i32 = arith.constant 2 : i32
    %0 = arith.addi %arg1, %c2_i32 : i32
    %c0_i32 = arith.constant 0 : i32
    %c0_i32_0 = arith.constant 0 : i32
    %c0_i32_1 = arith.constant 0 : i32
    return %arg0, %0, %c0_i32, %c0_i32_0 : i32, i32, i32, i32
  }
  func.func @transform_3(%arg0: i32, %arg1: i32) -> (i32, i32, i32, i32) {
    %c3_i32 = arith.constant 3 : i32
    %0 = arith.addi %arg1, %c3_i32 : i32
    %c0_i32 = arith.constant 0 : i32
    %c0_i32_0 = arith.constant 0 : i32
    %c0_i32_1 = arith.constant 0 : i32
    return %arg0, %0, %c0_i32, %c0_i32_0 : i32, i32, i32, i32
  }
  func.func @transform_4(%arg0: i32, %arg1: i32) -> (i32, i32, i32, i32) {
    %c4_i32 = arith.constant 4 : i32
    %0 = arith.addi %arg1, %c4_i32 : i32
    %c0_i32 = arith.constant 0 : i32
    %c0_i32_0 = arith.constant 0 : i32
    %c0_i32_1 = arith.constant 0 : i32
    return %arg0, %0, %c0_i32, %c0_i32_0 : i32, i32, i32, i32
  }
  func.func @transform_5(%arg0: i32, %arg1: i32) -> (i32, i32, i32) {
    %c0_i32 = arith.constant 0 : i32
    %c0_i32_0 = arith.constant 0 : i32
    %c0_i32_1 = arith.constant 0 : i32
    %c0_i32_2 = arith.constant 0 : i32
    return %c0_i32, %c0_i32_0, %c0_i32_1 : i32, i32, i32
  }
  func.func @transform_6(%arg0: i32, %arg1: i32) -> (i32, i32) {
    %c0_i32 = arith.constant 0 : i32
    %c0_i32_0 = arith.constant 0 : i32
    %c0_i32_1 = arith.constant 0 : i32
    return %c0_i32, %c0_i32_0 : i32, i32
  }
  func.func @transform_7(%arg0: i32, %arg1: i32) -> (i32, i32) {
    %c0_i32 = arith.constant 0 : i32
    %c0_i32_0 = arith.constant 0 : i32
    %c0_i32_1 = arith.constant 0 : i32
    return %c0_i32, %c0_i32_0 : i32, i32
  }
  func.func @transform_8(%arg0: i32, %arg1: i32) -> (i32, i32, i32, i32) {
    %c0_i32 = arith.constant 0 : i32
    %c0_i32_0 = arith.constant 0 : i32
    %c0_i32_1 = arith.constant 0 : i32
    return %arg0, %arg1, %c0_i32, %c0_i32_0 : i32, i32, i32, i32
  }
}

module attributes {stable_mosaic.version = 11 : i64} {
  func.func @_conv3d_bn_act_kernel(%arg0: i32, %arg1: i32, %arg2: memref<1x1x8x122xbf16, #tpu.memory_space<vmem>>, %arg3: memref<1x1x8x122xbf16, #tpu.memory_space<vmem>>, %arg4: memref<1x1x8x122xbf16, #tpu.memory_space<vmem>>, %arg5: memref<3x8x72xbf16, #tpu.memory_space<vmem>>, %arg6: memref<8x1xf32, #tpu.memory_space<vmem>>, %arg7: memref<8x1xf32, #tpu.memory_space<vmem>>, %arg8: memref<1x1x8x100xf32, #tpu.memory_space<vmem>>, %arg9: memref<72x100xbf16, #tpu.memory_space<vmem>>) attributes {dimension_semantics = [#tpu.dimension_semantics<parallel>, #tpu.dimension_semantics<parallel>], iteration_bounds = array<i64: 2, 4>, scalar_prefetch = 0 : i64, scratch_operands = 1 : i64, tpu.core_type = #tpu.core_type<tc>, window_params = [{transform_indices = @transform_0, window_bounds = array<i64: 1, 1, 8, 122>}, {transform_indices = @transform_1, window_bounds = array<i64: 1, 1, 8, 122>}, {transform_indices = @transform_2, window_bounds = array<i64: 1, 1, 8, 122>}, {pipeline_mode = #tpu.pipeline_mode<synchronous>, transform_indices = @transform_3, window_bounds = array<i64: 3, 8, 72>}, {pipeline_mode = #tpu.pipeline_mode<synchronous>, transform_indices = @transform_4, window_bounds = array<i64: 8, 1>}, {pipeline_mode = #tpu.pipeline_mode<synchronous>, transform_indices = @transform_5, window_bounds = array<i64: 8, 1>}, {transform_indices = @transform_6, window_bounds = array<i64: 1, 1, 8, 100>}]} {
    %cst = arith.constant 0.000000e+00 : f32
    %0 = vector.broadcast %cst : f32 to vector<8x100xf32>
    %c0 = arith.constant 0 : index
    %c0_0 = arith.constant 0 : index
    %c0_1 = arith.constant 0 : index
    %c0_2 = arith.constant 0 : index
    %1 = vector.load %arg2[%c0, %c0_0, %c0_1, %c0_2] : memref<1x1x8x122xbf16, #tpu.memory_space<vmem>>, vector<1x1x8x122xbf16>
    %2 = vector.shape_cast %1 : vector<1x1x8x122xbf16> to vector<8x122xbf16>
    %3 = vector.extract_strided_slice %2 {offsets = [0, 0], sizes = [8, 100], strides = [1, 1]} : vector<8x122xbf16> to vector<8x100xbf16>
    %c0_3 = arith.constant 0 : index
    %c0_4 = arith.constant 0 : index
    %4 = vector.load %arg9[%c0_3, %c0_4] : memref<72x100xbf16, #tpu.memory_space<vmem>>, vector<8x100xbf16>
    tpu.vector_store %arg9[%c0_3, %c0_4], %3 {strides = array<i32>} : memref<72x100xbf16, #tpu.memory_space<vmem>>, vector<8x100xbf16>,
    %5 = vector.extract_strided_slice %2 {offsets = [0, 1], sizes = [8, 100], strides = [1, 1]} : vector<8x122xbf16> to vector<8x100xbf16>
    %c8 = arith.constant 8 : index
    %c0_5 = arith.constant 0 : index
    %6 = vector.load %arg9[%c8, %c0_5] : memref<72x100xbf16, #tpu.memory_space<vmem>>, vector<8x100xbf16>
    tpu.vector_store %arg9[%c8, %c0_5], %5 {strides = array<i32>} : memref<72x100xbf16, #tpu.memory_space<vmem>>, vector<8x100xbf16>,
    %7 = vector.extract_strided_slice %2 {offsets = [0, 2], sizes = [8, 100], strides = [1, 1]} : vector<8x122xbf16> to vector<8x100xbf16>
    %c16 = arith.constant 16 : index
    %c0_6 = arith.constant 0 : index
    %8 = vector.load %arg9[%c16, %c0_6] : memref<72x100xbf16, #tpu.memory_space<vmem>>, vector<8x100xbf16>
    tpu.vector_store %arg9[%c16, %c0_6], %7 {strides = array<i32>} : memref<72x100xbf16, #tpu.memory_space<vmem>>, vector<8x100xbf16>,
    %9 = vector.extract_strided_slice %2 {offsets = [0, 10], sizes = [8, 100], strides = [1, 1]} : vector<8x122xbf16> to vector<8x100xbf16>
    %c24 = arith.constant 24 : index
    %c0_7 = arith.constant 0 : index
    %10 = vector.load %arg9[%c24, %c0_7] : memref<72x100xbf16, #tpu.memory_space<vmem>>, vector<8x100xbf16>
    tpu.vector_store %arg9[%c24, %c0_7], %9 {strides = array<i32>} : memref<72x100xbf16, #tpu.memory_space<vmem>>, vector<8x100xbf16>,
    %11 = vector.extract_strided_slice %2 {offsets = [0, 11], sizes = [8, 100], strides = [1, 1]} : vector<8x122xbf16> to vector<8x100xbf16>
    %c32 = arith.constant 32 : index
    %c0_8 = arith.constant 0 : index
    %12 = vector.load %arg9[%c32, %c0_8] : memref<72x100xbf16, #tpu.memory_space<vmem>>, vector<8x100xbf16>
    tpu.vector_store %arg9[%c32, %c0_8], %11 {strides = array<i32>} : memref<72x100xbf16, #tpu.memory_space<vmem>>, vector<8x100xbf16>,
    %13 = vector.extract_strided_slice %2 {offsets = [0, 12], sizes = [8, 100], strides = [1, 1]} : vector<8x122xbf16> to vector<8x100xbf16>
    %c40 = arith.constant 40 : index
    %c0_9 = arith.constant 0 : index
    %14 = vector.load %arg9[%c40, %c0_9] : memref<72x100xbf16, #tpu.memory_space<vmem>>, vector<8x100xbf16>
    tpu.vector_store %arg9[%c40, %c0_9], %13 {strides = array<i32>} : memref<72x100xbf16, #tpu.memory_space<vmem>>, vector<8x100xbf16>,
    %15 = vector.extract_strided_slice %2 {offsets = [0, 20], sizes = [8, 100], strides = [1, 1]} : vector<8x122xbf16> to vector<8x100xbf16>
    %c48 = arith.constant 48 : index
    %c0_10 = arith.constant 0 : index
    %16 = vector.load %arg9[%c48, %c0_10] : memref<72x100xbf16, #tpu.memory_space<vmem>>, vector<8x100xbf16>
    tpu.vector_store %arg9[%c48, %c0_10], %15 {strides = array<i32>} : memref<72x100xbf16, #tpu.memory_space<vmem>>, vector<8x100xbf16>,
    %17 = vector.extract_strided_slice %2 {offsets = [0, 21], sizes = [8, 100], strides = [1, 1]} : vector<8x122xbf16> to vector<8x100xbf16>
    %c56 = arith.constant 56 : index
    %c0_11 = arith.constant 0 : index
    %18 = vector.load %arg9[%c56, %c0_11] : memref<72x100xbf16, #tpu.memory_space<vmem>>, vector<8x100xbf16>
    tpu.vector_store %arg9[%c56, %c0_11], %17 {strides = array<i32>} : memref<72x100xbf16, #tpu.memory_space<vmem>>, vector<8x100xbf16>,
    %19 = vector.extract_strided_slice %2 {offsets = [0, 22], sizes = [8, 100], strides = [1, 1]} : vector<8x122xbf16> to vector<8x100xbf16>
    %c64 = arith.constant 64 : index
    %c0_12 = arith.constant 0 : index
    %20 = vector.load %arg9[%c64, %c0_12] : memref<72x100xbf16, #tpu.memory_space<vmem>>, vector<8x100xbf16>
    tpu.vector_store %arg9[%c64, %c0_12], %19 {strides = array<i32>} : memref<72x100xbf16, #tpu.memory_space<vmem>>, vector<8x100xbf16>,
    %c0_13 = arith.constant 0 : index
    %c0_14 = arith.constant 0 : index
    %c0_15 = arith.constant 0 : index
    %21 = vector.load %arg5[%c0_13, %c0_14, %c0_15] : memref<3x8x72xbf16, #tpu.memory_space<vmem>>, vector<1x8x72xbf16>
    %22 = vector.shape_cast %21 : vector<1x8x72xbf16> to vector<8x72xbf16>
    %c0_16 = arith.constant 0 : index
    %c0_17 = arith.constant 0 : index
    %23 = vector.load %arg9[%c0_16, %c0_17] : memref<72x100xbf16, #tpu.memory_space<vmem>>, vector<72x100xbf16>
    %cst_18 = arith.constant dense<0.000000e+00> : vector<8x100xf32>
    %24 = tpu.matmul %22, %23, %cst_18 {dimension_numbers = #tpu.dot_dimension_numbers<[1], [0], [0], [1], [0, 0, 1, 1], [], []>} : vector<8x72xbf16>, vector<72x100xbf16>, vector<8x100xf32> -> vector<8x100xf32>
    %25 = arith.addf %0, %24 : vector<8x100xf32>
    %c0_19 = arith.constant 0 : index
    %c0_20 = arith.constant 0 : index
    %c0_21 = arith.constant 0 : index
    %c0_22 = arith.constant 0 : index
    %26 = vector.load %arg3[%c0_19, %c0_20, %c0_21, %c0_22] : memref<1x1x8x122xbf16, #tpu.memory_space<vmem>>, vector<1x1x8x122xbf16>
    %27 = vector.shape_cast %26 : vector<1x1x8x122xbf16> to vector<8x122xbf16>
    %28 = vector.extract_strided_slice %27 {offsets = [0, 0], sizes = [8, 100], strides = [1, 1]} : vector<8x122xbf16> to vector<8x100xbf16>
    %c0_23 = arith.constant 0 : index
    %c0_24 = arith.constant 0 : index
    %29 = vector.load %arg9[%c0_23, %c0_24] : memref<72x100xbf16, #tpu.memory_space<vmem>>, vector<8x100xbf16>
    tpu.vector_store %arg9[%c0_23, %c0_24], %28 {strides = array<i32>} : memref<72x100xbf16, #tpu.memory_space<vmem>>, vector<8x100xbf16>,
    %30 = vector.extract_strided_slice %27 {offsets = [0, 1], sizes = [8, 100], strides = [1, 1]} : vector<8x122xbf16> to vector<8x100xbf16>
    %c8_25 = arith.constant 8 : index
    %c0_26 = arith.constant 0 : index
    %31 = vector.load %arg9[%c8_25, %c0_26] : memref<72x100xbf16, #tpu.memory_space<vmem>>, vector<8x100xbf16>
    tpu.vector_store %arg9[%c8_25, %c0_26], %30 {strides = array<i32>} : memref<72x100xbf16, #tpu.memory_space<vmem>>, vector<8x100xbf16>,
    %32 = vector.extract_strided_slice %27 {offsets = [0, 2], sizes = [8, 100], strides = [1, 1]} : vector<8x122xbf16> to vector<8x100xbf16>
    %c16_27 = arith.constant 16 : index
    %c0_28 = arith.constant 0 : index
    %33 = vector.load %arg9[%c16_27, %c0_28] : memref<72x100xbf16, #tpu.memory_space<vmem>>, vector<8x100xbf16>
    tpu.vector_store %arg9[%c16_27, %c0_28], %32 {strides = array<i32>} : memref<72x100xbf16, #tpu.memory_space<vmem>>, vector<8x100xbf16>,
    %34 = vector.extract_strided_slice %27 {offsets = [0, 10], sizes = [8, 100], strides = [1, 1]} : vector<8x122xbf16> to vector<8x100xbf16>
    %c24_29 = arith.constant 24 : index
    %c0_30 = arith.constant 0 : index
    %35 = vector.load %arg9[%c24_29, %c0_30] : memref<72x100xbf16, #tpu.memory_space<vmem>>, vector<8x100xbf16>
    tpu.vector_store %arg9[%c24_29, %c0_30], %34 {strides = array<i32>} : memref<72x100xbf16, #tpu.memory_space<vmem>>, vector<8x100xbf16>,
    %36 = vector.extract_strided_slice %27 {offsets = [0, 11], sizes = [8, 100], strides = [1, 1]} : vector<8x122xbf16> to vector<8x100xbf16>
    %c32_31 = arith.constant 32 : index
    %c0_32 = arith.constant 0 : index
    %37 = vector.load %arg9[%c32_31, %c0_32] : memref<72x100xbf16, #tpu.memory_space<vmem>>, vector<8x100xbf16>
    tpu.vector_store %arg9[%c32_31, %c0_32], %36 {strides = array<i32>} : memref<72x100xbf16, #tpu.memory_space<vmem>>, vector<8x100xbf16>,
    %38 = vector.extract_strided_slice %27 {offsets = [0, 12], sizes = [8, 100], strides = [1, 1]} : vector<8x122xbf16> to vector<8x100xbf16>
    %c40_33 = arith.constant 40 : index
    %c0_34 = arith.constant 0 : index
    %39 = vector.load %arg9[%c40_33, %c0_34] : memref<72x100xbf16, #tpu.memory_space<vmem>>, vector<8x100xbf16>
    tpu.vector_store %arg9[%c40_33, %c0_34], %38 {strides = array<i32>} : memref<72x100xbf16, #tpu.memory_space<vmem>>, vector<8x100xbf16>,
    %40 = vector.extract_strided_slice %27 {offsets = [0, 20], sizes = [8, 100], strides = [1, 1]} : vector<8x122xbf16> to vector<8x100xbf16>
    %c48_35 = arith.constant 48 : index
    %c0_36 = arith.constant 0 : index
    %41 = vector.load %arg9[%c48_35, %c0_36] : memref<72x100xbf16, #tpu.memory_space<vmem>>, vector<8x100xbf16>
    tpu.vector_store %arg9[%c48_35, %c0_36], %40 {strides = array<i32>} : memref<72x100xbf16, #tpu.memory_space<vmem>>, vector<8x100xbf16>,
    %42 = vector.extract_strided_slice %27 {offsets = [0, 21], sizes = [8, 100], strides = [1, 1]} : vector<8x122xbf16> to vector<8x100xbf16>
    %c56_37 = arith.constant 56 : index
    %c0_38 = arith.constant 0 : index
    %43 = vector.load %arg9[%c56_37, %c0_38] : memref<72x100xbf16, #tpu.memory_space<vmem>>, vector<8x100xbf16>
    tpu.vector_store %arg9[%c56_37, %c0_38], %42 {strides = array<i32>} : memref<72x100xbf16, #tpu.memory_space<vmem>>, vector<8x100xbf16>,
    %44 = vector.extract_strided_slice %27 {offsets = [0, 22], sizes = [8, 100], strides = [1, 1]} : vector<8x122xbf16> to vector<8x100xbf16>
    %c64_39 = arith.constant 64 : index
    %c0_40 = arith.constant 0 : index
    %45 = vector.load %arg9[%c64_39, %c0_40] : memref<72x100xbf16, #tpu.memory_space<vmem>>, vector<8x100xbf16>
    tpu.vector_store %arg9[%c64_39, %c0_40], %44 {strides = array<i32>} : memref<72x100xbf16, #tpu.memory_space<vmem>>, vector<8x100xbf16>,
    %c1 = arith.constant 1 : index
    %c0_41 = arith.constant 0 : index
    %c0_42 = arith.constant 0 : index
    %46 = vector.load %arg5[%c1, %c0_41, %c0_42] : memref<3x8x72xbf16, #tpu.memory_space<vmem>>, vector<1x8x72xbf16>
    %47 = vector.shape_cast %46 : vector<1x8x72xbf16> to vector<8x72xbf16>
    %c0_43 = arith.constant 0 : index
    %c0_44 = arith.constant 0 : index
    %48 = vector.load %arg9[%c0_43, %c0_44] : memref<72x100xbf16, #tpu.memory_space<vmem>>, vector<72x100xbf16>
    %cst_45 = arith.constant dense<0.000000e+00> : vector<8x100xf32>
    %49 = tpu.matmul %47, %48, %cst_45 {dimension_numbers = #tpu.dot_dimension_numbers<[1], [0], [0], [1], [0, 0, 1, 1], [], []>} : vector<8x72xbf16>, vector<72x100xbf16>, vector<8x100xf32> -> vector<8x100xf32>
    %50 = arith.addf %25, %49 : vector<8x100xf32>
    %c0_46 = arith.constant 0 : index
    %c0_47 = arith.constant 0 : index
    %c0_48 = arith.constant 0 : index
    %c0_49 = arith.constant 0 : index
    %51 = vector.load %arg4[%c0_46, %c0_47, %c0_48, %c0_49] : memref<1x1x8x122xbf16, #tpu.memory_space<vmem>>, vector<1x1x8x122xbf16>
    %52 = vector.shape_cast %51 : vector<1x1x8x122xbf16> to vector<8x122xbf16>
    %53 = vector.extract_strided_slice %52 {offsets = [0, 0], sizes = [8, 100], strides = [1, 1]} : vector<8x122xbf16> to vector<8x100xbf16>
    %c0_50 = arith.constant 0 : index
    %c0_51 = arith.constant 0 : index
    %54 = vector.load %arg9[%c0_50, %c0_51] : memref<72x100xbf16, #tpu.memory_space<vmem>>, vector<8x100xbf16>
    tpu.vector_store %arg9[%c0_50, %c0_51], %53 {strides = array<i32>} : memref<72x100xbf16, #tpu.memory_space<vmem>>, vector<8x100xbf16>,
    %55 = vector.extract_strided_slice %52 {offsets = [0, 1], sizes = [8, 100], strides = [1, 1]} : vector<8x122xbf16> to vector<8x100xbf16>
    %c8_52 = arith.constant 8 : index
    %c0_53 = arith.constant 0 : index
    %56 = vector.load %arg9[%c8_52, %c0_53] : memref<72x100xbf16, #tpu.memory_space<vmem>>, vector<8x100xbf16>
    tpu.vector_store %arg9[%c8_52, %c0_53], %55 {strides = array<i32>} : memref<72x100xbf16, #tpu.memory_space<vmem>>, vector<8x100xbf16>,
    %57 = vector.extract_strided_slice %52 {offsets = [0, 2], sizes = [8, 100], strides = [1, 1]} : vector<8x122xbf16> to vector<8x100xbf16>
    %c16_54 = arith.constant 16 : index
    %c0_55 = arith.constant 0 : index
    %58 = vector.load %arg9[%c16_54, %c0_55] : memref<72x100xbf16, #tpu.memory_space<vmem>>, vector<8x100xbf16>
    tpu.vector_store %arg9[%c16_54, %c0_55], %57 {strides = array<i32>} : memref<72x100xbf16, #tpu.memory_space<vmem>>, vector<8x100xbf16>,
    %59 = vector.extract_strided_slice %52 {offsets = [0, 10], sizes = [8, 100], strides = [1, 1]} : vector<8x122xbf16> to vector<8x100xbf16>
    %c24_56 = arith.constant 24 : index
    %c0_57 = arith.constant 0 : index
    %60 = vector.load %arg9[%c24_56, %c0_57] : memref<72x100xbf16, #tpu.memory_space<vmem>>, vector<8x100xbf16>
    tpu.vector_store %arg9[%c24_56, %c0_57], %59 {strides = array<i32>} : memref<72x100xbf16, #tpu.memory_space<vmem>>, vector<8x100xbf16>,
    %61 = vector.extract_strided_slice %52 {offsets = [0, 11], sizes = [8, 100], strides = [1, 1]} : vector<8x122xbf16> to vector<8x100xbf16>
    %c32_58 = arith.constant 32 : index
    %c0_59 = arith.constant 0 : index
    %62 = vector.load %arg9[%c32_58, %c0_59] : memref<72x100xbf16, #tpu.memory_space<vmem>>, vector<8x100xbf16>
    tpu.vector_store %arg9[%c32_58, %c0_59], %61 {strides = array<i32>} : memref<72x100xbf16, #tpu.memory_space<vmem>>, vector<8x100xbf16>,
    %63 = vector.extract_strided_slice %52 {offsets = [0, 12], sizes = [8, 100], strides = [1, 1]} : vector<8x122xbf16> to vector<8x100xbf16>
    %c40_60 = arith.constant 40 : index
    %c0_61 = arith.constant 0 : index
    %64 = vector.load %arg9[%c40_60, %c0_61] : memref<72x100xbf16, #tpu.memory_space<vmem>>, vector<8x100xbf16>
    tpu.vector_store %arg9[%c40_60, %c0_61], %63 {strides = array<i32>} : memref<72x100xbf16, #tpu.memory_space<vmem>>, vector<8x100xbf16>,
    %65 = vector.extract_strided_slice %52 {offsets = [0, 20], sizes = [8, 100], strides = [1, 1]} : vector<8x122xbf16> to vector<8x100xbf16>
    %c48_62 = arith.constant 48 : index
    %c0_63 = arith.constant 0 : index
    %66 = vector.load %arg9[%c48_62, %c0_63] : memref<72x100xbf16, #tpu.memory_space<vmem>>, vector<8x100xbf16>
    tpu.vector_store %arg9[%c48_62, %c0_63], %65 {strides = array<i32>} : memref<72x100xbf16, #tpu.memory_space<vmem>>, vector<8x100xbf16>,
    %67 = vector.extract_strided_slice %52 {offsets = [0, 21], sizes = [8, 100], strides = [1, 1]} : vector<8x122xbf16> to vector<8x100xbf16>
    %c56_64 = arith.constant 56 : index
    %c0_65 = arith.constant 0 : index
    %68 = vector.load %arg9[%c56_64, %c0_65] : memref<72x100xbf16, #tpu.memory_space<vmem>>, vector<8x100xbf16>
    tpu.vector_store %arg9[%c56_64, %c0_65], %67 {strides = array<i32>} : memref<72x100xbf16, #tpu.memory_space<vmem>>, vector<8x100xbf16>,
    %69 = vector.extract_strided_slice %52 {offsets = [0, 22], sizes = [8, 100], strides = [1, 1]} : vector<8x122xbf16> to vector<8x100xbf16>
    %c64_66 = arith.constant 64 : index
    %c0_67 = arith.constant 0 : index
    %70 = vector.load %arg9[%c64_66, %c0_67] : memref<72x100xbf16, #tpu.memory_space<vmem>>, vector<8x100xbf16>
    tpu.vector_store %arg9[%c64_66, %c0_67], %69 {strides = array<i32>} : memref<72x100xbf16, #tpu.memory_space<vmem>>, vector<8x100xbf16>,
    %c2 = arith.constant 2 : index
    %c0_68 = arith.constant 0 : index
    %c0_69 = arith.constant 0 : index
    %71 = vector.load %arg5[%c2, %c0_68, %c0_69] : memref<3x8x72xbf16, #tpu.memory_space<vmem>>, vector<1x8x72xbf16>
    %72 = vector.shape_cast %71 : vector<1x8x72xbf16> to vector<8x72xbf16>
    %c0_70 = arith.constant 0 : index
    %c0_71 = arith.constant 0 : index
    %73 = vector.load %arg9[%c0_70, %c0_71] : memref<72x100xbf16, #tpu.memory_space<vmem>>, vector<72x100xbf16>
    %cst_72 = arith.constant dense<0.000000e+00> : vector<8x100xf32>
    %74 = tpu.matmul %72, %73, %cst_72 {dimension_numbers = #tpu.dot_dimension_numbers<[1], [0], [0], [1], [0, 0, 1, 1], [], []>} : vector<8x72xbf16>, vector<72x100xbf16>, vector<8x100xf32> -> vector<8x100xf32>
    %75 = arith.addf %50, %74 : vector<8x100xf32>
    %c0_73 = arith.constant 0 : index
    %c0_74 = arith.constant 0 : index
    %76 = vector.load %arg6[%c0_73, %c0_74] : memref<8x1xf32, #tpu.memory_space<vmem>>, vector<8x1xf32>
    %77 = vector.broadcast %76 : vector<8x1xf32> to vector<8x100xf32>
    %78 = arith.mulf %75, %77 : vector<8x100xf32>
    %c0_75 = arith.constant 0 : index
    %c0_76 = arith.constant 0 : index
    %79 = vector.load %arg7[%c0_75, %c0_76] : memref<8x1xf32, #tpu.memory_space<vmem>>, vector<8x1xf32>
    %80 = vector.broadcast %79 : vector<8x1xf32> to vector<8x100xf32>
    %81 = arith.addf %78, %80 : vector<8x100xf32>
    %cst_77 = arith.constant 0.000000e+00 : f32
    %82 = vector.broadcast %cst_77 : f32 to vector<8x100xf32>
    %83 = arith.maximumf %81, %82 : vector<8x100xf32>
    %c0_78 = arith.constant 0 : index
    %c0_79 = arith.constant 0 : index
    %c0_80 = arith.constant 0 : index
    %c0_81 = arith.constant 0 : index
    %84 = vector.load %arg8[%c0_78, %c0_79, %c0_80, %c0_81] : memref<1x1x8x100xf32, #tpu.memory_space<vmem>>, vector<1x1x8x100xf32>
    %85 = vector.shape_cast %84 : vector<1x1x8x100xf32> to vector<8x100xf32>
    %86 = vector.shape_cast %83 : vector<8x100xf32> to vector<1x1x8x100xf32>
    tpu.vector_store %arg8[%c0_78, %c0_79, %c0_80, %c0_81], %86 {strides = array<i32>} : memref<1x1x8x100xf32, #tpu.memory_space<vmem>>, vector<1x1x8x100xf32>,
    return
  }
  func.func @transform_0(%arg0: i32, %arg1: i32) -> (i32, i32, i32, i32) {
    %c0_i32 = arith.constant 0 : i32
    %0 = arith.addi %arg1, %c0_i32 : i32
    %c0_i32_0 = arith.constant 0 : i32
    %c0_i32_1 = arith.constant 0 : i32
    %c0_i32_2 = arith.constant 0 : i32
    return %arg0, %0, %c0_i32_0, %c0_i32_1 : i32, i32, i32, i32
  }
  func.func @transform_1(%arg0: i32, %arg1: i32) -> (i32, i32, i32, i32) {
    %c1_i32 = arith.constant 1 : i32
    %0 = arith.addi %arg1, %c1_i32 : i32
    %c0_i32 = arith.constant 0 : i32
    %c0_i32_0 = arith.constant 0 : i32
    %c0_i32_1 = arith.constant 0 : i32
    return %arg0, %0, %c0_i32, %c0_i32_0 : i32, i32, i32, i32
  }
  func.func @transform_2(%arg0: i32, %arg1: i32) -> (i32, i32, i32, i32) {
    %c2_i32 = arith.constant 2 : i32
    %0 = arith.addi %arg1, %c2_i32 : i32
    %c0_i32 = arith.constant 0 : i32
    %c0_i32_0 = arith.constant 0 : i32
    %c0_i32_1 = arith.constant 0 : i32
    return %arg0, %0, %c0_i32, %c0_i32_0 : i32, i32, i32, i32
  }
  func.func @transform_3(%arg0: i32, %arg1: i32) -> (i32, i32, i32) {
    %c0_i32 = arith.constant 0 : i32
    %c0_i32_0 = arith.constant 0 : i32
    %c0_i32_1 = arith.constant 0 : i32
    %c0_i32_2 = arith.constant 0 : i32
    return %c0_i32, %c0_i32_0, %c0_i32_1 : i32, i32, i32
  }
  func.func @transform_4(%arg0: i32, %arg1: i32) -> (i32, i32) {
    %c0_i32 = arith.constant 0 : i32
    %c0_i32_0 = arith.constant 0 : i32
    %c0_i32_1 = arith.constant 0 : i32
    return %c0_i32, %c0_i32_0 : i32, i32
  }
  func.func @transform_5(%arg0: i32, %arg1: i32) -> (i32, i32) {
    %c0_i32 = arith.constant 0 : i32
    %c0_i32_0 = arith.constant 0 : i32
    %c0_i32_1 = arith.constant 0 : i32
    return %c0_i32, %c0_i32_0 : i32, i32
  }
  func.func @transform_6(%arg0: i32, %arg1: i32) -> (i32, i32, i32, i32) {
    %c0_i32 = arith.constant 0 : i32
    %c0_i32_0 = arith.constant 0 : i32
    %c0_i32_1 = arith.constant 0 : i32
    return %arg0, %arg1, %c0_i32, %c0_i32_0 : i32, i32, i32, i32
  }
}

module attributes {stable_mosaic.version = 11 : i64} {
  func.func @_conv3d_bn_act_kernel(%arg0: i32, %arg1: i32, %arg2: memref<1x1x8x122xbf16, #tpu.memory_space<vmem>>, %arg3: memref<1x1x8x122xbf16, #tpu.memory_space<vmem>>, %arg4: memref<1x1x8x122xbf16, #tpu.memory_space<vmem>>, %arg5: memref<1x1x8x122xbf16, #tpu.memory_space<vmem>>, %arg6: memref<3x8x72xbf16, #tpu.memory_space<vmem>>, %arg7: memref<8x1xf32, #tpu.memory_space<vmem>>, %arg8: memref<8x1xf32, #tpu.memory_space<vmem>>, %arg9: memref<1x1x8x100xf32, #tpu.memory_space<vmem>>, %arg10: memref<72x100xbf16, #tpu.memory_space<vmem>>) attributes {dimension_semantics = [#tpu.dimension_semantics<parallel>, #tpu.dimension_semantics<parallel>], iteration_bounds = array<i64: 2, 4>, scalar_prefetch = 0 : i64, scratch_operands = 1 : i64, tpu.core_type = #tpu.core_type<tc>, window_params = [{transform_indices = @transform_0, window_bounds = array<i64: 1, 1, 8, 122>}, {transform_indices = @transform_1, window_bounds = array<i64: 1, 1, 8, 122>}, {transform_indices = @transform_2, window_bounds = array<i64: 1, 1, 8, 122>}, {transform_indices = @transform_3, window_bounds = array<i64: 1, 1, 8, 122>}, {pipeline_mode = #tpu.pipeline_mode<synchronous>, transform_indices = @transform_4, window_bounds = array<i64: 3, 8, 72>}, {pipeline_mode = #tpu.pipeline_mode<synchronous>, transform_indices = @transform_5, window_bounds = array<i64: 8, 1>}, {pipeline_mode = #tpu.pipeline_mode<synchronous>, transform_indices = @transform_6, window_bounds = array<i64: 8, 1>}, {transform_indices = @transform_7, window_bounds = array<i64: 1, 1, 8, 100>}]} {
    %cst = arith.constant 0.000000e+00 : f32
    %0 = vector.broadcast %cst : f32 to vector<8x100xf32>
    %c0 = arith.constant 0 : index
    %c0_0 = arith.constant 0 : index
    %c0_1 = arith.constant 0 : index
    %c0_2 = arith.constant 0 : index
    %1 = vector.load %arg2[%c0, %c0_0, %c0_1, %c0_2] : memref<1x1x8x122xbf16, #tpu.memory_space<vmem>>, vector<1x1x8x122xbf16>
    %2 = vector.shape_cast %1 : vector<1x1x8x122xbf16> to vector<8x122xbf16>
    %3 = vector.extract_strided_slice %2 {offsets = [0, 0], sizes = [8, 100], strides = [1, 1]} : vector<8x122xbf16> to vector<8x100xbf16>
    %c0_3 = arith.constant 0 : index
    %c0_4 = arith.constant 0 : index
    %4 = vector.load %arg10[%c0_3, %c0_4] : memref<72x100xbf16, #tpu.memory_space<vmem>>, vector<8x100xbf16>
    tpu.vector_store %arg10[%c0_3, %c0_4], %3 {strides = array<i32>} : memref<72x100xbf16, #tpu.memory_space<vmem>>, vector<8x100xbf16>,
    %5 = vector.extract_strided_slice %2 {offsets = [0, 1], sizes = [8, 100], strides = [1, 1]} : vector<8x122xbf16> to vector<8x100xbf16>
    %c8 = arith.constant 8 : index
    %c0_5 = arith.constant 0 : index
    %6 = vector.load %arg10[%c8, %c0_5] : memref<72x100xbf16, #tpu.memory_space<vmem>>, vector<8x100xbf16>
    tpu.vector_store %arg10[%c8, %c0_5], %5 {strides = array<i32>} : memref<72x100xbf16, #tpu.memory_space<vmem>>, vector<8x100xbf16>,
    %7 = vector.extract_strided_slice %2 {offsets = [0, 2], sizes = [8, 100], strides = [1, 1]} : vector<8x122xbf16> to vector<8x100xbf16>
    %c16 = arith.constant 16 : index
    %c0_6 = arith.constant 0 : index
    %8 = vector.load %arg10[%c16, %c0_6] : memref<72x100xbf16, #tpu.memory_space<vmem>>, vector<8x100xbf16>
    tpu.vector_store %arg10[%c16, %c0_6], %7 {strides = array<i32>} : memref<72x100xbf16, #tpu.memory_space<vmem>>, vector<8x100xbf16>,
    %9 = vector.extract_strided_slice %2 {offsets = [0, 10], sizes = [8, 100], strides = [1, 1]} : vector<8x122xbf16> to vector<8x100xbf16>
    %c24 = arith.constant 24 : index
    %c0_7 = arith.constant 0 : index
    %10 = vector.load %arg10[%c24, %c0_7] : memref<72x100xbf16, #tpu.memory_space<vmem>>, vector<8x100xbf16>
    tpu.vector_store %arg10[%c24, %c0_7], %9 {strides = array<i32>} : memref<72x100xbf16, #tpu.memory_space<vmem>>, vector<8x100xbf16>,
    %11 = vector.extract_strided_slice %2 {offsets = [0, 11], sizes = [8, 100], strides = [1, 1]} : vector<8x122xbf16> to vector<8x100xbf16>
    %c32 = arith.constant 32 : index
    %c0_8 = arith.constant 0 : index
    %12 = vector.load %arg10[%c32, %c0_8] : memref<72x100xbf16, #tpu.memory_space<vmem>>, vector<8x100xbf16>
    tpu.vector_store %arg10[%c32, %c0_8], %11 {strides = array<i32>} : memref<72x100xbf16, #tpu.memory_space<vmem>>, vector<8x100xbf16>,
    %13 = vector.extract_strided_slice %2 {offsets = [0, 12], sizes = [8, 100], strides = [1, 1]} : vector<8x122xbf16> to vector<8x100xbf16>
    %c40 = arith.constant 40 : index
    %c0_9 = arith.constant 0 : index
    %14 = vector.load %arg10[%c40, %c0_9] : memref<72x100xbf16, #tpu.memory_space<vmem>>, vector<8x100xbf16>
    tpu.vector_store %arg10[%c40, %c0_9], %13 {strides = array<i32>} : memref<72x100xbf16, #tpu.memory_space<vmem>>, vector<8x100xbf16>,
    %15 = vector.extract_strided_slice %2 {offsets = [0, 20], sizes = [8, 100], strides = [1, 1]} : vector<8x122xbf16> to vector<8x100xbf16>
    %c48 = arith.constant 48 : index
    %c0_10 = arith.constant 0 : index
    %16 = vector.load %arg10[%c48, %c0_10] : memref<72x100xbf16, #tpu.memory_space<vmem>>, vector<8x100xbf16>
    tpu.vector_store %arg10[%c48, %c0_10], %15 {strides = array<i32>} : memref<72x100xbf16, #tpu.memory_space<vmem>>, vector<8x100xbf16>,
    %17 = vector.extract_strided_slice %2 {offsets = [0, 21], sizes = [8, 100], strides = [1, 1]} : vector<8x122xbf16> to vector<8x100xbf16>
    %c56 = arith.constant 56 : index
    %c0_11 = arith.constant 0 : index
    %18 = vector.load %arg10[%c56, %c0_11] : memref<72x100xbf16, #tpu.memory_space<vmem>>, vector<8x100xbf16>
    tpu.vector_store %arg10[%c56, %c0_11], %17 {strides = array<i32>} : memref<72x100xbf16, #tpu.memory_space<vmem>>, vector<8x100xbf16>,
    %19 = vector.extract_strided_slice %2 {offsets = [0, 22], sizes = [8, 100], strides = [1, 1]} : vector<8x122xbf16> to vector<8x100xbf16>
    %c64 = arith.constant 64 : index
    %c0_12 = arith.constant 0 : index
    %20 = vector.load %arg10[%c64, %c0_12] : memref<72x100xbf16, #tpu.memory_space<vmem>>, vector<8x100xbf16>
    tpu.vector_store %arg10[%c64, %c0_12], %19 {strides = array<i32>} : memref<72x100xbf16, #tpu.memory_space<vmem>>, vector<8x100xbf16>,
    %c0_13 = arith.constant 0 : index
    %c0_14 = arith.constant 0 : index
    %c0_15 = arith.constant 0 : index
    %21 = vector.load %arg6[%c0_13, %c0_14, %c0_15] : memref<3x8x72xbf16, #tpu.memory_space<vmem>>, vector<1x8x72xbf16>
    %22 = vector.shape_cast %21 : vector<1x8x72xbf16> to vector<8x72xbf16>
    %c0_16 = arith.constant 0 : index
    %c0_17 = arith.constant 0 : index
    %23 = vector.load %arg10[%c0_16, %c0_17] : memref<72x100xbf16, #tpu.memory_space<vmem>>, vector<72x100xbf16>
    %cst_18 = arith.constant dense<0.000000e+00> : vector<8x100xf32>
    %24 = tpu.matmul %22, %23, %cst_18 {dimension_numbers = #tpu.dot_dimension_numbers<[1], [0], [0], [1], [0, 0, 1, 1], [], []>} : vector<8x72xbf16>, vector<72x100xbf16>, vector<8x100xf32> -> vector<8x100xf32>
    %25 = arith.addf %0, %24 : vector<8x100xf32>
    %c0_19 = arith.constant 0 : index
    %c0_20 = arith.constant 0 : index
    %c0_21 = arith.constant 0 : index
    %c0_22 = arith.constant 0 : index
    %26 = vector.load %arg3[%c0_19, %c0_20, %c0_21, %c0_22] : memref<1x1x8x122xbf16, #tpu.memory_space<vmem>>, vector<1x1x8x122xbf16>
    %27 = vector.shape_cast %26 : vector<1x1x8x122xbf16> to vector<8x122xbf16>
    %28 = vector.extract_strided_slice %27 {offsets = [0, 0], sizes = [8, 100], strides = [1, 1]} : vector<8x122xbf16> to vector<8x100xbf16>
    %c0_23 = arith.constant 0 : index
    %c0_24 = arith.constant 0 : index
    %29 = vector.load %arg10[%c0_23, %c0_24] : memref<72x100xbf16, #tpu.memory_space<vmem>>, vector<8x100xbf16>
    tpu.vector_store %arg10[%c0_23, %c0_24], %28 {strides = array<i32>} : memref<72x100xbf16, #tpu.memory_space<vmem>>, vector<8x100xbf16>,
    %30 = vector.extract_strided_slice %27 {offsets = [0, 1], sizes = [8, 100], strides = [1, 1]} : vector<8x122xbf16> to vector<8x100xbf16>
    %c8_25 = arith.constant 8 : index
    %c0_26 = arith.constant 0 : index
    %31 = vector.load %arg10[%c8_25, %c0_26] : memref<72x100xbf16, #tpu.memory_space<vmem>>, vector<8x100xbf16>
    tpu.vector_store %arg10[%c8_25, %c0_26], %30 {strides = array<i32>} : memref<72x100xbf16, #tpu.memory_space<vmem>>, vector<8x100xbf16>,
    %32 = vector.extract_strided_slice %27 {offsets = [0, 2], sizes = [8, 100], strides = [1, 1]} : vector<8x122xbf16> to vector<8x100xbf16>
    %c16_27 = arith.constant 16 : index
    %c0_28 = arith.constant 0 : index
    %33 = vector.load %arg10[%c16_27, %c0_28] : memref<72x100xbf16, #tpu.memory_space<vmem>>, vector<8x100xbf16>
    tpu.vector_store %arg10[%c16_27, %c0_28], %32 {strides = array<i32>} : memref<72x100xbf16, #tpu.memory_space<vmem>>, vector<8x100xbf16>,
    %34 = vector.extract_strided_slice %27 {offsets = [0, 10], sizes = [8, 100], strides = [1, 1]} : vector<8x122xbf16> to vector<8x100xbf16>
    %c24_29 = arith.constant 24 : index
    %c0_30 = arith.constant 0 : index
    %35 = vector.load %arg10[%c24_29, %c0_30] : memref<72x100xbf16, #tpu.memory_space<vmem>>, vector<8x100xbf16>
    tpu.vector_store %arg10[%c24_29, %c0_30], %34 {strides = array<i32>} : memref<72x100xbf16, #tpu.memory_space<vmem>>, vector<8x100xbf16>,
    %36 = vector.extract_strided_slice %27 {offsets = [0, 11], sizes = [8, 100], strides = [1, 1]} : vector<8x122xbf16> to vector<8x100xbf16>
    %c32_31 = arith.constant 32 : index
    %c0_32 = arith.constant 0 : index
    %37 = vector.load %arg10[%c32_31, %c0_32] : memref<72x100xbf16, #tpu.memory_space<vmem>>, vector<8x100xbf16>
    tpu.vector_store %arg10[%c32_31, %c0_32], %36 {strides = array<i32>} : memref<72x100xbf16, #tpu.memory_space<vmem>>, vector<8x100xbf16>,
    %38 = vector.extract_strided_slice %27 {offsets = [0, 12], sizes = [8, 100], strides = [1, 1]} : vector<8x122xbf16> to vector<8x100xbf16>
    %c40_33 = arith.constant 40 : index
    %c0_34 = arith.constant 0 : index
    %39 = vector.load %arg10[%c40_33, %c0_34] : memref<72x100xbf16, #tpu.memory_space<vmem>>, vector<8x100xbf16>
    tpu.vector_store %arg10[%c40_33, %c0_34], %38 {strides = array<i32>} : memref<72x100xbf16, #tpu.memory_space<vmem>>, vector<8x100xbf16>,
    %40 = vector.extract_strided_slice %27 {offsets = [0, 20], sizes = [8, 100], strides = [1, 1]} : vector<8x122xbf16> to vector<8x100xbf16>
    %c48_35 = arith.constant 48 : index
    %c0_36 = arith.constant 0 : index
    %41 = vector.load %arg10[%c48_35, %c0_36] : memref<72x100xbf16, #tpu.memory_space<vmem>>, vector<8x100xbf16>
    tpu.vector_store %arg10[%c48_35, %c0_36], %40 {strides = array<i32>} : memref<72x100xbf16, #tpu.memory_space<vmem>>, vector<8x100xbf16>,
    %42 = vector.extract_strided_slice %27 {offsets = [0, 21], sizes = [8, 100], strides = [1, 1]} : vector<8x122xbf16> to vector<8x100xbf16>
    %c56_37 = arith.constant 56 : index
    %c0_38 = arith.constant 0 : index
    %43 = vector.load %arg10[%c56_37, %c0_38] : memref<72x100xbf16, #tpu.memory_space<vmem>>, vector<8x100xbf16>
    tpu.vector_store %arg10[%c56_37, %c0_38], %42 {strides = array<i32>} : memref<72x100xbf16, #tpu.memory_space<vmem>>, vector<8x100xbf16>,
    %44 = vector.extract_strided_slice %27 {offsets = [0, 22], sizes = [8, 100], strides = [1, 1]} : vector<8x122xbf16> to vector<8x100xbf16>
    %c64_39 = arith.constant 64 : index
    %c0_40 = arith.constant 0 : index
    %45 = vector.load %arg10[%c64_39, %c0_40] : memref<72x100xbf16, #tpu.memory_space<vmem>>, vector<8x100xbf16>
    tpu.vector_store %arg10[%c64_39, %c0_40], %44 {strides = array<i32>} : memref<72x100xbf16, #tpu.memory_space<vmem>>, vector<8x100xbf16>,
    %c1 = arith.constant 1 : index
    %c0_41 = arith.constant 0 : index
    %c0_42 = arith.constant 0 : index
    %46 = vector.load %arg6[%c1, %c0_41, %c0_42] : memref<3x8x72xbf16, #tpu.memory_space<vmem>>, vector<1x8x72xbf16>
    %47 = vector.shape_cast %46 : vector<1x8x72xbf16> to vector<8x72xbf16>
    %c0_43 = arith.constant 0 : index
    %c0_44 = arith.constant 0 : index
    %48 = vector.load %arg10[%c0_43, %c0_44] : memref<72x100xbf16, #tpu.memory_space<vmem>>, vector<72x100xbf16>
    %cst_45 = arith.constant dense<0.000000e+00> : vector<8x100xf32>
    %49 = tpu.matmul %47, %48, %cst_45 {dimension_numbers = #tpu.dot_dimension_numbers<[1], [0], [0], [1], [0, 0, 1, 1], [], []>} : vector<8x72xbf16>, vector<72x100xbf16>, vector<8x100xf32> -> vector<8x100xf32>
    %50 = arith.addf %25, %49 : vector<8x100xf32>
    %c0_46 = arith.constant 0 : index
    %c0_47 = arith.constant 0 : index
    %c0_48 = arith.constant 0 : index
    %c0_49 = arith.constant 0 : index
    %51 = vector.load %arg4[%c0_46, %c0_47, %c0_48, %c0_49] : memref<1x1x8x122xbf16, #tpu.memory_space<vmem>>, vector<1x1x8x122xbf16>
    %52 = vector.shape_cast %51 : vector<1x1x8x122xbf16> to vector<8x122xbf16>
    %53 = vector.extract_strided_slice %52 {offsets = [0, 0], sizes = [8, 100], strides = [1, 1]} : vector<8x122xbf16> to vector<8x100xbf16>
    %c0_50 = arith.constant 0 : index
    %c0_51 = arith.constant 0 : index
    %54 = vector.load %arg10[%c0_50, %c0_51] : memref<72x100xbf16, #tpu.memory_space<vmem>>, vector<8x100xbf16>
    tpu.vector_store %arg10[%c0_50, %c0_51], %53 {strides = array<i32>} : memref<72x100xbf16, #tpu.memory_space<vmem>>, vector<8x100xbf16>,
    %55 = vector.extract_strided_slice %52 {offsets = [0, 1], sizes = [8, 100], strides = [1, 1]} : vector<8x122xbf16> to vector<8x100xbf16>
    %c8_52 = arith.constant 8 : index
    %c0_53 = arith.constant 0 : index
    %56 = vector.load %arg10[%c8_52, %c0_53] : memref<72x100xbf16, #tpu.memory_space<vmem>>, vector<8x100xbf16>
    tpu.vector_store %arg10[%c8_52, %c0_53], %55 {strides = array<i32>} : memref<72x100xbf16, #tpu.memory_space<vmem>>, vector<8x100xbf16>,
    %57 = vector.extract_strided_slice %52 {offsets = [0, 2], sizes = [8, 100], strides = [1, 1]} : vector<8x122xbf16> to vector<8x100xbf16>
    %c16_54 = arith.constant 16 : index
    %c0_55 = arith.constant 0 : index
    %58 = vector.load %arg10[%c16_54, %c0_55] : memref<72x100xbf16, #tpu.memory_space<vmem>>, vector<8x100xbf16>
    tpu.vector_store %arg10[%c16_54, %c0_55], %57 {strides = array<i32>} : memref<72x100xbf16, #tpu.memory_space<vmem>>, vector<8x100xbf16>,
    %59 = vector.extract_strided_slice %52 {offsets = [0, 10], sizes = [8, 100], strides = [1, 1]} : vector<8x122xbf16> to vector<8x100xbf16>
    %c24_56 = arith.constant 24 : index
    %c0_57 = arith.constant 0 : index
    %60 = vector.load %arg10[%c24_56, %c0_57] : memref<72x100xbf16, #tpu.memory_space<vmem>>, vector<8x100xbf16>
    tpu.vector_store %arg10[%c24_56, %c0_57], %59 {strides = array<i32>} : memref<72x100xbf16, #tpu.memory_space<vmem>>, vector<8x100xbf16>,
    %61 = vector.extract_strided_slice %52 {offsets = [0, 11], sizes = [8, 100], strides = [1, 1]} : vector<8x122xbf16> to vector<8x100xbf16>
    %c32_58 = arith.constant 32 : index
    %c0_59 = arith.constant 0 : index
    %62 = vector.load %arg10[%c32_58, %c0_59] : memref<72x100xbf16, #tpu.memory_space<vmem>>, vector<8x100xbf16>
    tpu.vector_store %arg10[%c32_58, %c0_59], %61 {strides = array<i32>} : memref<72x100xbf16, #tpu.memory_space<vmem>>, vector<8x100xbf16>,
    %63 = vector.extract_strided_slice %52 {offsets = [0, 12], sizes = [8, 100], strides = [1, 1]} : vector<8x122xbf16> to vector<8x100xbf16>
    %c40_60 = arith.constant 40 : index
    %c0_61 = arith.constant 0 : index
    %64 = vector.load %arg10[%c40_60, %c0_61] : memref<72x100xbf16, #tpu.memory_space<vmem>>, vector<8x100xbf16>
    tpu.vector_store %arg10[%c40_60, %c0_61], %63 {strides = array<i32>} : memref<72x100xbf16, #tpu.memory_space<vmem>>, vector<8x100xbf16>,
    %65 = vector.extract_strided_slice %52 {offsets = [0, 20], sizes = [8, 100], strides = [1, 1]} : vector<8x122xbf16> to vector<8x100xbf16>
    %c48_62 = arith.constant 48 : index
    %c0_63 = arith.constant 0 : index
    %66 = vector.load %arg10[%c48_62, %c0_63] : memref<72x100xbf16, #tpu.memory_space<vmem>>, vector<8x100xbf16>
    tpu.vector_store %arg10[%c48_62, %c0_63], %65 {strides = array<i32>} : memref<72x100xbf16, #tpu.memory_space<vmem>>, vector<8x100xbf16>,
    %67 = vector.extract_strided_slice %52 {offsets = [0, 21], sizes = [8, 100], strides = [1, 1]} : vector<8x122xbf16> to vector<8x100xbf16>
    %c56_64 = arith.constant 56 : index
    %c0_65 = arith.constant 0 : index
    %68 = vector.load %arg10[%c56_64, %c0_65] : memref<72x100xbf16, #tpu.memory_space<vmem>>, vector<8x100xbf16>
    tpu.vector_store %arg10[%c56_64, %c0_65], %67 {strides = array<i32>} : memref<72x100xbf16, #tpu.memory_space<vmem>>, vector<8x100xbf16>,
    %69 = vector.extract_strided_slice %52 {offsets = [0, 22], sizes = [8, 100], strides = [1, 1]} : vector<8x122xbf16> to vector<8x100xbf16>
    %c64_66 = arith.constant 64 : index
    %c0_67 = arith.constant 0 : index
    %70 = vector.load %arg10[%c64_66, %c0_67] : memref<72x100xbf16, #tpu.memory_space<vmem>>, vector<8x100xbf16>
    tpu.vector_store %arg10[%c64_66, %c0_67], %69 {strides = array<i32>} : memref<72x100xbf16, #tpu.memory_space<vmem>>, vector<8x100xbf16>,
    %c2 = arith.constant 2 : index
    %c0_68 = arith.constant 0 : index
    %c0_69 = arith.constant 0 : index
    %71 = vector.load %arg6[%c2, %c0_68, %c0_69] : memref<3x8x72xbf16, #tpu.memory_space<vmem>>, vector<1x8x72xbf16>
    %72 = vector.shape_cast %71 : vector<1x8x72xbf16> to vector<8x72xbf16>
    %c0_70 = arith.constant 0 : index
    %c0_71 = arith.constant 0 : index
    %73 = vector.load %arg10[%c0_70, %c0_71] : memref<72x100xbf16, #tpu.memory_space<vmem>>, vector<72x100xbf16>
    %cst_72 = arith.constant dense<0.000000e+00> : vector<8x100xf32>
    %74 = tpu.matmul %72, %73, %cst_72 {dimension_numbers = #tpu.dot_dimension_numbers<[1], [0], [0], [1], [0, 0, 1, 1], [], []>} : vector<8x72xbf16>, vector<72x100xbf16>, vector<8x100xf32> -> vector<8x100xf32>
    %75 = arith.addf %50, %74 : vector<8x100xf32>
    %c0_73 = arith.constant 0 : index
    %c0_74 = arith.constant 0 : index
    %76 = vector.load %arg7[%c0_73, %c0_74] : memref<8x1xf32, #tpu.memory_space<vmem>>, vector<8x1xf32>
    %77 = vector.broadcast %76 : vector<8x1xf32> to vector<8x100xf32>
    %78 = arith.mulf %75, %77 : vector<8x100xf32>
    %c0_75 = arith.constant 0 : index
    %c0_76 = arith.constant 0 : index
    %79 = vector.load %arg8[%c0_75, %c0_76] : memref<8x1xf32, #tpu.memory_space<vmem>>, vector<8x1xf32>
    %80 = vector.broadcast %79 : vector<8x1xf32> to vector<8x100xf32>
    %81 = arith.addf %78, %80 : vector<8x100xf32>
    %c0_77 = arith.constant 0 : index
    %c0_78 = arith.constant 0 : index
    %c0_79 = arith.constant 0 : index
    %c11 = arith.constant 11 : index
    %82 = vector.load %arg5[%c0_77, %c0_78, %c0_79, %c11] : memref<1x1x8x122xbf16, #tpu.memory_space<vmem>>, vector<1x1x8x100xbf16>
    %83 = vector.shape_cast %82 : vector<1x1x8x100xbf16> to vector<8x100xbf16>
    %84 = arith.extf %83 : vector<8x100xbf16> to vector<8x100xf32>
    %85 = arith.addf %81, %84 : vector<8x100xf32>
    %cst_80 = arith.constant 0.000000e+00 : f32
    %86 = vector.broadcast %cst_80 : f32 to vector<8x100xf32>
    %87 = arith.maximumf %85, %86 : vector<8x100xf32>
    %c0_81 = arith.constant 0 : index
    %c0_82 = arith.constant 0 : index
    %c0_83 = arith.constant 0 : index
    %c0_84 = arith.constant 0 : index
    %88 = vector.load %arg9[%c0_81, %c0_82, %c0_83, %c0_84] : memref<1x1x8x100xf32, #tpu.memory_space<vmem>>, vector<1x1x8x100xf32>
    %89 = vector.shape_cast %88 : vector<1x1x8x100xf32> to vector<8x100xf32>
    %90 = vector.shape_cast %87 : vector<8x100xf32> to vector<1x1x8x100xf32>
    tpu.vector_store %arg9[%c0_81, %c0_82, %c0_83, %c0_84], %90 {strides = array<i32>} : memref<1x1x8x100xf32, #tpu.memory_space<vmem>>, vector<1x1x8x100xf32>,
    return
  }
  func.func @transform_0(%arg0: i32, %arg1: i32) -> (i32, i32, i32, i32) {
    %c0_i32 = arith.constant 0 : i32
    %0 = arith.addi %arg1, %c0_i32 : i32
    %c0_i32_0 = arith.constant 0 : i32
    %c0_i32_1 = arith.constant 0 : i32
    %c0_i32_2 = arith.constant 0 : i32
    return %arg0, %0, %c0_i32_0, %c0_i32_1 : i32, i32, i32, i32
  }
  func.func @transform_1(%arg0: i32, %arg1: i32) -> (i32, i32, i32, i32) {
    %c1_i32 = arith.constant 1 : i32
    %0 = arith.addi %arg1, %c1_i32 : i32
    %c0_i32 = arith.constant 0 : i32
    %c0_i32_0 = arith.constant 0 : i32
    %c0_i32_1 = arith.constant 0 : i32
    return %arg0, %0, %c0_i32, %c0_i32_0 : i32, i32, i32, i32
  }
  func.func @transform_2(%arg0: i32, %arg1: i32) -> (i32, i32, i32, i32) {
    %c2_i32 = arith.constant 2 : i32
    %0 = arith.addi %arg1, %c2_i32 : i32
    %c0_i32 = arith.constant 0 : i32
    %c0_i32_0 = arith.constant 0 : i32
    %c0_i32_1 = arith.constant 0 : i32
    return %arg0, %0, %c0_i32, %c0_i32_0 : i32, i32, i32, i32
  }
  func.func @transform_3(%arg0: i32, %arg1: i32) -> (i32, i32, i32, i32) {
    %c1_i32 = arith.constant 1 : i32
    %0 = arith.addi %arg1, %c1_i32 : i32
    %c0_i32 = arith.constant 0 : i32
    %c0_i32_0 = arith.constant 0 : i32
    %c0_i32_1 = arith.constant 0 : i32
    return %arg0, %0, %c0_i32, %c0_i32_0 : i32, i32, i32, i32
  }
  func.func @transform_4(%arg0: i32, %arg1: i32) -> (i32, i32, i32) {
    %c0_i32 = arith.constant 0 : i32
    %c0_i32_0 = arith.constant 0 : i32
    %c0_i32_1 = arith.constant 0 : i32
    %c0_i32_2 = arith.constant 0 : i32
    return %c0_i32, %c0_i32_0, %c0_i32_1 : i32, i32, i32
  }
  func.func @transform_5(%arg0: i32, %arg1: i32) -> (i32, i32) {
    %c0_i32 = arith.constant 0 : i32
    %c0_i32_0 = arith.constant 0 : i32
    %c0_i32_1 = arith.constant 0 : i32
    return %c0_i32, %c0_i32_0 : i32, i32
  }
  func.func @transform_6(%arg0: i32, %arg1: i32) -> (i32, i32) {
    %c0_i32 = arith.constant 0 : i32
    %c0_i32_0 = arith.constant 0 : i32
    %c0_i32_1 = arith.constant 0 : i32
    return %c0_i32, %c0_i32_0 : i32, i32
  }
  func.func @transform_7(%arg0: i32, %arg1: i32) -> (i32, i32, i32, i32) {
    %c0_i32 = arith.constant 0 : i32
    %c0_i32_0 = arith.constant 0 : i32
    %c0_i32_1 = arith.constant 0 : i32
    return %arg0, %arg1, %c0_i32, %c0_i32_0 : i32, i32, i32, i32
  }
}

module attributes {stable_mosaic.version = 11 : i64} {
  func.func @_conv3d_bn_act_kernel(%arg0: i32, %arg1: i32, %arg2: memref<1x1x8x196xbf16, #tpu.memory_space<vmem>>, %arg3: memref<1x1x8x196xbf16, #tpu.memory_space<vmem>>, %arg4: memref<1x1x8x196xbf16, #tpu.memory_space<vmem>>, %arg5: memref<1x1x8x196xbf16, #tpu.memory_space<vmem>>, %arg6: memref<1x1x8x196xbf16, #tpu.memory_space<vmem>>, %arg7: memref<5x3x200xbf16, #tpu.memory_space<vmem>>, %arg8: memref<3x1xf32, #tpu.memory_space<vmem>>, %arg9: memref<3x1xf32, #tpu.memory_space<vmem>>, %arg10: memref<1x1x3x144xf32, #tpu.memory_space<vmem>>, %arg11: memref<200x144xbf16, #tpu.memory_space<vmem>>) attributes {dimension_semantics = [#tpu.dimension_semantics<parallel>, #tpu.dimension_semantics<parallel>], iteration_bounds = array<i64: 2, 4>, scalar_prefetch = 0 : i64, scratch_operands = 1 : i64, tpu.core_type = #tpu.core_type<tc>, window_params = [{transform_indices = @transform_0, window_bounds = array<i64: 1, 1, 8, 196>}, {transform_indices = @transform_1, window_bounds = array<i64: 1, 1, 8, 196>}, {transform_indices = @transform_2, window_bounds = array<i64: 1, 1, 8, 196>}, {transform_indices = @transform_3, window_bounds = array<i64: 1, 1, 8, 196>}, {transform_indices = @transform_4, window_bounds = array<i64: 1, 1, 8, 196>}, {pipeline_mode = #tpu.pipeline_mode<synchronous>, transform_indices = @transform_5, window_bounds = array<i64: 5, 3, 200>}, {pipeline_mode = #tpu.pipeline_mode<synchronous>, transform_indices = @transform_6, window_bounds = array<i64: 3, 1>}, {pipeline_mode = #tpu.pipeline_mode<synchronous>, transform_indices = @transform_7, window_bounds = array<i64: 3, 1>}, {transform_indices = @transform_8, window_bounds = array<i64: 1, 1, 3, 144>}]} {
    %cst = arith.constant 0.000000e+00 : f32
    %0 = vector.broadcast %cst : f32 to vector<3x144xf32>
    %c0 = arith.constant 0 : index
    %c0_0 = arith.constant 0 : index
    %c0_1 = arith.constant 0 : index
    %c0_2 = arith.constant 0 : index
    %1 = vector.load %arg2[%c0, %c0_0, %c0_1, %c0_2] : memref<1x1x8x196xbf16, #tpu.memory_space<vmem>>, vector<1x1x8x196xbf16>
    %2 = vector.shape_cast %1 : vector<1x1x8x196xbf16> to vector<8x196xbf16>
    %3 = vector.extract_strided_slice %2 {offsets = [0, 0], sizes = [8, 144], strides = [1, 1]} : vector<8x196xbf16> to vector<8x144xbf16>
    %c0_3 = arith.constant 0 : index
    %c0_4 = arith.constant 0 : index
    %4 = vector.load %arg11[%c0_3, %c0_4] : memref<200x144xbf16, #tpu.memory_space<vmem>>, vector<8x144xbf16>
    tpu.vector_store %arg11[%c0_3, %c0_4], %3 {strides = array<i32>} : memref<200x144xbf16, #tpu.memory_space<vmem>>, vector<8x144xbf16>,
    %5 = vector.extract_strided_slice %2 {offsets = [0, 1], sizes = [8, 144], strides = [1, 1]} : vector<8x196xbf16> to vector<8x144xbf16>
    %c8 = arith.constant 8 : index
    %c0_5 = arith.constant 0 : index
    %6 = vector.load %arg11[%c8, %c0_5] : memref<200x144xbf16, #tpu.memory_space<vmem>>, vector<8x144xbf16>
    tpu.vector_store %arg11[%c8, %c0_5], %5 {strides = array<i32>} : memref<200x144xbf16, #tpu.memory_space<vmem>>, vector<8x144xbf16>,
    %7 = vector.extract_strided_slice %2 {offsets = [0, 2], sizes = [8, 144], strides = [1, 1]} : vector<8x196xbf16> to vector<8x144xbf16>
    %c16 = arith.constant 16 : index
    %c0_6 = arith.constant 0 : index
    %8 = vector.load %arg11[%c16, %c0_6] : memref<200x144xbf16, #tpu.memory_space<vmem>>, vector<8x144xbf16>
    tpu.vector_store %arg11[%c16, %c0_6], %7 {strides = array<i32>} : memref<200x144xbf16, #tpu.memory_space<vmem>>, vector<8x144xbf16>,
    %9 = vector.extract_strided_slice %2 {offsets = [0, 3], sizes = [8, 144], strides = [1, 1]} : vector<8x196xbf16> to vector<8x144xbf16>
    %c24 = arith.constant 24 : index
    %c0_7 = arith.constant 0 : index
    %10 = vector.load %arg11[%c24, %c0_7] : memref<200x144xbf16, #tpu.memory_space<vmem>>, vector<8x144xbf16>
    tpu.vector_store %arg11[%c24, %c0_7], %9 {strides = array<i32>} : memref<200x144xbf16, #tpu.memory_space<vmem>>, vector<8x144xbf16>,
    %11 = vector.extract_strided_slice %2 {offsets = [0, 4], sizes = [8, 144], strides = [1, 1]} : vector<8x196xbf16> to vector<8x144xbf16>
    %c32 = arith.constant 32 : index
    %c0_8 = arith.constant 0 : index
    %12 = vector.load %arg11[%c32, %c0_8] : memref<200x144xbf16, #tpu.memory_space<vmem>>, vector<8x144xbf16>
    tpu.vector_store %arg11[%c32, %c0_8], %11 {strides = array<i32>} : memref<200x144xbf16, #tpu.memory_space<vmem>>, vector<8x144xbf16>,
    %13 = vector.extract_strided_slice %2 {offsets = [0, 12], sizes = [8, 144], strides = [1, 1]} : vector<8x196xbf16> to vector<8x144xbf16>
    %c40 = arith.constant 40 : index
    %c0_9 = arith.constant 0 : index
    %14 = vector.load %arg11[%c40, %c0_9] : memref<200x144xbf16, #tpu.memory_space<vmem>>, vector<8x144xbf16>
    tpu.vector_store %arg11[%c40, %c0_9], %13 {strides = array<i32>} : memref<200x144xbf16, #tpu.memory_space<vmem>>, vector<8x144xbf16>,
    %15 = vector.extract_strided_slice %2 {offsets = [0, 13], sizes = [8, 144], strides = [1, 1]} : vector<8x196xbf16> to vector<8x144xbf16>
    %c48 = arith.constant 48 : index
    %c0_10 = arith.constant 0 : index
    %16 = vector.load %arg11[%c48, %c0_10] : memref<200x144xbf16, #tpu.memory_space<vmem>>, vector<8x144xbf16>
    tpu.vector_store %arg11[%c48, %c0_10], %15 {strides = array<i32>} : memref<200x144xbf16, #tpu.memory_space<vmem>>, vector<8x144xbf16>,
    %17 = vector.extract_strided_slice %2 {offsets = [0, 14], sizes = [8, 144], strides = [1, 1]} : vector<8x196xbf16> to vector<8x144xbf16>
    %c56 = arith.constant 56 : index
    %c0_11 = arith.constant 0 : index
    %18 = vector.load %arg11[%c56, %c0_11] : memref<200x144xbf16, #tpu.memory_space<vmem>>, vector<8x144xbf16>
    tpu.vector_store %arg11[%c56, %c0_11], %17 {strides = array<i32>} : memref<200x144xbf16, #tpu.memory_space<vmem>>, vector<8x144xbf16>,
    %19 = vector.extract_strided_slice %2 {offsets = [0, 15], sizes = [8, 144], strides = [1, 1]} : vector<8x196xbf16> to vector<8x144xbf16>
    %c64 = arith.constant 64 : index
    %c0_12 = arith.constant 0 : index
    %20 = vector.load %arg11[%c64, %c0_12] : memref<200x144xbf16, #tpu.memory_space<vmem>>, vector<8x144xbf16>
    tpu.vector_store %arg11[%c64, %c0_12], %19 {strides = array<i32>} : memref<200x144xbf16, #tpu.memory_space<vmem>>, vector<8x144xbf16>,
    %21 = vector.extract_strided_slice %2 {offsets = [0, 16], sizes = [8, 144], strides = [1, 1]} : vector<8x196xbf16> to vector<8x144xbf16>
    %c72 = arith.constant 72 : index
    %c0_13 = arith.constant 0 : index
    %22 = vector.load %arg11[%c72, %c0_13] : memref<200x144xbf16, #tpu.memory_space<vmem>>, vector<8x144xbf16>
    tpu.vector_store %arg11[%c72, %c0_13], %21 {strides = array<i32>} : memref<200x144xbf16, #tpu.memory_space<vmem>>, vector<8x144xbf16>,
    %23 = vector.extract_strided_slice %2 {offsets = [0, 24], sizes = [8, 144], strides = [1, 1]} : vector<8x196xbf16> to vector<8x144xbf16>
    %c80 = arith.constant 80 : index
    %c0_14 = arith.constant 0 : index
    %24 = vector.load %arg11[%c80, %c0_14] : memref<200x144xbf16, #tpu.memory_space<vmem>>, vector<8x144xbf16>
    tpu.vector_store %arg11[%c80, %c0_14], %23 {strides = array<i32>} : memref<200x144xbf16, #tpu.memory_space<vmem>>, vector<8x144xbf16>,
    %25 = vector.extract_strided_slice %2 {offsets = [0, 25], sizes = [8, 144], strides = [1, 1]} : vector<8x196xbf16> to vector<8x144xbf16>
    %c88 = arith.constant 88 : index
    %c0_15 = arith.constant 0 : index
    %26 = vector.load %arg11[%c88, %c0_15] : memref<200x144xbf16, #tpu.memory_space<vmem>>, vector<8x144xbf16>
    tpu.vector_store %arg11[%c88, %c0_15], %25 {strides = array<i32>} : memref<200x144xbf16, #tpu.memory_space<vmem>>, vector<8x144xbf16>,
    %27 = vector.extract_strided_slice %2 {offsets = [0, 26], sizes = [8, 144], strides = [1, 1]} : vector<8x196xbf16> to vector<8x144xbf16>
    %c96 = arith.constant 96 : index
    %c0_16 = arith.constant 0 : index
    %28 = vector.load %arg11[%c96, %c0_16] : memref<200x144xbf16, #tpu.memory_space<vmem>>, vector<8x144xbf16>
    tpu.vector_store %arg11[%c96, %c0_16], %27 {strides = array<i32>} : memref<200x144xbf16, #tpu.memory_space<vmem>>, vector<8x144xbf16>,
    %29 = vector.extract_strided_slice %2 {offsets = [0, 27], sizes = [8, 144], strides = [1, 1]} : vector<8x196xbf16> to vector<8x144xbf16>
    %c104 = arith.constant 104 : index
    %c0_17 = arith.constant 0 : index
    %30 = vector.load %arg11[%c104, %c0_17] : memref<200x144xbf16, #tpu.memory_space<vmem>>, vector<8x144xbf16>
    tpu.vector_store %arg11[%c104, %c0_17], %29 {strides = array<i32>} : memref<200x144xbf16, #tpu.memory_space<vmem>>, vector<8x144xbf16>,
    %31 = vector.extract_strided_slice %2 {offsets = [0, 28], sizes = [8, 144], strides = [1, 1]} : vector<8x196xbf16> to vector<8x144xbf16>
    %c112 = arith.constant 112 : index
    %c0_18 = arith.constant 0 : index
    %32 = vector.load %arg11[%c112, %c0_18] : memref<200x144xbf16, #tpu.memory_space<vmem>>, vector<8x144xbf16>
    tpu.vector_store %arg11[%c112, %c0_18], %31 {strides = array<i32>} : memref<200x144xbf16, #tpu.memory_space<vmem>>, vector<8x144xbf16>,
    %33 = vector.extract_strided_slice %2 {offsets = [0, 36], sizes = [8, 144], strides = [1, 1]} : vector<8x196xbf16> to vector<8x144xbf16>
    %c120 = arith.constant 120 : index
    %c0_19 = arith.constant 0 : index
    %34 = vector.load %arg11[%c120, %c0_19] : memref<200x144xbf16, #tpu.memory_space<vmem>>, vector<8x144xbf16>
    tpu.vector_store %arg11[%c120, %c0_19], %33 {strides = array<i32>} : memref<200x144xbf16, #tpu.memory_space<vmem>>, vector<8x144xbf16>,
    %35 = vector.extract_strided_slice %2 {offsets = [0, 37], sizes = [8, 144], strides = [1, 1]} : vector<8x196xbf16> to vector<8x144xbf16>
    %c128 = arith.constant 128 : index
    %c0_20 = arith.constant 0 : index
    %36 = vector.load %arg11[%c128, %c0_20] : memref<200x144xbf16, #tpu.memory_space<vmem>>, vector<8x144xbf16>
    tpu.vector_store %arg11[%c128, %c0_20], %35 {strides = array<i32>} : memref<200x144xbf16, #tpu.memory_space<vmem>>, vector<8x144xbf16>,
    %37 = vector.extract_strided_slice %2 {offsets = [0, 38], sizes = [8, 144], strides = [1, 1]} : vector<8x196xbf16> to vector<8x144xbf16>
    %c136 = arith.constant 136 : index
    %c0_21 = arith.constant 0 : index
    %38 = vector.load %arg11[%c136, %c0_21] : memref<200x144xbf16, #tpu.memory_space<vmem>>, vector<8x144xbf16>
    tpu.vector_store %arg11[%c136, %c0_21], %37 {strides = array<i32>} : memref<200x144xbf16, #tpu.memory_space<vmem>>, vector<8x144xbf16>,
    %39 = vector.extract_strided_slice %2 {offsets = [0, 39], sizes = [8, 144], strides = [1, 1]} : vector<8x196xbf16> to vector<8x144xbf16>
    %c144 = arith.constant 144 : index
    %c0_22 = arith.constant 0 : index
    %40 = vector.load %arg11[%c144, %c0_22] : memref<200x144xbf16, #tpu.memory_space<vmem>>, vector<8x144xbf16>
    tpu.vector_store %arg11[%c144, %c0_22], %39 {strides = array<i32>} : memref<200x144xbf16, #tpu.memory_space<vmem>>, vector<8x144xbf16>,
    %41 = vector.extract_strided_slice %2 {offsets = [0, 40], sizes = [8, 144], strides = [1, 1]} : vector<8x196xbf16> to vector<8x144xbf16>
    %c152 = arith.constant 152 : index
    %c0_23 = arith.constant 0 : index
    %42 = vector.load %arg11[%c152, %c0_23] : memref<200x144xbf16, #tpu.memory_space<vmem>>, vector<8x144xbf16>
    tpu.vector_store %arg11[%c152, %c0_23], %41 {strides = array<i32>} : memref<200x144xbf16, #tpu.memory_space<vmem>>, vector<8x144xbf16>,
    %43 = vector.extract_strided_slice %2 {offsets = [0, 48], sizes = [8, 144], strides = [1, 1]} : vector<8x196xbf16> to vector<8x144xbf16>
    %c160 = arith.constant 160 : index
    %c0_24 = arith.constant 0 : index
    %44 = vector.load %arg11[%c160, %c0_24] : memref<200x144xbf16, #tpu.memory_space<vmem>>, vector<8x144xbf16>
    tpu.vector_store %arg11[%c160, %c0_24], %43 {strides = array<i32>} : memref<200x144xbf16, #tpu.memory_space<vmem>>, vector<8x144xbf16>,
    %45 = vector.extract_strided_slice %2 {offsets = [0, 49], sizes = [8, 144], strides = [1, 1]} : vector<8x196xbf16> to vector<8x144xbf16>
    %c168 = arith.constant 168 : index
    %c0_25 = arith.constant 0 : index
    %46 = vector.load %arg11[%c168, %c0_25] : memref<200x144xbf16, #tpu.memory_space<vmem>>, vector<8x144xbf16>
    tpu.vector_store %arg11[%c168, %c0_25], %45 {strides = array<i32>} : memref<200x144xbf16, #tpu.memory_space<vmem>>, vector<8x144xbf16>,
    %47 = vector.extract_strided_slice %2 {offsets = [0, 50], sizes = [8, 144], strides = [1, 1]} : vector<8x196xbf16> to vector<8x144xbf16>
    %c176 = arith.constant 176 : index
    %c0_26 = arith.constant 0 : index
    %48 = vector.load %arg11[%c176, %c0_26] : memref<200x144xbf16, #tpu.memory_space<vmem>>, vector<8x144xbf16>
    tpu.vector_store %arg11[%c176, %c0_26], %47 {strides = array<i32>} : memref<200x144xbf16, #tpu.memory_space<vmem>>, vector<8x144xbf16>,
    %49 = vector.extract_strided_slice %2 {offsets = [0, 51], sizes = [8, 144], strides = [1, 1]} : vector<8x196xbf16> to vector<8x144xbf16>
    %c184 = arith.constant 184 : index
    %c0_27 = arith.constant 0 : index
    %50 = vector.load %arg11[%c184, %c0_27] : memref<200x144xbf16, #tpu.memory_space<vmem>>, vector<8x144xbf16>
    tpu.vector_store %arg11[%c184, %c0_27], %49 {strides = array<i32>} : memref<200x144xbf16, #tpu.memory_space<vmem>>, vector<8x144xbf16>,
    %51 = vector.extract_strided_slice %2 {offsets = [0, 52], sizes = [8, 144], strides = [1, 1]} : vector<8x196xbf16> to vector<8x144xbf16>
    %c192 = arith.constant 192 : index
    %c0_28 = arith.constant 0 : index
    %52 = vector.load %arg11[%c192, %c0_28] : memref<200x144xbf16, #tpu.memory_space<vmem>>, vector<8x144xbf16>
    tpu.vector_store %arg11[%c192, %c0_28], %51 {strides = array<i32>} : memref<200x144xbf16, #tpu.memory_space<vmem>>, vector<8x144xbf16>,
    %c0_29 = arith.constant 0 : index
    %c0_30 = arith.constant 0 : index
    %c0_31 = arith.constant 0 : index
    %53 = vector.load %arg7[%c0_29, %c0_30, %c0_31] : memref<5x3x200xbf16, #tpu.memory_space<vmem>>, vector<1x3x200xbf16>
    %54 = vector.shape_cast %53 : vector<1x3x200xbf16> to vector<3x200xbf16>
    %c0_32 = arith.constant 0 : index
    %c0_33 = arith.constant 0 : index
    %55 = vector.load %arg11[%c0_32, %c0_33] : memref<200x144xbf16, #tpu.memory_space<vmem>>, vector<200x144xbf16>
    %cst_34 = arith.constant dense<0.000000e+00> : vector<3x144xf32>
    %56 = tpu.matmul %54, %55, %cst_34 {dimension_numbers = #tpu.dot_dimension_numbers<[1], [0], [0], [1], [0, 0, 1, 1], [], []>} : vector<3x200xbf16>, vector<200x144xbf16>, vector<3x144xf32> -> vector<3x144xf32>
    %57 = arith.addf %0, %56 : vector<3x144xf32>
    %c0_35 = arith.constant 0 : index
    %c0_36 = arith.constant 0 : index
    %c0_37 = arith.constant 0 : index
    %c0_38 = arith.constant 0 : index
    %58 = vector.load %arg3[%c0_35, %c0_36, %c0_37, %c0_38] : memref<1x1x8x196xbf16, #tpu.memory_space<vmem>>, vector<1x1x8x196xbf16>
    %59 = vector.shape_cast %58 : vector<1x1x8x196xbf16> to vector<8x196xbf16>
    %60 = vector.extract_strided_slice %59 {offsets = [0, 0], sizes = [8, 144], strides = [1, 1]} : vector<8x196xbf16> to vector<8x144xbf16>
    %c0_39 = arith.constant 0 : index
    %c0_40 = arith.constant 0 : index
    %61 = vector.load %arg11[%c0_39, %c0_40] : memref<200x144xbf16, #tpu.memory_space<vmem>>, vector<8x144xbf16>
    tpu.vector_store %arg11[%c0_39, %c0_40], %60 {strides = array<i32>} : memref<200x144xbf16, #tpu.memory_space<vmem>>, vector<8x144xbf16>,
    %62 = vector.extract_strided_slice %59 {offsets = [0, 1], sizes = [8, 144], strides = [1, 1]} : vector<8x196xbf16> to vector<8x144xbf16>
    %c8_41 = arith.constant 8 : index
    %c0_42 = arith.constant 0 : index
    %63 = vector.load %arg11[%c8_41, %c0_42] : memref<200x144xbf16, #tpu.memory_space<vmem>>, vector<8x144xbf16>
    tpu.vector_store %arg11[%c8_41, %c0_42], %62 {strides = array<i32>} : memref<200x144xbf16, #tpu.memory_space<vmem>>, vector<8x144xbf16>,
    %64 = vector.extract_strided_slice %59 {offsets = [0, 2], sizes = [8, 144], strides = [1, 1]} : vector<8x196xbf16> to vector<8x144xbf16>
    %c16_43 = arith.constant 16 : index
    %c0_44 = arith.constant 0 : index
    %65 = vector.load %arg11[%c16_43, %c0_44] : memref<200x144xbf16, #tpu.memory_space<vmem>>, vector<8x144xbf16>
    tpu.vector_store %arg11[%c16_43, %c0_44], %64 {strides = array<i32>} : memref<200x144xbf16, #tpu.memory_space<vmem>>, vector<8x144xbf16>,
    %66 = vector.extract_strided_slice %59 {offsets = [0, 3], sizes = [8, 144], strides = [1, 1]} : vector<8x196xbf16> to vector<8x144xbf16>
    %c24_45 = arith.constant 24 : index
    %c0_46 = arith.constant 0 : index
    %67 = vector.load %arg11[%c24_45, %c0_46] : memref<200x144xbf16, #tpu.memory_space<vmem>>, vector<8x144xbf16>
    tpu.vector_store %arg11[%c24_45, %c0_46], %66 {strides = array<i32>} : memref<200x144xbf16, #tpu.memory_space<vmem>>, vector<8x144xbf16>,
    %68 = vector.extract_strided_slice %59 {offsets = [0, 4], sizes = [8, 144], strides = [1, 1]} : vector<8x196xbf16> to vector<8x144xbf16>
    %c32_47 = arith.constant 32 : index
    %c0_48 = arith.constant 0 : index
    %69 = vector.load %arg11[%c32_47, %c0_48] : memref<200x144xbf16, #tpu.memory_space<vmem>>, vector<8x144xbf16>
    tpu.vector_store %arg11[%c32_47, %c0_48], %68 {strides = array<i32>} : memref<200x144xbf16, #tpu.memory_space<vmem>>, vector<8x144xbf16>,
    %70 = vector.extract_strided_slice %59 {offsets = [0, 12], sizes = [8, 144], strides = [1, 1]} : vector<8x196xbf16> to vector<8x144xbf16>
    %c40_49 = arith.constant 40 : index
    %c0_50 = arith.constant 0 : index
    %71 = vector.load %arg11[%c40_49, %c0_50] : memref<200x144xbf16, #tpu.memory_space<vmem>>, vector<8x144xbf16>
    tpu.vector_store %arg11[%c40_49, %c0_50], %70 {strides = array<i32>} : memref<200x144xbf16, #tpu.memory_space<vmem>>, vector<8x144xbf16>,
    %72 = vector.extract_strided_slice %59 {offsets = [0, 13], sizes = [8, 144], strides = [1, 1]} : vector<8x196xbf16> to vector<8x144xbf16>
    %c48_51 = arith.constant 48 : index
    %c0_52 = arith.constant 0 : index
    %73 = vector.load %arg11[%c48_51, %c0_52] : memref<200x144xbf16, #tpu.memory_space<vmem>>, vector<8x144xbf16>
    tpu.vector_store %arg11[%c48_51, %c0_52], %72 {strides = array<i32>} : memref<200x144xbf16, #tpu.memory_space<vmem>>, vector<8x144xbf16>,
    %74 = vector.extract_strided_slice %59 {offsets = [0, 14], sizes = [8, 144], strides = [1, 1]} : vector<8x196xbf16> to vector<8x144xbf16>
    %c56_53 = arith.constant 56 : index
    %c0_54 = arith.constant 0 : index
    %75 = vector.load %arg11[%c56_53, %c0_54] : memref<200x144xbf16, #tpu.memory_space<vmem>>, vector<8x144xbf16>
    tpu.vector_store %arg11[%c56_53, %c0_54], %74 {strides = array<i32>} : memref<200x144xbf16, #tpu.memory_space<vmem>>, vector<8x144xbf16>,
    %76 = vector.extract_strided_slice %59 {offsets = [0, 15], sizes = [8, 144], strides = [1, 1]} : vector<8x196xbf16> to vector<8x144xbf16>
    %c64_55 = arith.constant 64 : index
    %c0_56 = arith.constant 0 : index
    %77 = vector.load %arg11[%c64_55, %c0_56] : memref<200x144xbf16, #tpu.memory_space<vmem>>, vector<8x144xbf16>
    tpu.vector_store %arg11[%c64_55, %c0_56], %76 {strides = array<i32>} : memref<200x144xbf16, #tpu.memory_space<vmem>>, vector<8x144xbf16>,
    %78 = vector.extract_strided_slice %59 {offsets = [0, 16], sizes = [8, 144], strides = [1, 1]} : vector<8x196xbf16> to vector<8x144xbf16>
    %c72_57 = arith.constant 72 : index
    %c0_58 = arith.constant 0 : index
    %79 = vector.load %arg11[%c72_57, %c0_58] : memref<200x144xbf16, #tpu.memory_space<vmem>>, vector<8x144xbf16>
    tpu.vector_store %arg11[%c72_57, %c0_58], %78 {strides = array<i32>} : memref<200x144xbf16, #tpu.memory_space<vmem>>, vector<8x144xbf16>,
    %80 = vector.extract_strided_slice %59 {offsets = [0, 24], sizes = [8, 144], strides = [1, 1]} : vector<8x196xbf16> to vector<8x144xbf16>
    %c80_59 = arith.constant 80 : index
    %c0_60 = arith.constant 0 : index
    %81 = vector.load %arg11[%c80_59, %c0_60] : memref<200x144xbf16, #tpu.memory_space<vmem>>, vector<8x144xbf16>
    tpu.vector_store %arg11[%c80_59, %c0_60], %80 {strides = array<i32>} : memref<200x144xbf16, #tpu.memory_space<vmem>>, vector<8x144xbf16>,
    %82 = vector.extract_strided_slice %59 {offsets = [0, 25], sizes = [8, 144], strides = [1, 1]} : vector<8x196xbf16> to vector<8x144xbf16>
    %c88_61 = arith.constant 88 : index
    %c0_62 = arith.constant 0 : index
    %83 = vector.load %arg11[%c88_61, %c0_62] : memref<200x144xbf16, #tpu.memory_space<vmem>>, vector<8x144xbf16>
    tpu.vector_store %arg11[%c88_61, %c0_62], %82 {strides = array<i32>} : memref<200x144xbf16, #tpu.memory_space<vmem>>, vector<8x144xbf16>,
    %84 = vector.extract_strided_slice %59 {offsets = [0, 26], sizes = [8, 144], strides = [1, 1]} : vector<8x196xbf16> to vector<8x144xbf16>
    %c96_63 = arith.constant 96 : index
    %c0_64 = arith.constant 0 : index
    %85 = vector.load %arg11[%c96_63, %c0_64] : memref<200x144xbf16, #tpu.memory_space<vmem>>, vector<8x144xbf16>
    tpu.vector_store %arg11[%c96_63, %c0_64], %84 {strides = array<i32>} : memref<200x144xbf16, #tpu.memory_space<vmem>>, vector<8x144xbf16>,
    %86 = vector.extract_strided_slice %59 {offsets = [0, 27], sizes = [8, 144], strides = [1, 1]} : vector<8x196xbf16> to vector<8x144xbf16>
    %c104_65 = arith.constant 104 : index
    %c0_66 = arith.constant 0 : index
    %87 = vector.load %arg11[%c104_65, %c0_66] : memref<200x144xbf16, #tpu.memory_space<vmem>>, vector<8x144xbf16>
    tpu.vector_store %arg11[%c104_65, %c0_66], %86 {strides = array<i32>} : memref<200x144xbf16, #tpu.memory_space<vmem>>, vector<8x144xbf16>,
    %88 = vector.extract_strided_slice %59 {offsets = [0, 28], sizes = [8, 144], strides = [1, 1]} : vector<8x196xbf16> to vector<8x144xbf16>
    %c112_67 = arith.constant 112 : index
    %c0_68 = arith.constant 0 : index
    %89 = vector.load %arg11[%c112_67, %c0_68] : memref<200x144xbf16, #tpu.memory_space<vmem>>, vector<8x144xbf16>
    tpu.vector_store %arg11[%c112_67, %c0_68], %88 {strides = array<i32>} : memref<200x144xbf16, #tpu.memory_space<vmem>>, vector<8x144xbf16>,
    %90 = vector.extract_strided_slice %59 {offsets = [0, 36], sizes = [8, 144], strides = [1, 1]} : vector<8x196xbf16> to vector<8x144xbf16>
    %c120_69 = arith.constant 120 : index
    %c0_70 = arith.constant 0 : index
    %91 = vector.load %arg11[%c120_69, %c0_70] : memref<200x144xbf16, #tpu.memory_space<vmem>>, vector<8x144xbf16>
    tpu.vector_store %arg11[%c120_69, %c0_70], %90 {strides = array<i32>} : memref<200x144xbf16, #tpu.memory_space<vmem>>, vector<8x144xbf16>,
    %92 = vector.extract_strided_slice %59 {offsets = [0, 37], sizes = [8, 144], strides = [1, 1]} : vector<8x196xbf16> to vector<8x144xbf16>
    %c128_71 = arith.constant 128 : index
    %c0_72 = arith.constant 0 : index
    %93 = vector.load %arg11[%c128_71, %c0_72] : memref<200x144xbf16, #tpu.memory_space<vmem>>, vector<8x144xbf16>
    tpu.vector_store %arg11[%c128_71, %c0_72], %92 {strides = array<i32>} : memref<200x144xbf16, #tpu.memory_space<vmem>>, vector<8x144xbf16>,
    %94 = vector.extract_strided_slice %59 {offsets = [0, 38], sizes = [8, 144], strides = [1, 1]} : vector<8x196xbf16> to vector<8x144xbf16>
    %c136_73 = arith.constant 136 : index
    %c0_74 = arith.constant 0 : index
    %95 = vector.load %arg11[%c136_73, %c0_74] : memref<200x144xbf16, #tpu.memory_space<vmem>>, vector<8x144xbf16>
    tpu.vector_store %arg11[%c136_73, %c0_74], %94 {strides = array<i32>} : memref<200x144xbf16, #tpu.memory_space<vmem>>, vector<8x144xbf16>,
    %96 = vector.extract_strided_slice %59 {offsets = [0, 39], sizes = [8, 144], strides = [1, 1]} : vector<8x196xbf16> to vector<8x144xbf16>
    %c144_75 = arith.constant 144 : index
    %c0_76 = arith.constant 0 : index
    %97 = vector.load %arg11[%c144_75, %c0_76] : memref<200x144xbf16, #tpu.memory_space<vmem>>, vector<8x144xbf16>
    tpu.vector_store %arg11[%c144_75, %c0_76], %96 {strides = array<i32>} : memref<200x144xbf16, #tpu.memory_space<vmem>>, vector<8x144xbf16>,
    %98 = vector.extract_strided_slice %59 {offsets = [0, 40], sizes = [8, 144], strides = [1, 1]} : vector<8x196xbf16> to vector<8x144xbf16>
    %c152_77 = arith.constant 152 : index
    %c0_78 = arith.constant 0 : index
    %99 = vector.load %arg11[%c152_77, %c0_78] : memref<200x144xbf16, #tpu.memory_space<vmem>>, vector<8x144xbf16>
    tpu.vector_store %arg11[%c152_77, %c0_78], %98 {strides = array<i32>} : memref<200x144xbf16, #tpu.memory_space<vmem>>, vector<8x144xbf16>,
    %100 = vector.extract_strided_slice %59 {offsets = [0, 48], sizes = [8, 144], strides = [1, 1]} : vector<8x196xbf16> to vector<8x144xbf16>
    %c160_79 = arith.constant 160 : index
    %c0_80 = arith.constant 0 : index
    %101 = vector.load %arg11[%c160_79, %c0_80] : memref<200x144xbf16, #tpu.memory_space<vmem>>, vector<8x144xbf16>
    tpu.vector_store %arg11[%c160_79, %c0_80], %100 {strides = array<i32>} : memref<200x144xbf16, #tpu.memory_space<vmem>>, vector<8x144xbf16>,
    %102 = vector.extract_strided_slice %59 {offsets = [0, 49], sizes = [8, 144], strides = [1, 1]} : vector<8x196xbf16> to vector<8x144xbf16>
    %c168_81 = arith.constant 168 : index
    %c0_82 = arith.constant 0 : index
    %103 = vector.load %arg11[%c168_81, %c0_82] : memref<200x144xbf16, #tpu.memory_space<vmem>>, vector<8x144xbf16>
    tpu.vector_store %arg11[%c168_81, %c0_82], %102 {strides = array<i32>} : memref<200x144xbf16, #tpu.memory_space<vmem>>, vector<8x144xbf16>,
    %104 = vector.extract_strided_slice %59 {offsets = [0, 50], sizes = [8, 144], strides = [1, 1]} : vector<8x196xbf16> to vector<8x144xbf16>
    %c176_83 = arith.constant 176 : index
    %c0_84 = arith.constant 0 : index
    %105 = vector.load %arg11[%c176_83, %c0_84] : memref<200x144xbf16, #tpu.memory_space<vmem>>, vector<8x144xbf16>
    tpu.vector_store %arg11[%c176_83, %c0_84], %104 {strides = array<i32>} : memref<200x144xbf16, #tpu.memory_space<vmem>>, vector<8x144xbf16>,
    %106 = vector.extract_strided_slice %59 {offsets = [0, 51], sizes = [8, 144], strides = [1, 1]} : vector<8x196xbf16> to vector<8x144xbf16>
    %c184_85 = arith.constant 184 : index
    %c0_86 = arith.constant 0 : index
    %107 = vector.load %arg11[%c184_85, %c0_86] : memref<200x144xbf16, #tpu.memory_space<vmem>>, vector<8x144xbf16>
    tpu.vector_store %arg11[%c184_85, %c0_86], %106 {strides = array<i32>} : memref<200x144xbf16, #tpu.memory_space<vmem>>, vector<8x144xbf16>,
    %108 = vector.extract_strided_slice %59 {offsets = [0, 52], sizes = [8, 144], strides = [1, 1]} : vector<8x196xbf16> to vector<8x144xbf16>
    %c192_87 = arith.constant 192 : index
    %c0_88 = arith.constant 0 : index
    %109 = vector.load %arg11[%c192_87, %c0_88] : memref<200x144xbf16, #tpu.memory_space<vmem>>, vector<8x144xbf16>
    tpu.vector_store %arg11[%c192_87, %c0_88], %108 {strides = array<i32>} : memref<200x144xbf16, #tpu.memory_space<vmem>>, vector<8x144xbf16>,
    %c1 = arith.constant 1 : index
    %c0_89 = arith.constant 0 : index
    %c0_90 = arith.constant 0 : index
    %110 = vector.load %arg7[%c1, %c0_89, %c0_90] : memref<5x3x200xbf16, #tpu.memory_space<vmem>>, vector<1x3x200xbf16>
    %111 = vector.shape_cast %110 : vector<1x3x200xbf16> to vector<3x200xbf16>
    %c0_91 = arith.constant 0 : index
    %c0_92 = arith.constant 0 : index
    %112 = vector.load %arg11[%c0_91, %c0_92] : memref<200x144xbf16, #tpu.memory_space<vmem>>, vector<200x144xbf16>
    %cst_93 = arith.constant dense<0.000000e+00> : vector<3x144xf32>
    %113 = tpu.matmul %111, %112, %cst_93 {dimension_numbers = #tpu.dot_dimension_numbers<[1], [0], [0], [1], [0, 0, 1, 1], [], []>} : vector<3x200xbf16>, vector<200x144xbf16>, vector<3x144xf32> -> vector<3x144xf32>
    %114 = arith.addf %57, %113 : vector<3x144xf32>
    %c0_94 = arith.constant 0 : index
    %c0_95 = arith.constant 0 : index
    %c0_96 = arith.constant 0 : index
    %c0_97 = arith.constant 0 : index
    %115 = vector.load %arg4[%c0_94, %c0_95, %c0_96, %c0_97] : memref<1x1x8x196xbf16, #tpu.memory_space<vmem>>, vector<1x1x8x196xbf16>
    %116 = vector.shape_cast %115 : vector<1x1x8x196xbf16> to vector<8x196xbf16>
    %117 = vector.extract_strided_slice %116 {offsets = [0, 0], sizes = [8, 144], strides = [1, 1]} : vector<8x196xbf16> to vector<8x144xbf16>
    %c0_98 = arith.constant 0 : index
    %c0_99 = arith.constant 0 : index
    %118 = vector.load %arg11[%c0_98, %c0_99] : memref<200x144xbf16, #tpu.memory_space<vmem>>, vector<8x144xbf16>
    tpu.vector_store %arg11[%c0_98, %c0_99], %117 {strides = array<i32>} : memref<200x144xbf16, #tpu.memory_space<vmem>>, vector<8x144xbf16>,
    %119 = vector.extract_strided_slice %116 {offsets = [0, 1], sizes = [8, 144], strides = [1, 1]} : vector<8x196xbf16> to vector<8x144xbf16>
    %c8_100 = arith.constant 8 : index
    %c0_101 = arith.constant 0 : index
    %120 = vector.load %arg11[%c8_100, %c0_101] : memref<200x144xbf16, #tpu.memory_space<vmem>>, vector<8x144xbf16>
    tpu.vector_store %arg11[%c8_100, %c0_101], %119 {strides = array<i32>} : memref<200x144xbf16, #tpu.memory_space<vmem>>, vector<8x144xbf16>,
    %121 = vector.extract_strided_slice %116 {offsets = [0, 2], sizes = [8, 144], strides = [1, 1]} : vector<8x196xbf16> to vector<8x144xbf16>
    %c16_102 = arith.constant 16 : index
    %c0_103 = arith.constant 0 : index
    %122 = vector.load %arg11[%c16_102, %c0_103] : memref<200x144xbf16, #tpu.memory_space<vmem>>, vector<8x144xbf16>
    tpu.vector_store %arg11[%c16_102, %c0_103], %121 {strides = array<i32>} : memref<200x144xbf16, #tpu.memory_space<vmem>>, vector<8x144xbf16>,
    %123 = vector.extract_strided_slice %116 {offsets = [0, 3], sizes = [8, 144], strides = [1, 1]} : vector<8x196xbf16> to vector<8x144xbf16>
    %c24_104 = arith.constant 24 : index
    %c0_105 = arith.constant 0 : index
    %124 = vector.load %arg11[%c24_104, %c0_105] : memref<200x144xbf16, #tpu.memory_space<vmem>>, vector<8x144xbf16>
    tpu.vector_store %arg11[%c24_104, %c0_105], %123 {strides = array<i32>} : memref<200x144xbf16, #tpu.memory_space<vmem>>, vector<8x144xbf16>,
    %125 = vector.extract_strided_slice %116 {offsets = [0, 4], sizes = [8, 144], strides = [1, 1]} : vector<8x196xbf16> to vector<8x144xbf16>
    %c32_106 = arith.constant 32 : index
    %c0_107 = arith.constant 0 : index
    %126 = vector.load %arg11[%c32_106, %c0_107] : memref<200x144xbf16, #tpu.memory_space<vmem>>, vector<8x144xbf16>
    tpu.vector_store %arg11[%c32_106, %c0_107], %125 {strides = array<i32>} : memref<200x144xbf16, #tpu.memory_space<vmem>>, vector<8x144xbf16>,
    %127 = vector.extract_strided_slice %116 {offsets = [0, 12], sizes = [8, 144], strides = [1, 1]} : vector<8x196xbf16> to vector<8x144xbf16>
    %c40_108 = arith.constant 40 : index
    %c0_109 = arith.constant 0 : index
    %128 = vector.load %arg11[%c40_108, %c0_109] : memref<200x144xbf16, #tpu.memory_space<vmem>>, vector<8x144xbf16>
    tpu.vector_store %arg11[%c40_108, %c0_109], %127 {strides = array<i32>} : memref<200x144xbf16, #tpu.memory_space<vmem>>, vector<8x144xbf16>,
    %129 = vector.extract_strided_slice %116 {offsets = [0, 13], sizes = [8, 144], strides = [1, 1]} : vector<8x196xbf16> to vector<8x144xbf16>
    %c48_110 = arith.constant 48 : index
    %c0_111 = arith.constant 0 : index
    %130 = vector.load %arg11[%c48_110, %c0_111] : memref<200x144xbf16, #tpu.memory_space<vmem>>, vector<8x144xbf16>
    tpu.vector_store %arg11[%c48_110, %c0_111], %129 {strides = array<i32>} : memref<200x144xbf16, #tpu.memory_space<vmem>>, vector<8x144xbf16>,
    %131 = vector.extract_strided_slice %116 {offsets = [0, 14], sizes = [8, 144], strides = [1, 1]} : vector<8x196xbf16> to vector<8x144xbf16>
    %c56_112 = arith.constant 56 : index
    %c0_113 = arith.constant 0 : index
    %132 = vector.load %arg11[%c56_112, %c0_113] : memref<200x144xbf16, #tpu.memory_space<vmem>>, vector<8x144xbf16>
    tpu.vector_store %arg11[%c56_112, %c0_113], %131 {strides = array<i32>} : memref<200x144xbf16, #tpu.memory_space<vmem>>, vector<8x144xbf16>,
    %133 = vector.extract_strided_slice %116 {offsets = [0, 15], sizes = [8, 144], strides = [1, 1]} : vector<8x196xbf16> to vector<8x144xbf16>
    %c64_114 = arith.constant 64 : index
    %c0_115 = arith.constant 0 : index
    %134 = vector.load %arg11[%c64_114, %c0_115] : memref<200x144xbf16, #tpu.memory_space<vmem>>, vector<8x144xbf16>
    tpu.vector_store %arg11[%c64_114, %c0_115], %133 {strides = array<i32>} : memref<200x144xbf16, #tpu.memory_space<vmem>>, vector<8x144xbf16>,
    %135 = vector.extract_strided_slice %116 {offsets = [0, 16], sizes = [8, 144], strides = [1, 1]} : vector<8x196xbf16> to vector<8x144xbf16>
    %c72_116 = arith.constant 72 : index
    %c0_117 = arith.constant 0 : index
    %136 = vector.load %arg11[%c72_116, %c0_117] : memref<200x144xbf16, #tpu.memory_space<vmem>>, vector<8x144xbf16>
    tpu.vector_store %arg11[%c72_116, %c0_117], %135 {strides = array<i32>} : memref<200x144xbf16, #tpu.memory_space<vmem>>, vector<8x144xbf16>,
    %137 = vector.extract_strided_slice %116 {offsets = [0, 24], sizes = [8, 144], strides = [1, 1]} : vector<8x196xbf16> to vector<8x144xbf16>
    %c80_118 = arith.constant 80 : index
    %c0_119 = arith.constant 0 : index
    %138 = vector.load %arg11[%c80_118, %c0_119] : memref<200x144xbf16, #tpu.memory_space<vmem>>, vector<8x144xbf16>
    tpu.vector_store %arg11[%c80_118, %c0_119], %137 {strides = array<i32>} : memref<200x144xbf16, #tpu.memory_space<vmem>>, vector<8x144xbf16>,
    %139 = vector.extract_strided_slice %116 {offsets = [0, 25], sizes = [8, 144], strides = [1, 1]} : vector<8x196xbf16> to vector<8x144xbf16>
    %c88_120 = arith.constant 88 : index
    %c0_121 = arith.constant 0 : index
    %140 = vector.load %arg11[%c88_120, %c0_121] : memref<200x144xbf16, #tpu.memory_space<vmem>>, vector<8x144xbf16>
    tpu.vector_store %arg11[%c88_120, %c0_121], %139 {strides = array<i32>} : memref<200x144xbf16, #tpu.memory_space<vmem>>, vector<8x144xbf16>,
    %141 = vector.extract_strided_slice %116 {offsets = [0, 26], sizes = [8, 144], strides = [1, 1]} : vector<8x196xbf16> to vector<8x144xbf16>
    %c96_122 = arith.constant 96 : index
    %c0_123 = arith.constant 0 : index
    %142 = vector.load %arg11[%c96_122, %c0_123] : memref<200x144xbf16, #tpu.memory_space<vmem>>, vector<8x144xbf16>
    tpu.vector_store %arg11[%c96_122, %c0_123], %141 {strides = array<i32>} : memref<200x144xbf16, #tpu.memory_space<vmem>>, vector<8x144xbf16>,
    %143 = vector.extract_strided_slice %116 {offsets = [0, 27], sizes = [8, 144], strides = [1, 1]} : vector<8x196xbf16> to vector<8x144xbf16>
    %c104_124 = arith.constant 104 : index
    %c0_125 = arith.constant 0 : index
    %144 = vector.load %arg11[%c104_124, %c0_125] : memref<200x144xbf16, #tpu.memory_space<vmem>>, vector<8x144xbf16>
    tpu.vector_store %arg11[%c104_124, %c0_125], %143 {strides = array<i32>} : memref<200x144xbf16, #tpu.memory_space<vmem>>, vector<8x144xbf16>,
    %145 = vector.extract_strided_slice %116 {offsets = [0, 28], sizes = [8, 144], strides = [1, 1]} : vector<8x196xbf16> to vector<8x144xbf16>
    %c112_126 = arith.constant 112 : index
    %c0_127 = arith.constant 0 : index
    %146 = vector.load %arg11[%c112_126, %c0_127] : memref<200x144xbf16, #tpu.memory_space<vmem>>, vector<8x144xbf16>
    tpu.vector_store %arg11[%c112_126, %c0_127], %145 {strides = array<i32>} : memref<200x144xbf16, #tpu.memory_space<vmem>>, vector<8x144xbf16>,
    %147 = vector.extract_strided_slice %116 {offsets = [0, 36], sizes = [8, 144], strides = [1, 1]} : vector<8x196xbf16> to vector<8x144xbf16>
    %c120_128 = arith.constant 120 : index
    %c0_129 = arith.constant 0 : index
    %148 = vector.load %arg11[%c120_128, %c0_129] : memref<200x144xbf16, #tpu.memory_space<vmem>>, vector<8x144xbf16>
    tpu.vector_store %arg11[%c120_128, %c0_129], %147 {strides = array<i32>} : memref<200x144xbf16, #tpu.memory_space<vmem>>, vector<8x144xbf16>,
    %149 = vector.extract_strided_slice %116 {offsets = [0, 37], sizes = [8, 144], strides = [1, 1]} : vector<8x196xbf16> to vector<8x144xbf16>
    %c128_130 = arith.constant 128 : index
    %c0_131 = arith.constant 0 : index
    %150 = vector.load %arg11[%c128_130, %c0_131] : memref<200x144xbf16, #tpu.memory_space<vmem>>, vector<8x144xbf16>
    tpu.vector_store %arg11[%c128_130, %c0_131], %149 {strides = array<i32>} : memref<200x144xbf16, #tpu.memory_space<vmem>>, vector<8x144xbf16>,
    %151 = vector.extract_strided_slice %116 {offsets = [0, 38], sizes = [8, 144], strides = [1, 1]} : vector<8x196xbf16> to vector<8x144xbf16>
    %c136_132 = arith.constant 136 : index
    %c0_133 = arith.constant 0 : index
    %152 = vector.load %arg11[%c136_132, %c0_133] : memref<200x144xbf16, #tpu.memory_space<vmem>>, vector<8x144xbf16>
    tpu.vector_store %arg11[%c136_132, %c0_133], %151 {strides = array<i32>} : memref<200x144xbf16, #tpu.memory_space<vmem>>, vector<8x144xbf16>,
    %153 = vector.extract_strided_slice %116 {offsets = [0, 39], sizes = [8, 144], strides = [1, 1]} : vector<8x196xbf16> to vector<8x144xbf16>
    %c144_134 = arith.constant 144 : index
    %c0_135 = arith.constant 0 : index
    %154 = vector.load %arg11[%c144_134, %c0_135] : memref<200x144xbf16, #tpu.memory_space<vmem>>, vector<8x144xbf16>
    tpu.vector_store %arg11[%c144_134, %c0_135], %153 {strides = array<i32>} : memref<200x144xbf16, #tpu.memory_space<vmem>>, vector<8x144xbf16>,
    %155 = vector.extract_strided_slice %116 {offsets = [0, 40], sizes = [8, 144], strides = [1, 1]} : vector<8x196xbf16> to vector<8x144xbf16>
    %c152_136 = arith.constant 152 : index
    %c0_137 = arith.constant 0 : index
    %156 = vector.load %arg11[%c152_136, %c0_137] : memref<200x144xbf16, #tpu.memory_space<vmem>>, vector<8x144xbf16>
    tpu.vector_store %arg11[%c152_136, %c0_137], %155 {strides = array<i32>} : memref<200x144xbf16, #tpu.memory_space<vmem>>, vector<8x144xbf16>,
    %157 = vector.extract_strided_slice %116 {offsets = [0, 48], sizes = [8, 144], strides = [1, 1]} : vector<8x196xbf16> to vector<8x144xbf16>
    %c160_138 = arith.constant 160 : index
    %c0_139 = arith.constant 0 : index
    %158 = vector.load %arg11[%c160_138, %c0_139] : memref<200x144xbf16, #tpu.memory_space<vmem>>, vector<8x144xbf16>
    tpu.vector_store %arg11[%c160_138, %c0_139], %157 {strides = array<i32>} : memref<200x144xbf16, #tpu.memory_space<vmem>>, vector<8x144xbf16>,
    %159 = vector.extract_strided_slice %116 {offsets = [0, 49], sizes = [8, 144], strides = [1, 1]} : vector<8x196xbf16> to vector<8x144xbf16>
    %c168_140 = arith.constant 168 : index
    %c0_141 = arith.constant 0 : index
    %160 = vector.load %arg11[%c168_140, %c0_141] : memref<200x144xbf16, #tpu.memory_space<vmem>>, vector<8x144xbf16>
    tpu.vector_store %arg11[%c168_140, %c0_141], %159 {strides = array<i32>} : memref<200x144xbf16, #tpu.memory_space<vmem>>, vector<8x144xbf16>,
    %161 = vector.extract_strided_slice %116 {offsets = [0, 50], sizes = [8, 144], strides = [1, 1]} : vector<8x196xbf16> to vector<8x144xbf16>
    %c176_142 = arith.constant 176 : index
    %c0_143 = arith.constant 0 : index
    %162 = vector.load %arg11[%c176_142, %c0_143] : memref<200x144xbf16, #tpu.memory_space<vmem>>, vector<8x144xbf16>
    tpu.vector_store %arg11[%c176_142, %c0_143], %161 {strides = array<i32>} : memref<200x144xbf16, #tpu.memory_space<vmem>>, vector<8x144xbf16>,
    %163 = vector.extract_strided_slice %116 {offsets = [0, 51], sizes = [8, 144], strides = [1, 1]} : vector<8x196xbf16> to vector<8x144xbf16>
    %c184_144 = arith.constant 184 : index
    %c0_145 = arith.constant 0 : index
    %164 = vector.load %arg11[%c184_144, %c0_145] : memref<200x144xbf16, #tpu.memory_space<vmem>>, vector<8x144xbf16>
    tpu.vector_store %arg11[%c184_144, %c0_145], %163 {strides = array<i32>} : memref<200x144xbf16, #tpu.memory_space<vmem>>, vector<8x144xbf16>,
    %165 = vector.extract_strided_slice %116 {offsets = [0, 52], sizes = [8, 144], strides = [1, 1]} : vector<8x196xbf16> to vector<8x144xbf16>
    %c192_146 = arith.constant 192 : index
    %c0_147 = arith.constant 0 : index
    %166 = vector.load %arg11[%c192_146, %c0_147] : memref<200x144xbf16, #tpu.memory_space<vmem>>, vector<8x144xbf16>
    tpu.vector_store %arg11[%c192_146, %c0_147], %165 {strides = array<i32>} : memref<200x144xbf16, #tpu.memory_space<vmem>>, vector<8x144xbf16>,
    %c2 = arith.constant 2 : index
    %c0_148 = arith.constant 0 : index
    %c0_149 = arith.constant 0 : index
    %167 = vector.load %arg7[%c2, %c0_148, %c0_149] : memref<5x3x200xbf16, #tpu.memory_space<vmem>>, vector<1x3x200xbf16>
    %168 = vector.shape_cast %167 : vector<1x3x200xbf16> to vector<3x200xbf16>
    %c0_150 = arith.constant 0 : index
    %c0_151 = arith.constant 0 : index
    %169 = vector.load %arg11[%c0_150, %c0_151] : memref<200x144xbf16, #tpu.memory_space<vmem>>, vector<200x144xbf16>
    %cst_152 = arith.constant dense<0.000000e+00> : vector<3x144xf32>
    %170 = tpu.matmul %168, %169, %cst_152 {dimension_numbers = #tpu.dot_dimension_numbers<[1], [0], [0], [1], [0, 0, 1, 1], [], []>} : vector<3x200xbf16>, vector<200x144xbf16>, vector<3x144xf32> -> vector<3x144xf32>
    %171 = arith.addf %114, %170 : vector<3x144xf32>
    %c0_153 = arith.constant 0 : index
    %c0_154 = arith.constant 0 : index
    %c0_155 = arith.constant 0 : index
    %c0_156 = arith.constant 0 : index
    %172 = vector.load %arg5[%c0_153, %c0_154, %c0_155, %c0_156] : memref<1x1x8x196xbf16, #tpu.memory_space<vmem>>, vector<1x1x8x196xbf16>
    %173 = vector.shape_cast %172 : vector<1x1x8x196xbf16> to vector<8x196xbf16>
    %174 = vector.extract_strided_slice %173 {offsets = [0, 0], sizes = [8, 144], strides = [1, 1]} : vector<8x196xbf16> to vector<8x144xbf16>
    %c0_157 = arith.constant 0 : index
    %c0_158 = arith.constant 0 : index
    %175 = vector.load %arg11[%c0_157, %c0_158] : memref<200x144xbf16, #tpu.memory_space<vmem>>, vector<8x144xbf16>
    tpu.vector_store %arg11[%c0_157, %c0_158], %174 {strides = array<i32>} : memref<200x144xbf16, #tpu.memory_space<vmem>>, vector<8x144xbf16>,
    %176 = vector.extract_strided_slice %173 {offsets = [0, 1], sizes = [8, 144], strides = [1, 1]} : vector<8x196xbf16> to vector<8x144xbf16>
    %c8_159 = arith.constant 8 : index
    %c0_160 = arith.constant 0 : index
    %177 = vector.load %arg11[%c8_159, %c0_160] : memref<200x144xbf16, #tpu.memory_space<vmem>>, vector<8x144xbf16>
    tpu.vector_store %arg11[%c8_159, %c0_160], %176 {strides = array<i32>} : memref<200x144xbf16, #tpu.memory_space<vmem>>, vector<8x144xbf16>,
    %178 = vector.extract_strided_slice %173 {offsets = [0, 2], sizes = [8, 144], strides = [1, 1]} : vector<8x196xbf16> to vector<8x144xbf16>
    %c16_161 = arith.constant 16 : index
    %c0_162 = arith.constant 0 : index
    %179 = vector.load %arg11[%c16_161, %c0_162] : memref<200x144xbf16, #tpu.memory_space<vmem>>, vector<8x144xbf16>
    tpu.vector_store %arg11[%c16_161, %c0_162], %178 {strides = array<i32>} : memref<200x144xbf16, #tpu.memory_space<vmem>>, vector<8x144xbf16>,
    %180 = vector.extract_strided_slice %173 {offsets = [0, 3], sizes = [8, 144], strides = [1, 1]} : vector<8x196xbf16> to vector<8x144xbf16>
    %c24_163 = arith.constant 24 : index
    %c0_164 = arith.constant 0 : index
    %181 = vector.load %arg11[%c24_163, %c0_164] : memref<200x144xbf16, #tpu.memory_space<vmem>>, vector<8x144xbf16>
    tpu.vector_store %arg11[%c24_163, %c0_164], %180 {strides = array<i32>} : memref<200x144xbf16, #tpu.memory_space<vmem>>, vector<8x144xbf16>,
    %182 = vector.extract_strided_slice %173 {offsets = [0, 4], sizes = [8, 144], strides = [1, 1]} : vector<8x196xbf16> to vector<8x144xbf16>
    %c32_165 = arith.constant 32 : index
    %c0_166 = arith.constant 0 : index
    %183 = vector.load %arg11[%c32_165, %c0_166] : memref<200x144xbf16, #tpu.memory_space<vmem>>, vector<8x144xbf16>
    tpu.vector_store %arg11[%c32_165, %c0_166], %182 {strides = array<i32>} : memref<200x144xbf16, #tpu.memory_space<vmem>>, vector<8x144xbf16>,
    %184 = vector.extract_strided_slice %173 {offsets = [0, 12], sizes = [8, 144], strides = [1, 1]} : vector<8x196xbf16> to vector<8x144xbf16>
    %c40_167 = arith.constant 40 : index
    %c0_168 = arith.constant 0 : index
    %185 = vector.load %arg11[%c40_167, %c0_168] : memref<200x144xbf16, #tpu.memory_space<vmem>>, vector<8x144xbf16>
    tpu.vector_store %arg11[%c40_167, %c0_168], %184 {strides = array<i32>} : memref<200x144xbf16, #tpu.memory_space<vmem>>, vector<8x144xbf16>,
    %186 = vector.extract_strided_slice %173 {offsets = [0, 13], sizes = [8, 144], strides = [1, 1]} : vector<8x196xbf16> to vector<8x144xbf16>
    %c48_169 = arith.constant 48 : index
    %c0_170 = arith.constant 0 : index
    %187 = vector.load %arg11[%c48_169, %c0_170] : memref<200x144xbf16, #tpu.memory_space<vmem>>, vector<8x144xbf16>
    tpu.vector_store %arg11[%c48_169, %c0_170], %186 {strides = array<i32>} : memref<200x144xbf16, #tpu.memory_space<vmem>>, vector<8x144xbf16>,
    %188 = vector.extract_strided_slice %173 {offsets = [0, 14], sizes = [8, 144], strides = [1, 1]} : vector<8x196xbf16> to vector<8x144xbf16>
    %c56_171 = arith.constant 56 : index
    %c0_172 = arith.constant 0 : index
    %189 = vector.load %arg11[%c56_171, %c0_172] : memref<200x144xbf16, #tpu.memory_space<vmem>>, vector<8x144xbf16>
    tpu.vector_store %arg11[%c56_171, %c0_172], %188 {strides = array<i32>} : memref<200x144xbf16, #tpu.memory_space<vmem>>, vector<8x144xbf16>,
    %190 = vector.extract_strided_slice %173 {offsets = [0, 15], sizes = [8, 144], strides = [1, 1]} : vector<8x196xbf16> to vector<8x144xbf16>
    %c64_173 = arith.constant 64 : index
    %c0_174 = arith.constant 0 : index
    %191 = vector.load %arg11[%c64_173, %c0_174] : memref<200x144xbf16, #tpu.memory_space<vmem>>, vector<8x144xbf16>
    tpu.vector_store %arg11[%c64_173, %c0_174], %190 {strides = array<i32>} : memref<200x144xbf16, #tpu.memory_space<vmem>>, vector<8x144xbf16>,
    %192 = vector.extract_strided_slice %173 {offsets = [0, 16], sizes = [8, 144], strides = [1, 1]} : vector<8x196xbf16> to vector<8x144xbf16>
    %c72_175 = arith.constant 72 : index
    %c0_176 = arith.constant 0 : index
    %193 = vector.load %arg11[%c72_175, %c0_176] : memref<200x144xbf16, #tpu.memory_space<vmem>>, vector<8x144xbf16>
    tpu.vector_store %arg11[%c72_175, %c0_176], %192 {strides = array<i32>} : memref<200x144xbf16, #tpu.memory_space<vmem>>, vector<8x144xbf16>,
    %194 = vector.extract_strided_slice %173 {offsets = [0, 24], sizes = [8, 144], strides = [1, 1]} : vector<8x196xbf16> to vector<8x144xbf16>
    %c80_177 = arith.constant 80 : index
    %c0_178 = arith.constant 0 : index
    %195 = vector.load %arg11[%c80_177, %c0_178] : memref<200x144xbf16, #tpu.memory_space<vmem>>, vector<8x144xbf16>
    tpu.vector_store %arg11[%c80_177, %c0_178], %194 {strides = array<i32>} : memref<200x144xbf16, #tpu.memory_space<vmem>>, vector<8x144xbf16>,
    %196 = vector.extract_strided_slice %173 {offsets = [0, 25], sizes = [8, 144], strides = [1, 1]} : vector<8x196xbf16> to vector<8x144xbf16>
    %c88_179 = arith.constant 88 : index
    %c0_180 = arith.constant 0 : index
    %197 = vector.load %arg11[%c88_179, %c0_180] : memref<200x144xbf16, #tpu.memory_space<vmem>>, vector<8x144xbf16>
    tpu.vector_store %arg11[%c88_179, %c0_180], %196 {strides = array<i32>} : memref<200x144xbf16, #tpu.memory_space<vmem>>, vector<8x144xbf16>,
    %198 = vector.extract_strided_slice %173 {offsets = [0, 26], sizes = [8, 144], strides = [1, 1]} : vector<8x196xbf16> to vector<8x144xbf16>
    %c96_181 = arith.constant 96 : index
    %c0_182 = arith.constant 0 : index
    %199 = vector.load %arg11[%c96_181, %c0_182] : memref<200x144xbf16, #tpu.memory_space<vmem>>, vector<8x144xbf16>
    tpu.vector_store %arg11[%c96_181, %c0_182], %198 {strides = array<i32>} : memref<200x144xbf16, #tpu.memory_space<vmem>>, vector<8x144xbf16>,
    %200 = vector.extract_strided_slice %173 {offsets = [0, 27], sizes = [8, 144], strides = [1, 1]} : vector<8x196xbf16> to vector<8x144xbf16>
    %c104_183 = arith.constant 104 : index
    %c0_184 = arith.constant 0 : index
    %201 = vector.load %arg11[%c104_183, %c0_184] : memref<200x144xbf16, #tpu.memory_space<vmem>>, vector<8x144xbf16>
    tpu.vector_store %arg11[%c104_183, %c0_184], %200 {strides = array<i32>} : memref<200x144xbf16, #tpu.memory_space<vmem>>, vector<8x144xbf16>,
    %202 = vector.extract_strided_slice %173 {offsets = [0, 28], sizes = [8, 144], strides = [1, 1]} : vector<8x196xbf16> to vector<8x144xbf16>
    %c112_185 = arith.constant 112 : index
    %c0_186 = arith.constant 0 : index
    %203 = vector.load %arg11[%c112_185, %c0_186] : memref<200x144xbf16, #tpu.memory_space<vmem>>, vector<8x144xbf16>
    tpu.vector_store %arg11[%c112_185, %c0_186], %202 {strides = array<i32>} : memref<200x144xbf16, #tpu.memory_space<vmem>>, vector<8x144xbf16>,
    %204 = vector.extract_strided_slice %173 {offsets = [0, 36], sizes = [8, 144], strides = [1, 1]} : vector<8x196xbf16> to vector<8x144xbf16>
    %c120_187 = arith.constant 120 : index
    %c0_188 = arith.constant 0 : index
    %205 = vector.load %arg11[%c120_187, %c0_188] : memref<200x144xbf16, #tpu.memory_space<vmem>>, vector<8x144xbf16>
    tpu.vector_store %arg11[%c120_187, %c0_188], %204 {strides = array<i32>} : memref<200x144xbf16, #tpu.memory_space<vmem>>, vector<8x144xbf16>,
    %206 = vector.extract_strided_slice %173 {offsets = [0, 37], sizes = [8, 144], strides = [1, 1]} : vector<8x196xbf16> to vector<8x144xbf16>
    %c128_189 = arith.constant 128 : index
    %c0_190 = arith.constant 0 : index
    %207 = vector.load %arg11[%c128_189, %c0_190] : memref<200x144xbf16, #tpu.memory_space<vmem>>, vector<8x144xbf16>
    tpu.vector_store %arg11[%c128_189, %c0_190], %206 {strides = array<i32>} : memref<200x144xbf16, #tpu.memory_space<vmem>>, vector<8x144xbf16>,
    %208 = vector.extract_strided_slice %173 {offsets = [0, 38], sizes = [8, 144], strides = [1, 1]} : vector<8x196xbf16> to vector<8x144xbf16>
    %c136_191 = arith.constant 136 : index
    %c0_192 = arith.constant 0 : index
    %209 = vector.load %arg11[%c136_191, %c0_192] : memref<200x144xbf16, #tpu.memory_space<vmem>>, vector<8x144xbf16>
    tpu.vector_store %arg11[%c136_191, %c0_192], %208 {strides = array<i32>} : memref<200x144xbf16, #tpu.memory_space<vmem>>, vector<8x144xbf16>,
    %210 = vector.extract_strided_slice %173 {offsets = [0, 39], sizes = [8, 144], strides = [1, 1]} : vector<8x196xbf16> to vector<8x144xbf16>
    %c144_193 = arith.constant 144 : index
    %c0_194 = arith.constant 0 : index
    %211 = vector.load %arg11[%c144_193, %c0_194] : memref<200x144xbf16, #tpu.memory_space<vmem>>, vector<8x144xbf16>
    tpu.vector_store %arg11[%c144_193, %c0_194], %210 {strides = array<i32>} : memref<200x144xbf16, #tpu.memory_space<vmem>>, vector<8x144xbf16>,
    %212 = vector.extract_strided_slice %173 {offsets = [0, 40], sizes = [8, 144], strides = [1, 1]} : vector<8x196xbf16> to vector<8x144xbf16>
    %c152_195 = arith.constant 152 : index
    %c0_196 = arith.constant 0 : index
    %213 = vector.load %arg11[%c152_195, %c0_196] : memref<200x144xbf16, #tpu.memory_space<vmem>>, vector<8x144xbf16>
    tpu.vector_store %arg11[%c152_195, %c0_196], %212 {strides = array<i32>} : memref<200x144xbf16, #tpu.memory_space<vmem>>, vector<8x144xbf16>,
    %214 = vector.extract_strided_slice %173 {offsets = [0, 48], sizes = [8, 144], strides = [1, 1]} : vector<8x196xbf16> to vector<8x144xbf16>
    %c160_197 = arith.constant 160 : index
    %c0_198 = arith.constant 0 : index
    %215 = vector.load %arg11[%c160_197, %c0_198] : memref<200x144xbf16, #tpu.memory_space<vmem>>, vector<8x144xbf16>
    tpu.vector_store %arg11[%c160_197, %c0_198], %214 {strides = array<i32>} : memref<200x144xbf16, #tpu.memory_space<vmem>>, vector<8x144xbf16>,
    %216 = vector.extract_strided_slice %173 {offsets = [0, 49], sizes = [8, 144], strides = [1, 1]} : vector<8x196xbf16> to vector<8x144xbf16>
    %c168_199 = arith.constant 168 : index
    %c0_200 = arith.constant 0 : index
    %217 = vector.load %arg11[%c168_199, %c0_200] : memref<200x144xbf16, #tpu.memory_space<vmem>>, vector<8x144xbf16>
    tpu.vector_store %arg11[%c168_199, %c0_200], %216 {strides = array<i32>} : memref<200x144xbf16, #tpu.memory_space<vmem>>, vector<8x144xbf16>,
    %218 = vector.extract_strided_slice %173 {offsets = [0, 50], sizes = [8, 144], strides = [1, 1]} : vector<8x196xbf16> to vector<8x144xbf16>
    %c176_201 = arith.constant 176 : index
    %c0_202 = arith.constant 0 : index
    %219 = vector.load %arg11[%c176_201, %c0_202] : memref<200x144xbf16, #tpu.memory_space<vmem>>, vector<8x144xbf16>
    tpu.vector_store %arg11[%c176_201, %c0_202], %218 {strides = array<i32>} : memref<200x144xbf16, #tpu.memory_space<vmem>>, vector<8x144xbf16>,
    %220 = vector.extract_strided_slice %173 {offsets = [0, 51], sizes = [8, 144], strides = [1, 1]} : vector<8x196xbf16> to vector<8x144xbf16>
    %c184_203 = arith.constant 184 : index
    %c0_204 = arith.constant 0 : index
    %221 = vector.load %arg11[%c184_203, %c0_204] : memref<200x144xbf16, #tpu.memory_space<vmem>>, vector<8x144xbf16>
    tpu.vector_store %arg11[%c184_203, %c0_204], %220 {strides = array<i32>} : memref<200x144xbf16, #tpu.memory_space<vmem>>, vector<8x144xbf16>,
    %222 = vector.extract_strided_slice %173 {offsets = [0, 52], sizes = [8, 144], strides = [1, 1]} : vector<8x196xbf16> to vector<8x144xbf16>
    %c192_205 = arith.constant 192 : index
    %c0_206 = arith.constant 0 : index
    %223 = vector.load %arg11[%c192_205, %c0_206] : memref<200x144xbf16, #tpu.memory_space<vmem>>, vector<8x144xbf16>
    tpu.vector_store %arg11[%c192_205, %c0_206], %222 {strides = array<i32>} : memref<200x144xbf16, #tpu.memory_space<vmem>>, vector<8x144xbf16>,
    %c3 = arith.constant 3 : index
    %c0_207 = arith.constant 0 : index
    %c0_208 = arith.constant 0 : index
    %224 = vector.load %arg7[%c3, %c0_207, %c0_208] : memref<5x3x200xbf16, #tpu.memory_space<vmem>>, vector<1x3x200xbf16>
    %225 = vector.shape_cast %224 : vector<1x3x200xbf16> to vector<3x200xbf16>
    %c0_209 = arith.constant 0 : index
    %c0_210 = arith.constant 0 : index
    %226 = vector.load %arg11[%c0_209, %c0_210] : memref<200x144xbf16, #tpu.memory_space<vmem>>, vector<200x144xbf16>
    %cst_211 = arith.constant dense<0.000000e+00> : vector<3x144xf32>
    %227 = tpu.matmul %225, %226, %cst_211 {dimension_numbers = #tpu.dot_dimension_numbers<[1], [0], [0], [1], [0, 0, 1, 1], [], []>} : vector<3x200xbf16>, vector<200x144xbf16>, vector<3x144xf32> -> vector<3x144xf32>
    %228 = arith.addf %171, %227 : vector<3x144xf32>
    %c0_212 = arith.constant 0 : index
    %c0_213 = arith.constant 0 : index
    %c0_214 = arith.constant 0 : index
    %c0_215 = arith.constant 0 : index
    %229 = vector.load %arg6[%c0_212, %c0_213, %c0_214, %c0_215] : memref<1x1x8x196xbf16, #tpu.memory_space<vmem>>, vector<1x1x8x196xbf16>
    %230 = vector.shape_cast %229 : vector<1x1x8x196xbf16> to vector<8x196xbf16>
    %231 = vector.extract_strided_slice %230 {offsets = [0, 0], sizes = [8, 144], strides = [1, 1]} : vector<8x196xbf16> to vector<8x144xbf16>
    %c0_216 = arith.constant 0 : index
    %c0_217 = arith.constant 0 : index
    %232 = vector.load %arg11[%c0_216, %c0_217] : memref<200x144xbf16, #tpu.memory_space<vmem>>, vector<8x144xbf16>
    tpu.vector_store %arg11[%c0_216, %c0_217], %231 {strides = array<i32>} : memref<200x144xbf16, #tpu.memory_space<vmem>>, vector<8x144xbf16>,
    %233 = vector.extract_strided_slice %230 {offsets = [0, 1], sizes = [8, 144], strides = [1, 1]} : vector<8x196xbf16> to vector<8x144xbf16>
    %c8_218 = arith.constant 8 : index
    %c0_219 = arith.constant 0 : index
    %234 = vector.load %arg11[%c8_218, %c0_219] : memref<200x144xbf16, #tpu.memory_space<vmem>>, vector<8x144xbf16>
    tpu.vector_store %arg11[%c8_218, %c0_219], %233 {strides = array<i32>} : memref<200x144xbf16, #tpu.memory_space<vmem>>, vector<8x144xbf16>,
    %235 = vector.extract_strided_slice %230 {offsets = [0, 2], sizes = [8, 144], strides = [1, 1]} : vector<8x196xbf16> to vector<8x144xbf16>
    %c16_220 = arith.constant 16 : index
    %c0_221 = arith.constant 0 : index
    %236 = vector.load %arg11[%c16_220, %c0_221] : memref<200x144xbf16, #tpu.memory_space<vmem>>, vector<8x144xbf16>
    tpu.vector_store %arg11[%c16_220, %c0_221], %235 {strides = array<i32>} : memref<200x144xbf16, #tpu.memory_space<vmem>>, vector<8x144xbf16>,
    %237 = vector.extract_strided_slice %230 {offsets = [0, 3], sizes = [8, 144], strides = [1, 1]} : vector<8x196xbf16> to vector<8x144xbf16>
    %c24_222 = arith.constant 24 : index
    %c0_223 = arith.constant 0 : index
    %238 = vector.load %arg11[%c24_222, %c0_223] : memref<200x144xbf16, #tpu.memory_space<vmem>>, vector<8x144xbf16>
    tpu.vector_store %arg11[%c24_222, %c0_223], %237 {strides = array<i32>} : memref<200x144xbf16, #tpu.memory_space<vmem>>, vector<8x144xbf16>,
    %239 = vector.extract_strided_slice %230 {offsets = [0, 4], sizes = [8, 144], strides = [1, 1]} : vector<8x196xbf16> to vector<8x144xbf16>
    %c32_224 = arith.constant 32 : index
    %c0_225 = arith.constant 0 : index
    %240 = vector.load %arg11[%c32_224, %c0_225] : memref<200x144xbf16, #tpu.memory_space<vmem>>, vector<8x144xbf16>
    tpu.vector_store %arg11[%c32_224, %c0_225], %239 {strides = array<i32>} : memref<200x144xbf16, #tpu.memory_space<vmem>>, vector<8x144xbf16>,
    %241 = vector.extract_strided_slice %230 {offsets = [0, 12], sizes = [8, 144], strides = [1, 1]} : vector<8x196xbf16> to vector<8x144xbf16>
    %c40_226 = arith.constant 40 : index
    %c0_227 = arith.constant 0 : index
    %242 = vector.load %arg11[%c40_226, %c0_227] : memref<200x144xbf16, #tpu.memory_space<vmem>>, vector<8x144xbf16>
    tpu.vector_store %arg11[%c40_226, %c0_227], %241 {strides = array<i32>} : memref<200x144xbf16, #tpu.memory_space<vmem>>, vector<8x144xbf16>,
    %243 = vector.extract_strided_slice %230 {offsets = [0, 13], sizes = [8, 144], strides = [1, 1]} : vector<8x196xbf16> to vector<8x144xbf16>
    %c48_228 = arith.constant 48 : index
    %c0_229 = arith.constant 0 : index
    %244 = vector.load %arg11[%c48_228, %c0_229] : memref<200x144xbf16, #tpu.memory_space<vmem>>, vector<8x144xbf16>
    tpu.vector_store %arg11[%c48_228, %c0_229], %243 {strides = array<i32>} : memref<200x144xbf16, #tpu.memory_space<vmem>>, vector<8x144xbf16>,
    %245 = vector.extract_strided_slice %230 {offsets = [0, 14], sizes = [8, 144], strides = [1, 1]} : vector<8x196xbf16> to vector<8x144xbf16>
    %c56_230 = arith.constant 56 : index
    %c0_231 = arith.constant 0 : index
    %246 = vector.load %arg11[%c56_230, %c0_231] : memref<200x144xbf16, #tpu.memory_space<vmem>>, vector<8x144xbf16>
    tpu.vector_store %arg11[%c56_230, %c0_231], %245 {strides = array<i32>} : memref<200x144xbf16, #tpu.memory_space<vmem>>, vector<8x144xbf16>,
    %247 = vector.extract_strided_slice %230 {offsets = [0, 15], sizes = [8, 144], strides = [1, 1]} : vector<8x196xbf16> to vector<8x144xbf16>
    %c64_232 = arith.constant 64 : index
    %c0_233 = arith.constant 0 : index
    %248 = vector.load %arg11[%c64_232, %c0_233] : memref<200x144xbf16, #tpu.memory_space<vmem>>, vector<8x144xbf16>
    tpu.vector_store %arg11[%c64_232, %c0_233], %247 {strides = array<i32>} : memref<200x144xbf16, #tpu.memory_space<vmem>>, vector<8x144xbf16>,
    %249 = vector.extract_strided_slice %230 {offsets = [0, 16], sizes = [8, 144], strides = [1, 1]} : vector<8x196xbf16> to vector<8x144xbf16>
    %c72_234 = arith.constant 72 : index
    %c0_235 = arith.constant 0 : index
    %250 = vector.load %arg11[%c72_234, %c0_235] : memref<200x144xbf16, #tpu.memory_space<vmem>>, vector<8x144xbf16>
    tpu.vector_store %arg11[%c72_234, %c0_235], %249 {strides = array<i32>} : memref<200x144xbf16, #tpu.memory_space<vmem>>, vector<8x144xbf16>,
    %251 = vector.extract_strided_slice %230 {offsets = [0, 24], sizes = [8, 144], strides = [1, 1]} : vector<8x196xbf16> to vector<8x144xbf16>
    %c80_236 = arith.constant 80 : index
    %c0_237 = arith.constant 0 : index
    %252 = vector.load %arg11[%c80_236, %c0_237] : memref<200x144xbf16, #tpu.memory_space<vmem>>, vector<8x144xbf16>
    tpu.vector_store %arg11[%c80_236, %c0_237], %251 {strides = array<i32>} : memref<200x144xbf16, #tpu.memory_space<vmem>>, vector<8x144xbf16>,
    %253 = vector.extract_strided_slice %230 {offsets = [0, 25], sizes = [8, 144], strides = [1, 1]} : vector<8x196xbf16> to vector<8x144xbf16>
    %c88_238 = arith.constant 88 : index
    %c0_239 = arith.constant 0 : index
    %254 = vector.load %arg11[%c88_238, %c0_239] : memref<200x144xbf16, #tpu.memory_space<vmem>>, vector<8x144xbf16>
    tpu.vector_store %arg11[%c88_238, %c0_239], %253 {strides = array<i32>} : memref<200x144xbf16, #tpu.memory_space<vmem>>, vector<8x144xbf16>,
    %255 = vector.extract_strided_slice %230 {offsets = [0, 26], sizes = [8, 144], strides = [1, 1]} : vector<8x196xbf16> to vector<8x144xbf16>
    %c96_240 = arith.constant 96 : index
    %c0_241 = arith.constant 0 : index
    %256 = vector.load %arg11[%c96_240, %c0_241] : memref<200x144xbf16, #tpu.memory_space<vmem>>, vector<8x144xbf16>
    tpu.vector_store %arg11[%c96_240, %c0_241], %255 {strides = array<i32>} : memref<200x144xbf16, #tpu.memory_space<vmem>>, vector<8x144xbf16>,
    %257 = vector.extract_strided_slice %230 {offsets = [0, 27], sizes = [8, 144], strides = [1, 1]} : vector<8x196xbf16> to vector<8x144xbf16>
    %c104_242 = arith.constant 104 : index
    %c0_243 = arith.constant 0 : index
    %258 = vector.load %arg11[%c104_242, %c0_243] : memref<200x144xbf16, #tpu.memory_space<vmem>>, vector<8x144xbf16>
    tpu.vector_store %arg11[%c104_242, %c0_243], %257 {strides = array<i32>} : memref<200x144xbf16, #tpu.memory_space<vmem>>, vector<8x144xbf16>,
    %259 = vector.extract_strided_slice %230 {offsets = [0, 28], sizes = [8, 144], strides = [1, 1]} : vector<8x196xbf16> to vector<8x144xbf16>
    %c112_244 = arith.constant 112 : index
    %c0_245 = arith.constant 0 : index
    %260 = vector.load %arg11[%c112_244, %c0_245] : memref<200x144xbf16, #tpu.memory_space<vmem>>, vector<8x144xbf16>
    tpu.vector_store %arg11[%c112_244, %c0_245], %259 {strides = array<i32>} : memref<200x144xbf16, #tpu.memory_space<vmem>>, vector<8x144xbf16>,
    %261 = vector.extract_strided_slice %230 {offsets = [0, 36], sizes = [8, 144], strides = [1, 1]} : vector<8x196xbf16> to vector<8x144xbf16>
    %c120_246 = arith.constant 120 : index
    %c0_247 = arith.constant 0 : index
    %262 = vector.load %arg11[%c120_246, %c0_247] : memref<200x144xbf16, #tpu.memory_space<vmem>>, vector<8x144xbf16>
    tpu.vector_store %arg11[%c120_246, %c0_247], %261 {strides = array<i32>} : memref<200x144xbf16, #tpu.memory_space<vmem>>, vector<8x144xbf16>,
    %263 = vector.extract_strided_slice %230 {offsets = [0, 37], sizes = [8, 144], strides = [1, 1]} : vector<8x196xbf16> to vector<8x144xbf16>
    %c128_248 = arith.constant 128 : index
    %c0_249 = arith.constant 0 : index
    %264 = vector.load %arg11[%c128_248, %c0_249] : memref<200x144xbf16, #tpu.memory_space<vmem>>, vector<8x144xbf16>
    tpu.vector_store %arg11[%c128_248, %c0_249], %263 {strides = array<i32>} : memref<200x144xbf16, #tpu.memory_space<vmem>>, vector<8x144xbf16>,
    %265 = vector.extract_strided_slice %230 {offsets = [0, 38], sizes = [8, 144], strides = [1, 1]} : vector<8x196xbf16> to vector<8x144xbf16>
    %c136_250 = arith.constant 136 : index
    %c0_251 = arith.constant 0 : index
    %266 = vector.load %arg11[%c136_250, %c0_251] : memref<200x144xbf16, #tpu.memory_space<vmem>>, vector<8x144xbf16>
    tpu.vector_store %arg11[%c136_250, %c0_251], %265 {strides = array<i32>} : memref<200x144xbf16, #tpu.memory_space<vmem>>, vector<8x144xbf16>,
    %267 = vector.extract_strided_slice %230 {offsets = [0, 39], sizes = [8, 144], strides = [1, 1]} : vector<8x196xbf16> to vector<8x144xbf16>
    %c144_252 = arith.constant 144 : index
    %c0_253 = arith.constant 0 : index
    %268 = vector.load %arg11[%c144_252, %c0_253] : memref<200x144xbf16, #tpu.memory_space<vmem>>, vector<8x144xbf16>
    tpu.vector_store %arg11[%c144_252, %c0_253], %267 {strides = array<i32>} : memref<200x144xbf16, #tpu.memory_space<vmem>>, vector<8x144xbf16>,
    %269 = vector.extract_strided_slice %230 {offsets = [0, 40], sizes = [8, 144], strides = [1, 1]} : vector<8x196xbf16> to vector<8x144xbf16>
    %c152_254 = arith.constant 152 : index
    %c0_255 = arith.constant 0 : index
    %270 = vector.load %arg11[%c152_254, %c0_255] : memref<200x144xbf16, #tpu.memory_space<vmem>>, vector<8x144xbf16>
    tpu.vector_store %arg11[%c152_254, %c0_255], %269 {strides = array<i32>} : memref<200x144xbf16, #tpu.memory_space<vmem>>, vector<8x144xbf16>,
    %271 = vector.extract_strided_slice %230 {offsets = [0, 48], sizes = [8, 144], strides = [1, 1]} : vector<8x196xbf16> to vector<8x144xbf16>
    %c160_256 = arith.constant 160 : index
    %c0_257 = arith.constant 0 : index
    %272 = vector.load %arg11[%c160_256, %c0_257] : memref<200x144xbf16, #tpu.memory_space<vmem>>, vector<8x144xbf16>
    tpu.vector_store %arg11[%c160_256, %c0_257], %271 {strides = array<i32>} : memref<200x144xbf16, #tpu.memory_space<vmem>>, vector<8x144xbf16>,
    %273 = vector.extract_strided_slice %230 {offsets = [0, 49], sizes = [8, 144], strides = [1, 1]} : vector<8x196xbf16> to vector<8x144xbf16>
    %c168_258 = arith.constant 168 : index
    %c0_259 = arith.constant 0 : index
    %274 = vector.load %arg11[%c168_258, %c0_259] : memref<200x144xbf16, #tpu.memory_space<vmem>>, vector<8x144xbf16>
    tpu.vector_store %arg11[%c168_258, %c0_259], %273 {strides = array<i32>} : memref<200x144xbf16, #tpu.memory_space<vmem>>, vector<8x144xbf16>,
    %275 = vector.extract_strided_slice %230 {offsets = [0, 50], sizes = [8, 144], strides = [1, 1]} : vector<8x196xbf16> to vector<8x144xbf16>
    %c176_260 = arith.constant 176 : index
    %c0_261 = arith.constant 0 : index
    %276 = vector.load %arg11[%c176_260, %c0_261] : memref<200x144xbf16, #tpu.memory_space<vmem>>, vector<8x144xbf16>
    tpu.vector_store %arg11[%c176_260, %c0_261], %275 {strides = array<i32>} : memref<200x144xbf16, #tpu.memory_space<vmem>>, vector<8x144xbf16>,
    %277 = vector.extract_strided_slice %230 {offsets = [0, 51], sizes = [8, 144], strides = [1, 1]} : vector<8x196xbf16> to vector<8x144xbf16>
    %c184_262 = arith.constant 184 : index
    %c0_263 = arith.constant 0 : index
    %278 = vector.load %arg11[%c184_262, %c0_263] : memref<200x144xbf16, #tpu.memory_space<vmem>>, vector<8x144xbf16>
    tpu.vector_store %arg11[%c184_262, %c0_263], %277 {strides = array<i32>} : memref<200x144xbf16, #tpu.memory_space<vmem>>, vector<8x144xbf16>,
    %279 = vector.extract_strided_slice %230 {offsets = [0, 52], sizes = [8, 144], strides = [1, 1]} : vector<8x196xbf16> to vector<8x144xbf16>
    %c192_264 = arith.constant 192 : index
    %c0_265 = arith.constant 0 : index
    %280 = vector.load %arg11[%c192_264, %c0_265] : memref<200x144xbf16, #tpu.memory_space<vmem>>, vector<8x144xbf16>
    tpu.vector_store %arg11[%c192_264, %c0_265], %279 {strides = array<i32>} : memref<200x144xbf16, #tpu.memory_space<vmem>>, vector<8x144xbf16>,
    %c4 = arith.constant 4 : index
    %c0_266 = arith.constant 0 : index
    %c0_267 = arith.constant 0 : index
    %281 = vector.load %arg7[%c4, %c0_266, %c0_267] : memref<5x3x200xbf16, #tpu.memory_space<vmem>>, vector<1x3x200xbf16>
    %282 = vector.shape_cast %281 : vector<1x3x200xbf16> to vector<3x200xbf16>
    %c0_268 = arith.constant 0 : index
    %c0_269 = arith.constant 0 : index
    %283 = vector.load %arg11[%c0_268, %c0_269] : memref<200x144xbf16, #tpu.memory_space<vmem>>, vector<200x144xbf16>
    %cst_270 = arith.constant dense<0.000000e+00> : vector<3x144xf32>
    %284 = tpu.matmul %282, %283, %cst_270 {dimension_numbers = #tpu.dot_dimension_numbers<[1], [0], [0], [1], [0, 0, 1, 1], [], []>} : vector<3x200xbf16>, vector<200x144xbf16>, vector<3x144xf32> -> vector<3x144xf32>
    %285 = arith.addf %228, %284 : vector<3x144xf32>
    %c0_271 = arith.constant 0 : index
    %c0_272 = arith.constant 0 : index
    %286 = vector.load %arg8[%c0_271, %c0_272] : memref<3x1xf32, #tpu.memory_space<vmem>>, vector<3x1xf32>
    %287 = vector.broadcast %286 : vector<3x1xf32> to vector<3x144xf32>
    %288 = arith.mulf %285, %287 : vector<3x144xf32>
    %c0_273 = arith.constant 0 : index
    %c0_274 = arith.constant 0 : index
    %289 = vector.load %arg9[%c0_273, %c0_274] : memref<3x1xf32, #tpu.memory_space<vmem>>, vector<3x1xf32>
    %290 = vector.broadcast %289 : vector<3x1xf32> to vector<3x144xf32>
    %291 = arith.addf %288, %290 : vector<3x144xf32>
    %292 = math.tanh %291 : vector<3x144xf32>
    %c0_275 = arith.constant 0 : index
    %c0_276 = arith.constant 0 : index
    %c0_277 = arith.constant 0 : index
    %c0_278 = arith.constant 0 : index
    %293 = vector.load %arg10[%c0_275, %c0_276, %c0_277, %c0_278] : memref<1x1x3x144xf32, #tpu.memory_space<vmem>>, vector<1x1x3x144xf32>
    %294 = vector.shape_cast %293 : vector<1x1x3x144xf32> to vector<3x144xf32>
    %295 = vector.shape_cast %292 : vector<3x144xf32> to vector<1x1x3x144xf32>
    tpu.vector_store %arg10[%c0_275, %c0_276, %c0_277, %c0_278], %295 {strides = array<i32>} : memref<1x1x3x144xf32, #tpu.memory_space<vmem>>, vector<1x1x3x144xf32>,
    return
  }
  func.func @transform_0(%arg0: i32, %arg1: i32) -> (i32, i32, i32, i32) {
    %c0_i32 = arith.constant 0 : i32
    %0 = arith.addi %arg1, %c0_i32 : i32
    %c0_i32_0 = arith.constant 0 : i32
    %c0_i32_1 = arith.constant 0 : i32
    %c0_i32_2 = arith.constant 0 : i32
    return %arg0, %0, %c0_i32_0, %c0_i32_1 : i32, i32, i32, i32
  }
  func.func @transform_1(%arg0: i32, %arg1: i32) -> (i32, i32, i32, i32) {
    %c1_i32 = arith.constant 1 : i32
    %0 = arith.addi %arg1, %c1_i32 : i32
    %c0_i32 = arith.constant 0 : i32
    %c0_i32_0 = arith.constant 0 : i32
    %c0_i32_1 = arith.constant 0 : i32
    return %arg0, %0, %c0_i32, %c0_i32_0 : i32, i32, i32, i32
  }
  func.func @transform_2(%arg0: i32, %arg1: i32) -> (i32, i32, i32, i32) {
    %c2_i32 = arith.constant 2 : i32
    %0 = arith.addi %arg1, %c2_i32 : i32
    %c0_i32 = arith.constant 0 : i32
    %c0_i32_0 = arith.constant 0 : i32
    %c0_i32_1 = arith.constant 0 : i32
    return %arg0, %0, %c0_i32, %c0_i32_0 : i32, i32, i32, i32
  }
  func.func @transform_3(%arg0: i32, %arg1: i32) -> (i32, i32, i32, i32) {
    %c3_i32 = arith.constant 3 : i32
    %0 = arith.addi %arg1, %c3_i32 : i32
    %c0_i32 = arith.constant 0 : i32
    %c0_i32_0 = arith.constant 0 : i32
    %c0_i32_1 = arith.constant 0 : i32
    return %arg0, %0, %c0_i32, %c0_i32_0 : i32, i32, i32, i32
  }
  func.func @transform_4(%arg0: i32, %arg1: i32) -> (i32, i32, i32, i32) {
    %c4_i32 = arith.constant 4 : i32
    %0 = arith.addi %arg1, %c4_i32 : i32
    %c0_i32 = arith.constant 0 : i32
    %c0_i32_0 = arith.constant 0 : i32
    %c0_i32_1 = arith.constant 0 : i32
    return %arg0, %0, %c0_i32, %c0_i32_0 : i32, i32, i32, i32
  }
  func.func @transform_5(%arg0: i32, %arg1: i32) -> (i32, i32, i32) {
    %c0_i32 = arith.constant 0 : i32
    %c0_i32_0 = arith.constant 0 : i32
    %c0_i32_1 = arith.constant 0 : i32
    %c0_i32_2 = arith.constant 0 : i32
    return %c0_i32, %c0_i32_0, %c0_i32_1 : i32, i32, i32
  }
  func.func @transform_6(%arg0: i32, %arg1: i32) -> (i32, i32) {
    %c0_i32 = arith.constant 0 : i32
    %c0_i32_0 = arith.constant 0 : i32
    %c0_i32_1 = arith.constant 0 : i32
    return %c0_i32, %c0_i32_0 : i32, i32
  }
  func.func @transform_7(%arg0: i32, %arg1: i32) -> (i32, i32) {
    %c0_i32 = arith.constant 0 : i32
    %c0_i32_0 = arith.constant 0 : i32
    %c0_i32_1 = arith.constant 0 : i32
    return %c0_i32, %c0_i32_0 : i32, i32
  }
  func.func @transform_8(%arg0: i32, %arg1: i32) -> (i32, i32, i32, i32) {
    %c0_i32 = arith.constant 0 : i32
    %c0_i32_0 = arith.constant 0 : i32
    %c0_i32_1 = arith.constant 0 : i32
    return %arg0, %arg1, %c0_i32, %c0_i32_0 : i32, i32, i32, i32
  }
}

</mosaic_0001>

<bundles_post_ra>
// kernel: decoder_video_forward.6
= control target key start
LH: loop header
LB: loop body
LE: loop exit
PB: predicated region body
PF: predicated region fallthrough
CT: control target
= control target key end

     0   :  { %s2590_s27 = smov 0   ;;  %s2592_s28 = smov 0   ;;  %s3427_s0 = inlined_call_operand.vmem [shape: bf16[2,8,4,196], index: 0, kind: input, shape index: {}, may-alias: {0,1,2,3,4}]   ;;  %s3428_s1 = inlined_call_operand.vmem [shape: bf16[2,8,4,196], index: 1, kind: input, shape index: {}, may-alias: {0,1,2,3,4}]   ;;  %s3429_s2 = inlined_call_operand.vmem [shape: bf16[2,8,4,196], index: 2, kind: input, shape index: {}, may-alias: {0,1,2,3,4}]   ;;  %s3430_s3 = inlined_call_operand.vmem [shape: bf16[2,8,4,196], index: 3, kind: input, shape index: {}, may-alias: {0,1,2,3,4}]   ;;  %s3431_s4 = inlined_call_operand.vmem [shape: bf16[2,8,4,196], index: 4, kind: input, shape index: {}, may-alias: {0,1,2,3,4}]   ;;  %s3432_s5 = inlined_call_operand.vmem [shape: bf16[5,8,100], index: 5, kind: input, shape index: {}]   ;;  %s3433_s6 = inlined_call_operand.vmem [shape: f32[8,1], index: 6, kind: input, shape index: {}]   ;;  %s3434_s7 = inlined_call_operand.vmem [shape: f32[8,1], index: 7, kind: input, shape index: {}]   ;;  %s3435_s8 = inlined_call_operand.vmem [shape: f32[2,4,8,144], index: 8, kind: output, shape index: {}]  }
   0x1   :  { %3504 = sst [smem:[#allocation9_spill]] %s3427_s0  ;;  %s2594_s29 = smov 0  }
   0x2   :  { %3505 = sst [smem:[#allocation10_spill]] %s3428_s1  ;;  %s2596_s30 = smov 0  }
   0x3   :  { %3506 = sst [smem:[#allocation11_spill]] %s3429_s2  ;;  %s2598_s9 = smov 0  }
   0x4   :  { %3507 = sst [smem:[#allocation12_spill]] %s3430_s3 }
   0x5   :  { %3508 = sst [smem:[#allocation13_spill]] %s3432_s5 }
   0x6   :  { %3509 = sst [smem:[#allocation14_spill]] %s3433_s6 }
   0x7   :  { %3510 = sst [smem:[#allocation15_spill]] %s3434_s7 }
   0x8   :  { %3511 = sst [smem:[#allocation16_spill]] %s3435_s8 }
   0x9 LB: > { %3512 = sst [smem:[#allocation3_spill]] %s2509_s29  ;;  %s27_s10 = sadd.s32 1, %s2509_s29  ;;  %s2517_s9 = sphi %s2598_s9, %s18_s9   ;;  %s2513_s30 = sphi %s2596_s30, %s3612_s30   ;;  %s2509_s29 = sphi %s2594_s29, %s3611_s29   ;;  %s2505_s28 = sphi %s2592_s28, %s3610_s28   ;;  %s2501_s27 = sphi %s2590_s27, %s3609_s27  }
   0xa   : > { %3513 = sst [smem:[#allocation4_spill]] %s2513_s30  ;;  %s30_s11 = sadd.s32 1, %s2513_s30 }
   0xb   : > { %3514 = sst [smem:[#allocation5_spill]] %s2517_s9  ;;  %p28_p0 = scmp.ge.s32.totalorder %s27_s10, 4 }
   0xc   : > { %p2212_p1 = scmp.ge.s32.totalorder %s2517_s9, 1  ;;  %p362_p2 = scmp.lt.s32.totalorder %s2517_s9, 9 }
   0xd   : > { %s3614_s10 = smov (%p28_p0, %s27_s10), 0  ;;  %s3616_s11 = smov (!%p28_p0, %s30_s11), %s2513_s30 }
   0xe   : > { %3515 = sst [smem:[#allocation6_spill]] %s3614_s10  ;;  %p363_p3 = pnand %p2212_p1, %p362_p2 }
   0xf   : > { %p32_p4 = scmp.ge.s32.totalorder %s3616_s11, 2 }
  0x10   : > { %366 = sbr.rel (%p363_p3) target bundleno = 628 (0x274), region = 52 }
  0x11   : > { %s3618_s11 = smov (%p32_p4, %s3616_s11), 0 }
  0x12   : > { %3516 = sst [smem:[#allocation7_spill]] %s3618_s11 }
  0x17   : > { %p444_p5 = scmp.lt.s32.totalorder %s2505_s28, 1  ;;  %p446_p6 = scmp.lt.s32.totalorder %s2501_s27, 7  ;;  %v512_v0 = vlaneseq  ;;  %v2519_v1 = vmov 1983009808   ;;  %vm3489_vm0 = vcmask 1041408   ;;  %vm518_vm1 = vcmask 128004  }
  0x18   : > { %v510_v2 = vunpack.c.l.s4 %v2519_v1  ;;  %s3518_s0 = sld [smem:[#allocation9_spill]]  ;;  %s453_s20 = sadd.s32 1, %s2501_s27  ;;  %vm2640_vm2 = vmor %vm518_vm1, %vm3489_vm0  ;;  %vm3501_vm3 = vcmask 1014784   ;;  %vm3496_vm4 = vcmask 1031168   ;;  %vm535_vm5 = vcmask 1043458  }
  0x19   : > { %s3620_s28 = smov (!%p444_p5, %s2505_s28), 1  ;;  %v513_v3 = vshrl.u32 %v512_v0, 7  ;;  %p456_p7 = scmp.lt.s32.totalorder %s453_s20, 7  ;;  %vm536_vm6 = vcmask 130054   ;;  %vm3494_vm7 = vcmask 941056   ;;  %vm3497_vm8 = vcmask 1039360  }
  0x1a   : > { %3517 = sst [smem:[#allocation8_spill]] %s3620_s28  ;;  %v511_v4 = vunpack.c.0.s8 %v510_v2  ;;  %s2627_s13 = sshll.u32 %s3620_s28, 4  ;;  %vm2798_vm9 = vmor %vm536_vm6, %vm535_vm5  ;;  %vm584_vm10 = vcmask 924672   ;;  %vm3491_vm11 = vcmask 949248   ;;  %vm3490_vm12 = vcmask 1022976  }
  0x1b   : > { %s447_s12 = scalar_select %p446_p6, %s2501_s27, 7  ;;  %vm3493_vm13 = vcmask 932864   ;;  %v2544_v45 = vmov 0   ;;  %vm3495_vm14 = vcmask 850944   ;;  %vm591_vm15 = vcmask 916480  }
  0x1c   : > { %v2630_v5 = vsub.s32 %v511_v4, %v513_v3  ;;  %s3454_s21 = smov 124   ;;  %s3452_s22 = smov 126   ;;  %999 = vmatprep.mubr.bf16.mxu1 %v2544_v45  ;;  %1407 = vmatprep.mubr.bf16.mxu0 %v2544_v45  ;;  %vm3498_vm1 = vcmask 842752   ;;  %vm3502_vm5 = vcmask 826368   ;;  %vm3500_vm6 = vcmask 834560  }
  0x1d   : > { %s2213_s14 = sshll.u32 %s447_s12, 1  ;;  %s3622_s20 = smov (!%p456_p7, %s453_s20), 7  ;;  %2397 = vset.pattern.permute.xlu0 %v2544_v45  ;;  %2398 = vset.pattern.permute.xlu1 %v2544_v45  ;;  %vm3492_vm0 = vcmask 752640  }
  0x1e   : > { %s450_s15 = sadd.s32 %s2627_s13, %s2213_s14  ;;  %s2216_s23 = sshll.u32 %s3622_s20, 1 }
  0x1f   : > { %s2215_s16 = sshll.u32 %s450_s15, 1  ;;  %s3478_s24 = smov 115  }
  0x20   : > { %s452_s19 = scalar_lea.vmem %s3518_s0, %s2215_s16  ;;  %s3436_s25 = smov 127  }
  0x21   : > { %v507_v6 = vld [vmem:[%s452_s19] sm:$0xf]  ;;  %s460_s26 = sadd.s32 %s2216_s23, %s2627_s13  ;;  %s3521_s1 = sld [smem:[#allocation10_spill]] }
  0x22   : > { %v2636_v7 = vrot.slane %v507_v6, %v2630_v5  ;;  %v521_v8 = vcombine.low %v507_v6, %v507_v6  ;;  %s2218_s12 = sshll.u32 %s460_s26, 1  ;;  %s3460_s17 = smov 113  }
  0x23   : > { %s3450_s18 = smov 116   ;;  %s3446_s19 = smov 125  }
  0x24   : > { %553 = vrot.lane.b32.xlu1 %v2636_v7, %s3454_s21  ;;  %539 = vrot.lane.b32.xlu0 %v2636_v7, %s3452_s22  ;;  %v2649_v10 = vrot.slane %v521_v8, %v2630_v5  ;;  %520 = vst.msk [vmem:[#allocation2] sm:$0x33] %vm2640_vm2, %v2636_v7  ;;  %s3456_s20 = smov 114   ;;  %s3438_s23 = smov 104  }
  0x25   : > { %s3462_s26 = smov 112   ;;  %s464_s14 = sadd.s32 2, %s2501_s27 }
  0x26   : > { %s3440_s15 = smov 101   ;;  %p467_p8 = scmp.lt.s32.totalorder %s464_s14, 7 }
  0x27   : > { %s462_s16 = scalar_lea.vmem %s3521_s1, %s2218_s12  ;;  %s3458_s12 = smov 103  }
  0x28   : > { %567 = vrot.lane.b32.xlu1 %v2636_v7, %s3478_s24  ;;  %529 = vrot.lane.b32.xlu0 %v2649_v10, %s3436_s25  ;;  %v714_v11 = vld [vmem:[%s462_s16] sm:$0xf]  ;;  %s3442_s16 = smov 102   ;;  %s3624_s14 = smov (!%p467_p8, %s464_s14), 7 }
  0x29   : > { %v725_v12 = vcombine.low %v714_v11, %v714_v11  ;;  %v2678_v14 = vrot.slane %v714_v11, %v2630_v5  ;;  %s3522_s2 = sld [smem:[#allocation11_spill]]  ;;  %s3534_s0 = smov 91  }
  0x2a   : > { %s3535_s1 = smov 88   ;;  %s3538_s11 = smov 113  }
  0x2b   : > { %v2675_v13 = vrot.slane %v725_v12, %v2630_v5  ;;  %s3541_s10 = smov 80   ;;  %s475_s30 = sadd.s32 3, %s2501_s27 }
  0x2c   : > { %581 = vrot.lane.b32.xlu1 %v2636_v7, %s3460_s17  ;;  %560 = vrot.lane.b32.xlu0 %v2649_v10, %s3450_s18  ;;  %s3542_s29 = smov 77   ;;  %s3543_s9 = smov 78  }
  0x2d   : > { %p478_p9 = scmp.lt.s32.totalorder %s475_s30, 7  ;;  %s3546_s28 = smov 76  }
  0x2e   : > { %s3547_s7 = smov 90   ;;  %s3548_s3 = sld [smem:[#allocation12_spill]] }
  0x2f   : > { %s3626_s30 = smov (!%p478_p9, %s475_s30), 7  ;;  %p499_p11 = scmp.lt.s32.totalorder %s2501_s27, 3 }
  0x30   : > { %546 = vrot.lane.b32.xlu1 %v2649_v10, %s3446_s19  ;;  %574 = vrot.lane.b32.xlu0 %v2649_v10, %s3456_s20  ;;  %s2222_s8 = sshll.u32 %s3626_s30, 1 }
  0x31   : > { %s482_s5 = sadd.s32 %s2222_s8, %s2627_s13 }
  0x32   : > { %s2224_s30 = sshll.u32 %s482_s5, 1 }
  0x34   : > { %595 = vrot.lane.b32.xlu1 %v2636_v7, %s3438_s23  ;;  %588 = vrot.lane.b32.xlu0 %v2649_v10, %s3462_s26  ;;  %s3448_s23 = smov 100   ;;  %s484_s6 = scalar_lea.vmem %s3548_s3, %s2224_s30 }
  0x35   : > { %v1418_v52 = vld [vmem:[%s484_s6] sm:$0xf]  ;;  %s3549_s6 = smov 115   ;;  %s486_s30 = sadd.s32 4, %s2501_s27 }
  0x36   : > { %v1429_v57 = vcombine.low %v1418_v52, %v1418_v52  ;;  %v2870_v0 = vrot.slane %v1418_v52, %v2630_v5  ;;  %p489_p10 = scmp.lt.s32.totalorder %s486_s30, 7  ;;  %s3630_s27 = smov (!%p499_p11, %s2501_s27), 3 }
  0x38   : > { %733 = vrot.lane.b32.xlu1 %v2675_v13, %s3436_s25  ;;  %602 = vrot.lane.b32.xlu0 %v2649_v10, %s3458_s12  ;;  %s3444_s25 = smov 92   ;;  %v2873_v1 = vrot.slane %v1429_v57, %v2630_v5  ;;  %s3628_s30 = smov (!%p489_p10, %s486_s30), 7 }
  0x39   : > { %s2225_s5 = sshll.u32 %s3628_s30, 1 }
  0x3a   : > { %s493_s8 = sadd.s32 %s2225_s5, %s2627_s13 }
  0x3c   : > { %745 = vrot.lane.b32.xlu1 %v2675_v13, %s3446_s19  ;;  %739 = vrot.lane.b32.xlu0 %v2678_v14, %s3452_s22  ;;  %s3482_s19 = smov 90   ;;  %s3523_s22 = smov 104  }
  0x40   : > { %616 = vrot.lane.b32.xlu1 %v2649_v10, %s3440_s15  ;;  %609 = vrot.lane.b32.xlu0 %v2636_v7, %s3442_s16  ;;  %s2219_s15 = sshll.u32 %s3624_s14, 1 }
  0x41   : > { %s471_s16 = sadd.s32 %s2219_s15, %s2627_s13  ;;  %s3466_s15 = smov 80  }
  0x42   : > { %s2227_s13 = sshll.u32 %s493_s8, 1 }
  0x43   : > { %s495_s3 = scalar_lea.vmem %s3431_s4, %s2227_s13 }
  0x44   : > { %630 = vrot.lane.b32.xlu1 %v2649_v10, %s3444_s25  ;;  %623 = vrot.lane.b32.xlu0 %v2636_v7, %s3448_s23  ;;  %s2221_s25 = sshll.u32 %s471_s16, 1  ;;  %s3476_s23 = smov 91  }
  0x45   : > { %s473_s14 = scalar_lea.vmem %s3522_s2, %s2221_s25  ;;  %s3524_s25 = smov 126  }
  0x46   : > { %v1123_v15 = vld [vmem:[%s473_s14] sm:$0xf]  ;;  %s3526_s16 = smov 125   ;;  %s3470_s14 = smov 78  }
  0x47   : > { %v1134_v16 = vcombine.low %v1123_v15, %v1123_v15  ;;  %v2726_v17 = vrot.slane %v1123_v15, %v2630_v5  ;;  %s3537_s2 = smov 112  }
  0x48   : > { %757 = vrot.lane.b32.xlu1 %v2675_v13, %s3450_s18  ;;  %751 = vrot.lane.b32.xlu0 %v2678_v14, %s3454_s21  ;;  %s3468_s21 = smov 88   ;;  %s3525_s18 = smov 127  }
  0x49   : > { %v2729_v18 = vrot.slane %v1134_v16, %v2630_v5 }
  0x4c   : > { %769 = vrot.lane.b32.xlu1 %v2675_v13, %s3456_s20  ;;  %763 = vrot.lane.b32.xlu0 %v2678_v14, %s3478_s24  ;;  %s3464_s20 = smov 89  }
  0x50   : > { %644 = vrot.lane.b32.xlu1 %v2649_v10, %s3482_s19  ;;  %637 = vrot.lane.b32.xlu0 %v2636_v7, %s3476_s23  ;;  %s3533_s23 = smov 114  }
  0x54   : > { %658 = vrot.lane.b32.xlu1 %v2649_v10, %s3468_s21  ;;  %651 = vrot.lane.b32.xlu0 %v2636_v7, %s3464_s20  ;;  %s3528_s20 = smov 100   ;;  %s3530_s21 = smov 124  }
  0x58   : > { %781 = vrot.lane.b32.xlu1 %v2675_v13, %s3462_s26  ;;  %775 = vrot.lane.b32.xlu0 %v2678_v14, %s3460_s17  ;;  %s3527_s17 = smov 102   ;;  %s3474_s26 = smov 77  }
  0x5c   : > { %793 = vrot.lane.b32.xlu1 %v2675_v13, %s3458_s12  ;;  %787 = vrot.lane.b32.xlu0 %v2678_v14, %s3523_s22  ;;  %s3472_s12 = smov 79  }
  0x60   : > { %1148 = vrot.lane.b32.xlu1 %v2726_v17, %s3524_s25  ;;  %1142 = vrot.lane.b32.xlu0 %v2729_v18, %s3525_s18 }
  0x64   : > { %665 = vrot.lane.b32.xlu1 %v2636_v7, %s3466_s15  ;;  %1154 = vrot.lane.b32.xlu0 %v2729_v18, %s3526_s16  ;;  %s3529_s15 = smov 101  }
  0x68   : > { %679 = vrot.lane.b32.xlu1 %v2636_v7, %s3470_s14  ;;  %672 = vrot.lane.b32.xlu0 %v2649_v10, %s3472_s12  ;;  %s3531_s14 = smov 92   ;;  %s3532_s12 = smov 116  }
  0x6c   : > { %799 = vrot.lane.b32.xlu1 %v2678_v14, %s3527_s17  ;;  %686 = vrot.lane.b32.xlu0 %v2649_v10, %s3474_s26  ;;  %s3480_s26 = smov 76  }
  0x70   : > { %811 = vrot.lane.b32.xlu1 %v2678_v14, %s3528_s20  ;;  %805 = vrot.lane.b32.xlu0 %v2675_v13, %s3529_s15 }
  0x74   : > { %1160 = vrot.lane.b32.xlu1 %v2726_v17, %s3530_s21  ;;  %817 = vrot.lane.b32.xlu0 %v2675_v13, %s3531_s14 }
  0x78   : > { %1172 = vrot.lane.b32.xlu1 %v2726_v17, %s3478_s24  ;;  %1166 = vrot.lane.b32.xlu0 %v2729_v18, %s3532_s12  ;;  %s3536_s24 = smov 89  }
  0x7c   : > { %693 = vrot.lane.b32.xlu1 %v2636_v7, %s3480_s26  ;;  %1178 = vrot.lane.b32.xlu0 %v2729_v18, %s3533_s23  ;;  %s3539_s26 = smov 103  }
  0x80   : > { %829 = vrot.lane.b32.xlu1 %v2675_v13, %s3482_s19  ;;  %823 = vrot.lane.b32.xlu0 %v2678_v14, %s3534_s0  ;;  %s3540_s19 = smov 79  }
  0x84   : > { %841 = vrot.lane.b32.xlu1 %v2675_v13, %s3535_s1  ;;  %835 = vrot.lane.b32.xlu0 %v2678_v14, %s3536_s24 }
  0x88   : > { %1190 = vrot.lane.b32.xlu1 %v2729_v18, %s3537_s2  ;;  %1184 = vrot.lane.b32.xlu0 %v2726_v17, %s3538_s11 }
  0x8c   : > { %1202 = vrot.lane.b32.xlu1 %v2729_v18, %s3539_s26  ;;  %1196 = vrot.lane.b32.xlu0 %v2726_v17, %s3523_s22 }
  0x90   : > { %853 = vrot.lane.b32.xlu1 %v2675_v13, %s3540_s19  ;;  %847 = vrot.lane.b32.xlu0 %v2678_v14, %s3541_s10 }
  0x94   : > { %865 = vrot.lane.b32.xlu1 %v2675_v13, %s3542_s29  ;;  %859 = vrot.lane.b32.xlu0 %v2678_v14, %s3543_s9 }
  0x96   : > { %v554_v19 = vpop.permute.xlu1 %553  ;;  %v540_v20 = vpop.permute.xlu0 %539 }
  0x97   : > { %v555_v21 = vrot.slane %v554_v19, 4  ;;  %v541_v22 = vrot.slane %v540_v20, 4 }
  0x98   : > { %1214 = vrot.lane.b32.xlu1 %v2729_v18, %s3529_s15  ;;  %1208 = vrot.lane.b32.xlu0 %v2726_v17, %s3527_s17 }
  0x99   : > { %v557_v23 = vsel %vm3501_vm3, %v554_v19, %v555_v21  ;;  %v543_v24 = vsel %vm3496_vm4, %v540_v20, %v541_v22 }
  0x9a   : > { %559 = vst.msk [vmem:[#allocation2 + $0x10] sm:$0x33] %vm2640_vm2, %v557_v23  ;;  %545 = vst.msk [vmem:[#allocation2 + $0x8] sm:$0x33] %vm2640_vm2, %v543_v24  ;;  %v568_v25 = vpop.permute.xlu1 %567  ;;  %v530_v26 = vpop.permute.xlu0 %529 }
  0x9b   : > { %v569_v27 = vrot.slane %v568_v25, 4  ;;  %v531_v29 = vrot.slane %v530_v26, 4 }
  0x9c   : > { %1226 = vrot.lane.b32.xlu1 %v2729_v18, %s3531_s14  ;;  %1220 = vrot.lane.b32.xlu0 %v2726_v17, %s3528_s20 }
  0x9d   : > { %v571_v30 = vsel %vm3494_vm7, %v568_v25, %v569_v27  ;;  %v533_v31 = vsel %vm3497_vm8, %v530_v26, %v531_v29 }
  0x9e   : > { %573 = vst.msk [vmem:[#allocation2 + $0x18] sm:$0x33] %vm2640_vm2, %v571_v30  ;;  %v582_v32 = vpop.permute.xlu1 %581  ;;  %v561_v33 = vpop.permute.xlu0 %560 }
  0x9f   : > { %538 = vst.msk [vmem:[#allocation2] sm:$0xcc] %vm2798_vm9, %v533_v31  ;;  %v583_v34 = vrot.slane %v582_v32, 4  ;;  %v562_v35 = vrot.slane %v561_v33, 4 }
  0xa0   : > { %871 = vrot.lane.b32.xlu0 %v2678_v14, %s3546_s28  ;;  %1232 = vrot.lane.b32.xlu1 %v2726_v17, %s3534_s0 }
  0xa1   : > { %v585_v36 = vsel %vm584_vm10, %v582_v32, %v583_v34  ;;  %v564_v37 = vsel %vm3491_vm11, %v561_v33, %v562_v35 }
  0xa2   : > { %587 = vst.msk [vmem:[#allocation2 + $0x20] sm:$0x33] %vm2640_vm2, %v585_v36  ;;  %v547_v38 = vpop.permute.xlu1 %546  ;;  %v575_v39 = vpop.permute.xlu0 %574 }
  0xa3   : > { %566 = vst.msk [vmem:[#allocation2 + $0x10] sm:$0xcc] %vm2798_vm9, %v564_v37  ;;  %v548_v40 = vrot.slane %v547_v38, 4  ;;  %v576_v41 = vrot.slane %v575_v39, 4 }
  0xa4   : > { %1238 = vrot.lane.b32.xlu0 %v2729_v18, %s3547_s7  ;;  %1244 = vrot.lane.b32.xlu1 %v2726_v17, %s3536_s24 }
  0xa5   : > { %v550_v42 = vsel %vm3490_vm12, %v547_v38, %v548_v40  ;;  %v578_v43 = vsel %vm3493_vm13, %v575_v39, %v576_v41 }
  0xa6   : > { %v2829_v44 = vld [vmem:[#allocation2] sm:$0xff]  ;;  %552 = vst.msk [vmem:[#allocation2 + $0x8] sm:$0xcc] %vm2798_vm9, %v550_v42  ;;  %580 = vst.msk [vmem:[#allocation2 + $0x18] sm:$0xcc] %vm2798_vm9, %v578_v43  ;;  %v596_v46 = vpop.permute.xlu1 %595  ;;  %v589_v47 = vpop.permute.xlu0 %588 }
  0xa7   : > { %724 = vst.msk [vmem:[#allocation2] sm:$0x33] %vm2640_vm2, %v2678_v14  ;;  %v597_v48 = vrot.slane %v596_v46, 4  ;;  %v590_v49 = vrot.slane %v589_v47, 4 }
  0xa8   : > { %1250 = vrot.lane.b32.xlu0 %v2729_v18, %s3535_s1  ;;  %1256 = vrot.lane.b32.xlu1 %v2726_v17, %s3541_s10 }
  0xa9   : > { %v599_v50 = vsel %vm3495_vm14, %v596_v46, %v597_v48  ;;  %v592_v51 = vsel %vm591_vm15, %v589_v47, %v590_v49 }
  0xaa   : > { %601 = vst.msk [vmem:[#allocation2 + $0x28] sm:$0x33] %vm2640_vm2, %v599_v50  ;;  %v734_v53 = vpop.permute.xlu1 %733  ;;  %v603_v54 = vpop.permute.xlu0 %602  ;;  %v2908_v29 = vld [vmem:[#allocation2 + $0x10] sm:$0xff] }
  0xab   : > { %594 = vst.msk [vmem:[#allocation2 + $0x20] sm:$0xcc] %vm2798_vm9, %v592_v51  ;;  %v735_v55 = vrot.slane %v734_v53, 4  ;;  %v604_v56 = vrot.slane %v603_v54, 4 }
  0xac   : > { %1262 = vrot.lane.b32.xlu0 %v2729_v18, %s3540_s19  ;;  %1268 = vrot.lane.b32.xlu1 %v2726_v17, %s3543_s9 }
  0xad   : > { %v736_v58 = vsel %vm3497_vm8, %v734_v53, %v735_v55  ;;  %v606_v59 = vsel %vm3498_vm1, %v603_v54, %v604_v56  ;;  %v2875_v2 = vld [vmem:[#allocation2 + $0x8] sm:$0xff]  ;;  %v2920_v35 = vld [vmem:[#allocation2 + $0x18] sm:$0xff] }
  0xae   : > { %738 = vst.msk [vmem:[#allocation2] sm:$0xcc] %vm2798_vm9, %v736_v58  ;;  %608 = vst.msk [vmem:[#allocation2 + $0x28] sm:$0xcc] %vm2798_vm9, %v606_v59  ;;  %v746_v60 = vpop.permute.xlu1 %745  ;;  %v740_v61 = vpop.permute.xlu0 %739 }
  0xaf   : > { %v747_v62 = vrot.slane %v746_v60, 4  ;;  %v741_v63 = vrot.slane %v740_v61, 4 }
  0xb0   : > { %1274 = vrot.lane.b32.xlu0 %v2729_v18, %s3542_s29  ;;  %1280 = vrot.lane.b32.xlu1 %v2726_v17, %s3546_s28 }
  0xb1   : > { %v748_v3 = vsel %vm3490_vm12, %v746_v60, %v747_v62  ;;  %v742_v4 = vsel %vm3496_vm4, %v740_v61, %v741_v63  ;;  %vm3499_vm12 = vcmask 818176  }
  0xb2   : > { %750 = vst.msk [vmem:[#allocation2 + $0x8] sm:$0xcc] %vm2798_vm9, %v748_v3  ;;  %v617_v6 = vpop.permute.xlu1 %616  ;;  %v610_v7 = vpop.permute.xlu0 %609  ;;  %v2953_v58 = vld [vmem:[#allocation2 + $0x20] sm:$0xff] }
  0xb3   : > { %744 = vst.msk [vmem:[#allocation2 + $0x8] sm:$0x33] %vm2640_vm2, %v742_v4  ;;  %v618_v8 = vrot.slane %v617_v6, 4  ;;  %v611_v10 = vrot.slane %v610_v7, 4 }
  0xb4   : > { %1437 = vrot.lane.b32.xlu0 %v2873_v1, %s3525_s18  ;;  %1443 = vrot.lane.b32.xlu1 %v2870_v0, %s3524_s25 }
  0xb5   : > { %v620_v11 = vsel %vm3502_vm5, %v617_v6, %v618_v8  ;;  %v613_v12 = vsel %vm3500_vm6, %v610_v7, %v611_v10  ;;  %v879_v20 = vld [vmem:[#allocation2] sm:$0xff]  ;;  %v2966_v4 = vld [vmem:[#allocation2 + $0x28] sm:$0xff] }
  0xb6   : > { %622 = vst.msk [vmem:[#allocation2 + $0x30] sm:$0xcc] %vm2798_vm9, %v620_v11  ;;  %v631_v13 = vpop.permute.xlu1 %630  ;;  %v624_v14 = vpop.permute.xlu0 %623 }
  0xb7   : > { %615 = vst.msk [vmem:[#allocation2 + $0x30] sm:$0x33] %vm2640_vm2, %v613_v12  ;;  %v632_v15 = vrot.slane %v631_v13, 4  ;;  %v625_v16 = vrot.slane %v624_v14, 4 }
  0xb8   : > { %1449 = vrot.lane.b32.xlu0 %v2873_v1, %s3526_s16  ;;  %1455 = vrot.lane.b32.xlu1 %v2870_v0, %s3530_s21 }
  0xb9   : > { %v634_v18 = vsel %vm3492_vm0, %v631_v13, %v632_v15  ;;  %v627_v19 = vsel %vm3499_vm12, %v624_v14, %v625_v16  ;;  %vm640_vm0 = vcmask 744448  }
  0xba   : > { %v880_v21 = vld [vmem:[#allocation2 + $0x8] sm:$0xff]  ;;  %636 = vst.msk [vmem:[#allocation2 + $0x38] sm:$0xcc] %vm2798_vm9, %v634_v18  ;;  %v758_v23 = vpop.permute.xlu1 %757  ;;  %v752_v24 = vpop.permute.xlu0 %751 }
  0xbb   : > { %v2403_v22 = vld [vmem:[#allocation2 + $0x4] ss:$8 sps:$4 sm:$0xff]   ;;  %629 = vst.msk [vmem:[#allocation2 + $0x38] sm:$0x33] %vm2640_vm2, %v627_v19  ;;  %v2232_v25 = vcombine.low %v879_v20, %v880_v21  ;;  %v759_v26 = vrot.slane %v758_v23, 4  ;;  %v753_v27 = vrot.slane %v752_v24, 4 }
  0xbc   : > { %1133 = vst.msk [vmem:[#allocation2] sm:$0x33] %vm2640_vm2, %v2726_v17  ;;  %967 = vmatprep.subr.bf16.mxu1 %v2403_v22  ;;  %1461 = vrot.lane.b32.xlu0 %v2873_v1, %s3532_s12  ;;  %v1713_v20 = vld [vmem:[%s495_s3] sm:$0xf] }
  0xbd   : > { %968 = vmatpush1.bf16.msra.mxu1 %v2232_v25  ;;  %v760_v30 = vsel %vm3491_vm11, %v758_v23, %v759_v26  ;;  %v754_v31 = vsel %vm3501_vm3, %v752_v24, %v753_v27  ;;  %1467 = vrot.lane.b32.xlu1 %v2870_v0, %s3549_s6  ;;  %vm647_vm11 = vcmask 736256  }
  0xbe   : > { %762 = vst.msk [vmem:[#allocation2 + $0x10] sm:$0xcc] %vm2798_vm9, %v760_v30  ;;  %v770_v17 = vpop.permute.xlu1 %769  ;;  %v764_v32 = vpop.permute.xlu0 %763 }
  0xbf   : > { %756 = vst.msk [vmem:[#allocation2 + $0x10] sm:$0x33] %vm2640_vm2, %v754_v31  ;;  %v771_v33 = vrot.slane %v770_v17, 4  ;;  %v765_v34 = vrot.slane %v764_v32, 4  ;;  %v1724_v31 = vcombine.low %v1713_v20, %v1713_v20 }
  0xc0   : > { %1473 = vrot.lane.b32.xlu0 %v2873_v1, %s3533_s23 }
  0xc1   : > { %v772_v36 = vsel %vm3493_vm13, %v770_v17, %v771_v33  ;;  %v766_v37 = vsel %vm3494_vm7, %v764_v32, %v765_v34  ;;  %1479 = vrot.lane.b32.xlu1 %v2870_v0, %s3538_s11  ;;  %vm661_vm13 = vcmask 719872   ;;  %vm654_vm7 = vcmask 728064  }
  0xc2   : > { %774 = vst.msk [vmem:[#allocation2 + $0x18] sm:$0xcc] %vm2798_vm9, %v772_v36  ;;  %v645_v38 = vpop.permute.xlu1 %644  ;;  %v638_v39 = vpop.permute.xlu0 %637 }
  0xc3   : > { %768 = vst.msk [vmem:[#allocation2 + $0x18] sm:$0x33] %vm2640_vm2, %v766_v37  ;;  %v646_v40 = vrot.slane %v645_v38, 4  ;;  %v639_v41 = vrot.slane %v638_v39, 4 }
  0xc4   : > { %1485 = vrot.lane.b32.xlu0 %v2873_v1, %s3537_s2 }
  0xc5   : > { %v648_v42 = vsel %vm647_vm11, %v645_v38, %v646_v40  ;;  %v641_v43 = vsel %vm640_vm0, %v638_v39, %v639_v41  ;;  %1491 = vrot.lane.b32.xlu1 %v2870_v0, %s3523_s22  ;;  %v3009_v38 = vld [vmem:[#allocation2 + $0x30] sm:$0xff]  ;;  %v3014_v39 = vrot.slane %v1724_v31, %v2630_v5 }
  0xc6   : > { %650 = vst.msk [vmem:[#allocation2 + $0x40] sm:$0xcc] %vm2798_vm9, %v648_v42  ;;  %v659_v46 = vpop.permute.xlu1 %658  ;;  %v652_v47 = vpop.permute.xlu0 %651  ;;  %v3021_v42 = vrot.slane %v1713_v20, %v2630_v5  ;;  %v3032_v5 = vld [vmem:[#allocation2 + $0x38] sm:$0xff] }
  0xc7   : > { %643 = vst.msk [vmem:[#allocation2 + $0x40] sm:$0x33] %vm2640_vm2, %v641_v43  ;;  %v660_v48 = vrot.slane %v659_v46, 4  ;;  %v653_v49 = vrot.slane %v652_v47, 4 }
  0xc8   : > { %1497 = vrot.lane.b32.xlu0 %v2873_v1, %s3539_s26 }
  0xc9   : > { %v662_v50 = vsel %vm661_vm13, %v659_v46, %v660_v48  ;;  %v655_v51 = vsel %vm654_vm7, %v652_v47, %v653_v49  ;;  %1503 = vrot.lane.b32.xlu1 %v2870_v0, %s3527_s17 }
  0xca   : > { %v2405_v52 = vld [vmem:[#allocation2 + $0x14] ss:$8 sps:$4 sm:$0xff]   ;;  %v2407_v53 = vld [vmem:[#allocation2 + $0x10] ss:$8 sps:$4 sm:$0xff]   ;;  %664 = vst.msk [vmem:[#allocation2 + $0x48] sm:$0xcc] %vm2798_vm9, %v662_v50  ;;  %v782_v54 = vpop.permute.xlu1 %781  ;;  %v776_v55 = vpop.permute.xlu0 %775 }
  0xcb   : > { %657 = vst.msk [vmem:[#allocation2 + $0x48] sm:$0x33] %vm2640_vm2, %v655_v51  ;;  %v783_v56 = vrot.slane %v782_v54, 4  ;;  %v777_v57 = vrot.slane %v776_v55, 4  ;;  %969 = vmatprep.subr.bf16.mxu1 %v2405_v52 }
  0xcc   : > { %1509 = vrot.lane.b32.xlu0 %v2873_v1, %s3529_s15  ;;  %970 = vmatpush1.bf16.msra.mxu1 %v2407_v53 }
  0xcd   : > { %v784_v59 = vsel %vm591_vm15, %v782_v54, %v783_v56  ;;  %v778_v60 = vsel %vm584_vm10, %v776_v55, %v777_v57  ;;  %1515 = vrot.lane.b32.xlu1 %v2870_v0, %s3528_s20 }
  0xce   : > { %786 = vst.msk [vmem:[#allocation2 + $0x20] sm:$0xcc] %vm2798_vm9, %v784_v59  ;;  %v794_v61 = vpop.permute.xlu1 %793  ;;  %v788_v62 = vpop.permute.xlu0 %787 }
  0xcf   : > { %780 = vst.msk [vmem:[#allocation2 + $0x20] sm:$0x33] %vm2640_vm2, %v778_v60  ;;  %v795_v63 = vrot.slane %v794_v61, 4  ;;  %v789_v3 = vrot.slane %v788_v62, 4 }
  0xd0   : > { %1521 = vrot.lane.b32.xlu0 %v2873_v1, %s3531_s14 }
  0xd1   : > { %v796_v6 = vsel %vm3498_vm1, %v794_v61, %v795_v63  ;;  %v790_v7 = vsel %vm3495_vm14, %v788_v62, %v789_v3  ;;  %1527 = vrot.lane.b32.xlu1 %v2870_v0, %s3534_s0  ;;  %vm668_vm14 = vcmask 654336   ;;  %vm675_vm1 = vcmask 646144  }
  0xd2   : > { %798 = vst.msk [vmem:[#allocation2 + $0x28] sm:$0xcc] %vm2798_vm9, %v796_v6  ;;  %v1149_v8 = vpop.permute.xlu1 %1148  ;;  %v1143_v10 = vpop.permute.xlu0 %1142 }
  0xd3   : > { %792 = vst.msk [vmem:[#allocation2 + $0x28] sm:$0x33] %vm2640_vm2, %v790_v7  ;;  %v1150_v11 = vrot.slane %v1149_v8, 4  ;;  %v1144_v12 = vrot.slane %v1143_v10, 4 }
  0xd4   : > { %1533 = vrot.lane.b32.xlu0 %v2873_v1, %s3547_s7 }
  0xd5   : > { %v1151_v13 = vsel %vm3496_vm4, %v1149_v8, %v1150_v11  ;;  %v1145_v14 = vsel %vm3497_vm8, %v1143_v10, %v1144_v12  ;;  %1539 = vrot.lane.b32.xlu1 %v2870_v0, %s3536_s24  ;;  %vm3550_vm4 = vcmask 1022976   ;;  %vm682_vm8 = vcmask 637952  }
  0xd6   : > { %1153 = vst.msk [vmem:[#allocation2 + $0x8] sm:$0x33] %vm2640_vm2, %v1151_v13  ;;  %v666_v15 = vpop.permute.xlu1 %665  ;;  %v1155_v16 = vpop.permute.xlu0 %1154 }
  0xd7   : > { %1147 = vst.msk [vmem:[#allocation2] sm:$0xcc] %vm2798_vm9, %v1145_v14  ;;  %v667_v18 = vrot.slane %v666_v15, 4  ;;  %v1156_v19 = vrot.slane %v1155_v16, 4 }
  0xd8   : > { %1545 = vrot.lane.b32.xlu0 %v2873_v1, %s3535_s1 }
  0xd9   : > { %v669_v21 = vsel %vm668_vm14, %v666_v15, %v667_v18  ;;  %v1157_v22 = vsel %vm3550_vm4, %v1155_v16, %v1156_v19  ;;  %1551 = vrot.lane.b32.xlu1 %v2870_v0, %s3541_s10  ;;  %vm689_vm4 = vcmask 629760  }
  0xda   : > { %v2408_v23 = vld [vmem:[#allocation2 + $0x24] ss:$8 sps:$4 sm:$0xff]   ;;  %v2410_v24 = vld [vmem:[#allocation2 + $0x20] ss:$8 sps:$4 sm:$0xff]   ;;  %671 = vst.msk [vmem:[#allocation2 + $0x50] sm:$0x33] %vm2640_vm2, %v669_v21  ;;  %v680_v25 = vpop.permute.xlu1 %679  ;;  %v673_v26 = vpop.permute.xlu0 %672 }
  0xdb   : > { %1159 = vst.msk [vmem:[#allocation2 + $0x8] sm:$0xcc] %vm2798_vm9, %v1157_v22  ;;  %v681_v27 = vrot.slane %v680_v25, 4  ;;  %v674_v30 = vrot.slane %v673_v26, 4  ;;  %971 = vmatprep.subr.bf16.mxu1 %v2408_v23  ;;  %v3074_v21 = vld [vmem:[#allocation2 + $0x40] sm:$0xff] }
  0xdc   : > { %1557 = vrot.lane.b32.xlu0 %v2873_v1, %s3540_s19  ;;  %972 = vmatpush1.bf16.msra.mxu1 %v2410_v24 }
  0xdd   : > { %v683_v17 = vsel %vm682_vm8, %v680_v25, %v681_v27  ;;  %v676_v32 = vsel %vm675_vm1, %v673_v26, %v674_v30  ;;  %1563 = vrot.lane.b32.xlu1 %v2870_v0, %s3543_s9  ;;  %v3084_v30 = vld [vmem:[#allocation2 + $0x48] sm:$0xff] }
  0xde   : > { %685 = vst.msk [vmem:[#allocation2 + $0x58] sm:$0x33] %vm2640_vm2, %v683_v17  ;;  %v800_v33 = vpop.permute.xlu1 %799  ;;  %v687_v34 = vpop.permute.xlu0 %686  ;;  %v1288_v43 = vld [vmem:[#allocation2] sm:$0xff] }
  0xdf   : > { %678 = vst.msk [vmem:[#allocation2 + $0x50] sm:$0xcc] %vm2798_vm9, %v676_v32  ;;  %v801_v36 = vrot.slane %v800_v33, 4  ;;  %v688_v37 = vrot.slane %v687_v34, 4 }
  0xe0   : > { %1569 = vrot.lane.b32.xlu0 %v2873_v1, %s3542_s29 }
  0xe1   : > { %v802_v40 = vsel %vm3500_vm6, %v800_v33, %v801_v36  ;;  %v690_v41 = vsel %vm689_vm4, %v687_v34, %v688_v37  ;;  %1575 = vrot.lane.b32.xlu1 %v2870_v0, %s3546_s28  ;;  %vm3552_vm6 = vcmask 941056  }
  0xe2   : > { %v1289_v46 = vld [vmem:[#allocation2 + $0x8] sm:$0xff]  ;;  %804 = vst.msk [vmem:[#allocation2 + $0x30] sm:$0x33] %vm2640_vm2, %v802_v40  ;;  %v812_v1 = vpop.permute.xlu1 %811  ;;  %v806_v48 = vpop.permute.xlu0 %805 }
  0xe3   : > { %v2412_v47 = vld [vmem:[#allocation2 + $0x4] ss:$8 sps:$4 sm:$0xff]   ;;  %692 = vst.msk [vmem:[#allocation2 + $0x58] sm:$0xcc] %vm2798_vm9, %v690_v41  ;;  %v2265_v49 = vcombine.low %v1288_v43, %v1289_v46  ;;  %v813_v50 = vrot.slane %v812_v1, 4  ;;  %v807_v51 = vrot.slane %v806_v48, 4 }
  0xe4   : > { %1428 = vst.msk [vmem:[#allocation2] sm:$0x33] %vm2640_vm2, %v2870_v0  ;;  %1375 = vmatprep.subr.bf16.mxu0 %v2412_v47  ;;  %1732 = vrot.lane.b32.xlu0 %v3014_v39, %s3525_s18 }
  0xe5   : > { %1376 = vmatpush1.bf16.msra.mxu0 %v2265_v49  ;;  %v814_v52 = vsel %vm3499_vm12, %v812_v1, %v813_v50  ;;  %v808_v53 = vsel %vm3502_vm5, %v806_v48, %v807_v51  ;;  %1738 = vrot.lane.b32.xlu1 %v3021_v42, %s3524_s25  ;;  %vm3551_vm12 = vcmask 752640  }
  0xe6   : > { %816 = vst.msk [vmem:[#allocation2 + $0x38] sm:$0x33] %vm2640_vm2, %v814_v52  ;;  %v1161_v0 = vpop.permute.xlu1 %1160  ;;  %v818_v54 = vpop.permute.xlu0 %817 }
  0xe7   : > { %810 = vst.msk [vmem:[#allocation2 + $0x30] sm:$0xcc] %vm2798_vm9, %v808_v53  ;;  %v1162_v55 = vrot.slane %v1161_v0, 4  ;;  %v819_v56 = vrot.slane %v818_v54, 4 }
  0xe8   : > { %1744 = vrot.lane.b32.xlu0 %v3014_v39, %s3526_s16 }
  0xe9   : > { %v1163_v57 = vsel %vm3501_vm3, %v1161_v0, %v1162_v55  ;;  %v820_v59 = vsel %vm3551_vm12, %v818_v54, %v819_v56  ;;  %1750 = vrot.lane.b32.xlu1 %v3021_v42, %s3530_s21  ;;  %vm3553_vm3 = vcmask 949248   ;;  %vm3503_vm12 = vcmask 621568   ;;  %v3118_v56 = vld [vmem:[#allocation2 + $0x50] sm:$0xff] }
  0xea   : > { %1165 = vst.msk [vmem:[#allocation2 + $0x10] sm:$0x33] %vm2640_vm2, %v1163_v57  ;;  %v1173_v60 = vpop.permute.xlu1 %1172  ;;  %v1167_v61 = vpop.permute.xlu0 %1166 }
  0xeb   : > { %822 = vst.msk [vmem:[#allocation2 + $0x38] sm:$0xcc] %vm2798_vm9, %v820_v59  ;;  %v1174_v62 = vrot.slane %v1173_v60, 4  ;;  %v1168_v63 = vrot.slane %v1167_v61, 4 }
  0xec   : > { %1756 = vrot.lane.b32.xlu0 %v3014_v39, %s3532_s12 }
  0xed   : > { %v1175_v3 = vsel %vm3552_vm6, %v1173_v60, %v1174_v62  ;;  %v1169_v6 = vsel %vm3553_vm3, %v1167_v61, %v1168_v63  ;;  %1762 = vrot.lane.b32.xlu1 %v3021_v42, %s3549_s6  ;;  %vm3554_vm3 = vcmask 932864   ;;  %vm3555_vm6 = vcmask 842752   ;;  %s3607_s6 = sld [smem:[#allocation16_spill]] }
  0xee   : > { %1177 = vst.msk [vmem:[#allocation2 + $0x18] sm:$0x33] %vm2640_vm2, %v1175_v3  ;;  %v694_v7 = vpop.permute.xlu1 %693  ;;  %v1179_v8 = vpop.permute.xlu0 %1178  ;;  %v3128_v3 = vld [vmem:[#allocation2 + $0x58] sm:$0xff] }
  0xef   : > { %1171 = vst.msk [vmem:[#allocation2 + $0x10] sm:$0xcc] %vm2798_vm9, %v1169_v6  ;;  %v695_v10 = vrot.slane %v694_v7, 4  ;;  %v1180_v11 = vrot.slane %v1179_v8, 4 }
  0xf0   : > { %1768 = vrot.lane.b32.xlu0 %v3014_v39, %s3533_s23  ;;  %s3603_s23 = sld [smem:[#allocation8_spill]] }
  0xf1   : > { %v697_v12 = vsel %vm3503_vm12, %v694_v7, %v695_v10  ;;  %v1181_v13 = vsel %vm3554_vm3, %v1179_v8, %v1180_v11  ;;  %1774 = vrot.lane.b32.xlu1 %v3021_v42, %s3538_s11  ;;  %vm3556_vm3 = vcmask 850944  }
  0xf2   : > { %v2414_v14 = vld [vmem:[#allocation2 + $0x34] ss:$8 sps:$4 sm:$0xff]   ;;  %v2416_v15 = vld [vmem:[#allocation2 + $0x30] ss:$8 sps:$4 sm:$0xff]   ;;  %699 = vst.msk [vmem:[#allocation2 + $0x60] sm:$0x33] %vm2640_vm2, %v697_v12  ;;  %v830_v16 = vpop.permute.xlu1 %829  ;;  %v824_v18 = vpop.permute.xlu0 %823 }
  0xf3   : > { %1183 = vst.msk [vmem:[#allocation2 + $0x18] sm:$0xcc] %vm2798_vm9, %v1181_v13  ;;  %v831_v19 = vrot.slane %v830_v16, 4  ;;  %v825_v20 = vrot.slane %v824_v18, 4  ;;  %973 = vmatprep.subr.bf16.mxu1 %v2414_v14 }
  0xf4   : > { %1780 = vrot.lane.b32.xlu0 %v3014_v39, %s3537_s2  ;;  %974 = vmatpush1.bf16.msra.mxu1 %v2416_v15  ;;  %s3560_s2 = sld [smem:[#allocation14_spill]] }
  0xf5   : > { %v832_v22 = vsel %vm647_vm11, %v830_v16, %v831_v19  ;;  %v826_v23 = vsel %vm640_vm0, %v824_v18, %v825_v20  ;;  %1786 = vrot.lane.b32.xlu1 %v3021_v42, %s3523_s22  ;;  %s2228_s22 = sshll.u32 %s3630_s27, 1 }
  0xf6   : > { %834 = vst.msk [vmem:[#allocation2 + $0x40] sm:$0xcc] %vm2798_vm9, %v832_v22  ;;  %v842_v24 = vpop.permute.xlu1 %841  ;;  %v836_v25 = vpop.permute.xlu0 %835  ;;  %s2229_s25 = sshll.u32 %s3603_s23, 3 }
  0xf7   : > { %828 = vst.msk [vmem:[#allocation2 + $0x40] sm:$0x33] %vm2640_vm2, %v826_v23  ;;  %v843_v26 = vrot.slane %v842_v24, 4  ;;  %v837_v27 = vrot.slane %v836_v25, 4  ;;  %s503_s18 = sadd.s32 %s2229_s25, %s2228_s22 }
  0xf8   : > { %1792 = vrot.lane.b32.xlu0 %v3014_v39, %s3539_s26 }
  0xf9   : > { %v844_v31 = vsel %vm661_vm13, %v842_v24, %v843_v26  ;;  %v838_v17 = vsel %vm654_vm7, %v836_v25, %v837_v27  ;;  %1798 = vrot.lane.b32.xlu1 %v3021_v42, %s3527_s17 }
  0xfa   : > { %v2417_v32 = vld [vmem:[#allocation2 + $0x14] ss:$8 sps:$4 sm:$0xff]   ;;  %v2419_v33 = vld [vmem:[#allocation2 + $0x10] ss:$8 sps:$4 sm:$0xff]   ;;  %846 = vst.msk [vmem:[#allocation2 + $0x48] sm:$0xcc] %vm2798_vm9, %v844_v31  ;;  %v1191_v34 = vpop.permute.xlu1 %1190  ;;  %v1185_v36 = vpop.permute.xlu0 %1184 }
  0xfb   : > { %840 = vst.msk [vmem:[#allocation2 + $0x48] sm:$0x33] %vm2640_vm2, %v838_v17  ;;  %v1192_v37 = vrot.slane %v1191_v34, 4  ;;  %v1186_v40 = vrot.slane %v1185_v36, 4  ;;  %1377 = vmatprep.subr.bf16.mxu0 %v2417_v32 }
  0xfc   : > { %1804 = vrot.lane.b32.xlu0 %v3014_v39, %s3529_s15  ;;  %1378 = vmatpush1.bf16.msra.mxu0 %v2419_v33  ;;  %s2230_s15 = sshll.u32 %s503_s18, 3 }
  0xfd   : > { %v1193_v41 = vsel %vm591_vm15, %v1191_v34, %v1192_v37  ;;  %v1187_v43 = vsel %vm584_vm10, %v1185_v36, %v1186_v40  ;;  %1810 = vrot.lane.b32.xlu1 %v3021_v42, %s3528_s20  ;;  %s505_s8 = scalar_lea.vmem %s3607_s6, %s2230_s15 }
  0xfe   : > { %1195 = vst.msk [vmem:[#allocation2 + $0x20] sm:$0xcc] %vm2798_vm9, %v1193_v41  ;;  %v1203_v46 = vpop.permute.xlu1 %1202  ;;  %v1197_v47 = vpop.permute.xlu0 %1196 }
  0xff   : > { %1189 = vst.msk [vmem:[#allocation2 + $0x20] sm:$0x33] %vm2640_vm2, %v1187_v43  ;;  %v1204_v1 = vrot.slane %v1203_v46, 4  ;;  %v1198_v48 = vrot.slane %v1197_v47, 4  ;;  %v2008_v43 = vld [vmem:[%s3560_s2] sm:$0xff] }
 0x100   : > { %1816 = vrot.lane.b32.xlu0 %v3014_v39, %s3531_s14 }
 0x101   : > { %v1205_v49 = vsel %vm3555_vm6, %v1203_v46, %v1204_v1  ;;  %v1199_v50 = vsel %vm3556_vm3, %v1197_v47, %v1198_v48  ;;  %1822 = vrot.lane.b32.xlu1 %v3021_v42, %s3534_s0  ;;  %vm3557_vm6 = vcmask 834560   ;;  %vm3558_vm3 = vcmask 752640  }
 0x102   : > { %v2420_v51 = vld [vmem:[#allocation2 + $0x44] ss:$8 sps:$4 sm:$0xff]   ;;  %v2422_v52 = vld [vmem:[#allocation2 + $0x40] ss:$8 sps:$4 sm:$0xff]   ;;  %1207 = vst.msk [vmem:[#allocation2 + $0x28] sm:$0xcc] %vm2798_vm9, %v1205_v49  ;;  %v854_v53 = vpop.permute.xlu1 %853  ;;  %v848_v0 = vpop.permute.xlu0 %847 }
 0x103   : > { %1201 = vst.msk [vmem:[#allocation2 + $0x28] sm:$0x33] %vm2640_vm2, %v1199_v50  ;;  %v855_v54 = vrot.slane %v854_v53, 4  ;;  %v849_v55 = vrot.slane %v848_v0, 4  ;;  %975 = vmatprep.subr.bf16.mxu1 %v2420_v51 }
 0x104   : > { %1828 = vrot.lane.b32.xlu0 %v3014_v39, %s3547_s7  ;;  %976 = vmatpush1.bf16.msra.mxu1 %v2422_v52 }
 0x105   : > { %v856_v57 = vsel %vm675_vm1, %v854_v53, %v855_v54  ;;  %v850_v59 = vsel %vm668_vm14, %v848_v0, %v849_v55  ;;  %1834 = vrot.lane.b32.xlu1 %v3021_v42, %s3536_s24 }
 0x106   : > { %858 = vst.msk [vmem:[#allocation2 + $0x50] sm:$0xcc] %vm2798_vm9, %v856_v57  ;;  %v866_v60 = vpop.permute.xlu1 %865  ;;  %v860_v61 = vpop.permute.xlu0 %859 }
 0x107   : > { %852 = vst.msk [vmem:[#allocation2 + $0x50] sm:$0x33] %vm2640_vm2, %v850_v59  ;;  %v867_v62 = vrot.slane %v866_v60, 4  ;;  %v861_v63 = vrot.slane %v860_v61, 4 }
 0x108   : > { %1840 = vrot.lane.b32.xlu0 %v3014_v39, %s3535_s1 }
 0x109   : > { %v868_v6 = vsel %vm689_vm4, %v866_v60, %v867_v62  ;;  %v862_v7 = vsel %vm682_vm8, %v860_v61, %v861_v63  ;;  %1846 = vrot.lane.b32.xlu1 %v3021_v42, %s3541_s10  ;;  %s3564_s10 = sld [smem:[#allocation13_spill]] }
 0x10a   : > { %v2423_v8 = vld [vmem:[#allocation2 + $0x24] ss:$8 sps:$4 sm:$0xff]   ;;  %v2425_v10 = vld [vmem:[#allocation2 + $0x20] ss:$8 sps:$4 sm:$0xff]   ;;  %870 = vst.msk [vmem:[#allocation2 + $0x58] sm:$0xcc] %vm2798_vm9, %v868_v6  ;;  %v1215_v11 = vpop.permute.xlu1 %1214  ;;  %v1209_v12 = vpop.permute.xlu0 %1208 }
 0x10b   : > { %864 = vst.msk [vmem:[#allocation2 + $0x58] sm:$0x33] %vm2640_vm2, %v862_v7  ;;  %v1216_v13 = vrot.slane %v1215_v11, 4  ;;  %v1210_v14 = vrot.slane %v1209_v12, 4  ;;  %1379 = vmatprep.subr.bf16.mxu0 %v2423_v8  ;;  %v2249_v7 = vcombine.high %v2829_v44, %v2875_v2 }
 0x10c   : > { %1852 = vrot.lane.b32.xlu0 %v3014_v39, %s3540_s19  ;;  %1380 = vmatpush1.bf16.msra.mxu0 %v2425_v10 }
 0x10d   : > { %v1217_v15 = vsel %vm3502_vm5, %v1215_v11, %v1216_v13  ;;  %v1211_v16 = vsel %vm3557_vm6, %v1209_v12, %v1210_v14  ;;  %1858 = vrot.lane.b32.xlu1 %v3021_v42, %s3543_s9  ;;  %vm3559_vm5 = vcmask 818176  }
 0x10e   : > { %1219 = vst.msk [vmem:[#allocation2 + $0x30] sm:$0xcc] %vm2798_vm9, %v1217_v15  ;;  %v1227_v18 = vpop.permute.xlu1 %1226  ;;  %v1221_v19 = vpop.permute.xlu0 %1220 }
 0x10f   : > { %1213 = vst.msk [vmem:[#allocation2 + $0x30] sm:$0x33] %vm2640_vm2, %v1211_v16  ;;  %v1228_v20 = vrot.slane %v1227_v18, 4  ;;  %v1222_v22 = vrot.slane %v1221_v19, 4  ;;  %v2231_v11 = vld [vmem:[%s3564_s10 + $0x4] sm:$0xf]  ;;  %v2248_v16 = vcombine.low %v2829_v44, %v2875_v2 }
 0x110   : > { %1864 = vrot.lane.b32.xlu0 %v3014_v39, %s3542_s29  ;;  %v3160_v39 = vld [vmem:[#allocation2 + $0x60] sm:$0x33]  ;;  %v2298_v9 = vld [vmem:[%s3564_s10 + $0x10] sm:$0xf] }
 0x111   : > { %v1229_v23 = vsel %vm3558_vm3, %v1227_v18, %v1228_v20  ;;  %v1223_v24 = vsel %vm3559_vm5, %v1221_v19, %v1222_v22  ;;  %1870 = vrot.lane.b32.xlu1 %v3021_v42, %s3546_s28  ;;  %s3561_s28 = sld [smem:[#allocation15_spill]]  ;;  %vm3562_vm5 = vcmask 1041408   ;;  %vm3565_vm3 = vcmask 818176  }
 0x112   : > { %v2426_v25 = vld [vmem:[#allocation2 + $0x54] ss:$8 sps:$4 sm:$0xff]   ;;  %v2428_v26 = vld [vmem:[#allocation2 + $0x50] ss:$8 sps:$4 sm:$0xff]   ;;  %1231 = vst.msk [vmem:[#allocation2 + $0x38] sm:$0xcc] %vm2798_vm9, %v1229_v23  ;;  %v872_v27 = vpop.permute.xlu0 %871  ;;  %v1233_v31 = vpop.permute.xlu1 %1232  ;;  %vm3563_vm6 = vmmov %vm3562_vm5  ;;  %v2251_v18 = vcombine.high %v2908_v29, %v2920_v35 }
 0x113   : > { %1225 = vst.msk [vmem:[#allocation2 + $0x38] sm:$0x33] %vm2640_vm2, %v1223_v24  ;;  %v873_v17 = vrot.slane %v872_v27, 4  ;;  %v1234_v32 = vrot.slane %v1233_v31, 4  ;;  %977 = vmatprep.subr.bf16.mxu1 %v2426_v25 }
 0x114   : > { %978 = vmatpush1.bf16.msra.mxu1 %v2428_v26  ;;  %2011 = vperm.xlu0 %2397, %v2008_v43   ;;  %v2250_v26 = vcombine.low %v2908_v29, %v2920_v35  ;;  %v2252_v35 = vcombine.low %v2953_v58, %v2966_v4 }
 0x115   : > { %v874_v33 = vsel %vm3503_vm12, %v872_v27, %v873_v17  ;;  %v1235_v34 = vsel %vm640_vm0, %v1233_v31, %v1234_v32  ;;  %v2253_v27 = vcombine.high %v2953_v58, %v2966_v4 }
 0x116   : > { %876 = vst.msk [vmem:[#allocation2 + $0x60] sm:$0x33] %vm2640_vm2, %v874_v33  ;;  %1237 = vst.msk [vmem:[#allocation2 + $0x40] sm:$0x33] %vm2640_vm2, %v1235_v34  ;;  %v1239_v36 = vpop.permute.xlu0 %1238  ;;  %v1245_v37 = vpop.permute.xlu1 %1244 }
 0x117   : > { %v1240_v40 = vrot.slane %v1239_v36, 4  ;;  %v1246_v41 = vrot.slane %v1245_v37, 4  ;;  %v2016_v46 = vld [vmem:[%s3561_s28] sm:$0xff] }
 0x118   : > { %2019 = vperm.xlu1 %2398, %v2016_v46  }
 0x119   : > { %v1241_v47 = vsel %vm647_vm11, %v1239_v36, %v1240_v40  ;;  %v1247_v1 = vsel %vm654_vm7, %v1245_v37, %v1246_v41  ;;  %v2255_v36 = vcombine.high %v3009_v38, %v3032_v5 }
 0x11a   : > { %v2429_v48 = vld [vmem:[#allocation2 + $0x34] ss:$8 sps:$4 sm:$0xff]   ;;  %v2431_v49 = vld [vmem:[#allocation2 + $0x30] ss:$8 sps:$4 sm:$0xff]   ;;  %1243 = vst.msk [vmem:[#allocation2 + $0x40] sm:$0xcc] %vm2798_vm9, %v1241_v47  ;;  %v1251_v50 = vpop.permute.xlu0 %1250  ;;  %v1257_v51 = vpop.permute.xlu1 %1256 }
 0x11b   : > { %1249 = vst.msk [vmem:[#allocation2 + $0x48] sm:$0x33] %vm2640_vm2, %v1247_v1  ;;  %v1252_v52 = vrot.slane %v1251_v50, 4  ;;  %v1258_v53 = vrot.slane %v1257_v51, 4  ;;  %1381 = vmatprep.subr.bf16.mxu0 %v2429_v48  ;;  %v2254_v1 = vcombine.low %v3009_v38, %v3032_v5 }
 0x11c   : > { %1382 = vmatpush1.bf16.msra.mxu0 %v2431_v49 }
 0x11d   : > { %v1253_v0 = vsel %vm661_vm13, %v1251_v50, %v1252_v52  ;;  %v1259_v54 = vsel %vm668_vm14, %v1257_v51, %v1258_v53  ;;  %v891_v55 = vld [vmem:[#allocation2 + $0x60] sm:$0x33]  ;;  %v2257_v51 = vcombine.high %v3074_v21, %v3084_v30 }
 0x11e   : > { %1255 = vst.msk [vmem:[#allocation2 + $0x48] sm:$0xcc] %vm2798_vm9, %v1253_v0  ;;  %v1263_v57 = vpop.permute.xlu0 %1262  ;;  %v1269_v59 = vpop.permute.xlu1 %1268  ;;  %v2245_v60 = vcombine.high %v891_v55, %v891_v55  ;;  %v2244_v61 = vcombine.low %v891_v55, %v891_v55 }
 0x11f   : > { %1261 = vst.msk [vmem:[#allocation2 + $0x50] sm:$0x33] %vm2640_vm2, %v1259_v54  ;;  %v1264_v62 = vrot.slane %v1263_v57, 4  ;;  %v1270_v63 = vrot.slane %v1269_v59, 4  ;;  %v2256_v54 = vcombine.low %v3074_v21, %v3084_v30 }
 0x120   : > { %2246 = vmatprep.subr.msk.bf16.mxu1 %vm3562_vm5, %v2245_v60  ;;  %v962_v6 = vsel %vm3563_vm6, %v2244_v61, 0  ;;  %vm3566_vm5 = vcmask 1039360   ;;  %vm3567_vm6 = vcmask 1031168   ;;  %v2264_v60 = vld [vmem:[%s3564_s10 + $0x8] sm:$0xf] }
 0x121   : > { %v1265_v8 = vsel %vm675_vm1, %v1263_v57, %v1264_v62  ;;  %v1271_v10 = vsel %vm682_vm8, %v1269_v59, %v1270_v63  ;;  %980 = vmatpush1.bf16.msra.mxu1 %v962_v6  ;;  %v2259_v59 = vcombine.high %v3118_v56, %v3128_v3 }
 0x122   : > { %1267 = vst.msk [vmem:[#allocation2 + $0x50] sm:$0xcc] %vm2798_vm9, %v1265_v8  ;;  %v1275_v12 = vpop.permute.xlu0 %1274  ;;  %1082 = vmatprep.subr.bf16.mxu1 %v2249_v7  ;;  %v1281_v13 = vpop.permute.xlu1 %1280 }
 0x123   : > { %1273 = vst.msk [vmem:[#allocation2 + $0x58] sm:$0x33] %vm2640_vm2, %v1271_v10  ;;  %v1276_v14 = vrot.slane %v1275_v12, 4  ;;  %v1282_v15 = vrot.slane %v1281_v13, 4 }
 0x124   : > { %2247 = vmatmul.mubr.msk.bf16.vlgmr.msra.gmra.mrb[0].mxu1 %vm3565_vm3, %v2231_v11  ;;  %vm3568_vm3 = vcmask 1022976   ;;  %v2258_v11 = vcombine.low %v3118_v56, %v3128_v3 }
 0x125   : > { %v1277_v19 = vsel %vm689_vm4, %v1275_v12, %v1276_v14  ;;  %v1283_v20 = vsel %vm3503_vm12, %v1281_v13, %v1282_v15  ;;  %1083 = vmatpush1.bf16.msra.mxu1 %v2248_v16  ;;  %v2434_v22 = vld [vmem:[#allocation2 + $0x44] ss:$8 sps:$4 sm:$0xff]   ;;  %v2436_v23 = vld [vmem:[#allocation2 + $0x40] ss:$8 sps:$4 sm:$0xff]   ;;  %1114 = vmatprep.mubr.bf16.mxu1 %v2544_v45  ;;  %v2261_v13 = vcombine.high %v3160_v39, %v3160_v39 }
 0x126   : > { %1279 = vst.msk [vmem:[#allocation2 + $0x58] sm:$0xcc] %vm2798_vm9, %v1277_v19  ;;  %v1438_v44 = vpop.permute.xlu0 %1437  ;;  %1084 = vmatprep.subr.bf16.mxu1 %v2251_v18  ;;  %v1444_v2 = vpop.permute.xlu1 %1443  ;;  %1383 = vmatprep.subr.bf16.mxu0 %v2434_v22  ;;  %v700_v19 = vld [vmem:[%s3564_s10] sm:$0xf] }
 0x127   : > { %1285 = vst.msk [vmem:[#allocation2 + $0x60] sm:$0x33] %vm2640_vm2, %v1283_v20  ;;  %v1439_v24 = vrot.slane %v1438_v44, 4  ;;  %v1445_v25 = vrot.slane %v1444_v2, 4  ;;  %1384 = vmatpush1.bf16.msra.mxu0 %v2436_v23 }
 0x129   : > { %v1440_v31 = vsel %vm3566_vm5, %v1438_v44, %v1439_v24  ;;  %v1446_v17 = vsel %vm3567_vm6, %v1444_v2, %v1445_v25  ;;  %1085 = vmatpush1.bf16.msra.mxu1 %v2250_v26  ;;  %vm3569_vm5 = vcmask 1014784   ;;  %vm3570_vm6 = vcmask 949248  }
 0x12a   : > { %1442 = vst.msk [vmem:[#allocation2] sm:$0xcc] %vm2798_vm9, %v1440_v31  ;;  %v1450_v32 = vpop.permute.xlu0 %1449  ;;  %1086 = vmatprep.subr.bf16.mxu1 %v2253_v27  ;;  %v1456_v33 = vpop.permute.xlu1 %1455 }
 0x12b   : > { %1448 = vst.msk [vmem:[#allocation2 + $0x8] sm:$0x33] %vm2640_vm2, %v1446_v17  ;;  %v1451_v34 = vrot.slane %v1450_v32, 4  ;;  %v1457_v29 = vrot.slane %v1456_v33, 4 }
 0x12d   : > { %v1452_v37 = vsel %vm3568_vm3, %v1450_v32, %v1451_v34  ;;  %v1458_v40 = vsel %vm3569_vm5, %v1456_v33, %v1457_v29  ;;  %1087 = vmatpush1.bf16.msra.mxu1 %v2252_v35  ;;  %v2437_v41 = vld [vmem:[#allocation2 + $0x54] ss:$8 sps:$4 sm:$0xff]   ;;  %v2439_v43 = vld [vmem:[#allocation2 + $0x50] ss:$8 sps:$4 sm:$0xff]   ;;  %vm3571_vm3 = vcmask 1041408   ;;  %vm3572_vm5 = vcmask 941056  }
 0x12e   : > { %1454 = vst.msk [vmem:[#allocation2 + $0x8] sm:$0xcc] %vm2798_vm9, %v1452_v37  ;;  %v1462_v46 = vpop.permute.xlu0 %1461  ;;  %1088 = vmatprep.subr.bf16.mxu1 %v2255_v36  ;;  %v1300_v47 = vld [vmem:[#allocation2 + $0x60] sm:$0x33]  ;;  %1385 = vmatprep.subr.bf16.mxu0 %v2437_v41  ;;  %vm3573_vm12 = vmmov %vm3571_vm3 }
 0x12f   : > { %1460 = vst.msk [vmem:[#allocation2 + $0x10] sm:$0x33] %vm2640_vm2, %v1458_v40  ;;  %v1463_v58 = vrot.slane %v1462_v46, 4  ;;  %v1468_v4 = vpop.permute.xlu1 %1467  ;;  %v2278_v48 = vcombine.high %v1300_v47, %v1300_v47  ;;  %v2277_v49 = vcombine.low %v1300_v47, %v1300_v47  ;;  %1386 = vmatpush1.bf16.msra.mxu0 %v2439_v43 }
 0x130   : > { %v1469_v50 = vrot.slane %v1468_v4, 4 }
 0x131   : > { %v1464_v52 = vsel %vm3570_vm6, %v1462_v46, %v1463_v58  ;;  %1089 = vmatpush1.bf16.msra.mxu1 %v2254_v1  ;;  %2279 = vmatprep.subr.msk.bf16.mxu0 %vm3571_vm3, %v2278_v48  ;;  %v1370_v55 = vsel %vm3573_vm12, %v2277_v49, 0  ;;  %vm3574_vm6 = vcmask 932864   ;;  %v1583_v62 = vld [vmem:[#allocation2] sm:$0xff]  ;;  %vm3575_vm12 = vcmask 818176  }
 0x132   : > { %1466 = vst.msk [vmem:[#allocation2 + $0x10] sm:$0xcc] %vm2798_vm9, %v1464_v52  ;;  %v1470_v53 = vsel %vm3572_vm5, %v1468_v4, %v1469_v50  ;;  %v1474_v0 = vpop.permute.xlu0 %1473  ;;  %1090 = vmatprep.subr.bf16.mxu1 %v2257_v51  ;;  %vm3576_vm3 = vcmask 850944   ;;  %vm3577_vm5 = vcmask 1041408  }
 0x133   : > { %1472 = vst.msk [vmem:[#allocation2 + $0x18] sm:$0x33] %vm2640_vm2, %v1470_v53  ;;  %v1475_v38 = vrot.slane %v1474_v0, 4  ;;  %v1480_v5 = vpop.permute.xlu1 %1479  ;;  %1388 = vmatpush1.bf16.msra.mxu0 %v1370_v55 }
 0x134   : > { %v1481_v57 = vrot.slane %v1480_v5, 4 }
 0x135   : > { %v1476_v61 = vsel %vm3574_vm6, %v1474_v0, %v1475_v38  ;;  %1091 = vmatpush1.bf16.msra.mxu1 %v2256_v54  ;;  %v1584_v63 = vld [vmem:[#allocation2 + $0x8] sm:$0xff]  ;;  %vm3578_vm6 = vmmov %vm3577_vm5 }
 0x136   : > { %v2441_v6 = vld [vmem:[#allocation2 + $0x4] ss:$8 sps:$4 sm:$0xff]   ;;  %1478 = vst.msk [vmem:[#allocation2 + $0x18] sm:$0xcc] %vm2798_vm9, %v1476_v61  ;;  %v1482_v21 = vsel %vm584_vm10, %v1480_v5, %v1481_v57  ;;  %v1486_v30 = vpop.permute.xlu0 %1485  ;;  %1092 = vmatprep.subr.bf16.mxu1 %v2259_v59  ;;  %v2282_v7 = vcombine.low %v1583_v62, %v1584_v63  ;;  %2280 = vmatmul.mubr.msk.bf16.vlgmr.msra.gmra.mrb[0].mxu0 %vm3575_vm12, %v2264_v60  ;;  %vm3579_vm12 = vcmask 842752  }
 0x137   : > { %1723 = vst.msk [vmem:[#allocation2] sm:$0x33] %vm2640_vm2, %v3021_v42  ;;  %1484 = vst.msk [vmem:[#allocation2 + $0x20] sm:$0x33] %vm2640_vm2, %v1482_v21  ;;  %v1487_v8 = vrot.slane %v1486_v30, 4  ;;  %v1492_v10 = vpop.permute.xlu1 %1491  ;;  %1670 = vmatprep.subr.bf16.mxu0 %v2441_v6  ;;  %v2260_v42 = vcombine.low %v3160_v39, %v3160_v39  ;;  %1702 = vmatprep.mubr.bf16.mxu0 %v2544_v45 }
 0x138   : > { %v1493_v12 = vrot.slane %v1492_v10, 4  ;;  %1671 = vmatpush1.bf16.msra.mxu0 %v2282_v7 }
 0x139   : > { %v1488_v14 = vsel %vm591_vm15, %v1486_v30, %v1487_v8  ;;  %1093 = vmatpush1.bf16.msra.mxu1 %v2258_v11  ;;  %v1077_v39 = vsel %vm3578_vm6, %v2260_v42, 0  ;;  %vm3582_vm6 = vcmask 826368  }
 0x13a   : > { %1490 = vst.msk [vmem:[#allocation2 + $0x20] sm:$0xcc] %vm2798_vm9, %v1488_v14  ;;  %v1494_v56 = vsel %vm3576_vm3, %v1492_v10, %v1493_v12  ;;  %v1498_v3 = vpop.permute.xlu0 %1497  ;;  %2262 = vmatprep.subr.msk.bf16.mxu1 %vm3577_vm5, %v2261_v13  ;;  %vm3580_vm3 = vcmask 834560   ;;  %vm3581_vm5 = vcmask 818176  }
 0x13b   : > { %1496 = vst.msk [vmem:[#allocation2 + $0x28] sm:$0x33] %vm2640_vm2, %v1494_v56  ;;  %v1499_v15 = vrot.slane %v1498_v3, 4  ;;  %v1504_v16 = vpop.permute.xlu1 %1503 }
 0x13c   : > { %v1505_v18 = vrot.slane %v1504_v16, 4 }
 0x13d   : > { %v1500_v20 = vsel %vm3579_vm12, %v1498_v3, %v1499_v15  ;;  %1095 = vmatpush1.bf16.msra.mxu1 %v1077_v39  ;;  %v2443_v22 = vld [vmem:[#allocation2 + $0x14] ss:$8 sps:$4 sm:$0xff]   ;;  %v2445_v23 = vld [vmem:[#allocation2 + $0x10] ss:$8 sps:$4 sm:$0xff]   ;;  %vm3583_vm12 = vmmov %vm3581_vm5 }
 0x13e   : > { %1502 = vst.msk [vmem:[#allocation2 + $0x28] sm:$0xcc] %vm2798_vm9, %v1500_v20  ;;  %v1506_v44 = vsel %vm3580_vm3, %v1504_v16, %v1505_v18  ;;  %v1510_v2 = vpop.permute.xlu0 %1509  ;;  %1672 = vmatprep.subr.bf16.mxu0 %v2443_v22  ;;  %vm3584_vm3 = vcmask 752640  }
 0x13f   : > { %1508 = vst.msk [vmem:[#allocation2 + $0x30] sm:$0x33] %vm2640_vm2, %v1506_v44  ;;  %v1511_v24 = vrot.slane %v1510_v2, 4  ;;  %v1516_v25 = vpop.permute.xlu1 %1515  ;;  %1673 = vmatpush1.bf16.msra.mxu0 %v2445_v23 }
 0x140   : > { %v1517_v26 = vrot.slane %v1516_v25, 4  ;;  %2263 = vmatmul.mubr.msk.bf16.vlgmr.msra.gmra.mrb[0].mxu1 %vm3581_vm5, %v700_v19  ;;  %vm3585_vm5 = vcmask 621568  }
 0x141   : > { %v1512_v27 = vsel %vm3582_vm6, %v1510_v2, %v1511_v24  ;;  %vm3586_vm6 = vcmask 1039360  }
 0x142   : > { %1514 = vst.msk [vmem:[#allocation2 + $0x30] sm:$0xcc] %vm2798_vm9, %v1512_v27  ;;  %v1518_v31 = vsel %vm3583_vm12, %v1516_v25, %v1517_v26  ;;  %v1522_v17 = vpop.permute.xlu0 %1521  ;;  %vm3587_vm12 = vcmask 1031168  }
 0x143   : > { %1520 = vst.msk [vmem:[#allocation2 + $0x38] sm:$0x33] %vm2640_vm2, %v1518_v31  ;;  %v1523_v32 = vrot.slane %v1522_v17, 4  ;;  %v1528_v33 = vpop.permute.xlu1 %1527 }
 0x144   : > { %v1529_v34 = vrot.slane %v1528_v33, 4 }
 0x145   : > { %v1524_v29 = vsel %vm3584_vm3, %v1522_v17, %v1523_v32  ;;  %v2446_v35 = vld [vmem:[#allocation2 + $0x24] ss:$8 sps:$4 sm:$0xff]   ;;  %v2448_v36 = vld [vmem:[#allocation2 + $0x20] ss:$8 sps:$4 sm:$0xff]   ;;  %vm3588_vm3 = vcmask 1022976  }
 0x146   : > { %1526 = vst.msk [vmem:[#allocation2 + $0x38] sm:$0xcc] %vm2798_vm9, %v1524_v29  ;;  %v1530_v37 = vsel %vm640_vm0, %v1528_v33, %v1529_v34  ;;  %v1534_v40 = vpop.permute.xlu0 %1533  ;;  %1674 = vmatprep.subr.bf16.mxu0 %v2446_v35  ;;  %v2281_v34 = vld [vmem:[%s3564_s10 + $0xc] sm:$0xf] }
 0x147   : > { %1532 = vst.msk [vmem:[#allocation2 + $0x40] sm:$0x33] %vm2640_vm2, %v1530_v37  ;;  %v1535_v41 = vrot.slane %v1534_v40, 4  ;;  %v1540_v43 = vpop.permute.xlu1 %1539  ;;  %1675 = vmatpush1.bf16.msra.mxu0 %v2448_v36 }
 0x148   : > { %v1541_v46 = vrot.slane %v1540_v43, 4 }
 0x149   : > { %v1536_v47 = vsel %vm647_vm11, %v1534_v40, %v1535_v41 }
 0x14a   : > { %1538 = vst.msk [vmem:[#allocation2 + $0x40] sm:$0xcc] %vm2798_vm9, %v1536_v47  ;;  %v1542_v58 = vsel %vm654_vm7, %v1540_v43, %v1541_v46  ;;  %v1546_v4 = vpop.permute.xlu0 %1545 }
 0x14b   : > { %1544 = vst.msk [vmem:[#allocation2 + $0x48] sm:$0x33] %vm2640_vm2, %v1542_v58  ;;  %v1547_v1 = vrot.slane %v1546_v4, 4  ;;  %v1552_v48 = vpop.permute.xlu1 %1551 }
 0x14c   : > { %v1553_v49 = vrot.slane %v1552_v48, 4 }
 0x14d   : > { %v1548_v50 = vsel %vm661_vm13, %v1546_v4, %v1547_v1  ;;  %v2449_v51 = vld [vmem:[#allocation2 + $0x34] ss:$8 sps:$4 sm:$0xff]   ;;  %v2451_v52 = vld [vmem:[#allocation2 + $0x30] ss:$8 sps:$4 sm:$0xff]  }
 0x14e   : > { %1550 = vst.msk [vmem:[#allocation2 + $0x48] sm:$0xcc] %vm2798_vm9, %v1548_v50  ;;  %v1554_v53 = vsel %vm668_vm14, %v1552_v48, %v1553_v49  ;;  %v1558_v0 = vpop.permute.xlu0 %1557  ;;  %1676 = vmatprep.subr.bf16.mxu0 %v2449_v51 }
 0x14f   : > { %1556 = vst.msk [vmem:[#allocation2 + $0x50] sm:$0x33] %vm2640_vm2, %v1554_v53  ;;  %v1559_v38 = vrot.slane %v1558_v0, 4  ;;  %v1564_v5 = vpop.permute.xlu1 %1563  ;;  %1677 = vmatpush1.bf16.msra.mxu0 %v2451_v52 }
 0x150   : > { %v1565_v54 = vrot.slane %v1564_v5, 4 }
 0x151   : > { %v1560_v55 = vsel %vm675_vm1, %v1558_v0, %v1559_v38 }
 0x152   : > { %1562 = vst.msk [vmem:[#allocation2 + $0x50] sm:$0xcc] %vm2798_vm9, %v1560_v55  ;;  %v1566_v57 = vsel %vm682_vm8, %v1564_v5, %v1565_v54  ;;  %v1570_v59 = vpop.permute.xlu0 %1569 }
 0x153   : > { %1568 = vst.msk [vmem:[#allocation2 + $0x58] sm:$0x33] %vm2640_vm2, %v1566_v57  ;;  %v1571_v60 = vrot.slane %v1570_v59, 4  ;;  %v1576_v61 = vpop.permute.xlu1 %1575 }
 0x154   : > { %v1577_v62 = vrot.slane %v1576_v61, 4 }
 0x155   : > { %v1572_v63 = vsel %vm689_vm4, %v1570_v59, %v1571_v60  ;;  %v2452_v6 = vld [vmem:[#allocation2 + $0x44] ss:$8 sps:$4 sm:$0xff]   ;;  %v2454_v21 = vld [vmem:[#allocation2 + $0x40] ss:$8 sps:$4 sm:$0xff]  }
 0x156   : > { %1574 = vst.msk [vmem:[#allocation2 + $0x58] sm:$0xcc] %vm2798_vm9, %v1572_v63  ;;  %v1578_v30 = vsel %vm3585_vm5, %v1576_v61, %v1577_v62  ;;  %v1733_v7 = vpop.permute.xlu0 %1732  ;;  %1678 = vmatprep.subr.bf16.mxu0 %v2452_v6  ;;  %vm3589_vm5 = vcmask 1014784  }
 0x157   : > { %1580 = vst.msk [vmem:[#allocation2 + $0x60] sm:$0x33] %vm2640_vm2, %v1578_v30  ;;  %v1734_v8 = vrot.slane %v1733_v7, 4  ;;  %v1739_v10 = vpop.permute.xlu1 %1738  ;;  %1679 = vmatpush1.bf16.msra.mxu0 %v2454_v21 }
 0x158   : > { %v1740_v11 = vrot.slane %v1739_v10, 4 }
 0x159   : > { %v1735_v12 = vsel %vm3586_vm6, %v1733_v7, %v1734_v8  ;;  %vm3590_vm6 = vcmask 949248  }
 0x15a   : > { %1737 = vst.msk [vmem:[#allocation2] sm:$0xcc] %vm2798_vm9, %v1735_v12  ;;  %v1741_v13 = vsel %vm3587_vm12, %v1739_v10, %v1740_v11  ;;  %v1745_v42 = vpop.permute.xlu0 %1744  ;;  %vm3591_vm12 = vcmask 1041408  }
 0x15b   : > { %1743 = vst.msk [vmem:[#allocation2 + $0x8] sm:$0x33] %vm2640_vm2, %v1741_v13  ;;  %v1746_v14 = vrot.slane %v1745_v42, 4  ;;  %v1751_v56 = vpop.permute.xlu1 %1750 }
 0x15c   : > { %v1752_v3 = vrot.slane %v1751_v56, 4 }
 0x15d   : > { %v1747_v15 = vsel %vm3588_vm3, %v1745_v42, %v1746_v14  ;;  %v2455_v16 = vld [vmem:[#allocation2 + $0x54] ss:$8 sps:$4 sm:$0xff]   ;;  %v2457_v18 = vld [vmem:[#allocation2 + $0x50] ss:$8 sps:$4 sm:$0xff]   ;;  %vm3592_vm3 = vcmask 941056  }
 0x15e   : > { %1749 = vst.msk [vmem:[#allocation2 + $0x8] sm:$0xcc] %vm2798_vm9, %v1747_v15  ;;  %v1753_v39 = vsel %vm3589_vm5, %v1751_v56, %v1752_v3  ;;  %v1757_v19 = vpop.permute.xlu0 %1756  ;;  %v1595_v20 = vld [vmem:[#allocation2 + $0x60] sm:$0x33]  ;;  %1680 = vmatprep.subr.bf16.mxu0 %v2455_v16  ;;  %vm3593_vm5 = vmmov %vm3591_vm12 }
 0x15f   : > { %1755 = vst.msk [vmem:[#allocation2 + $0x10] sm:$0x33] %vm2640_vm2, %v1753_v39  ;;  %v1758_v22 = vrot.slane %v1757_v19, 4  ;;  %v1763_v23 = vpop.permute.xlu1 %1762  ;;  %v2295_v44 = vcombine.high %v1595_v20, %v1595_v20  ;;  %v2294_v2 = vcombine.low %v1595_v20, %v1595_v20  ;;  %1681 = vmatpush1.bf16.msra.mxu0 %v2457_v18 }
 0x160   : > { %v1764_v24 = vrot.slane %v1763_v23, 4 }
 0x161   : > { %v1759_v25 = vsel %vm3590_vm6, %v1757_v19, %v1758_v22  ;;  %2296 = vmatprep.subr.msk.bf16.mxu0 %vm3591_vm12, %v2295_v44  ;;  %v1665_v32 = vsel %vm3593_vm5, %v2294_v2, 0  ;;  %vm3594_vm6 = vcmask 932864   ;;  %vm3595_vm12 = vcmask 818176  }
 0x162   : > { %1761 = vst.msk [vmem:[#allocation2 + $0x10] sm:$0xcc] %vm2798_vm9, %v1759_v25  ;;  %v1765_v26 = vsel %vm3592_vm3, %v1763_v23, %v1764_v24  ;;  %v1769_v27 = vpop.permute.xlu0 %1768  ;;  %vm3596_vm3 = vcmask 850944   ;;  %vm3599_vm5 = vcmask 826368  }
 0x163   : > { %1767 = vst.msk [vmem:[#allocation2 + $0x18] sm:$0x33] %vm2640_vm2, %v1765_v26  ;;  %v1770_v31 = vrot.slane %v1769_v27, 4  ;;  %v1775_v17 = vpop.permute.xlu1 %1774  ;;  %1683 = vmatpush1.bf16.msra.mxu0 %v1665_v32 }
 0x164   : > { %v1776_v33 = vrot.slane %v1775_v17, 4 }
 0x165   : > { %v1771_v29 = vsel %vm3594_vm6, %v1769_v27, %v1770_v31  ;;  %v2459_v35 = vld [vmem:[#allocation2] ss:$8 sps:$4 sm:$0xff]   ;;  %v2461_v36 = vld [vmem:[#allocation2 + $0x4] ss:$8 sps:$4 sm:$0xff]   ;;  %vm3600_vm6 = vmmov %vm3595_vm12 }
 0x166   : > { %1773 = vst.msk [vmem:[#allocation2 + $0x18] sm:$0xcc] %vm2798_vm9, %v1771_v29  ;;  %v1777_v37 = vsel %vm584_vm10, %v1775_v17, %v1776_v33  ;;  %v1781_v40 = vpop.permute.xlu0 %1780  ;;  %1965 = vmatprep.subr.bf16.mxu0 %v2461_v36  ;;  %2297 = vmatmul.mubr.msk.bf16.vlgmr.msra.gmra.mrb[0].mxu0 %vm3595_vm12, %v2281_v34  ;;  %vm3597_vm10 = vcmask 842752   ;;  %vm3601_vm12 = vcmask 752640  }
 0x167   : > { %1779 = vst.msk [vmem:[#allocation2 + $0x20] sm:$0x33] %vm2640_vm2, %v1777_v37  ;;  %v1782_v41 = vrot.slane %v1781_v40, 4  ;;  %v1787_v43 = vpop.permute.xlu1 %1786  ;;  %1966 = vmatpush1.bf16.msra.mxu0 %v2459_v35  ;;  %1997 = vmatprep.mubr.bf16.mxu0 %v2544_v45 }
 0x168   : > { %v1788_v46 = vrot.slane %v1787_v43, 4 }
 0x169   : > { %v1783_v47 = vsel %vm591_vm15, %v1781_v40, %v1782_v41  ;;  %vm3598_vm15 = vcmask 834560  }
 0x16a   : > { %1785 = vst.msk [vmem:[#allocation2 + $0x20] sm:$0xcc] %vm2798_vm9, %v1783_v47  ;;  %v1789_v58 = vsel %vm3596_vm3, %v1787_v43, %v1788_v46  ;;  %v1793_v4 = vpop.permute.xlu0 %1792 }
 0x16b   : > { %1791 = vst.msk [vmem:[#allocation2 + $0x28] sm:$0x33] %vm2640_vm2, %v1789_v58  ;;  %v1794_v1 = vrot.slane %v1793_v4, 4  ;;  %v1799_v48 = vpop.permute.xlu1 %1798 }
 0x16c   : > { %v1800_v49 = vrot.slane %v1799_v48, 4 }
 0x16d   : > { %v1795_v50 = vsel %vm3597_vm10, %v1793_v4, %v1794_v1  ;;  %v2462_v51 = vld [vmem:[#allocation2 + $0x10] ss:$8 sps:$4 sm:$0xff]   ;;  %v2464_v52 = vld [vmem:[#allocation2 + $0x14] ss:$8 sps:$4 sm:$0xff]  }
 0x16e   : > { %1797 = vst.msk [vmem:[#allocation2 + $0x28] sm:$0xcc] %vm2798_vm9, %v1795_v50  ;;  %v1801_v45 = vsel %vm3598_vm15, %v1799_v48, %v1800_v49  ;;  %v1805_v53 = vpop.permute.xlu0 %1804  ;;  %1967 = vmatprep.subr.bf16.mxu0 %v2464_v52 }
 0x16f   : > { %1803 = vst.msk [vmem:[#allocation2 + $0x30] sm:$0x33] %vm2640_vm2, %v1801_v45  ;;  %v1806_v0 = vrot.slane %v1805_v53, 4  ;;  %v1811_v38 = vpop.permute.xlu1 %1810  ;;  %1968 = vmatpush1.bf16.msra.mxu0 %v2462_v51 }
 0x170   : > { %v1812_v5 = vrot.slane %v1811_v38, 4 }
 0x171   : > { %v1807_v54 = vsel %vm3599_vm5, %v1805_v53, %v1806_v0 }
 0x172   : > { %1809 = vst.msk [vmem:[#allocation2 + $0x30] sm:$0xcc] %vm2798_vm9, %v1807_v54  ;;  %v1813_v55 = vsel %vm3600_vm6, %v1811_v38, %v1812_v5  ;;  %v1817_v57 = vpop.permute.xlu0 %1816 }
 0x173   : > { %1815 = vst.msk [vmem:[#allocation2 + $0x38] sm:$0x33] %vm2640_vm2, %v1813_v55  ;;  %v1818_v59 = vrot.slane %v1817_v57, 4  ;;  %v1823_v60 = vpop.permute.xlu1 %1822 }
 0x174   : > { %v1824_v61 = vrot.slane %v1823_v60, 4 }
 0x175   : > { %v1819_v62 = vsel %vm3601_vm12, %v1817_v57, %v1818_v59  ;;  %v2465_v63 = vld [vmem:[#allocation2 + $0x20] ss:$8 sps:$4 sm:$0xff]   ;;  %v2467_v6 = vld [vmem:[#allocation2 + $0x24] ss:$8 sps:$4 sm:$0xff]  }
 0x176   : > { %1821 = vst.msk [vmem:[#allocation2 + $0x38] sm:$0xcc] %vm2798_vm9, %v1819_v62  ;;  %v1825_v21 = vsel %vm640_vm0, %v1823_v60, %v1824_v61  ;;  %v1829_v30 = vpop.permute.xlu0 %1828  ;;  %1969 = vmatprep.subr.bf16.mxu0 %v2467_v6  ;;  %vm3602_vm0 = vcmask 621568  }
 0x177   : > { %1827 = vst.msk [vmem:[#allocation2 + $0x40] sm:$0x33] %vm2640_vm2, %v1825_v21  ;;  %v1830_v7 = vrot.slane %v1829_v30, 4  ;;  %v1835_v8 = vpop.permute.xlu1 %1834  ;;  %1970 = vmatpush1.bf16.msra.mxu0 %v2465_v63 }
 0x178   : > { %v1836_v10 = vrot.slane %v1835_v8, 4 }
 0x179   : > { %v1831_v11 = vsel %vm647_vm11, %v1829_v30, %v1830_v7 }
 0x17a   : > { %1833 = vst.msk [vmem:[#allocation2 + $0x40] sm:$0xcc] %vm2798_vm9, %v1831_v11  ;;  %v1837_v12 = vsel %vm654_vm7, %v1835_v8, %v1836_v10  ;;  %v1841_v13 = vpop.permute.xlu0 %1840  ;;  %vm3604_vm7 = vcmask 1041408  }
 0x17b   : > { %1839 = vst.msk [vmem:[#allocation2 + $0x48] sm:$0x33] %vm2640_vm2, %v1837_v12  ;;  %v1842_v42 = vrot.slane %v1841_v13, 4  ;;  %v1847_v14 = vpop.permute.xlu1 %1846 }
 0x17c   : > { %v1848_v56 = vrot.slane %v1847_v14, 4 }
 0x17d   : > { %v1843_v3 = vsel %vm661_vm13, %v1841_v13, %v1842_v42  ;;  %v2468_v15 = vld [vmem:[#allocation2 + $0x30] ss:$8 sps:$4 sm:$0xff]   ;;  %v2470_v16 = vld [vmem:[#allocation2 + $0x34] ss:$8 sps:$4 sm:$0xff]  }
 0x17e   : > { %1845 = vst.msk [vmem:[#allocation2 + $0x48] sm:$0xcc] %vm2798_vm9, %v1843_v3  ;;  %v1849_v18 = vsel %vm668_vm14, %v1847_v14, %v1848_v56  ;;  %v1853_v39 = vpop.permute.xlu0 %1852  ;;  %1971 = vmatprep.subr.bf16.mxu0 %v2470_v16 }
 0x17f   : > { %1851 = vst.msk [vmem:[#allocation2 + $0x50] sm:$0x33] %vm2640_vm2, %v1849_v18  ;;  %v1854_v19 = vrot.slane %v1853_v39, 4  ;;  %v1859_v20 = vpop.permute.xlu1 %1858  ;;  %1972 = vmatpush1.bf16.msra.mxu0 %v2468_v15 }
 0x180   : > { %v1860_v22 = vrot.slane %v1859_v20, 4 }
 0x181   : > { %v1855_v23 = vsel %vm675_vm1, %v1853_v39, %v1854_v19 }
 0x182   : > { %1857 = vst.msk [vmem:[#allocation2 + $0x50] sm:$0xcc] %vm2798_vm9, %v1855_v23  ;;  %v1861_v44 = vsel %vm682_vm8, %v1859_v20, %v1860_v22  ;;  %v1865_v2 = vpop.permute.xlu0 %1864  ;;  %vm3605_vm8 = vmmov %vm3604_vm7 }
 0x183   : > { %1863 = vst.msk [vmem:[#allocation2 + $0x58] sm:$0x33] %vm2640_vm2, %v1861_v44  ;;  %v1866_v24 = vrot.slane %v1865_v2, 4  ;;  %v1871_v25 = vpop.permute.xlu1 %1870 }
 0x184   : > { %v1872_v26 = vrot.slane %v1871_v25, 4 }
 0x185   : > { %v1867_v27 = vsel %vm689_vm4, %v1865_v2, %v1866_v24  ;;  %v2471_v31 = vld [vmem:[#allocation2 + $0x40] ss:$8 sps:$4 sm:$0xff]   ;;  %v2473_v17 = vld [vmem:[#allocation2 + $0x44] ss:$8 sps:$4 sm:$0xff]  }
 0x186   : > { %1869 = vst.msk [vmem:[#allocation2 + $0x58] sm:$0xcc] %vm2798_vm9, %v1867_v27  ;;  %v1873_v32 = vsel %vm3602_vm0, %v1871_v25, %v1872_v26  ;;  %1973 = vmatprep.subr.bf16.mxu0 %v2473_v17  ;;  %vm2027_vm9 = vcmask 130048  }
 0x187   : > { %1875 = vst.msk [vmem:[#allocation2 + $0x60] sm:$0x33] %vm2640_vm2, %v1873_v32  ;;  %1974 = vmatpush1.bf16.msra.mxu0 %v2471_v31  ;;  %vm3606_vm2 = vmmov %vm3600_vm6 }
 0x18d   : > { %v2474_v33 = vld [vmem:[#allocation2 + $0x50] ss:$8 sps:$4 sm:$0xff]   ;;  %v2476_v34 = vld [vmem:[#allocation2 + $0x54] ss:$8 sps:$4 sm:$0xff]  }
 0x18e   : > { %v1890_v29 = vld [vmem:[#allocation2 + $0x60] sm:$0x33]  ;;  %1975 = vmatprep.subr.bf16.mxu0 %v2476_v34 }
 0x18f   : > { %v2312_v35 = vcombine.high %v1890_v29, %v1890_v29  ;;  %v2311_v36 = vcombine.low %v1890_v29, %v1890_v29  ;;  %1976 = vmatpush1.bf16.msra.mxu0 %v2474_v33 }
 0x191   : > { %2313 = vmatprep.subr.msk.bf16.mxu0 %vm3604_vm7, %v2312_v35  ;;  %v1960_v28 = vsel %vm3605_vm8, %v2311_v36, 0 }
 0x193   : > { %1978 = vmatpush1.bf16.msra.mxu0 %v1960_v28  ;;  %v2012_v47 = vpop.permute.xlu0 %2011 }
 0x196   : > { %2314 = vmatmul.mubr.msk.bf16.vlgmr.msra.gmra.mrb[0].mxu0 %vm3606_vm2, %v2298_v9 }
 0x197   : > { %v2020_v49 = vpop.permute.xlu1 %2019 }
 0x213   : > { %v1116_v37 = vpop.f32.mrb[0].mxu1 }
 0x214   : > { %v1118_v40 = vpop.f32.mrb[1].mxu1 }
 0x215   : > { %v1120_v41 = vpop.f32.mrb[2].mxu1 }
 0x216   : > { %v1121_v43 = vpop.f32.mrb[3].mxu1 }
 0x269   : > { %v1999_v46 = vpop.f32.mrb[0].mxu0 }
 0x26a   : > { %v2317_v58 = vadd.f32 %v1999_v46, %v1116_v37  ;;  %v2001_v4 = vpop.f32.mrb[1].mxu0 }
 0x26b   : > { %v2318_v1 = vadd.f32 %v2001_v4, %v1118_v40  ;;  %v2003_v48 = vpop.f32.mrb[2].mxu0 }
 0x26c   : > { %v2014_v50 = vmul.f32 %v2317_v58, %v2012_v47  ;;  %v2004_v51 = vpop.f32.mrb[3].mxu0 }
 0x26d   : > { %v2015_v52 = vmul.f32 %v2318_v1, %v2012_v47 }
 0x26e   : > { %v2022_v45 = vadd.f32 %v2020_v49, %v2014_v50 }
 0x26f   : > { %v2023_v53 = vadd.f32 %v2020_v49, %v2015_v52 }
 0x270   : > { %v2024_v0 = vmax.f32 %v2022_v45, 0.0 }
 0x271   : > { %v2025_v38 = vmax.f32 %v2023_v53, 0.0 }
 0x272   : > { %2026 = vst [vmem:[%s505_s8] sm:$0xff] %v2024_v0 }
 0x273   : > { %2028 = vst.msk [vmem:[%s505_s8 + $0x8] sm:$0xff] %vm2027_vm9, %v2025_v38 }
 0x274 PF: > { %s3608_s27 = sld [smem:[#allocation5_spill]]  ;;  %s3610_s28 = sld [smem:[#allocation4_spill]] }
 0x275   : > { %s3611_s29 = sld [smem:[#allocation6_spill]]  ;;  %s3612_s30 = sld [smem:[#allocation7_spill]] }
 0x27a   : > { %s18_s9 = sadd.s32 1, %s3608_s27   ;;  %s3609_s27 = sld [smem:[#allocation3_spill]] }
 0x27b   : > { %p15_p12 = scmp.ge.s32.totalorder %s18_s9, 10  }
 0x27d   :  { %17 = sbr.rel (!%p15_p12) target bundleno = 9 (0x9), region = 98 }

// kernel: decoder_video_forward.7
= control target key start
LH: loop header
LB: loop body
LE: loop exit
PB: predicated region body
PF: predicated region fallthrough
CT: control target
= control target key end

     0   :  { %s1111_s21 = smov 0   ;;  %s1113_s22 = smov 0   ;;  %s1269_s0 = inlined_call_operand.vmem [shape: bf16[2,6,8,122], index: 0, kind: input, shape index: {}, may-alias: {0,1,2}]   ;;  %s1270_s1 = inlined_call_operand.vmem [shape: bf16[2,6,8,122], index: 1, kind: input, shape index: {}, may-alias: {0,1,2}]   ;;  %s1271_s2 = inlined_call_operand.vmem [shape: bf16[2,6,8,122], index: 2, kind: input, shape index: {}, may-alias: {0,1,2}]   ;;  %s1272_s3 = inlined_call_operand.vmem [shape: bf16[3,8,72], index: 3, kind: input, shape index: {}]   ;;  %s1273_s4 = inlined_call_operand.vmem [shape: f32[8,1], index: 4, kind: input, shape index: {}]   ;;  %s1274_s5 = inlined_call_operand.vmem [shape: f32[8,1], index: 5, kind: input, shape index: {}]   ;;  %s1275_s6 = inlined_call_operand.vmem [shape: f32[2,4,8,100], index: 6, kind: output, shape index: {}]  }
   0x1   :  { %s1115_s23 = smov 0   ;;  %s1117_s24 = smov 0  }
   0x2   :  { %s1119_s25 = smov 0  }
   0x3 LB: > { %s25_s26 = sadd.s32 1, %s1055_s23  ;;  %s28_s27 = sadd.s32 1, %s1059_s24  ;;  %s1063_s25 = sphi %s1119_s25, %s16_s25   ;;  %s1059_s24 = sphi %s1117_s24, %s1279_s24   ;;  %s1055_s23 = sphi %s1115_s23, %s1278_s23   ;;  %s1051_s22 = sphi %s1113_s22, %s1277_s22   ;;  %s1047_s21 = sphi %s1111_s21, %s1276_s21  }
   0x4   : > { %p26_p0 = scmp.ge.s32.totalorder %s25_s26, 4  ;;  %p863_p1 = scmp.ge.s32.totalorder %s1063_s25, 1 }
   0x5   : > { %p269_p2 = scmp.lt.s32.totalorder %s1063_s25, 9 }
   0x6   : > { %s1281_s26 = smov (%p26_p0, %s25_s26), 0  ;;  %s1283_s27 = smov (!%p26_p0, %s28_s27), %s1059_s24 }
   0x7   : > { %p270_p3 = pnand %p863_p1, %p269_p2  ;;  %p30_p4 = scmp.ge.s32.totalorder %s1283_s27, 2 }
   0x8   : > { %p323_p5 = scmp.lt.s32.totalorder (!%p270_p3), %s1051_s22, 1  ;;  %p325_p6 = scmp.lt.s32.totalorder (!%p270_p3), %s1047_s21, 5  ;;  %v1065_v0 = vmov (!%p270_p3), 0.0   ;;  %vm361_vm0 = vcmask (!%p270_p3), 814080   ;;  %vm1074_vm1 = vmmov (!%p270_p3), 0   ;;  %v720_v4 = vld [vmem:[%s1273_s4] sm:$0xff] (!%p270_p3) }
   0x9   : > { %s1285_s27 = smov (%p30_p4, %s1283_s27), 0  ;;  %273 = sbr.rel (%p270_p3) target bundleno = 419 (0x1a3), region = 44 }
   0xa   : > { %923 = vmatprep.subr.bf16.mxu0 (!%p270_p3), %v1065_v0  ;;  %909 = vmatprep.subr.bf16.mxu1 (!%p270_p3), %v1065_v0  ;;  %s331_s8 = sadd.s32 (!%p270_p3), 1, %s1047_s21  ;;  %s1066_s12 = smov (!%p270_p3), 118   ;;  %v727_v5 = vld [vmem:[%s1274_s5] sm:$0xff] (!%p270_p3)  ;;  %v1075_v6 = vmov (!%p270_p3), 0   ;;  %vm483_vm2 = vcmask (!%p270_p3), 1043456   ;;  %vm479_vm3 = vcmask (!%p270_p3), 588800  }
   0xb   : > { %p334_p7 = scmp.lt.s32.totalorder (!%p270_p3), %s331_s8, 5  ;;  %s1067_s13 = smov (!%p270_p3), 127   ;;  %933 = vmatprep.mubr.msk.bf16.mxu0 (!%p270_p3), %vm1074_vm1, %v1065_v0  ;;  %919 = vmatprep.mubr.msk.bf16.mxu1 (!%p270_p3), %vm1074_vm1, %v1065_v0  ;;  %v396_v28 = vld [vmem:[%s1272_s3] sm:$0xf] (!%p270_p3)  ;;  %v869_v46 = vld [vmem:[%s1272_s3 + $0x4] sm:$0xf] (!%p270_p3) }
   0xc   : > { %s341_s14 = sadd.s32 (!%p270_p3), 2, %s1047_s21  ;;  %s1068_s17 = smov (!%p270_p3), 117   ;;  %1008 = vset.pattern.permute.xlu0 (!%p270_p3), %v1075_v6  ;;  %1009 = vset.pattern.permute.xlu1 (!%p270_p3), %v1075_v6  ;;  %v882_v51 = vld [vmem:[%s1272_s3 + $0x8] sm:$0xf] (!%p270_p3)  ;;  %vm735_vm4 = vcmask (!%p270_p3), 818176  }
   0xd   : > { %s1069_s18 = smov (!%p270_p3), 126   ;;  %p344_p8 = scmp.lt.s32.totalorder (!%p270_p3), %s341_s14, 5 }
   0xe   : > { %p353_p9 = scmp.lt.s32.totalorder (!%p270_p3), %s1047_s21, 3 }
  0x10   : > { %s1287_s22 = smov (!%p323_p5, %s1051_s22), 1  ;;  %s1289_s8 = smov (!%p334_p7, %s331_s8), 5 }
  0x11   : > { %s326_s28 = scalar_select %p325_p6, %s1047_s21, 5 }
  0x12   : > { %s1148_s29 = smul.u32 6, %s1287_s22  ;;  %s1291_s14 = smov (!%p344_p8, %s341_s14), 5 }
  0x13   : > { %s1293_s21 = smov (!%p353_p9, %s1047_s21), 3 }
  0x14   : > { %s328_s30 = sadd.s32 %s1148_s29, %s326_s28  ;;  %s337_s15 = sadd.s32 %s1148_s29, %s1289_s8 }
  0x15   : > { %s864_s7 = sshll.u32 %s328_s30, 2  ;;  %s865_s16 = sshll.u32 %s337_s15, 2 }
  0x16   : > { %s330_s11 = scalar_lea.vmem %s1269_s0, %s864_s7  ;;  %s339_s28 = scalar_lea.vmem %s1270_s1, %s865_s16 }
  0x17   : > { %v360_v1 = vld [vmem:[%s330_s11] sm:$0xf]  ;;  %s1070_s30 = smov 108   ;;  %s1071_s7 = smov 116  }
  0x18   : > { %372 = vrot.lane.b32.xlu1 %v360_v1, %s1066_s12  ;;  %364 = vrot.lane.b32.xlu0 %v360_v1, %s1067_s13  ;;  %362 = vst.msk [vmem:[#allocation2] sm:$0xf] %vm361_vm0, %v360_v1  ;;  %v406_v2 = vld [vmem:[%s339_s28] sm:$0xf]  ;;  %s1072_s8 = smov 107   ;;  %s347_s9 = sadd.s32 %s1148_s29, %s1291_s14 }
  0x19   : > { %s866_s10 = sshll.u32 %s347_s9, 2  ;;  %s1073_s11 = smov 106  }
  0x1a   : > { %s349_s16 = scalar_lea.vmem %s1271_s2, %s866_s10 }
  0x1b   : > { %v600_v3 = vld [vmem:[%s349_s16] sm:$0xf] }
  0x1c   : > { %376 = vrot.lane.b32.xlu1 %v360_v1, %s1068_s17  ;;  %368 = vrot.lane.b32.xlu0 %v360_v1, %s1069_s18 }
  0x20   : > { %384 = vrot.lane.b32.xlu1 %v360_v1, %s1070_s30  ;;  %380 = vrot.lane.b32.xlu0 %v360_v1, %s1071_s7 }
  0x24   : > { %409 = vrot.lane.b32.xlu1 %v406_v2, %s1067_s13  ;;  %388 = vrot.lane.b32.xlu0 %v360_v1, %s1072_s8 }
  0x28   : > { %413 = vrot.lane.b32.xlu1 %v406_v2, %s1069_s18  ;;  %392 = vrot.lane.b32.xlu0 %v360_v1, %s1073_s11 }
  0x2c   : > { %421 = vrot.lane.b32.xlu1 %v406_v2, %s1068_s17  ;;  %417 = vrot.lane.b32.xlu0 %v406_v2, %s1066_s12 }
  0x30   : > { %603 = vrot.lane.b32.xlu1 %v600_v3, %s1067_s13  ;;  %425 = vrot.lane.b32.xlu0 %v406_v2, %s1071_s7 }
  0x34   : > { %433 = vrot.lane.b32.xlu1 %v406_v2, %s1072_s8  ;;  %429 = vrot.lane.b32.xlu0 %v406_v2, %s1070_s30 }
  0x38   : > { %611 = vrot.lane.b32.xlu1 %v600_v3, %s1066_s12  ;;  %607 = vrot.lane.b32.xlu0 %v600_v3, %s1069_s18 }
  0x3c   : > { %437 = vrot.lane.b32.xlu0 %v406_v2, %s1073_s11  ;;  %615 = vrot.lane.b32.xlu1 %v600_v3, %s1068_s17 }
  0x40   : > { %619 = vrot.lane.b32.xlu0 %v600_v3, %s1071_s7  ;;  %623 = vrot.lane.b32.xlu1 %v600_v3, %s1070_s30 }
  0x44   : > { %627 = vrot.lane.b32.xlu0 %v600_v3, %s1072_s8  ;;  %631 = vrot.lane.b32.xlu1 %v600_v3, %s1073_s11  ;;  %s867_s8 = sshll.u32 %s1287_s22, 2 }
  0x45   : > { %s356_s9 = sadd.s32 %s867_s8, %s1293_s21 }
  0x46   : > { %s868_s10 = sshll.u32 %s356_s9, 3 }
  0x47   : > { %s358_s19 = scalar_lea.vmem %s1275_s6, %s868_s10 }
  0x48   : > { %723 = vperm.xlu0 %1008, %v720_v4   ;;  %730 = vperm.xlu1 %1009, %v727_v5  }
  0x8a   : > { %v373_v7 = vpop.permute.xlu1 %372  ;;  %v365_v8 = vpop.permute.xlu0 %364 }
  0x8b   : > { %375 = vst.msk [vmem:[#allocation2 + $0xc] sm:$0xf] %vm361_vm0, %v373_v7  ;;  %367 = vst.msk [vmem:[#allocation2 + $0x4] sm:$0xf] %vm361_vm0, %v365_v8 }
  0x8e   : > { %v377_v9 = vpop.permute.xlu1 %376  ;;  %v369_v10 = vpop.permute.xlu0 %368 }
  0x8f   : > { %379 = vst.msk [vmem:[#allocation2 + $0x10] sm:$0xf] %vm361_vm0, %v377_v9  ;;  %371 = vst.msk [vmem:[#allocation2 + $0x8] sm:$0xf] %vm361_vm0, %v369_v10 }
  0x92   : > { %v385_v11 = vpop.permute.xlu1 %384  ;;  %v381_v12 = vpop.permute.xlu0 %380  ;;  %v397_v13 = vld [vmem:[#allocation2] sm:$0xff]  }
  0x93   : > { %387 = vst.msk [vmem:[#allocation2 + $0x18] sm:$0xf] %vm361_vm0, %v385_v11  ;;  %383 = vst.msk [vmem:[#allocation2 + $0x14] sm:$0xf] %vm361_vm0, %v381_v12  ;;  %924 = vmatpush3.bf16.msra.mxu0 %v397_v13 }
  0x94   : > { %407 = vst.msk [vmem:[#allocation2] sm:$0xf] %vm361_vm0, %v406_v2  ;;  %925 = vmatprep.subr.bf16.mxu0 %v1065_v0 }
  0x96   : > { %v410_v14 = vpop.permute.xlu1 %409  ;;  %v389_v15 = vpop.permute.xlu0 %388  ;;  %v1010_v16 = vld [vmem:[#allocation2 + $0x8] sm:$0xff]  }
  0x97   : > { %412 = vst.msk [vmem:[#allocation2 + $0x4] sm:$0xf] %vm361_vm0, %v410_v14  ;;  %391 = vst.msk [vmem:[#allocation2 + $0x1c] sm:$0xf] %vm361_vm0, %v389_v15  ;;  %926 = vmatpush3.bf16.msra.mxu0 %v1010_v16 }
  0x98   : > { %927 = vmatprep.subr.bf16.mxu0 %v1065_v0 }
  0x9a   : > { %v414_v17 = vpop.permute.xlu1 %413  ;;  %v393_v18 = vpop.permute.xlu0 %392  ;;  %v1011_v19 = vld [vmem:[#allocation2 + $0x10] sm:$0xff]  }
  0x9b   : > { %416 = vst.msk [vmem:[#allocation2 + $0x8] sm:$0xf] %vm361_vm0, %v414_v17  ;;  %395 = vst.msk [vmem:[#allocation2 + $0x20] sm:$0xf] %vm361_vm0, %v393_v18  ;;  %928 = vmatpush3.bf16.msra.mxu0 %v1011_v19 }
  0x9c   : > { %929 = vmatprep.subr.bf16.mxu0 %v1065_v0 }
  0x9e   : > { %v422_v20 = vpop.permute.xlu1 %421  ;;  %v418_v21 = vpop.permute.xlu0 %417  ;;  %v1012_v22 = vld [vmem:[#allocation2 + $0x18] sm:$0xff]   ;;  %v1013_v23 = vld [vmem:[#allocation2] sm:$0xff]  }
  0x9f   : > { %424 = vst.msk [vmem:[#allocation2 + $0x10] sm:$0xf] %vm361_vm0, %v422_v20  ;;  %420 = vst.msk [vmem:[#allocation2 + $0xc] sm:$0xf] %vm361_vm0, %v418_v21  ;;  %930 = vmatpush3.bf16.msra.mxu0 %v1012_v22  ;;  %910 = vmatpush3.bf16.msra.mxu1 %v1013_v23 }
  0xa0   : > { %601 = vst.msk [vmem:[#allocation2] sm:$0xf] %vm361_vm0, %v600_v3  ;;  %931 = vmatprep.subr.bf16.mxu0 %v1065_v0  ;;  %911 = vmatprep.subr.bf16.mxu1 %v1065_v0 }
  0xa2   : > { %v604_v24 = vpop.permute.xlu1 %603  ;;  %v426_v25 = vpop.permute.xlu0 %425  ;;  %v1014_v26 = vld [vmem:[#allocation2 + $0x20] ss:$0 sps:$4 sm:$0xff]  }
  0xa3   : > { %428 = vst.msk [vmem:[#allocation2 + $0x14] sm:$0xf] %vm361_vm0, %v426_v25  ;;  %606 = vst.msk [vmem:[#allocation2 + $0x4] sm:$0xf] %vm361_vm0, %v604_v24  ;;  %v558_v27 = vsel %vm483_vm2, %v1014_v26, 0 }
  0xa4   : > { %932 = vmatpush3.bf16.msra.mxu0 %v558_v27 }
  0xa5   : > { %937 = vmatprep.subr.bf16.mxu0 %v1065_v0 }
  0xa6   : > { %v434_v29 = vpop.permute.xlu1 %433  ;;  %v430_v30 = vpop.permute.xlu0 %429  ;;  %v1015_v31 = vld [vmem:[#allocation2 + $0x8] sm:$0xff]  }
  0xa7   : > { %436 = vst.msk [vmem:[#allocation2 + $0x1c] sm:$0xf] %vm361_vm0, %v434_v29  ;;  %432 = vst.msk [vmem:[#allocation2 + $0x18] sm:$0xf] %vm361_vm0, %v430_v30  ;;  %912 = vmatpush3.bf16.msra.mxu1 %v1015_v31  ;;  %934 = vmatmul.mubr.msk.bf16.vlgmr.msra.gmra.mrb[0].mxu0 %vm479_vm3, %v396_v28 }
  0xa8   : > { %913 = vmatprep.subr.bf16.mxu1 %v1065_v0  ;;  %947 = vmatprep.mubr.msk.bf16.mxu0 %vm1074_vm1, %v1065_v0 }
  0xaa   : > { %v612_v32 = vpop.permute.xlu1 %611  ;;  %v608_v33 = vpop.permute.xlu0 %607  ;;  %v1016_v34 = vld [vmem:[#allocation2 + $0x10] sm:$0xff]   ;;  %v1017_v35 = vld [vmem:[#allocation2] sm:$0xff]  }
  0xab   : > { %614 = vst.msk [vmem:[#allocation2 + $0xc] sm:$0xf] %vm361_vm0, %v612_v32  ;;  %610 = vst.msk [vmem:[#allocation2 + $0x8] sm:$0xf] %vm361_vm0, %v608_v33  ;;  %914 = vmatpush3.bf16.msra.mxu1 %v1016_v34  ;;  %938 = vmatpush3.bf16.msra.mxu0 %v1017_v35 }
  0xac   : > { %915 = vmatprep.subr.bf16.mxu1 %v1065_v0  ;;  %939 = vmatprep.subr.bf16.mxu0 %v1065_v0 }
  0xae   : > { %v438_v36 = vpop.permute.xlu0 %437  ;;  %v616_v37 = vpop.permute.xlu1 %615  ;;  %v1018_v38 = vld [vmem:[#allocation2 + $0x18] sm:$0xff]  }
  0xaf   : > { %440 = vst.msk [vmem:[#allocation2 + $0x20] sm:$0xf] %vm361_vm0, %v438_v36  ;;  %618 = vst.msk [vmem:[#allocation2 + $0x10] sm:$0xf] %vm361_vm0, %v616_v37  ;;  %916 = vmatpush3.bf16.msra.mxu1 %v1018_v38 }
  0xb0   : > { %917 = vmatprep.subr.bf16.mxu1 %v1065_v0 }
  0xb2   : > { %v620_v39 = vpop.permute.xlu0 %619  ;;  %v624_v40 = vpop.permute.xlu1 %623  ;;  %v1019_v41 = vld [vmem:[#allocation2 + $0x8] sm:$0xff]  }
  0xb3   : > { %622 = vst.msk [vmem:[#allocation2 + $0x14] sm:$0xf] %vm361_vm0, %v620_v39  ;;  %626 = vst.msk [vmem:[#allocation2 + $0x18] sm:$0xf] %vm361_vm0, %v624_v40  ;;  %940 = vmatpush3.bf16.msra.mxu0 %v1019_v41 }
  0xb4   : > { %941 = vmatprep.subr.bf16.mxu0 %v1065_v0 }
  0xb6   : > { %v628_v42 = vpop.permute.xlu0 %627  ;;  %v632_v43 = vpop.permute.xlu1 %631  ;;  %v1020_v44 = vld [vmem:[#allocation2 + $0x20] ss:$0 sps:$4 sm:$0xff]  }
  0xb7   : > { %630 = vst.msk [vmem:[#allocation2 + $0x1c] sm:$0xf] %vm361_vm0, %v628_v42  ;;  %634 = vst.msk [vmem:[#allocation2 + $0x20] sm:$0xf] %vm361_vm0, %v632_v43  ;;  %v485_v45 = vsel %vm483_vm2, %v1020_v44, 0 }
  0xb8   : > { %918 = vmatpush3.bf16.msra.mxu1 %v485_v45 }
  0xba   : > { %v1021_v47 = vld [vmem:[#allocation2 + $0x10] sm:$0xff]  }
  0xbb   : > { %942 = vmatpush3.bf16.msra.mxu0 %v1021_v47  ;;  %920 = vmatmul.mubr.msk.bf16.vlgmr.msra.gmra.mrb[0].mxu1 %vm479_vm3, %v869_v46 }
  0xbc   : > { %943 = vmatprep.subr.bf16.mxu0 %v1065_v0 }
  0xbe   : > { %v1022_v48 = vld [vmem:[#allocation2 + $0x18] sm:$0xff]   ;;  %v1023_v49 = vld [vmem:[#allocation2 + $0x20] ss:$0 sps:$4 sm:$0xff]  }
  0xbf   : > { %944 = vmatpush3.bf16.msra.mxu0 %v1022_v48  ;;  %v677_v50 = vsel %vm483_vm2, %v1023_v49, 0 }
  0xc0   : > { %945 = vmatprep.subr.bf16.mxu0 %v1065_v0 }
  0xc3   : > { %946 = vmatpush3.bf16.msra.mxu0 %v677_v50 }
  0xc6   : > { %948 = vmatmul.mubr.msk.bf16.vlgmr.msra.gmra.mrb[0].mxu0 %vm479_vm3, %v882_v51 }
  0xc7   : > { %v724_v57 = vpop.permute.xlu0 %723  ;;  %v731_v61 = vpop.permute.xlu1 %730 }
 0x18e   : > { %v521_v52 = vpop.f32.mrb[0].mxu1 }
 0x18f   : > { %v921_v53 = vpop.f32.mrb[1].mxu1 }
 0x190   : > { %v524_v54 = vpop.f32.mrb[2].mxu1 }
 0x191   : > { %v922_v55 = vpop.f32.mrb[3].mxu1 }
 0x199   : > { %v713_v56 = vpop.f32.mrb[0].mxu0 }
 0x19a   : > { %v951_v58 = vadd.f32 %v713_v56, %v521_v52  ;;  %v949_v59 = vpop.f32.mrb[1].mxu0 }
 0x19b   : > { %v716_v60 = vpop.f32.mrb[2].mxu0 }
 0x19c   : > { %v726_v62 = vmul.f32 %v951_v58, %v724_v57  ;;  %v950_v63 = vpop.f32.mrb[3].mxu0 }
 0x19e   : > { %v733_v0 = vadd.f32 %v731_v61, %v726_v62 }
 0x1a0   : > { %v734_v1 = vmax.f32 %v733_v0, 0.0 }
 0x1a2   : > { %736 = vst.msk [vmem:[%s358_s19] sm:$0xff] %vm735_vm4, %v734_v1 }
 0x1a3 PF: > { %s16_s25 = sadd.s32 1, %s1063_s25   ;;  %s1276_s21 = smov %s1055_s23 }
 0x1a4   : > { %p13_p10 = scmp.ge.s32.totalorder %s16_s25, 10   ;;  %s1277_s22 = smov %s1059_s24 }
 0x1a5   : > { %s1278_s23 = smov %s1281_s26  ;;  %s1279_s24 = smov %s1285_s27 }
 0x1a6   :  { %15 = sbr.rel (!%p13_p10) target bundleno = 3 (0x3), region = 82 }

// kernel: decoder_video_forward.8
= control target key start
LH: loop header
LB: loop body
LE: loop exit
PB: predicated region body
PF: predicated region fallthrough
CT: control target
= control target key end

     0   :  { %s1207_s24 = smov 0   ;;  %s1209_s25 = smov 0   ;;  %s1384_s0 = inlined_call_operand.vmem [shape: bf16[2,6,8,122], index: 0, kind: input, shape index: {}, may-alias: {0,1,2}]   ;;  %s1385_s1 = inlined_call_operand.vmem [shape: bf16[2,6,8,122], index: 1, kind: input, shape index: {}, may-alias: {0,1,2}]   ;;  %s1386_s2 = inlined_call_operand.vmem [shape: bf16[2,6,8,122], index: 2, kind: input, shape index: {}, may-alias: {0,1,2}]   ;;  %s1387_s3 = inlined_call_operand.vmem [shape: bf16[2,6,8,122], index: 3, kind: input, shape index: {}]   ;;  %s1388_s4 = inlined_call_operand.vmem [shape: bf16[3,8,72], index: 4, kind: input, shape index: {}]   ;;  %s1389_s5 = inlined_call_operand.vmem [shape: f32[8,1], index: 5, kind: input, shape index: {}]   ;;  %s1390_s6 = inlined_call_operand.vmem [shape: f32[8,1], index: 6, kind: input, shape index: {}]   ;;  %s1391_s7 = inlined_call_operand.vmem [shape: f32[2,4,8,100], index: 7, kind: output, shape index: {}]  }
   0x1   :  { %s1211_s26 = smov 0   ;;  %s1213_s27 = smov 0  }
   0x2   :  { %s1215_s28 = smov 0  }
   0x3 LB: > { %s26_s29 = sadd.s32 1, %s1146_s26  ;;  %s29_s30 = sadd.s32 1, %s1150_s27  ;;  %s1154_s28 = sphi %s1215_s28, %s17_s28   ;;  %s1150_s27 = sphi %s1213_s27, %s1401_s27   ;;  %s1146_s26 = sphi %s1211_s26, %s1400_s26   ;;  %s1142_s25 = sphi %s1209_s25, %s1399_s25   ;;  %s1138_s24 = sphi %s1207_s24, %s1398_s24  }
   0x4   : > { %p27_p0 = scmp.ge.s32.totalorder %s26_s29, 4  ;;  %p953_p1 = scmp.ge.s32.totalorder %s1154_s28, 1 }
   0x5   : > { %p313_p2 = scmp.lt.s32.totalorder %s1154_s28, 9 }
   0x6   : > { %s1403_s29 = smov (%p27_p0, %s26_s29), 0  ;;  %s1405_s30 = smov (!%p27_p0, %s29_s30), %s1150_s27 }
   0x7   : > { %p314_p3 = pnand %p953_p1, %p313_p2  ;;  %p31_p4 = scmp.ge.s32.totalorder %s1405_s30, 2 }
   0x8   : > { %p378_p5 = scmp.lt.s32.totalorder (!%p314_p3), %s1142_s25, 1  ;;  %p380_p6 = scmp.lt.s32.totalorder (!%p314_p3), %s1138_s24, 5  ;;  %v1156_v0 = vmov (!%p314_p3), 0.0   ;;  %vm426_vm0 = vcmask (!%p314_p3), 814080   ;;  %vm1165_vm1 = vmmov (!%p314_p3), 0   ;;  %v792_v4 = vld [vmem:[%s1390_s6] sm:$0xff] (!%p314_p3) }
   0x9   : > { %s1407_s30 = smov (%p31_p4, %s1405_s30), 0  ;;  %317 = sbr.rel (%p314_p3) target bundleno = 421 (0x1a5), region = 48 }
   0xa   : > { %1014 = vmatprep.subr.bf16.mxu0 (!%p314_p3), %v1156_v0  ;;  %1000 = vmatprep.subr.bf16.mxu1 (!%p314_p3), %v1156_v0  ;;  %s386_s12 = sadd.s32 (!%p314_p3), 1, %s1138_s24  ;;  %s1392_s16 = smov (!%p314_p3), 118   ;;  %v785_v5 = vld [vmem:[%s1389_s5] sm:$0xff] (!%p314_p3)  ;;  %v1166_v6 = vmov (!%p314_p3), 0   ;;  %vm548_vm2 = vcmask (!%p314_p3), 1043456   ;;  %vm544_vm3 = vcmask (!%p314_p3), 588800  }
   0xb   : > { %p389_p7 = scmp.lt.s32.totalorder (!%p314_p3), %s386_s12, 5  ;;  %s1158_s17 = smov (!%p314_p3), 127   ;;  %1024 = vmatprep.mubr.msk.bf16.mxu0 (!%p314_p3), %vm1165_vm1, %v1156_v0  ;;  %1010 = vmatprep.mubr.msk.bf16.mxu1 (!%p314_p3), %vm1165_vm1, %v1156_v0  ;;  %v461_v30 = vld [vmem:[%s1388_s4] sm:$0xf] (!%p314_p3)  ;;  %v960_v48 = vld [vmem:[%s1388_s4 + $0x4] sm:$0xf] (!%p314_p3) }
   0xc   : > { %s396_s18 = sadd.s32 (!%p314_p3), 2, %s1138_s24  ;;  %s1159_s21 = smov (!%p314_p3), 117   ;;  %1100 = vset.pattern.permute.xlu1 (!%p314_p3), %v1166_v6  ;;  %1099 = vset.pattern.permute.xlu0 (!%p314_p3), %v1166_v6  ;;  %v973_v53 = vld [vmem:[%s1388_s4 + $0x8] sm:$0xf] (!%p314_p3)  ;;  %vm807_vm4 = vcmask (!%p314_p3), 818176  }
   0xd   : > { %s1160_s22 = smov (!%p314_p3), 126   ;;  %p399_p8 = scmp.lt.s32.totalorder (!%p314_p3), %s396_s18, 5 }
   0xe   : > { %s1162_s13 = smov (!%p314_p3), 116   ;;  %p418_p9 = scmp.lt.s32.totalorder (!%p314_p3), %s1138_s24, 3 }
  0x10   : > { %s1409_s25 = smov (!%p378_p5, %s1142_s25), 1  ;;  %s1411_s12 = smov (!%p389_p7, %s386_s12), 5 }
  0x11   : > { %s381_s8 = scalar_select %p380_p6, %s1138_s24, 5 }
  0x12   : > { %s1244_s9 = smul.u32 6, %s1409_s25  ;;  %s1413_s18 = smov (!%p399_p8, %s396_s18), 5 }
  0x13   : > { %s1415_s24 = smov (!%p418_p9, %s1138_s24), 3  ;;  %s958_s23 = sshll.u32 %s1409_s25, 2 }
  0x14   : > { %s383_s10 = sadd.s32 %s1244_s9, %s381_s8  ;;  %s392_s19 = sadd.s32 %s1244_s9, %s1411_s12 }
  0x15   : > { %s954_s11 = sshll.u32 %s383_s10, 2  ;;  %s1258_s20 = sshll.u32 %s392_s19, 2 }
  0x16   : > { %s385_s15 = scalar_lea.vmem %s1384_s0, %s954_s11  ;;  %s394_s10 = scalar_lea.vmem %s1385_s1, %s1258_s20 }
  0x17   : > { %v425_v1 = vld [vmem:[%s385_s15] sm:$0xf]  ;;  %s1394_s11 = smov 108   ;;  %s1163_s12 = smov 107  }
  0x18   : > { %437 = vrot.lane.b32.xlu1 %v425_v1, %s1392_s16  ;;  %429 = vrot.lane.b32.xlu0 %v425_v1, %s1158_s17  ;;  %427 = vst.msk [vmem:[#allocation2] sm:$0xf] %vm426_vm0, %v425_v1  ;;  %v471_v2 = vld [vmem:[%s394_s10] sm:$0xf]  ;;  %s402_s14 = sadd.s32 %s1244_s9, %s1413_s18  ;;  %s1164_s19 = smov 106  }
  0x19   : > { %s956_s15 = sshll.u32 %s402_s14, 2  ;;  %s1397_s9 = smov 108  }
  0x1a   : > { %s404_s8 = scalar_lea.vmem %s1386_s2, %s956_s15  ;;  %s414_s14 = scalar_lea.vmem %s1387_s3, %s1258_s20 }
  0x1b   : > { %v1275_v3 = vld [vmem:[%s404_s8] sm:$0xf]  ;;  %s421_s8 = sadd.s32 %s958_s23, %s1415_s24 }
  0x1c   : > { %441 = vrot.lane.b32.xlu1 %v425_v1, %s1159_s21  ;;  %433 = vrot.lane.b32.xlu0 %v425_v1, %s1160_s22  ;;  %v799_v7 = vld [vmem:[%s414_s14] sm:$0xf] }
  0x1d   : > { %v800_v8 = vunpack.c.l.bf16 %v799_v7 }
  0x20   : > { %449 = vrot.lane.b32.xlu1 %v425_v1, %s1394_s11  ;;  %445 = vrot.lane.b32.xlu0 %v425_v1, %s1162_s13  ;;  %s1396_s11 = smov 118  }
  0x24   : > { %474 = vrot.lane.b32.xlu1 %v471_v2, %s1158_s17  ;;  %453 = vrot.lane.b32.xlu0 %v425_v1, %s1163_s12 }
  0x28   : > { %478 = vrot.lane.b32.xlu1 %v471_v2, %s1160_s22  ;;  %457 = vrot.lane.b32.xlu0 %v425_v1, %s1164_s19 }
  0x2c   : > { %486 = vrot.lane.b32.xlu1 %v471_v2, %s1159_s21  ;;  %482 = vrot.lane.b32.xlu0 %v471_v2, %s1396_s11 }
  0x30   : > { %668 = vrot.lane.b32.xlu1 %v1275_v3, %s1158_s17  ;;  %490 = vrot.lane.b32.xlu0 %v471_v2, %s1162_s13 }
  0x34   : > { %498 = vrot.lane.b32.xlu1 %v471_v2, %s1163_s12  ;;  %494 = vrot.lane.b32.xlu0 %v471_v2, %s1397_s9 }
  0x38   : > { %676 = vrot.lane.b32.xlu1 %v1275_v3, %s1396_s11  ;;  %672 = vrot.lane.b32.xlu0 %v1275_v3, %s1160_s22 }
  0x3c   : > { %502 = vrot.lane.b32.xlu0 %v471_v2, %s1164_s19  ;;  %680 = vrot.lane.b32.xlu1 %v1275_v3, %s1159_s21 }
  0x40   : > { %684 = vrot.lane.b32.xlu0 %v1275_v3, %s1162_s13  ;;  %688 = vrot.lane.b32.xlu1 %v1275_v3, %s1397_s9  ;;  %s959_s9 = sshll.u32 %s421_s8, 3 }
  0x41   : > { %s423_s18 = scalar_lea.vmem %s1391_s7, %s959_s9 }
  0x44   : > { %692 = vrot.lane.b32.xlu0 %v1275_v3, %s1163_s12  ;;  %696 = vrot.lane.b32.xlu1 %v1275_v3, %s1164_s19 }
  0x48   : > { %795 = vperm.xlu1 %1100, %v792_v4   ;;  %788 = vperm.xlu0 %1099, %v785_v5  }
  0x4c   : > { %802 = vrot.lane.b32.xlu1 %v800_v8, %s1159_s21 }
  0x8a   : > { %v438_v9 = vpop.permute.xlu1 %437  ;;  %v430_v10 = vpop.permute.xlu0 %429 }
  0x8b   : > { %440 = vst.msk [vmem:[#allocation2 + $0xc] sm:$0xf] %vm426_vm0, %v438_v9  ;;  %432 = vst.msk [vmem:[#allocation2 + $0x4] sm:$0xf] %vm426_vm0, %v430_v10 }
  0x8e   : > { %v442_v11 = vpop.permute.xlu1 %441  ;;  %v434_v12 = vpop.permute.xlu0 %433 }
  0x8f   : > { %444 = vst.msk [vmem:[#allocation2 + $0x10] sm:$0xf] %vm426_vm0, %v442_v11  ;;  %436 = vst.msk [vmem:[#allocation2 + $0x8] sm:$0xf] %vm426_vm0, %v434_v12 }
  0x92   : > { %v450_v13 = vpop.permute.xlu1 %449  ;;  %v446_v14 = vpop.permute.xlu0 %445  ;;  %v462_v15 = vld [vmem:[#allocation2] sm:$0xff]  }
  0x93   : > { %452 = vst.msk [vmem:[#allocation2 + $0x18] sm:$0xf] %vm426_vm0, %v450_v13  ;;  %448 = vst.msk [vmem:[#allocation2 + $0x14] sm:$0xf] %vm426_vm0, %v446_v14  ;;  %1015 = vmatpush3.bf16.msra.mxu0 %v462_v15 }
  0x94   : > { %472 = vst.msk [vmem:[#allocation2] sm:$0xf] %vm426_vm0, %v471_v2  ;;  %1016 = vmatprep.subr.bf16.mxu0 %v1156_v0 }
  0x96   : > { %v475_v16 = vpop.permute.xlu1 %474  ;;  %v454_v17 = vpop.permute.xlu0 %453  ;;  %v1101_v18 = vld [vmem:[#allocation2 + $0x8] sm:$0xff]  }
  0x97   : > { %477 = vst.msk [vmem:[#allocation2 + $0x4] sm:$0xf] %vm426_vm0, %v475_v16  ;;  %456 = vst.msk [vmem:[#allocation2 + $0x1c] sm:$0xf] %vm426_vm0, %v454_v17  ;;  %1017 = vmatpush3.bf16.msra.mxu0 %v1101_v18 }
  0x98   : > { %1018 = vmatprep.subr.bf16.mxu0 %v1156_v0 }
  0x9a   : > { %v479_v19 = vpop.permute.xlu1 %478  ;;  %v458_v20 = vpop.permute.xlu0 %457  ;;  %v1102_v21 = vld [vmem:[#allocation2 + $0x10] sm:$0xff]  }
  0x9b   : > { %481 = vst.msk [vmem:[#allocation2 + $0x8] sm:$0xf] %vm426_vm0, %v479_v19  ;;  %460 = vst.msk [vmem:[#allocation2 + $0x20] sm:$0xf] %vm426_vm0, %v458_v20  ;;  %1019 = vmatpush3.bf16.msra.mxu0 %v1102_v21 }
  0x9c   : > { %1020 = vmatprep.subr.bf16.mxu0 %v1156_v0 }
  0x9e   : > { %v487_v22 = vpop.permute.xlu1 %486  ;;  %v483_v23 = vpop.permute.xlu0 %482  ;;  %v1103_v24 = vld [vmem:[#allocation2 + $0x18] sm:$0xff]   ;;  %v1104_v25 = vld [vmem:[#allocation2] sm:$0xff]  }
  0x9f   : > { %489 = vst.msk [vmem:[#allocation2 + $0x10] sm:$0xf] %vm426_vm0, %v487_v22  ;;  %485 = vst.msk [vmem:[#allocation2 + $0xc] sm:$0xf] %vm426_vm0, %v483_v23  ;;  %1021 = vmatpush3.bf16.msra.mxu0 %v1103_v24  ;;  %1001 = vmatpush3.bf16.msra.mxu1 %v1104_v25 }
  0xa0   : > { %666 = vst.msk [vmem:[#allocation2] sm:$0xf] %vm426_vm0, %v1275_v3  ;;  %1022 = vmatprep.subr.bf16.mxu0 %v1156_v0  ;;  %1002 = vmatprep.subr.bf16.mxu1 %v1156_v0 }
  0xa2   : > { %v669_v26 = vpop.permute.xlu1 %668  ;;  %v491_v27 = vpop.permute.xlu0 %490  ;;  %v1105_v28 = vld [vmem:[#allocation2 + $0x20] ss:$0 sps:$4 sm:$0xff]  }
  0xa3   : > { %493 = vst.msk [vmem:[#allocation2 + $0x14] sm:$0xf] %vm426_vm0, %v491_v27  ;;  %671 = vst.msk [vmem:[#allocation2 + $0x4] sm:$0xf] %vm426_vm0, %v669_v26  ;;  %v623_v29 = vsel %vm548_vm2, %v1105_v28, 0 }
  0xa4   : > { %1023 = vmatpush3.bf16.msra.mxu0 %v623_v29 }
  0xa5   : > { %1028 = vmatprep.subr.bf16.mxu0 %v1156_v0 }
  0xa6   : > { %v499_v31 = vpop.permute.xlu1 %498  ;;  %v495_v32 = vpop.permute.xlu0 %494  ;;  %v1106_v33 = vld [vmem:[#allocation2 + $0x8] sm:$0xff]  }
  0xa7   : > { %501 = vst.msk [vmem:[#allocation2 + $0x1c] sm:$0xf] %vm426_vm0, %v499_v31  ;;  %497 = vst.msk [vmem:[#allocation2 + $0x18] sm:$0xf] %vm426_vm0, %v495_v32  ;;  %1003 = vmatpush3.bf16.msra.mxu1 %v1106_v33  ;;  %1025 = vmatmul.mubr.msk.bf16.vlgmr.msra.gmra.mrb[0].mxu0 %vm544_vm3, %v461_v30 }
  0xa8   : > { %1004 = vmatprep.subr.bf16.mxu1 %v1156_v0  ;;  %1038 = vmatprep.mubr.msk.bf16.mxu0 %vm1165_vm1, %v1156_v0 }
  0xaa   : > { %v677_v34 = vpop.permute.xlu1 %676  ;;  %v673_v35 = vpop.permute.xlu0 %672  ;;  %v1107_v36 = vld [vmem:[#allocation2 + $0x10] sm:$0xff]   ;;  %v1108_v37 = vld [vmem:[#allocation2] sm:$0xff]  }
  0xab   : > { %679 = vst.msk [vmem:[#allocation2 + $0xc] sm:$0xf] %vm426_vm0, %v677_v34  ;;  %675 = vst.msk [vmem:[#allocation2 + $0x8] sm:$0xf] %vm426_vm0, %v673_v35  ;;  %1005 = vmatpush3.bf16.msra.mxu1 %v1107_v36  ;;  %1029 = vmatpush3.bf16.msra.mxu0 %v1108_v37 }
  0xac   : > { %1006 = vmatprep.subr.bf16.mxu1 %v1156_v0  ;;  %1030 = vmatprep.subr.bf16.mxu0 %v1156_v0 }
  0xae   : > { %v503_v38 = vpop.permute.xlu0 %502  ;;  %v681_v39 = vpop.permute.xlu1 %680  ;;  %v1109_v40 = vld [vmem:[#allocation2 + $0x18] sm:$0xff]  }
  0xaf   : > { %505 = vst.msk [vmem:[#allocation2 + $0x20] sm:$0xf] %vm426_vm0, %v503_v38  ;;  %683 = vst.msk [vmem:[#allocation2 + $0x10] sm:$0xf] %vm426_vm0, %v681_v39  ;;  %1007 = vmatpush3.bf16.msra.mxu1 %v1109_v40 }
  0xb0   : > { %1008 = vmatprep.subr.bf16.mxu1 %v1156_v0 }
  0xb2   : > { %v685_v41 = vpop.permute.xlu0 %684  ;;  %v689_v42 = vpop.permute.xlu1 %688  ;;  %v1110_v43 = vld [vmem:[#allocation2 + $0x8] sm:$0xff]  }
  0xb3   : > { %687 = vst.msk [vmem:[#allocation2 + $0x14] sm:$0xf] %vm426_vm0, %v685_v41  ;;  %691 = vst.msk [vmem:[#allocation2 + $0x18] sm:$0xf] %vm426_vm0, %v689_v42  ;;  %1031 = vmatpush3.bf16.msra.mxu0 %v1110_v43 }
  0xb4   : > { %1032 = vmatprep.subr.bf16.mxu0 %v1156_v0 }
  0xb6   : > { %v693_v44 = vpop.permute.xlu0 %692  ;;  %v697_v45 = vpop.permute.xlu1 %696  ;;  %v1111_v46 = vld [vmem:[#allocation2 + $0x20] ss:$0 sps:$4 sm:$0xff]  }
  0xb7   : > { %695 = vst.msk [vmem:[#allocation2 + $0x1c] sm:$0xf] %vm426_vm0, %v693_v44  ;;  %699 = vst.msk [vmem:[#allocation2 + $0x20] sm:$0xf] %vm426_vm0, %v697_v45  ;;  %v550_v47 = vsel %vm548_vm2, %v1111_v46, 0 }
  0xb8   : > { %1009 = vmatpush3.bf16.msra.mxu1 %v550_v47 }
  0xba   : > { %v1112_v49 = vld [vmem:[#allocation2 + $0x10] sm:$0xff]  }
  0xbb   : > { %1033 = vmatpush3.bf16.msra.mxu0 %v1112_v49  ;;  %1011 = vmatmul.mubr.msk.bf16.vlgmr.msra.gmra.mrb[0].mxu1 %vm544_vm3, %v960_v48 }
  0xbc   : > { %1034 = vmatprep.subr.bf16.mxu0 %v1156_v0 }
  0xbe   : > { %v1113_v50 = vld [vmem:[#allocation2 + $0x18] sm:$0xff]   ;;  %v1114_v51 = vld [vmem:[#allocation2 + $0x20] ss:$0 sps:$4 sm:$0xff]  }
  0xbf   : > { %1035 = vmatpush3.bf16.msra.mxu0 %v1113_v50  ;;  %v742_v52 = vsel %vm548_vm2, %v1114_v51, 0 }
  0xc0   : > { %1036 = vmatprep.subr.bf16.mxu0 %v1156_v0 }
  0xc3   : > { %1037 = vmatpush3.bf16.msra.mxu0 %v742_v52 }
  0xc6   : > { %1039 = vmatmul.mubr.msk.bf16.vlgmr.msra.gmra.mrb[0].mxu0 %vm544_vm3, %v973_v53 }
  0xc7   : > { %v796_v58 = vpop.permute.xlu1 %795  ;;  %v789_v60 = vpop.permute.xlu0 %788 }
  0xcb   : > { %v803_v2 = vpop.permute.xlu1 %802 }
 0x18e   : > { %v586_v54 = vpop.f32.mrb[0].mxu1 }
 0x18f   : > { %v1012_v55 = vpop.f32.mrb[1].mxu1 }
 0x190   : > { %v589_v56 = vpop.f32.mrb[2].mxu1 }
 0x191   : > { %v1013_v57 = vpop.f32.mrb[3].mxu1 }
 0x199   : > { %v778_v59 = vpop.f32.mrb[0].mxu0 }
 0x19a   : > { %v1042_v61 = vadd.f32 %v778_v59, %v586_v54  ;;  %v1040_v62 = vpop.f32.mrb[1].mxu0 }
 0x19b   : > { %v781_v63 = vpop.f32.mrb[2].mxu0 }
 0x19c   : > { %v791_v0 = vmul.f32 %v1042_v61, %v789_v60  ;;  %v1041_v1 = vpop.f32.mrb[3].mxu0 }
 0x19e   : > { %v798_v3 = vadd.f32 %v796_v58, %v791_v0 }
 0x1a0   : > { %v805_v4 = vadd.f32 %v803_v2, %v798_v3 }
 0x1a2   : > { %v806_v5 = vmax.f32 %v805_v4, 0.0 }
 0x1a4   : > { %808 = vst.msk [vmem:[%s423_s18] sm:$0xff] %vm807_vm4, %v806_v5 }
 0x1a5 PF: > { %s17_s28 = sadd.s32 1, %s1154_s28   ;;  %s1398_s24 = smov %s1146_s26 }
 0x1a6   : > { %p14_p10 = scmp.ge.s32.totalorder %s17_s28, 10   ;;  %s1399_s25 = smov %s1150_s27 }
 0x1a7   : > { %s1400_s26 = smov %s1403_s29  ;;  %s1401_s27 = smov %s1407_s30 }
 0x1a8   :  { %16 = sbr.rel (!%p14_p10) target bundleno = 3 (0x3), region = 89 }

// kernel: decoder_video_forward.11
= control target key start
LH: loop header
LB: loop body
LE: loop exit
PB: predicated region body
PF: predicated region fallthrough
CT: control target
= control target key end

     0   :  { %s3042_s27 = smov 0   ;;  %s3044_s28 = smov 0   ;;  %s3993_s0 = inlined_call_operand.vmem [shape: bf16[2,8,8,196], index: 0, kind: input, shape index: {}, may-alias: {0,1,2,3,4}]   ;;  %s3994_s1 = inlined_call_operand.vmem [shape: bf16[2,8,8,196], index: 1, kind: input, shape index: {}, may-alias: {0,1,2,3,4}]   ;;  %s3995_s2 = inlined_call_operand.vmem [shape: bf16[2,8,8,196], index: 2, kind: input, shape index: {}, may-alias: {0,1,2,3,4}]   ;;  %s3996_s3 = inlined_call_operand.vmem [shape: bf16[2,8,8,196], index: 3, kind: input, shape index: {}, may-alias: {0,1,2,3,4}]   ;;  %s3997_s4 = inlined_call_operand.vmem [shape: bf16[2,8,8,196], index: 4, kind: input, shape index: {}, may-alias: {0,1,2,3,4}]   ;;  %s3998_s5 = inlined_call_operand.vmem [shape: bf16[5,3,200], index: 5, kind: input, shape index: {}]   ;;  %s3999_s6 = inlined_call_operand.vmem [shape: f32[3,1], index: 6, kind: input, shape index: {}]   ;;  %s4000_s7 = inlined_call_operand.vmem [shape: f32[3,1], index: 7, kind: input, shape index: {}]   ;;  %s4001_s8 = inlined_call_operand.vmem [shape: f32[2,4,3,144], index: 8, kind: output, shape index: {}]  }
   0x1   :  { %4065 = sst [smem:[#allocation8_spill]] %s3993_s0  ;;  %s3046_s29 = smov 0  }
   0x2   :  { %4066 = sst [smem:[#allocation9_spill]] %s3994_s1  ;;  %s3048_s30 = smov 0  }
   0x3   :  { %4067 = sst [smem:[#allocation10_spill]] %s3995_s2  ;;  %s3050_s9 = smov 0  }
   0x4   :  { %4068 = sst [smem:[#allocation11_spill]] %s3996_s3 }
   0x5   :  { %4069 = sst [smem:[#allocation12_spill]] %s4001_s8 }
   0x6 LB: > { %4070 = sst [smem:[#allocation3_spill]] %s2962_s29  ;;  %s27_s10 = sadd.s32 1, %s2962_s29  ;;  %s2970_s9 = sphi %s3050_s9, %s18_s9   ;;  %s2966_s30 = sphi %s3048_s30, %s4137_s30   ;;  %s2962_s29 = sphi %s3046_s29, %s4136_s29   ;;  %s2958_s28 = sphi %s3044_s28, %s4135_s28   ;;  %s2954_s27 = sphi %s3042_s27, %s4134_s27  }
   0x7   : > { %4071 = sst [smem:[#allocation4_spill]] %s2966_s30  ;;  %s30_s11 = sadd.s32 1, %s2966_s30 }
   0x8   : > { %4072 = sst [smem:[#allocation5_spill]] %s2970_s9  ;;  %p28_p0 = scmp.ge.s32.totalorder %s27_s10, 4 }
   0x9   : > { %p2544_p1 = scmp.ge.s32.totalorder %s2970_s9, 1  ;;  %p362_p2 = scmp.lt.s32.totalorder %s2970_s9, 9 }
   0xa   : > { %s4139_s10 = smov (%p28_p0, %s27_s10), 0  ;;  %s4141_s11 = smov (!%p28_p0, %s30_s11), %s2966_s30 }
   0xb   : > { %4073 = sst [smem:[#allocation6_spill]] %s4139_s10  ;;  %p363_p3 = pnand %p2544_p1, %p362_p2 }
   0xc   : > { %p32_p4 = scmp.ge.s32.totalorder %s4141_s11, 2  ;;  %p444_p5 = scmp.lt.s32.totalorder (!%p363_p3), %s2958_s28, 1  ;;  %vm508_vm0 = vcmask (!%p363_p3), 1043456   ;;  %vm509_vm1 = vcmask (!%p363_p3), 130052   ;;  %vm4064_vm3 = vcmask (!%p363_p3), 1022976   ;;  %vm4063_vm4 = vcmask (!%p363_p3), 1039360  }
   0xd   : > { %366 = sbr.rel (%p363_p3) target bundleno = 644 (0x284), region = 52  ;;  %p446_p6 = scmp.lt.s32.totalorder (!%p363_p3), %s2954_s27, 7  ;;  %vm3084_vm2 = vmor (!%p363_p3), %vm509_vm1, %vm508_vm0  ;;  %vm4048_vm5 = vcmask (!%p363_p3), 1014784   ;;  %vm4062_vm6 = vcmask (!%p363_p3), 1031168   ;;  %vm4050_vm7 = vcmask (!%p363_p3), 949248   ;;  %vm4055_vm8 = vcmask (!%p363_p3), 932864  }
   0xe   : > { %s4143_s11 = smov (%p32_p4, %s4141_s11), 0  ;;  %s453_s16 = sadd.s32 (!%p363_p3), 1, %s2954_s27  ;;  %vm4051_vm9 = vcmask (!%p363_p3), 941056   ;;  %vm4057_vm10 = vcmask (!%p363_p3), 916480   ;;  %vm4056_vm11 = vcmask (!%p363_p3), 924672   ;;  %vm4045_vm12 = vcmask (!%p363_p3), 588800  }
   0xf   : > { %4074 = sst [smem:[#allocation7_spill]] %s4143_s11  ;;  %p456_p7 = scmp.lt.s32.totalorder (!%p363_p3), %s453_s16, 7  ;;  %v2564_v48 = vld.sshfl [vmem:[%s3998_s5 + $0x4] sm:$0x33 pattern:$0x76325410] (!%p363_p3) }
  0x10   : > { %s4077_s0 = sld [smem:[#allocation8_spill]] (!%p363_p3)  ;;  %s4004_s21 = smov (!%p363_p3), 125   ;;  %v889_v53 = vcombine.high (!%p363_p3), %v2564_v48, %v2564_v48  ;;  %vm4058_vm13 = vcmask (!%p363_p3), 850944   ;;  %vm4059_vm14 = vcmask (!%p363_p3), 842752   ;;  %vm4060_vm15 = vcmask (!%p363_p3), 834560  }
  0x11   : > { %s4032_s22 = smov (!%p363_p3), 127   ;;  %s4006_s26 = smov (!%p363_p3), 124   ;;  %vm4061_vm1 = vcmask (!%p363_p3), 826368  }
  0x12   : > { %s4078_s1 = sld [smem:[#allocation9_spill]] (!%p363_p3)  ;;  %s464_s18 = sadd.s32 (!%p363_p3), 2, %s2954_s27  ;;  %2592 = vmatprep.mubr.msk.bf16.mxu1 (!%p363_p3), %vm4045_vm12, %v889_v53 }
  0x13   : > { %p467_p8 = scmp.lt.s32.totalorder (!%p363_p3), %s464_s18, 7  ;;  %s4002_s19 = smov (!%p363_p3), 114  }
  0x14   : > { %s4145_s28 = smov (!%p444_p5, %s2958_s28), 1  ;;  %s4147_s16 = smov (!%p456_p7, %s453_s16), 7 }
  0x15   : > { %s447_s12 = scalar_select %p446_p6, %s2954_s27, 7 }
  0x16   : > { %s3079_s13 = sshll.u32 %s4145_s28, 4  ;;  %s2548_s23 = sshll.u32 %s4147_s16, 1 }
  0x17   : > { %s2545_s14 = sshll.u32 %s447_s12, 1  ;;  %s460_s24 = sadd.s32 %s2548_s23, %s3079_s13 }
  0x18   : > { %s450_s15 = sadd.s32 %s3079_s13, %s2545_s14  ;;  %s2550_s25 = sshll.u32 %s460_s24, 2 }
  0x19   : > { %s2547_s17 = sshll.u32 %s450_s15, 2  ;;  %s4012_s12 = smov 126  }
  0x1a   : > { %s452_s20 = scalar_lea.vmem %s4077_s0, %s2547_s17  ;;  %s462_s17 = scalar_lea.vmem %s4078_s1, %s2550_s25 }
  0x1b   : > { %v3091_v1 = vld [vmem:[%s452_s20] sm:$0xff]  ;;  %s4008_s16 = smov 116   ;;  %s4149_s18 = smov (!%p467_p8, %s464_s18), 7 }
  0x1c   : > { %527 = vrot.lane.b32.xlu1 %v3091_v1, %s4004_s21  ;;  %513 = vrot.lane.b32.xlu0 %v3091_v1, %s4032_s22  ;;  %511 = vst.msk [vmem:[#allocation2] sm:$0xff] %vm3084_vm2, %v3091_v1  ;;  %v3109_v2 = vld [vmem:[%s462_s17] sm:$0xff]  ;;  %s4010_s20 = smov 115   ;;  %s2551_s23 = sshll.u32 %s4149_s18, 1 }
  0x1d   : > { %s471_s24 = sadd.s32 %s2551_s23, %s3079_s13  ;;  %s4016_s14 = smov 112  }
  0x1e   : > { %s2553_s25 = sshll.u32 %s471_s24, 2  ;;  %s4014_s15 = smov 113  }
  0x1f   : > { %s4079_s2 = sld [smem:[#allocation10_spill]]  ;;  %s4018_s23 = smov 104  }
  0x20   : > { %534 = vrot.lane.b32.xlu1 %v3091_v1, %s4006_s26  ;;  %520 = vrot.lane.b32.xlu0 %v3091_v1, %s4012_s12  ;;  %s4080_s24 = smov 114   ;;  %s4049_s17 = smov 101  }
  0x21   : > { %s4081_s3 = sld [smem:[#allocation11_spill]]  ;;  %s4093_s0 = smov 100  }
  0x22   : > { %s4095_s1 = smov 91   ;;  %s4098_s11 = smov 88  }
  0x23   : > { %v3111_v3 = vld [vmem:[#allocation2] sm:$0xff]  ;;  %s4099_s10 = smov 80   ;;  %s4101_s30 = smov 78  }
  0x24   : > { %710 = vrot.lane.b32.xlu1 %v3109_v2, %s4032_s22  ;;  %541 = vrot.lane.b32.xlu0 %v3091_v1, %s4008_s16  ;;  %708 = vst.msk [vmem:[#allocation2] sm:$0xff] %vm3084_vm2, %v3109_v2  ;;  %s4102_s8 = smov 77   ;;  %s4103_s29 = smov 76  }
  0x25   : > { %s473_s18 = scalar_lea.vmem %s4079_s2, %s2553_s25  ;;  %s4022_s25 = smov 102  }
  0x26   : > { %v3140_v4 = vld [vmem:[%s473_s18] sm:$0xff]  ;;  %s4024_s18 = smov 100   ;;  %p499_p11 = scmp.lt.s32.totalorder %s2954_s27, 3 }
  0x28   : > { %555 = vrot.lane.b32.xlu1 %v3091_v1, %s4002_s19  ;;  %548 = vrot.lane.b32.xlu0 %v3091_v1, %s4010_s20  ;;  %s4020_s19 = smov 103  }
  0x2b   : > { %v856_v38 = vld [vmem:[#allocation2] sm:$0xff] }
  0x2c   : > { %722 = vrot.lane.b32.xlu1 %v3109_v2, %s4004_s21  ;;  %716 = vrot.lane.b32.xlu0 %v3109_v2, %s4012_s12 }
  0x30   : > { %569 = vrot.lane.b32.xlu1 %v3091_v1, %s4016_s14  ;;  %562 = vrot.lane.b32.xlu0 %v3091_v1, %s4014_s15 }
  0x34   : > { %734 = vrot.lane.b32.xlu1 %v3109_v2, %s4008_s16  ;;  %728 = vrot.lane.b32.xlu0 %v3109_v2, %s4006_s26 }
  0x38   : > { %576 = vrot.lane.b32.xlu1 %v3091_v1, %s4018_s23  ;;  %1255 = vrot.lane.b32.xlu0 %v3140_v4, %s4032_s22 }
  0x3c   : > { %740 = vrot.lane.b32.xlu1 %v3109_v2, %s4010_s20  ;;  %583 = vrot.lane.b32.xlu0 %v3091_v1, %s4020_s19 }
  0x40   : > { %1261 = vrot.lane.b32.xlu1 %v3140_v4, %s4012_s12  ;;  %746 = vrot.lane.b32.xlu0 %v3109_v2, %s4080_s24  ;;  %s4030_s12 = smov 88  }
  0x44   : > { %590 = vrot.lane.b32.xlu1 %v3091_v1, %s4022_s25  ;;  %1267 = vrot.lane.b32.xlu0 %v3140_v4, %s4004_s21  ;;  %s4046_s21 = smov 92  }
  0x48   : > { %752 = vrot.lane.b32.xlu1 %v3109_v2, %s4014_s15  ;;  %597 = vrot.lane.b32.xlu0 %v3091_v1, %s4049_s17 }
  0x4c   : > { %1273 = vrot.lane.b32.xlu1 %v3140_v4, %s4006_s26  ;;  %758 = vrot.lane.b32.xlu0 %v3109_v2, %s4016_s14  ;;  %s4043_s26 = smov 91  }
  0x50   : > { %604 = vrot.lane.b32.xlu1 %v3091_v1, %s4024_s18  ;;  %1279 = vrot.lane.b32.xlu0 %v3140_v4, %s4008_s16  ;;  %s4026_s16 = smov 90  }
  0x54   : > { %764 = vrot.lane.b32.xlu1 %v3109_v2, %s4018_s23  ;;  %611 = vrot.lane.b32.xlu0 %v3091_v1, %s4046_s21 }
  0x58   : > { %1285 = vrot.lane.b32.xlu1 %v3140_v4, %s4010_s20  ;;  %770 = vrot.lane.b32.xlu0 %v3109_v2, %s4020_s19  ;;  %s4041_s20 = smov 89  }
  0x5c   : > { %618 = vrot.lane.b32.xlu1 %v3091_v1, %s4043_s26  ;;  %1291 = vrot.lane.b32.xlu0 %v3140_v4, %s4080_s24 }
  0x60   : > { %776 = vrot.lane.b32.xlu1 %v3109_v2, %s4022_s25  ;;  %625 = vrot.lane.b32.xlu0 %v3091_v1, %s4026_s16 }
  0x64   : > { %1297 = vrot.lane.b32.xlu1 %v3140_v4, %s4014_s15  ;;  %782 = vrot.lane.b32.xlu0 %v3109_v2, %s4049_s17  ;;  %s4028_s15 = smov 80  }
  0x68   : > { %632 = vrot.lane.b32.xlu1 %v3091_v1, %s4041_s20  ;;  %1303 = vrot.lane.b32.xlu0 %v3140_v4, %s4016_s14  ;;  %s4039_s14 = smov 79  }
  0x6c   : > { %788 = vrot.lane.b32.xlu1 %v3109_v2, %s4024_s18  ;;  %639 = vrot.lane.b32.xlu0 %v3091_v1, %s4030_s12 }
  0x70   : > { %1309 = vrot.lane.b32.xlu1 %v3140_v4, %s4018_s23  ;;  %794 = vrot.lane.b32.xlu0 %v3109_v2, %s4046_s21  ;;  %s4037_s23 = smov 78  }
  0x74   : > { %646 = vrot.lane.b32.xlu1 %v3091_v1, %s4028_s15  ;;  %1315 = vrot.lane.b32.xlu0 %v3140_v4, %s4020_s19  ;;  %s4035_s19 = smov 77  }
  0x78   : > { %800 = vrot.lane.b32.xlu1 %v3109_v2, %s4043_s26  ;;  %653 = vrot.lane.b32.xlu0 %v3091_v1, %s4039_s14 }
  0x7c   : > { %1321 = vrot.lane.b32.xlu1 %v3140_v4, %s4022_s25  ;;  %806 = vrot.lane.b32.xlu0 %v3109_v2, %s4026_s16  ;;  %s4033_s25 = smov 76  }
  0x80   : > { %660 = vrot.lane.b32.xlu1 %v3091_v1, %s4037_s23  ;;  %1327 = vrot.lane.b32.xlu0 %v3140_v4, %s4049_s17 }
  0x84   : > { %812 = vrot.lane.b32.xlu1 %v3109_v2, %s4041_s20  ;;  %667 = vrot.lane.b32.xlu0 %v3091_v1, %s4035_s19 }
  0x88   : > { %1333 = vrot.lane.b32.xlu1 %v3140_v4, %s4024_s18  ;;  %818 = vrot.lane.b32.xlu0 %v3109_v2, %s4030_s12  ;;  %s475_s18 = sadd.s32 3, %s2954_s27 }
  0x89   : > { %p478_p9 = scmp.lt.s32.totalorder %s475_s18, 7 }
  0x8b   : > { %s4151_s18 = smov (!%p478_p9, %s475_s18), 7 }
  0x8c   : > { %674 = vrot.lane.b32.xlu1 %v3091_v1, %s4033_s25  ;;  %1339 = vrot.lane.b32.xlu0 %v3140_v4, %s4046_s21  ;;  %s4096_s21 = smov 90  }
  0x8e   : > { %v528_v5 = vpop.permute.xlu1 %527  ;;  %v514_v6 = vpop.permute.xlu0 %513 }
  0x8f   : > { %v529_v7 = vrot.slane %v528_v5, 4  ;;  %v515_v8 = vrot.slane %v514_v6, 4 }
  0x90   : > { %830 = vrot.lane.b32.xlu1 %v3109_v2, %s4039_s14  ;;  %824 = vrot.lane.b32.xlu0 %v3109_v2, %s4028_s15 }
  0x91   : > { %v531_v9 = vsel %vm4064_vm3, %v528_v5, %v529_v7  ;;  %v517_v10 = vsel %vm4063_vm4, %v514_v6, %v515_v8 }
  0x92   : > { %533 = vst.msk [vmem:[#allocation2 + $0x18] sm:$0xff] %vm3084_vm2, %v531_v9  ;;  %519 = vst.msk [vmem:[#allocation2 + $0x8] sm:$0xff] %vm3084_vm2, %v517_v10  ;;  %v535_v11 = vpop.permute.xlu1 %534  ;;  %v521_v12 = vpop.permute.xlu0 %520 }
  0x93   : > { %v536_v13 = vrot.slane %v535_v11, 4  ;;  %v522_v14 = vrot.slane %v521_v12, 4 }
  0x94   : > { %1351 = vrot.lane.b32.xlu1 %v3140_v4, %s4026_s16  ;;  %1345 = vrot.lane.b32.xlu0 %v3140_v4, %s4043_s26  ;;  %s2554_s16 = sshll.u32 %s4151_s18, 1  ;;  %s486_s26 = sadd.s32 4, %s2954_s27 }
  0x95   : > { %v538_v15 = vsel %vm4048_vm5, %v535_v11, %v536_v13  ;;  %v524_v16 = vsel %vm4062_vm6, %v521_v12, %v522_v14  ;;  %s3285_s18 = sadd.s32 %s2554_s16, %s3079_s13  ;;  %p3432_p10 = scmp.lt.s32.totalorder %s486_s26, 7 }
  0x96   : > { %540 = vst.msk [vmem:[#allocation2 + $0x20] sm:$0xff] %vm3084_vm2, %v538_v15  ;;  %526 = vst.msk [vmem:[#allocation2 + $0x10] sm:$0xff] %vm3084_vm2, %v524_v16  ;;  %v711_v17 = vpop.permute.xlu1 %710  ;;  %v542_v18 = vpop.permute.xlu0 %541  ;;  %s2556_s16 = sshll.u32 %s3285_s18, 2  ;;  %s4155_s27 = smov (!%p499_p11, %s2954_s27), 3 }
  0x97   : > { %v712_v19 = vrot.slane %v711_v17, 4  ;;  %v543_v20 = vrot.slane %v542_v18, 4  ;;  %s484_s18 = scalar_lea.vmem %s4081_s3, %s2556_s16  ;;  %s4082_s16 = smov 126  }
  0x98   : > { %842 = vrot.lane.b32.xlu1 %v3109_v2, %s4035_s19  ;;  %836 = vrot.lane.b32.xlu0 %v3109_v2, %s4037_s23  ;;  %v3338_v1 = vld [vmem:[%s484_s18] sm:$0xff]  ;;  %v2623_v15 = vld.sshfl [vmem:[%s3998_s5 + $0x8] sm:$0x33 pattern:$0x76325410]  ;;  %s4083_s18 = smov 125  }
  0x99   : > { %v3257_v21 = vld [vmem:[#allocation2 + $0x8] sm:$0xff]  ;;  %v713_v22 = vsel %vm4063_vm4, %v711_v17, %v712_v19  ;;  %v545_v23 = vsel %vm4050_vm7, %v542_v18, %v543_v20  ;;  %v3272_v30 = vld [vmem:[#allocation2 + $0x18] sm:$0xff]  ;;  %v1434_v18 = vcombine.high %v2623_v15, %v2623_v15  ;;  %s4153_s26 = smov (!%p3432_p10, %s486_s26), 7  ;;  %s4097_s3 = smov 89  }
  0x9a   : > { %715 = vst.msk [vmem:[#allocation2 + $0x8] sm:$0xff] %vm3084_vm2, %v713_v22  ;;  %547 = vst.msk [vmem:[#allocation2 + $0x28] sm:$0xff] %vm3084_vm2, %v545_v23  ;;  %v556_v24 = vpop.permute.xlu1 %555  ;;  %v549_v25 = vpop.permute.xlu0 %548  ;;  %s2557_s2 = sshll.u32 %s4153_s26, 1 }
  0x9b   : > { %v557_v26 = vrot.slane %v556_v24, 4  ;;  %v550_v27 = vrot.slane %v549_v25, 4  ;;  %2651 = vmatprep.mubr.msk.bf16.mxu0 %vm4045_vm12, %v1434_v18  ;;  %vm607_vm12 = vcmask 818176   ;;  %s493_s26 = sadd.s32 %s2557_s2, %s3079_s13  ;;  %s4100_s13 = smov 79  }
  0x9c   : > { %1363 = vrot.lane.b32.xlu1 %v3140_v4, %s4030_s12  ;;  %1357 = vrot.lane.b32.xlu0 %v3140_v4, %s4041_s20  ;;  %s4084_s12 = smov 124   ;;  %s4091_s20 = smov 102  }
  0x9d   : > { %v559_v28 = vsel %vm4055_vm8, %v556_v24, %v557_v26  ;;  %v552_v29 = vsel %vm4051_vm9, %v549_v25, %v550_v27  ;;  %v3274_v31 = vld [vmem:[#allocation2 + $0x10] sm:$0xff]  ;;  %v3291_v39 = vld [vmem:[#allocation2 + $0x20] sm:$0xff]  ;;  %s2559_s2 = sshll.u32 %s493_s26, 2 }
  0x9e   : > { %561 = vst.msk [vmem:[#allocation2 + $0x38] sm:$0xff] %vm3084_vm2, %v559_v28  ;;  %554 = vst.msk [vmem:[#allocation2 + $0x30] sm:$0xff] %vm3084_vm2, %v552_v29  ;;  %v723_v32 = vpop.permute.xlu1 %722  ;;  %v717_v33 = vpop.permute.xlu0 %716  ;;  %v2597_v34 = vcombine.high %v3274_v31, %v3272_v30  ;;  %v2596_v35 = vcombine.low %v3274_v31, %v3272_v30  ;;  %s495_s9 = scalar_lea.vmem %s3997_s4, %s2559_s2 }
  0x9f   : > { %v724_v36 = vrot.slane %v723_v32, 4  ;;  %v718_v37 = vrot.slane %v717_v33, 4 }
  0xa0   : > { %848 = vrot.lane.b32.xlu0 %v3109_v2, %s4033_s25  ;;  %1369 = vrot.lane.b32.xlu1 %v3140_v4, %s4028_s15  ;;  %s4085_s15 = smov 116  }
  0xa1   : > { %v725_v40 = vsel %vm4064_vm3, %v723_v32, %v724_v36  ;;  %v719_v41 = vsel %vm4062_vm6, %v717_v33, %v718_v37  ;;  %v857_v42 = vld [vmem:[#allocation2 + $0x8] sm:$0xff] }
  0xa2   : > { %v2795_v43 = vld [vmem:[#allocation2 + $0x4] ss:$8 sps:$4 sm:$0xff]   ;;  %727 = vst.msk [vmem:[#allocation2 + $0x18] sm:$0xff] %vm3084_vm2, %v725_v40  ;;  %721 = vst.msk [vmem:[#allocation2 + $0x10] sm:$0xff] %vm3084_vm2, %v719_v41  ;;  %v570_v45 = vpop.permute.xlu1 %569  ;;  %v563_v46 = vpop.permute.xlu0 %562  ;;  %v2565_v47 = vcombine.low %v856_v38, %v857_v42 }
  0xa3   : > { %v3295_v44 = vld [vmem:[#allocation2 + $0x28] sm:$0xff]  ;;  %1253 = vst.msk [vmem:[#allocation2] sm:$0xff] %vm3084_vm2, %v3140_v4  ;;  %v571_v51 = vrot.slane %v570_v45, 4  ;;  %v564_v52 = vrot.slane %v563_v46, 4  ;;  %1026 = vmatprep.subr.bf16.mxu1 %v2795_v43 }
  0xa4   : > { %v2599_v49 = vcombine.high %v3291_v39, %v3295_v44  ;;  %v2598_v50 = vcombine.low %v3291_v39, %v3295_v44  ;;  %1375 = vrot.lane.b32.xlu0 %v3140_v4, %s4039_s14  ;;  %1381 = vrot.lane.b32.xlu1 %v3140_v4, %s4037_s23  ;;  %s4089_s23 = smov 104   ;;  %s4090_s14 = smov 103   ;;  %v2931_v39 = vld.sshfl [vmem:[%s3998_s5 + $0x8] sm:$0x33 pattern:$0x76325410] }
  0xa5   : > { %v573_v54 = vsel %vm4057_vm10, %v570_v45, %v571_v51  ;;  %v566_v55 = vsel %vm4056_vm11, %v563_v46, %v564_v52  ;;  %1027 = vmatpush1.bf16.msra.mxu1 %v2565_v47  ;;  %v3318_v56 = vld [vmem:[#allocation2 + $0x30] sm:$0xff]  ;;  %v3323_v57 = vld [vmem:[#allocation2 + $0x38] sm:$0xff] }
  0xa6   : > { %575 = vst.msk [vmem:[#allocation2 + $0x48] sm:$0xff] %vm3084_vm2, %v573_v54  ;;  %568 = vst.msk [vmem:[#allocation2 + $0x40] sm:$0xff] %vm3084_vm2, %v566_v55  ;;  %v735_v58 = vpop.permute.xlu1 %734  ;;  %v729_v59 = vpop.permute.xlu0 %728  ;;  %v2601_v60 = vcombine.high %v3318_v56, %v3323_v57  ;;  %v2600_v61 = vcombine.low %v3318_v56, %v3323_v57 }
  0xa7   : > { %v736_v62 = vrot.slane %v735_v58, 4  ;;  %v730_v63 = vrot.slane %v729_v59, 4 }
  0xa8   : > { %1387 = vrot.lane.b32.xlu0 %v3140_v4, %s4035_s19  ;;  %1393 = vrot.lane.b32.xlu1 %v3140_v4, %s4033_s25  ;;  %s4087_s25 = smov 113   ;;  %s4088_s19 = smov 112  }
  0xa9   : > { %v737_v2 = vsel %vm4050_vm7, %v735_v58, %v736_v62  ;;  %v731_v5 = vsel %vm4048_vm5, %v729_v59, %v730_v63  ;;  %v2797_v6 = vld [vmem:[#allocation2 + $0x14] ss:$8 sps:$4 sm:$0xff]   ;;  %v2799_v9 = vld [vmem:[#allocation2 + $0x10] ss:$8 sps:$4 sm:$0xff]  }
  0xaa   : > { %739 = vst.msk [vmem:[#allocation2 + $0x28] sm:$0xff] %vm3084_vm2, %v737_v2  ;;  %733 = vst.msk [vmem:[#allocation2 + $0x20] sm:$0xff] %vm3084_vm2, %v731_v5  ;;  %v577_v7 = vpop.permute.xlu1 %576  ;;  %v1256_v8 = vpop.permute.xlu0 %1255  ;;  %1028 = vmatprep.subr.bf16.mxu1 %v2797_v6  ;;  %v1401_v36 = vld [vmem:[#allocation2] sm:$0xff] }
  0xab   : > { %v578_v10 = vrot.slane %v577_v7, 4  ;;  %v1257_v11 = vrot.slane %v1256_v8, 4  ;;  %1029 = vmatpush1.bf16.msra.mxu1 %v2799_v9 }
  0xac   : > { %1616 = vrot.lane.b32.xlu0 %v3338_v1, %s4032_s22  ;;  %1622 = vrot.lane.b32.xlu1 %v3338_v1, %s4082_s16  ;;  %s4086_s22 = smov 115  }
  0xad   : > { %v580_v4 = vsel %vm4058_vm13, %v577_v7, %v578_v10  ;;  %v1258_v12 = vsel %vm4063_vm4, %v1256_v8, %v1257_v11  ;;  %v3352_v13 = vld [vmem:[#allocation2 + $0x40] sm:$0xff]  ;;  %v3354_v14 = vld [vmem:[#allocation2 + $0x48] sm:$0xff] }
  0xae   : > { %582 = vst.msk [vmem:[#allocation2 + $0x50] sm:$0xff] %vm3084_vm2, %v580_v4  ;;  %1260 = vst.msk [vmem:[#allocation2 + $0x8] sm:$0xff] %vm3084_vm2, %v1258_v12  ;;  %v741_v16 = vpop.permute.xlu1 %740  ;;  %v584_v17 = vpop.permute.xlu0 %583  ;;  %v2603_v19 = vcombine.high %v3352_v13, %v3354_v14  ;;  %v2602_v20 = vcombine.low %v3352_v13, %v3354_v14 }
  0xaf   : > { %v742_v22 = vrot.slane %v741_v16, 4  ;;  %v585_v23 = vrot.slane %v584_v17, 4 }
  0xb0   : > { %1628 = vrot.lane.b32.xlu0 %v3338_v1, %s4083_s18  ;;  %1634 = vrot.lane.b32.xlu1 %v3338_v1, %s4084_s12 }
  0xb1   : > { %v743_v24 = vsel %vm4051_vm9, %v741_v16, %v742_v22  ;;  %v587_v25 = vsel %vm4059_vm14, %v584_v17, %v585_v23  ;;  %v2800_v26 = vld [vmem:[#allocation2 + $0x24] ss:$8 sps:$4 sm:$0xff]   ;;  %v2802_v29 = vld [vmem:[#allocation2 + $0x20] ss:$8 sps:$4 sm:$0xff]  }
  0xb2   : > { %745 = vst.msk [vmem:[#allocation2 + $0x30] sm:$0xff] %vm3084_vm2, %v743_v24  ;;  %589 = vst.msk [vmem:[#allocation2 + $0x58] sm:$0xff] %vm3084_vm2, %v587_v25  ;;  %v1262_v27 = vpop.permute.xlu1 %1261  ;;  %v747_v28 = vpop.permute.xlu0 %746  ;;  %1030 = vmatprep.subr.bf16.mxu1 %v2800_v26 }
  0xb3   : > { %v1263_v32 = vrot.slane %v1262_v27, 4  ;;  %v748_v33 = vrot.slane %v747_v28, 4  ;;  %1031 = vmatpush1.bf16.msra.mxu1 %v2802_v29 }
  0xb4   : > { %1640 = vrot.lane.b32.xlu0 %v3338_v1, %s4085_s15  ;;  %1646 = vrot.lane.b32.xlu1 %v3338_v1, %s4086_s22 }
  0xb5   : > { %v1264_v37 = vsel %vm4062_vm6, %v1262_v27, %v1263_v32  ;;  %v749_v38 = vsel %vm4055_vm8, %v747_v28, %v748_v33  ;;  %v1402_v40 = vld [vmem:[#allocation2 + $0x8] sm:$0xff]  ;;  %v3397_v52 = vld [vmem:[#allocation2 + $0x50] sm:$0xff] }
  0xb6   : > { %v2803_v41 = vld [vmem:[#allocation2 + $0x4] ss:$8 sps:$4 sm:$0xff]   ;;  %1266 = vst.msk [vmem:[#allocation2 + $0x10] sm:$0xff] %vm3084_vm2, %v1264_v37  ;;  %751 = vst.msk [vmem:[#allocation2 + $0x38] sm:$0xff] %vm3084_vm2, %v749_v38  ;;  %v591_v42 = vpop.permute.xlu1 %590  ;;  %v1268_v43 = vpop.permute.xlu0 %1267  ;;  %v2624_v45 = vcombine.low %v1401_v36, %v1402_v40 }
  0xb7   : > { %1614 = vst.msk [vmem:[#allocation2] sm:$0xff] %vm3084_vm2, %v3338_v1  ;;  %v592_v46 = vrot.slane %v591_v42, 4  ;;  %v1269_v47 = vrot.slane %v1268_v43, 4  ;;  %1570 = vmatprep.subr.bf16.mxu0 %v2803_v41 }
  0xb8   : > { %1571 = vmatpush1.bf16.msra.mxu0 %v2624_v45  ;;  %1652 = vrot.lane.b32.xlu0 %v3338_v1, %s4080_s24 }
  0xb9   : > { %v594_v48 = vsel %vm4060_vm15, %v591_v42, %v592_v46  ;;  %v1270_v51 = vsel %vm4064_vm3, %v1268_v43, %v1269_v47  ;;  %1658 = vrot.lane.b32.xlu1 %v3338_v1, %s4087_s25  ;;  %v3399_v53 = vld [vmem:[#allocation2 + $0x58] sm:$0xff] }
  0xba   : > { %596 = vst.msk [vmem:[#allocation2 + $0x60] sm:$0xff] %vm3084_vm2, %v594_v48  ;;  %1272 = vst.msk [vmem:[#allocation2 + $0x18] sm:$0xff] %vm3084_vm2, %v1270_v51  ;;  %v753_v54 = vpop.permute.xlu1 %752  ;;  %v598_v55 = vpop.permute.xlu0 %597  ;;  %v2605_v58 = vcombine.high %v3397_v52, %v3399_v53  ;;  %v2604_v59 = vcombine.low %v3397_v52, %v3399_v53 }
  0xbb   : > { %v754_v62 = vrot.slane %v753_v54, 4  ;;  %v599_v63 = vrot.slane %v598_v55, 4 }
  0xbc   : > { %1664 = vrot.lane.b32.xlu0 %v3338_v1, %s4088_s19 }
  0xbd   : > { %v755_v2 = vsel %vm4056_vm11, %v753_v54, %v754_v62  ;;  %v601_v5 = vsel %vm4061_vm1, %v598_v55, %v599_v63  ;;  %v2805_v6 = vld [vmem:[#allocation2 + $0x34] ss:$8 sps:$4 sm:$0xff]   ;;  %v2807_v7 = vld [vmem:[#allocation2 + $0x30] ss:$8 sps:$4 sm:$0xff]   ;;  %1670 = vrot.lane.b32.xlu1 %v3338_v1, %s4089_s23 }
  0xbe   : > { %757 = vst.msk [vmem:[#allocation2 + $0x40] sm:$0xff] %vm3084_vm2, %v755_v2  ;;  %603 = vst.msk [vmem:[#allocation2 + $0x68] sm:$0xff] %vm3084_vm2, %v601_v5  ;;  %v1274_v8 = vpop.permute.xlu1 %1273  ;;  %v759_v9 = vpop.permute.xlu0 %758  ;;  %1032 = vmatprep.subr.bf16.mxu1 %v2805_v6 }
  0xbf   : > { %v1275_v10 = vrot.slane %v1274_v8, 4  ;;  %v760_v11 = vrot.slane %v759_v9, 4  ;;  %1033 = vmatpush1.bf16.msra.mxu1 %v2807_v7 }
  0xc0   : > { %1676 = vrot.lane.b32.xlu0 %v3338_v1, %s4090_s14 }
  0xc1   : > { %v1276_v4 = vsel %vm4048_vm5, %v1274_v8, %v1275_v10  ;;  %v761_v12 = vsel %vm4057_vm10, %v759_v9, %v760_v11  ;;  %v2808_v15 = vld [vmem:[#allocation2 + $0x14] ss:$8 sps:$4 sm:$0xff]   ;;  %v2810_v16 = vld [vmem:[#allocation2 + $0x10] ss:$8 sps:$4 sm:$0xff]   ;;  %1682 = vrot.lane.b32.xlu1 %v3338_v1, %s4091_s20  ;;  %v3440_v26 = vld [vmem:[#allocation2 + $0x60] sm:$0xff]  ;;  %vm614_vm5 = vcmask 752640  }
  0xc2   : > { %1278 = vst.msk [vmem:[#allocation2 + $0x20] sm:$0xff] %vm3084_vm2, %v1276_v4  ;;  %763 = vst.msk [vmem:[#allocation2 + $0x48] sm:$0xff] %vm3084_vm2, %v761_v12  ;;  %v605_v17 = vpop.permute.xlu1 %604  ;;  %v1280_v18 = vpop.permute.xlu0 %1279  ;;  %1572 = vmatprep.subr.bf16.mxu0 %v2808_v15 }
  0xc3   : > { %v606_v22 = vrot.slane %v605_v17, 4  ;;  %v1281_v23 = vrot.slane %v1280_v18, 4  ;;  %1573 = vmatpush1.bf16.msra.mxu0 %v2810_v16 }
  0xc4   : > { %1688 = vrot.lane.b32.xlu0 %v3338_v1, %s4049_s17  ;;  %s4094_s17 = smov 92  }
  0xc5   : > { %v608_v24 = vsel %vm607_vm12, %v605_v17, %v606_v22  ;;  %v1282_v25 = vsel %vm4050_vm7, %v1280_v18, %v1281_v23  ;;  %1694 = vrot.lane.b32.xlu1 %v3338_v1, %s4093_s0  ;;  %v3442_v27 = vld [vmem:[#allocation2 + $0x68] sm:$0xff]  ;;  %vm621_vm7 = vcmask 744448  }
  0xc6   : > { %610 = vst.msk [vmem:[#allocation2 + $0x70] sm:$0xff] %vm3084_vm2, %v608_v24  ;;  %1284 = vst.msk [vmem:[#allocation2 + $0x28] sm:$0xff] %vm3084_vm2, %v1282_v25  ;;  %v765_v28 = vpop.permute.xlu1 %764  ;;  %v612_v29 = vpop.permute.xlu0 %611  ;;  %v2607_v32 = vcombine.high %v3440_v26, %v3442_v27  ;;  %v2606_v33 = vcombine.low %v3440_v26, %v3442_v27 }
  0xc7   : > { %v766_v36 = vrot.slane %v765_v28, 4  ;;  %v613_v37 = vrot.slane %v612_v29, 4 }
  0xc8   : > { %1700 = vrot.lane.b32.xlu0 %v3338_v1, %s4094_s17 }
  0xc9   : > { %v767_v38 = vsel %vm4058_vm13, %v765_v28, %v766_v36  ;;  %v615_v40 = vsel %vm614_vm5, %v612_v29, %v613_v37  ;;  %v2811_v41 = vld [vmem:[#allocation2 + $0x44] ss:$8 sps:$4 sm:$0xff]   ;;  %v2813_v42 = vld [vmem:[#allocation2 + $0x40] ss:$8 sps:$4 sm:$0xff]   ;;  %1706 = vrot.lane.b32.xlu1 %v3338_v1, %s4095_s1 }
  0xca   : > { %769 = vst.msk [vmem:[#allocation2 + $0x50] sm:$0xff] %vm3084_vm2, %v767_v38  ;;  %617 = vst.msk [vmem:[#allocation2 + $0x78] sm:$0xff] %vm3084_vm2, %v615_v40  ;;  %v1286_v43 = vpop.permute.xlu1 %1285  ;;  %v771_v45 = vpop.permute.xlu0 %770  ;;  %1034 = vmatprep.subr.bf16.mxu1 %v2811_v41  ;;  %v3511_v36 = vld [vmem:[%s495_s9] sm:$0xff]  ;;  %s4104_s9 = smov 127  }
  0xcb   : > { %v1287_v46 = vrot.slane %v1286_v43, 4  ;;  %v772_v47 = vrot.slane %v771_v45, 4  ;;  %1035 = vmatpush1.bf16.msra.mxu1 %v2813_v42 }
  0xcc   : > { %1712 = vrot.lane.b32.xlu0 %v3338_v1, %s4096_s21 }
  0xcd   : > { %v1288_v48 = vsel %vm4051_vm9, %v1286_v43, %v1287_v46  ;;  %v773_v51 = vsel %vm4059_vm14, %v771_v45, %v772_v47  ;;  %v2814_v54 = vld [vmem:[#allocation2 + $0x24] ss:$8 sps:$4 sm:$0xff]   ;;  %v2816_v55 = vld [vmem:[#allocation2 + $0x20] ss:$8 sps:$4 sm:$0xff]   ;;  %1718 = vrot.lane.b32.xlu1 %v3338_v1, %s4097_s3  ;;  %v3484_v8 = vld [vmem:[#allocation2 + $0x70] sm:$0xff]  ;;  %vm628_vm9 = vcmask 736256  }
  0xce   : > { %1290 = vst.msk [vmem:[#allocation2 + $0x30] sm:$0xff] %vm3084_vm2, %v1288_v48  ;;  %775 = vst.msk [vmem:[#allocation2 + $0x58] sm:$0xff] %vm3084_vm2, %v773_v51  ;;  %v619_v62 = vpop.permute.xlu1 %618  ;;  %v1292_v63 = vpop.permute.xlu0 %1291  ;;  %1574 = vmatprep.subr.bf16.mxu0 %v2814_v54 }
  0xcf   : > { %v620_v2 = vrot.slane %v619_v62, 4  ;;  %v1293_v5 = vrot.slane %v1292_v63, 4  ;;  %1575 = vmatpush1.bf16.msra.mxu0 %v2816_v55 }
  0xd0   : > { %1724 = vrot.lane.b32.xlu0 %v3338_v1, %s4098_s11 }
  0xd1   : > { %v622_v6 = vsel %vm621_vm7, %v619_v62, %v620_v2  ;;  %v1294_v7 = vsel %vm4055_vm8, %v1292_v63, %v1293_v5  ;;  %1730 = vrot.lane.b32.xlu1 %v3338_v1, %s4099_s10  ;;  %v3486_v9 = vld [vmem:[#allocation2 + $0x78] sm:$0xff]  ;;  %vm635_vm8 = vcmask 728064  }
  0xd2   : > { %624 = vst.msk [vmem:[#allocation2 + $0x80] sm:$0xff] %vm3084_vm2, %v622_v6  ;;  %1296 = vst.msk [vmem:[#allocation2 + $0x38] sm:$0xff] %vm3084_vm2, %v1294_v7  ;;  %v777_v10 = vpop.permute.xlu1 %776  ;;  %v626_v11 = vpop.permute.xlu0 %625  ;;  %v2609_v4 = vcombine.high %v3484_v8, %v3486_v9  ;;  %v2608_v12 = vcombine.low %v3484_v8, %v3486_v9 }
  0xd3   : > { %v778_v15 = vrot.slane %v777_v10, 4  ;;  %v627_v16 = vrot.slane %v626_v11, 4 }
  0xd4   : > { %1736 = vrot.lane.b32.xlu0 %v3338_v1, %s4100_s13 }
  0xd5   : > { %v779_v17 = vsel %vm4060_vm15, %v777_v10, %v778_v15  ;;  %v629_v18 = vsel %vm628_vm9, %v626_v11, %v627_v16  ;;  %v2817_v22 = vld [vmem:[#allocation2 + $0x54] ss:$8 sps:$4 sm:$0xff]   ;;  %v2819_v23 = vld [vmem:[#allocation2 + $0x50] ss:$8 sps:$4 sm:$0xff]   ;;  %1742 = vrot.lane.b32.xlu1 %v3338_v1, %s4101_s30 }
  0xd6   : > { %781 = vst.msk [vmem:[#allocation2 + $0x60] sm:$0xff] %vm3084_vm2, %v779_v17  ;;  %631 = vst.msk [vmem:[#allocation2 + $0x88] sm:$0xff] %vm3084_vm2, %v629_v18  ;;  %v1298_v24 = vpop.permute.xlu1 %1297  ;;  %v783_v25 = vpop.permute.xlu0 %782  ;;  %1036 = vmatprep.subr.bf16.mxu1 %v2817_v22 }
  0xd7   : > { %v1299_v28 = vrot.slane %v1298_v24, 4  ;;  %v784_v29 = vrot.slane %v783_v25, 4  ;;  %1037 = vmatpush1.bf16.msra.mxu1 %v2819_v23 }
  0xd8   : > { %1748 = vrot.lane.b32.xlu0 %v3338_v1, %s4102_s8 }
  0xd9   : > { %v1300_v37 = vsel %vm4056_vm11, %v1298_v24, %v1299_v28  ;;  %v785_v38 = vsel %vm4061_vm1, %v783_v25, %v784_v29  ;;  %v2820_v40 = vld [vmem:[#allocation2 + $0x34] ss:$8 sps:$4 sm:$0xff]   ;;  %v2822_v41 = vld [vmem:[#allocation2 + $0x30] ss:$8 sps:$4 sm:$0xff]   ;;  %1754 = vrot.lane.b32.xlu1 %v3338_v1, %s4103_s29  ;;  %v3527_v48 = vld [vmem:[#allocation2 + $0x80] sm:$0xff]  ;;  %vm642_vm11 = vcmask 719872  }
  0xda   : > { %1302 = vst.msk [vmem:[#allocation2 + $0x40] sm:$0xff] %vm3084_vm2, %v1300_v37  ;;  %787 = vst.msk [vmem:[#allocation2 + $0x68] sm:$0xff] %vm3084_vm2, %v785_v38  ;;  %v633_v42 = vpop.permute.xlu1 %632  ;;  %v1304_v43 = vpop.permute.xlu0 %1303  ;;  %1576 = vmatprep.subr.bf16.mxu0 %v2820_v40 }
  0xdb   : > { %v634_v45 = vrot.slane %v633_v42, 4  ;;  %v1305_v46 = vrot.slane %v1304_v43, 4  ;;  %1577 = vmatpush1.bf16.msra.mxu0 %v2822_v41 }
  0xdc   : > { %1977 = vrot.lane.b32.xlu0 %v3511_v36, %s4104_s9 }
  0xdd   : > { %v636_v47 = vsel %vm635_vm8, %v633_v42, %v634_v45  ;;  %v1306_v1 = vsel %vm4057_vm10, %v1304_v43, %v1305_v46  ;;  %1983 = vrot.lane.b32.xlu1 %v3511_v36, %s4082_s16  ;;  %v3529_v51 = vld [vmem:[#allocation2 + $0x88] sm:$0xff]  ;;  %vm649_vm10 = vcmask 654336   ;;  %s2560_s16 = sshll.u32 %s4155_s27, 1 }
  0xde   : > { %638 = vst.msk [vmem:[#allocation2 + $0x90] sm:$0xff] %vm3084_vm2, %v636_v47  ;;  %1308 = vst.msk [vmem:[#allocation2 + $0x48] sm:$0xff] %vm3084_vm2, %v1306_v1  ;;  %v789_v54 = vpop.permute.xlu1 %788  ;;  %v640_v55 = vpop.permute.xlu0 %639  ;;  %v2611_v62 = vcombine.high %v3527_v48, %v3529_v51  ;;  %v2610_v63 = vcombine.low %v3527_v48, %v3529_v51 }
  0xdf   : > { %v790_v2 = vrot.slane %v789_v54, 4  ;;  %v641_v5 = vrot.slane %v640_v55, 4 }
  0xe0   : > { %1989 = vrot.lane.b32.xlu0 %v3511_v36, %s4083_s18  ;;  %s2561_s18 = sshll.u32 %s4145_s28, 3 }
  0xe1   : > { %v791_v6 = vsel %vm607_vm12, %v789_v54, %v790_v2  ;;  %v643_v7 = vsel %vm642_vm11, %v640_v55, %v641_v5  ;;  %v2823_v10 = vld [vmem:[#allocation2 + $0x64] ss:$8 sps:$4 sm:$0xff]   ;;  %v2825_v11 = vld [vmem:[#allocation2 + $0x60] ss:$8 sps:$4 sm:$0xff]   ;;  %1995 = vrot.lane.b32.xlu1 %v3511_v36, %s4084_s12  ;;  %s503_s12 = sadd.s32 %s2561_s18, %s2560_s16 }
  0xe2   : > { %793 = vst.msk [vmem:[#allocation2 + $0x70] sm:$0xff] %vm3084_vm2, %v791_v6  ;;  %645 = vst.msk [vmem:[#allocation2 + $0x98] sm:$0xff] %vm3084_vm2, %v643_v7  ;;  %v1310_v15 = vpop.permute.xlu1 %1309  ;;  %v795_v16 = vpop.permute.xlu0 %794  ;;  %1038 = vmatprep.subr.bf16.mxu1 %v2823_v10 }
  0xe3   : > { %v1311_v17 = vrot.slane %v1310_v15, 4  ;;  %v796_v18 = vrot.slane %v795_v16, 4  ;;  %1039 = vmatpush1.bf16.msra.mxu1 %v2825_v11 }
  0xe4   : > { %2001 = vrot.lane.b32.xlu0 %v3511_v36, %s4085_s15  ;;  %s2562_s15 = sshll.u32 %s503_s12, 2 }
  0xe5   : > { %v1312_v22 = vsel %vm4058_vm13, %v1310_v15, %v1311_v17  ;;  %v797_v23 = vsel %vm614_vm5, %v795_v16, %v796_v18  ;;  %v2826_v24 = vld [vmem:[#allocation2 + $0x44] ss:$8 sps:$4 sm:$0xff]   ;;  %v2828_v25 = vld [vmem:[#allocation2 + $0x40] ss:$8 sps:$4 sm:$0xff]   ;;  %2007 = vrot.lane.b32.xlu1 %v3511_v36, %s4086_s22  ;;  %v3565_v42 = vld [vmem:[#allocation2 + $0x90] sm:$0xff]  ;;  %vm656_vm13 = vcmask 646144  }
  0xe6   : > { %1314 = vst.msk [vmem:[#allocation2 + $0x50] sm:$0xff] %vm3084_vm2, %v1312_v22  ;;  %799 = vst.msk [vmem:[#allocation2 + $0x78] sm:$0xff] %vm3084_vm2, %v797_v23  ;;  %v647_v28 = vpop.permute.xlu1 %646  ;;  %v1316_v29 = vpop.permute.xlu0 %1315  ;;  %1578 = vmatprep.subr.bf16.mxu0 %v2826_v24  ;;  %s4105_s22 = smov 101  }
  0xe7   : > { %v648_v37 = vrot.slane %v647_v28, 4  ;;  %v1317_v38 = vrot.slane %v1316_v29, 4  ;;  %1579 = vmatpush1.bf16.msra.mxu0 %v2828_v25 }
  0xe8   : > { %2013 = vrot.lane.b32.xlu0 %v3511_v36, %s4080_s24 }
  0xe9   : > { %v650_v40 = vsel %vm649_vm10, %v647_v28, %v648_v37  ;;  %v1318_v41 = vsel %vm4059_vm14, %v1316_v29, %v1317_v38  ;;  %2019 = vrot.lane.b32.xlu1 %v3511_v36, %s4087_s25  ;;  %v3567_v43 = vld [vmem:[#allocation2 + $0x98] sm:$0xff]  ;;  %vm663_vm14 = vcmask 637952  }
  0xea   : > { %652 = vst.msk [vmem:[#allocation2 + $0xa0] sm:$0xff] %vm3084_vm2, %v650_v40  ;;  %1320 = vst.msk [vmem:[#allocation2 + $0x58] sm:$0xff] %vm3084_vm2, %v1318_v41  ;;  %v801_v45 = vpop.permute.xlu1 %800  ;;  %v654_v46 = vpop.permute.xlu0 %653  ;;  %v2613_v47 = vcombine.high %v3565_v42, %v3567_v43  ;;  %v2612_v1 = vcombine.low %v3565_v42, %v3567_v43 }
  0xeb   : > { %v802_v54 = vrot.slane %v801_v45, 4  ;;  %v655_v55 = vrot.slane %v654_v46, 4 }
  0xec   : > { %2025 = vrot.lane.b32.xlu0 %v3511_v36, %s4088_s19 }
  0xed   : > { %v803_v2 = vsel %vm621_vm7, %v801_v45, %v802_v54  ;;  %v657_v5 = vsel %vm656_vm13, %v654_v46, %v655_v55  ;;  %v2829_v6 = vld [vmem:[#allocation2 + $0x74] ss:$8 sps:$4 sm:$0xff]   ;;  %v2831_v7 = vld [vmem:[#allocation2 + $0x70] ss:$8 sps:$4 sm:$0xff]   ;;  %2031 = vrot.lane.b32.xlu1 %v3511_v36, %s4089_s23 }
  0xee   : > { %805 = vst.msk [vmem:[#allocation2 + $0x80] sm:$0xff] %vm3084_vm2, %v803_v2  ;;  %659 = vst.msk [vmem:[#allocation2 + $0xa8] sm:$0xff] %vm3084_vm2, %v657_v5  ;;  %v1322_v10 = vpop.permute.xlu1 %1321  ;;  %v807_v11 = vpop.permute.xlu0 %806  ;;  %1040 = vmatprep.subr.bf16.mxu1 %v2829_v6 }
  0xef   : > { %v1323_v15 = vrot.slane %v1322_v10, 4  ;;  %v808_v16 = vrot.slane %v807_v11, 4  ;;  %1041 = vmatpush1.bf16.msra.mxu1 %v2831_v7 }
  0xf0   : > { %2037 = vrot.lane.b32.xlu0 %v3511_v36, %s4090_s14 }
  0xf1   : > { %v1324_v17 = vsel %vm4060_vm15, %v1322_v10, %v1323_v15  ;;  %v809_v18 = vsel %vm628_vm9, %v807_v11, %v808_v16  ;;  %v2832_v22 = vld [vmem:[#allocation2 + $0x54] ss:$8 sps:$4 sm:$0xff]   ;;  %v2834_v23 = vld [vmem:[#allocation2 + $0x50] ss:$8 sps:$4 sm:$0xff]   ;;  %2043 = vrot.lane.b32.xlu1 %v3511_v36, %s4091_s20  ;;  %v3605_v41 = vld [vmem:[#allocation2 + $0xa0] sm:$0xff]  ;;  %vm670_vm15 = vcmask 629760  }
  0xf2   : > { %1326 = vst.msk [vmem:[#allocation2 + $0x60] sm:$0xff] %vm3084_vm2, %v1324_v17  ;;  %811 = vst.msk [vmem:[#allocation2 + $0x88] sm:$0xff] %vm3084_vm2, %v809_v18  ;;  %v661_v24 = vpop.permute.xlu1 %660  ;;  %v1328_v25 = vpop.permute.xlu0 %1327  ;;  %1580 = vmatprep.subr.bf16.mxu0 %v2832_v22 }
  0xf3   : > { %v662_v28 = vrot.slane %v661_v24, 4  ;;  %v1329_v29 = vrot.slane %v1328_v25, 4  ;;  %1581 = vmatpush1.bf16.msra.mxu0 %v2834_v23 }
  0xf4   : > { %2049 = vrot.lane.b32.xlu0 %v3511_v36, %s4105_s22 }
  0xf5   : > { %v664_v37 = vsel %vm663_vm14, %v661_v24, %v662_v28  ;;  %v1330_v38 = vsel %vm4061_vm1, %v1328_v25, %v1329_v29  ;;  %2055 = vrot.lane.b32.xlu1 %v3511_v36, %s4093_s0  ;;  %v3603_v40 = vld [vmem:[#allocation2 + $0xa8] sm:$0xff]  ;;  %vm677_vm1 = vcmask 621568  }
  0xf6   : > { %666 = vst.msk [vmem:[#allocation2 + $0xb0] sm:$0xff] %vm3084_vm2, %v664_v37  ;;  %1332 = vst.msk [vmem:[#allocation2 + $0x68] sm:$0xff] %vm3084_vm2, %v1330_v38  ;;  %v813_v45 = vpop.permute.xlu1 %812  ;;  %v668_v46 = vpop.permute.xlu0 %667  ;;  %v2615_v54 = vcombine.high %v3605_v41, %v3603_v40  ;;  %v2614_v55 = vcombine.low %v3605_v41, %v3603_v40 }
  0xf7   : > { %v814_v2 = vrot.slane %v813_v45, 4  ;;  %v669_v5 = vrot.slane %v668_v46, 4 }
  0xf8   : > { %2061 = vrot.lane.b32.xlu0 %v3511_v36, %s4094_s17 }
  0xf9   : > { %v815_v6 = vsel %vm635_vm8, %v813_v45, %v814_v2  ;;  %v671_v7 = vsel %vm670_vm15, %v668_v46, %v669_v5  ;;  %v2835_v10 = vld [vmem:[#allocation2 + $0x84] ss:$8 sps:$4 sm:$0xff]   ;;  %v2837_v11 = vld [vmem:[#allocation2 + $0x80] ss:$8 sps:$4 sm:$0xff]   ;;  %2067 = vrot.lane.b32.xlu1 %v3511_v36, %s4095_s1 }
  0xfa   : > { %817 = vst.msk [vmem:[#allocation2 + $0x90] sm:$0xff] %vm3084_vm2, %v815_v6  ;;  %673 = vst.msk [vmem:[#allocation2 + $0xb8] sm:$0xff] %vm3084_vm2, %v671_v7  ;;  %v1334_v15 = vpop.permute.xlu1 %1333  ;;  %v819_v16 = vpop.permute.xlu0 %818  ;;  %1042 = vmatprep.subr.bf16.mxu1 %v2835_v10 }
  0xfb   : > { %v1335_v17 = vrot.slane %v1334_v15, 4  ;;  %v820_v18 = vrot.slane %v819_v16, 4  ;;  %1043 = vmatpush1.bf16.msra.mxu1 %v2837_v11 }
  0xfc   : > { %2073 = vrot.lane.b32.xlu0 %v3511_v36, %s4096_s21 }
  0xfd   : > { %v1336_v22 = vsel %vm607_vm12, %v1334_v15, %v1335_v17  ;;  %v821_v23 = vsel %vm642_vm11, %v819_v16, %v820_v18  ;;  %v2838_v24 = vld [vmem:[#allocation2 + $0x64] ss:$8 sps:$4 sm:$0xff]   ;;  %v2840_v25 = vld [vmem:[#allocation2 + $0x60] ss:$8 sps:$4 sm:$0xff]   ;;  %2079 = vrot.lane.b32.xlu1 %v3511_v36, %s4097_s3  ;;  %v3643_v5 = vld [vmem:[#allocation2 + $0xb0] sm:$0xff] }
  0xfe   : > { %1338 = vst.msk [vmem:[#allocation2 + $0x70] sm:$0xff] %vm3084_vm2, %v1336_v22  ;;  %823 = vst.msk [vmem:[#allocation2 + $0x98] sm:$0xff] %vm3084_vm2, %v821_v23  ;;  %v675_v28 = vpop.permute.xlu1 %674  ;;  %v1340_v29 = vpop.permute.xlu0 %1339  ;;  %1582 = vmatprep.subr.bf16.mxu0 %v2838_v24 }
  0xff   : > { %v676_v37 = vrot.slane %v675_v28, 4  ;;  %v1341_v38 = vrot.slane %v1340_v29, 4  ;;  %1583 = vmatpush1.bf16.msra.mxu0 %v2840_v25 }
 0x100   : > { %2085 = vrot.lane.b32.xlu0 %v3511_v36, %s4098_s11 }
 0x101   : > { %v678_v45 = vsel %vm677_vm1, %v675_v28, %v676_v37  ;;  %v1342_v46 = vsel %vm614_vm5, %v1340_v29, %v1341_v38  ;;  %2091 = vrot.lane.b32.xlu1 %v3511_v36, %s4099_s10  ;;  %v3641_v2 = vld [vmem:[#allocation2 + $0xb8] sm:$0xff] }
 0x102   : > { %680 = vst.msk [vmem:[#allocation2 + $0xc0] sm:$0xff] %vm3084_vm2, %v678_v45  ;;  %1344 = vst.msk [vmem:[#allocation2 + $0x78] sm:$0xff] %vm3084_vm2, %v1342_v46  ;;  %v831_v6 = vpop.permute.xlu1 %830  ;;  %v825_v7 = vpop.permute.xlu0 %824  ;;  %v2616_v10 = vcombine.low %v3643_v5, %v3641_v2 }
 0x103   : > { %v832_v11 = vrot.slane %v831_v6, 4  ;;  %v826_v15 = vrot.slane %v825_v7, 4 }
 0x104   : > { %2097 = vrot.lane.b32.xlu0 %v3511_v36, %s4100_s13  ;;  %s4132_s13 = sld [smem:[#allocation12_spill]] }
 0x105   : > { %v833_v16 = vsel %vm656_vm13, %v831_v6, %v832_v11  ;;  %v827_v17 = vsel %vm649_vm10, %v825_v7, %v826_v15  ;;  %v2841_v18 = vld [vmem:[#allocation2 + $0x94] ss:$8 sps:$4 sm:$0xff]   ;;  %v2843_v22 = vld [vmem:[#allocation2 + $0x90] ss:$8 sps:$4 sm:$0xff]   ;;  %2103 = vrot.lane.b32.xlu1 %v3511_v36, %s4101_s30 }
 0x106   : > { %835 = vst.msk [vmem:[#allocation2 + $0xa8] sm:$0xff] %vm3084_vm2, %v833_v16  ;;  %829 = vst.msk [vmem:[#allocation2 + $0xa0] sm:$0xff] %vm3084_vm2, %v827_v17  ;;  %v1352_v23 = vpop.permute.xlu1 %1351  ;;  %v1346_v24 = vpop.permute.xlu0 %1345  ;;  %1044 = vmatprep.subr.bf16.mxu1 %v2841_v18 }
 0x107   : > { %v1353_v25 = vrot.slane %v1352_v23, 4  ;;  %v1347_v28 = vrot.slane %v1346_v24, 4  ;;  %1045 = vmatpush1.bf16.msra.mxu1 %v2843_v22 }
 0x108   : > { %2109 = vrot.lane.b32.xlu0 %v3511_v36, %s4102_s8 }
 0x109   : > { %v1354_v29 = vsel %vm628_vm9, %v1352_v23, %v1353_v25  ;;  %v1348_v37 = vsel %vm621_vm7, %v1346_v24, %v1347_v28  ;;  %v2844_v38 = vld [vmem:[#allocation2 + $0x74] ss:$8 sps:$4 sm:$0xff]   ;;  %v2846_v45 = vld [vmem:[#allocation2 + $0x70] ss:$8 sps:$4 sm:$0xff]   ;;  %2115 = vrot.lane.b32.xlu1 %v3511_v36, %s4103_s29 }
 0x10a   : > { %1356 = vst.msk [vmem:[#allocation2 + $0x88] sm:$0xff] %vm3084_vm2, %v1354_v29  ;;  %1350 = vst.msk [vmem:[#allocation2 + $0x80] sm:$0xff] %vm3084_vm2, %v1348_v37  ;;  %v843_v46 = vpop.permute.xlu1 %842  ;;  %v837_v6 = vpop.permute.xlu0 %836  ;;  %1584 = vmatprep.subr.bf16.mxu0 %v2844_v38  ;;  %s505_s26 = scalar_lea.vmem %s4132_s13, %s2562_s15 }
 0x10b   : > { %v844_v7 = vrot.slane %v843_v46, 4  ;;  %v838_v11 = vrot.slane %v837_v6, 4  ;;  %1585 = vmatpush1.bf16.msra.mxu0 %v2846_v45 }
 0x10d   : > { %v845_v15 = vsel %vm670_vm15, %v843_v46, %v844_v7  ;;  %v839_v16 = vsel %vm663_vm14, %v837_v6, %v838_v11  ;;  %v2847_v17 = vld [vmem:[#allocation2 + $0xa4] ss:$8 sps:$4 sm:$0xff]   ;;  %v2849_v23 = vld [vmem:[#allocation2 + $0xa0] ss:$8 sps:$4 sm:$0xff]  }
 0x10e   : > { %847 = vst.msk [vmem:[#allocation2 + $0xb8] sm:$0xff] %vm3084_vm2, %v845_v15  ;;  %841 = vst.msk [vmem:[#allocation2 + $0xb0] sm:$0xff] %vm3084_vm2, %v839_v16  ;;  %v1364_v18 = vpop.permute.xlu1 %1363  ;;  %v1358_v22 = vpop.permute.xlu0 %1357  ;;  %1046 = vmatprep.subr.bf16.mxu1 %v2847_v17  ;;  %v3683_v11 = vld [vmem:[#allocation2 + $0xc0] sm:$0xff] }
 0x10f   : > { %v1365_v24 = vrot.slane %v1364_v18, 4  ;;  %v1359_v25 = vrot.slane %v1358_v22, 4  ;;  %1047 = vmatpush1.bf16.msra.mxu1 %v2849_v23  ;;  %v2619_v40 = vcombine.high %v3683_v11, %v3683_v11  ;;  %v2618_v41 = vcombine.low %v3683_v11, %v3683_v11 }
 0x111   : > { %v1366_v28 = vsel %vm642_vm11, %v1364_v18, %v1365_v24  ;;  %v1360_v29 = vsel %vm635_vm8, %v1358_v22, %v1359_v25  ;;  %v2850_v37 = vld [vmem:[#allocation2 + $0x84] ss:$8 sps:$4 sm:$0xff]   ;;  %v2852_v46 = vld [vmem:[#allocation2 + $0x80] ss:$8 sps:$4 sm:$0xff]  }
 0x112   : > { %1368 = vst.msk [vmem:[#allocation2 + $0x98] sm:$0xff] %vm3084_vm2, %v1366_v28  ;;  %1362 = vst.msk [vmem:[#allocation2 + $0x90] sm:$0xff] %vm3084_vm2, %v1360_v29  ;;  %v849_v38 = vpop.permute.xlu0 %848  ;;  %v1370_v45 = vpop.permute.xlu1 %1369  ;;  %1586 = vmatprep.subr.bf16.mxu0 %v2850_v37  ;;  %v2335_v37 = vld [vmem:[%s3999_s6] sm:$0x7] }
 0x113   : > { %v850_v6 = vrot.slane %v849_v38, 4  ;;  %v1371_v7 = vrot.slane %v1370_v45, 4  ;;  %1587 = vmatpush1.bf16.msra.mxu0 %v2852_v46 }
 0x115   : > { %v851_v15 = vsel %vm677_vm1, %v849_v38, %v850_v6  ;;  %v1372_v16 = vsel %vm649_vm10, %v1370_v45, %v1371_v7  ;;  %v878_v17 = vld [vmem:[#allocation2 + $0xb0] sm:$0xff]  ;;  %v879_v18 = vld [vmem:[#allocation2 + $0xb8] sm:$0xff]  ;;  %v2996_v38 = vmov 0   ;;  %v2343_v45 = vld [vmem:[%s4000_s7] sm:$0x7] }
 0x116   : > { %853 = vst.msk [vmem:[#allocation2 + $0xc0] sm:$0xff] %vm3084_vm2, %v851_v15  ;;  %1374 = vst.msk [vmem:[#allocation2 + $0xa0] sm:$0xff] %vm3084_vm2, %v1372_v16  ;;  %v1376_v22 = vpop.permute.xlu0 %1375  ;;  %v1382_v23 = vpop.permute.xlu1 %1381  ;;  %v2588_v24 = vcombine.high %v878_v17, %v879_v18  ;;  %v2587_v25 = vcombine.low %v878_v17, %v879_v18  ;;  %2793 = vset.pattern.permute.xlu0 %v2996_v38  ;;  %2794 = vset.pattern.permute.xlu1 %v2996_v38  ;;  %v3712_v38 = vld.sshfl [vmem:[%s3998_s5] sm:$0x33 pattern:$0x76325410] }
 0x117   : > { %v1377_v28 = vrot.slane %v1376_v22, 4  ;;  %v1383_v29 = vrot.slane %v1382_v23, 4  ;;  %2338 = vperm.xlu0 %2793, %v2335_v37   ;;  %2346 = vperm.xlu1 %2794, %v2343_v45  }
 0x118   : > { %1048 = vmatprep.subr.bf16.mxu1 %v2588_v24 }
 0x119   : > { %v1378_v46 = vsel %vm656_vm13, %v1376_v22, %v1377_v28  ;;  %v1384_v6 = vsel %vm663_vm14, %v1382_v23, %v1383_v29  ;;  %1049 = vmatpush1.bf16.msra.mxu1 %v2587_v25  ;;  %v2853_v7 = vld [vmem:[#allocation2 + $0x94] ss:$8 sps:$4 sm:$0xff]   ;;  %v2855_v17 = vld [vmem:[#allocation2 + $0x90] ss:$8 sps:$4 sm:$0xff]  }
 0x11a   : > { %1380 = vst.msk [vmem:[#allocation2 + $0xa8] sm:$0xff] %vm3084_vm2, %v1378_v46  ;;  %1386 = vst.msk [vmem:[#allocation2 + $0xb0] sm:$0xff] %vm3084_vm2, %v1384_v6  ;;  %v1388_v15 = vpop.permute.xlu0 %1387  ;;  %v1394_v16 = vpop.permute.xlu1 %1393  ;;  %1588 = vmatprep.subr.bf16.mxu0 %v2853_v7  ;;  %v2595_v7 = vcombine.high %v3111_v3, %v3257_v21 }
 0x11b   : > { %v1389_v18 = vrot.slane %v1388_v15, 4  ;;  %v1395_v24 = vrot.slane %v1394_v16, 4  ;;  %1589 = vmatpush1.bf16.msra.mxu0 %v2855_v17 }
 0x11d   : > { %v1390_v22 = vsel %vm670_vm15, %v1388_v15, %v1389_v18  ;;  %v880_v23 = vld [vmem:[#allocation2 + $0xc0] sm:$0xff]  ;;  %v1396_v25 = vsel %vm677_vm1, %v1394_v16, %v1395_v24  ;;  %v1075_v24 = vcombine.high %v3712_v38, %v3712_v38 }
 0x11e   : > { %1392 = vst.msk [vmem:[#allocation2 + $0xb8] sm:$0xff] %vm3084_vm2, %v1390_v22  ;;  %1398 = vst.msk [vmem:[#allocation2 + $0xc0] sm:$0xff] %vm3084_vm2, %v1396_v25  ;;  %v1617_v28 = vpop.permute.xlu0 %1616  ;;  %v2590_v29 = vcombine.high %v880_v23, %v880_v23  ;;  %v2589_v37 = vcombine.low %v880_v23, %v880_v23  ;;  %v1623_v46 = vpop.permute.xlu1 %1622 }
 0x11f   : > { %v1618_v45 = vrot.slane %v1617_v28, 4  ;;  %v1624_v15 = vrot.slane %v1623_v46, 4 }
 0x120   : > { %2591 = vmatprep.subr.msk.bf16.mxu1 %vm508_vm0, %v2590_v29  ;;  %v1021_v6 = vsel %vm508_vm0, %v2589_v37, 0  ;;  %v2930_v37 = vld.sshfl [vmem:[%s3998_s5 + $0x4] sm:$0x33 pattern:$0x76325410] }
 0x121   : > { %v1619_v16 = vsel %vm4063_vm4, %v1617_v28, %v1618_v45  ;;  %1051 = vmatpush1.bf16.msra.mxu1 %v1021_v6  ;;  %v2856_v17 = vld [vmem:[#allocation2 + $0xa4] ss:$8 sps:$4 sm:$0xff]   ;;  %v2858_v18 = vld [vmem:[#allocation2 + $0xa0] ss:$8 sps:$4 sm:$0xff]   ;;  %v1625_v22 = vsel %vm4062_vm6, %v1623_v46, %v1624_v15  ;;  %v2594_v28 = vcombine.low %v3111_v3, %v3257_v21  ;;  %vm4106_vm6 = vcmask 588800  }
 0x122   : > { %1621 = vst.msk [vmem:[#allocation2 + $0x8] sm:$0xff] %vm3084_vm2, %v1619_v16  ;;  %1211 = vmatprep.subr.bf16.mxu1 %v2595_v7  ;;  %v1629_v23 = vpop.permute.xlu0 %1628  ;;  %1627 = vst.msk [vmem:[#allocation2 + $0x10] sm:$0xff] %vm3084_vm2, %v1625_v22  ;;  %1590 = vmatprep.subr.bf16.mxu0 %v2856_v17  ;;  %v1635_v29 = vpop.permute.xlu1 %1634  ;;  %vm4107_vm4 = vcmask 1014784  }
 0x123   : > { %v1630_v25 = vrot.slane %v1629_v23, 4  ;;  %1591 = vmatpush1.bf16.msra.mxu0 %v2858_v18  ;;  %v1636_v45 = vrot.slane %v1635_v29, 4 }
 0x124   : > { %1059 = vmatmul.mubr.bf16.vlgmr.msra.gmra.mrb[0].mxu1 %v2930_v37 }
 0x125   : > { %v1631_v6 = vsel %vm4064_vm3, %v1629_v23, %v1630_v25  ;;  %1212 = vmatpush1.bf16.msra.mxu1 %v2594_v28  ;;  %v2859_v46 = vld [vmem:[#allocation2 + $0xb4] ss:$8 sps:$4 sm:$0xff]   ;;  %v2861_v7 = vld [vmem:[#allocation2 + $0xb0] ss:$8 sps:$4 sm:$0xff]   ;;  %2621 = vmatprep.mubr.msk.bf16.mxu1 %vm4106_vm6, %v1075_v24  ;;  %v1637_v3 = vsel %vm4107_vm4, %v1635_v29, %v1636_v45  ;;  %v1425_v15 = vld [vmem:[#allocation2 + $0xc0] sm:$0xff]  ;;  %vm4108_vm6 = vcmask 949248  }
 0x126   : > { %1633 = vst.msk [vmem:[#allocation2 + $0x18] sm:$0xff] %vm3084_vm2, %v1631_v6  ;;  %1213 = vmatprep.subr.bf16.mxu1 %v2597_v34  ;;  %v1641_v21 = vpop.permute.xlu0 %1640  ;;  %1639 = vst.msk [vmem:[#allocation2 + $0x20] sm:$0xff] %vm3084_vm2, %v1637_v3  ;;  %1592 = vmatprep.subr.bf16.mxu0 %v2859_v46  ;;  %v2649_v17 = vcombine.high %v1425_v15, %v1425_v15  ;;  %v1647_v18 = vpop.permute.xlu1 %1646  ;;  %v2648_v22 = vcombine.low %v1425_v15, %v1425_v15  ;;  %v3749_v25 = vld.sshfl [vmem:[%s3998_s5 + $0xc] sm:$0x33 pattern:$0x76325410] }
 0x127   : > { %v1642_v16 = vrot.slane %v1641_v21, 4  ;;  %1593 = vmatpush1.bf16.msra.mxu0 %v2861_v7  ;;  %v1648_v24 = vrot.slane %v1647_v18, 4  ;;  %vm4109_vm4 = vcmask 941056   ;;  %vm4113_vm3 = vcmask 916480  }
 0x128   : > { %2650 = vmatprep.subr.msk.bf16.mxu0 %vm508_vm0, %v2649_v17  ;;  %v1565_v31 = vsel %vm508_vm0, %v2648_v22, 0 }
 0x129   : > { %v1643_v23 = vsel %vm4108_vm6, %v1641_v21, %v1642_v16  ;;  %1214 = vmatpush1.bf16.msra.mxu1 %v2596_v35  ;;  %v2863_v34 = vld [vmem:[#allocation2 + $0x4] ss:$8 sps:$4 sm:$0xff]   ;;  %v1649_v28 = vsel %vm4109_vm4, %v1647_v18, %v1648_v24  ;;  %vm4110_vm6 = vcmask 932864   ;;  %vm4111_vm4 = vcmask 924672   ;;  %v1764_v44 = vld [vmem:[#allocation2 + $0x10] sm:$0xff] }
 0x12a   : > { %1645 = vst.msk [vmem:[#allocation2 + $0x28] sm:$0xff] %vm3084_vm2, %v1643_v23  ;;  %1215 = vmatprep.subr.bf16.mxu1 %v2599_v49  ;;  %v1653_v29 = vpop.permute.xlu0 %1652  ;;  %1975 = vst.msk [vmem:[#allocation2] sm:$0xff] %vm3084_vm2, %v3511_v36  ;;  %v1763_v37 = vld [vmem:[#allocation2 + $0x8] sm:$0xff]  ;;  %v1795_v49 = vcombine.high %v3749_v25, %v3749_v25 }
 0x12b   : > { %1651 = vst.msk [vmem:[#allocation2 + $0x30] sm:$0xff] %vm3084_vm2, %v1649_v28  ;;  %v1654_v30 = vrot.slane %v1653_v29, 4  ;;  %v1659_v45 = vpop.permute.xlu1 %1658  ;;  %1595 = vmatpush1.bf16.msra.mxu0 %v1565_v31 }
 0x12c   : > { %v1660_v6 = vrot.slane %v1659_v45, 4  ;;  %1931 = vmatprep.subr.bf16.mxu0 %v2863_v34 }
 0x12d   : > { %v1655_v46 = vsel %vm4110_vm6, %v1653_v29, %v1654_v30  ;;  %1216 = vmatpush1.bf16.msra.mxu1 %v2598_v50  ;;  %v2865_v36 = vld [vmem:[#allocation2 + $0x14] ss:$8 sps:$4 sm:$0xff]   ;;  %vm4112_vm6 = vcmask 588800   ;;  %v1766_v28 = vld [vmem:[#allocation2 + $0x20] sm:$0xff] }
 0x12e   : > { %1657 = vst.msk [vmem:[#allocation2 + $0x38] sm:$0xff] %vm3084_vm2, %v1655_v46  ;;  %1217 = vmatprep.subr.bf16.mxu1 %v2601_v60  ;;  %v1661_v7 = vsel %vm4111_vm4, %v1659_v45, %v1660_v6  ;;  %v1665_v3 = vpop.permute.xlu0 %1664  ;;  %1603 = vmatmul.mubr.bf16.vlgmr.msra.gmra.mrb[0].mxu0 %v2931_v39  ;;  %v1765_v50 = vld [vmem:[#allocation2 + $0x18] sm:$0xff]  ;;  %vm4114_vm4 = vcmask 850944  }
 0x12f   : > { %1663 = vst.msk [vmem:[#allocation2 + $0x40] sm:$0xff] %vm3084_vm2, %v1661_v7  ;;  %v1666_v15 = vrot.slane %v1665_v3, 4  ;;  %v1671_v16 = vpop.permute.xlu1 %1670  ;;  %2681 = vmatprep.mubr.msk.bf16.mxu0 %vm4112_vm6, %v1795_v49  ;;  %v2656_v23 = vcombine.low %v1764_v44, %v1765_v50  ;;  %vm4116_vm6 = vcmask 834560  }
 0x130   : > { %v1672_v17 = vrot.slane %v1671_v16, 4 }
 0x131   : > { %v1762_v35 = vld [vmem:[#allocation2] sm:$0xff]  ;;  %v1667_v60 = vsel %vm4113_vm3, %v1665_v3, %v1666_v15  ;;  %1218 = vmatpush1.bf16.msra.mxu1 %v2600_v61  ;;  %v1767_v56 = vld [vmem:[#allocation2 + $0x28] sm:$0xff]  ;;  %vm4115_vm3 = vcmask 842752  }
 0x132   : > { %v2654_v21 = vcombine.low %v1762_v35, %v1763_v37  ;;  %v2867_v18 = vld [vmem:[#allocation2 + $0x24] ss:$8 sps:$4 sm:$0xff]   ;;  %1669 = vst.msk [vmem:[#allocation2 + $0x48] sm:$0xff] %vm3084_vm2, %v1667_v60  ;;  %1219 = vmatprep.subr.bf16.mxu1 %v2603_v19  ;;  %v1673_v22 = vsel %vm4114_vm4, %v1671_v16, %v1672_v17  ;;  %v1677_v24 = vpop.permute.xlu0 %1676  ;;  %v2658_v35 = vcombine.low %v1766_v28, %v1767_v56  ;;  %v1768_v45 = vld [vmem:[#allocation2 + $0x30] sm:$0xff]  ;;  %vm4117_vm4 = vcmask 826368  }
 0x133   : > { %1675 = vst.msk [vmem:[#allocation2 + $0x50] sm:$0xff] %vm3084_vm2, %v1673_v22  ;;  %v1678_v34 = vrot.slane %v1677_v24, 4  ;;  %v1683_v57 = vpop.permute.xlu1 %1682 }
 0x134   : > { %1932 = vmatpush1.bf16.msra.mxu0 %v2654_v21  ;;  %v1684_v61 = vrot.slane %v1683_v57, 4 }
 0x135   : > { %1933 = vmatprep.subr.bf16.mxu0 %v2865_v36  ;;  %v1679_v29 = vsel %vm4115_vm3, %v1677_v24, %v1678_v34  ;;  %1220 = vmatpush1.bf16.msra.mxu1 %v2602_v20  ;;  %v2869_v19 = vld [vmem:[#allocation2 + $0x34] ss:$8 sps:$4 sm:$0xff]   ;;  %vm4118_vm3 = vcmask 1039360  }
 0x136   : > { %1681 = vst.msk [vmem:[#allocation2 + $0x58] sm:$0xff] %vm3084_vm2, %v1679_v29  ;;  %1221 = vmatprep.subr.bf16.mxu1 %v2605_v58  ;;  %v1685_v30 = vsel %vm4116_vm6, %v1683_v57, %v1684_v61  ;;  %v1689_v31 = vpop.permute.xlu0 %1688  ;;  %v1769_v13 = vld [vmem:[#allocation2 + $0x38] sm:$0xff]  ;;  %v1770_v3 = vld [vmem:[#allocation2 + $0x40] sm:$0xff]  ;;  %vm4119_vm6 = vcmask 1031168  }
 0x137   : > { %1687 = vst.msk [vmem:[#allocation2 + $0x60] sm:$0xff] %vm3084_vm2, %v1685_v30  ;;  %v1690_v37 = vrot.slane %v1689_v31, 4  ;;  %v1695_v14 = vpop.permute.xlu1 %1694  ;;  %v2660_v36 = vcombine.low %v1768_v45, %v1769_v13 }
 0x138   : > { %1934 = vmatpush1.bf16.msra.mxu0 %v2656_v23  ;;  %v1696_v20 = vrot.slane %v1695_v14, 4 }
 0x139   : > { %1935 = vmatprep.subr.bf16.mxu0 %v2867_v18  ;;  %v1691_v6 = vsel %vm4117_vm4, %v1689_v31, %v1690_v37  ;;  %1222 = vmatpush1.bf16.msra.mxu1 %v2604_v59  ;;  %v2871_v58 = vld [vmem:[#allocation2 + $0x44] ss:$8 sps:$4 sm:$0xff]   ;;  %vm4120_vm4 = vcmask 1022976  }
 0x13a   : > { %1693 = vst.msk [vmem:[#allocation2 + $0x68] sm:$0xff] %vm3084_vm2, %v1691_v6  ;;  %1223 = vmatprep.subr.bf16.mxu1 %v2607_v32  ;;  %v1697_v49 = vsel %vm607_vm12, %v1695_v14, %v1696_v20  ;;  %v1701_v46 = vpop.permute.xlu0 %1700  ;;  %v1771_v52 = vld [vmem:[#allocation2 + $0x48] sm:$0xff]  ;;  %v1772_v16 = vld [vmem:[#allocation2 + $0x50] sm:$0xff] }
 0x13b   : > { %1699 = vst.msk [vmem:[#allocation2 + $0x70] sm:$0xff] %vm3084_vm2, %v1697_v49  ;;  %v1702_v7 = vrot.slane %v1701_v46, 4  ;;  %v1707_v53 = vpop.permute.xlu1 %1706  ;;  %v2662_v44 = vcombine.low %v1770_v3, %v1771_v52 }
 0x13c   : > { %1936 = vmatpush1.bf16.msra.mxu0 %v2658_v35  ;;  %v1708_v59 = vrot.slane %v1707_v53, 4 }
 0x13d   : > { %1937 = vmatprep.subr.bf16.mxu0 %v2869_v19  ;;  %v1703_v21 = vsel %vm614_vm5, %v1701_v46, %v1702_v7  ;;  %1224 = vmatpush1.bf16.msra.mxu1 %v2606_v33  ;;  %v2873_v32 = vld [vmem:[#allocation2 + $0x54] ss:$8 sps:$4 sm:$0xff]  }
 0x13e   : > { %1705 = vst.msk [vmem:[#allocation2 + $0x78] sm:$0xff] %vm3084_vm2, %v1703_v21  ;;  %1225 = vmatprep.subr.bf16.mxu1 %v2609_v4  ;;  %v1709_v15 = vsel %vm621_vm7, %v1707_v53, %v1708_v59  ;;  %v1713_v39 = vpop.permute.xlu0 %1712  ;;  %v1773_v26 = vld [vmem:[#allocation2 + $0x58] sm:$0xff]  ;;  %v1774_v23 = vld [vmem:[#allocation2 + $0x60] sm:$0xff] }
 0x13f   : > { %1711 = vst.msk [vmem:[#allocation2 + $0x80] sm:$0xff] %vm3084_vm2, %v1709_v15  ;;  %v1714_v50 = vrot.slane %v1713_v39, 4  ;;  %v1719_v27 = vpop.permute.xlu1 %1718  ;;  %v2664_v22 = vcombine.low %v1772_v16, %v1773_v26 }
 0x140   : > { %1938 = vmatpush1.bf16.msra.mxu0 %v2660_v36  ;;  %v1720_v33 = vrot.slane %v1719_v27, 4 }
 0x141   : > { %1939 = vmatprep.subr.bf16.mxu0 %v2871_v58  ;;  %v1715_v17 = vsel %vm628_vm9, %v1713_v39, %v1714_v50  ;;  %1226 = vmatpush1.bf16.msra.mxu1 %v2608_v12  ;;  %v2875_v4 = vld [vmem:[#allocation2 + $0x64] ss:$8 sps:$4 sm:$0xff]  }
 0x142   : > { %1717 = vst.msk [vmem:[#allocation2 + $0x88] sm:$0xff] %vm3084_vm2, %v1715_v17  ;;  %1227 = vmatprep.subr.bf16.mxu1 %v2611_v62  ;;  %v1721_v60 = vsel %vm635_vm8, %v1719_v27, %v1720_v33  ;;  %v1725_v18 = vpop.permute.xlu0 %1724  ;;  %v1775_v8 = vld [vmem:[#allocation2 + $0x68] sm:$0xff]  ;;  %v1776_v29 = vld [vmem:[#allocation2 + $0x70] sm:$0xff] }
 0x143   : > { %1723 = vst.msk [vmem:[#allocation2 + $0x90] sm:$0xff] %vm3084_vm2, %v1721_v60  ;;  %v1726_v24 = vrot.slane %v1725_v18, 4  ;;  %v1731_v9 = vpop.permute.xlu1 %1730  ;;  %v2666_v57 = vcombine.low %v1774_v23, %v1775_v8 }
 0x144   : > { %1940 = vmatpush1.bf16.msra.mxu0 %v2662_v44  ;;  %v1732_v12 = vrot.slane %v1731_v9, 4 }
 0x145   : > { %1941 = vmatprep.subr.bf16.mxu0 %v2873_v32  ;;  %v1727_v34 = vsel %vm642_vm11, %v1725_v18, %v1726_v24  ;;  %1228 = vmatpush1.bf16.msra.mxu1 %v2610_v63  ;;  %v2877_v62 = vld [vmem:[#allocation2 + $0x74] ss:$8 sps:$4 sm:$0xff]  }
 0x146   : > { %1729 = vst.msk [vmem:[#allocation2 + $0x98] sm:$0xff] %vm3084_vm2, %v1727_v34  ;;  %1229 = vmatprep.subr.bf16.mxu1 %v2613_v47  ;;  %v1733_v28 = vsel %vm649_vm10, %v1731_v9, %v1732_v12  ;;  %v1737_v56 = vpop.permute.xlu0 %1736  ;;  %v1777_v48 = vld [vmem:[#allocation2 + $0x78] sm:$0xff]  ;;  %v1778_v45 = vld [vmem:[#allocation2 + $0x80] sm:$0xff] }
 0x147   : > { %1735 = vst.msk [vmem:[#allocation2 + $0xa0] sm:$0xff] %vm3084_vm2, %v1733_v28  ;;  %v1738_v61 = vrot.slane %v1737_v56, 4  ;;  %v1743_v51 = vpop.permute.xlu1 %1742  ;;  %v2668_v35 = vcombine.low %v1776_v29, %v1777_v48 }
 0x148   : > { %1942 = vmatpush1.bf16.msra.mxu0 %v2664_v22  ;;  %v1744_v63 = vrot.slane %v1743_v51, 4 }
 0x149   : > { %1943 = vmatprep.subr.bf16.mxu0 %v2875_v4  ;;  %v1739_v19 = vsel %vm656_vm13, %v1737_v56, %v1738_v61  ;;  %1230 = vmatpush1.bf16.msra.mxu1 %v2612_v1  ;;  %v2879_v47 = vld [vmem:[#allocation2 + $0x84] ss:$8 sps:$4 sm:$0xff]   ;;  %v2617_v1 = vcombine.high %v3643_v5, %v3641_v2 }
 0x14a   : > { %1741 = vst.msk [vmem:[#allocation2 + $0xa8] sm:$0xff] %vm3084_vm2, %v1739_v19  ;;  %1231 = vmatprep.subr.bf16.mxu1 %v2615_v54  ;;  %v1745_v30 = vsel %vm663_vm14, %v1743_v51, %v1744_v63  ;;  %v1749_v31 = vpop.permute.xlu0 %1748  ;;  %v1779_v42 = vld [vmem:[#allocation2 + $0x88] sm:$0xff]  ;;  %v1780_v49 = vld [vmem:[#allocation2 + $0x90] sm:$0xff] }
 0x14b   : > { %1747 = vst.msk [vmem:[#allocation2 + $0xb0] sm:$0xff] %vm3084_vm2, %v1745_v30  ;;  %v1750_v37 = vrot.slane %v1749_v31, 4  ;;  %v1755_v43 = vpop.permute.xlu1 %1754  ;;  %v2670_v6 = vcombine.low %v1778_v45, %v1779_v42 }
 0x14c   : > { %1944 = vmatpush1.bf16.msra.mxu0 %v2666_v57  ;;  %v1756_v13 = vrot.slane %v1755_v43, 4 }
 0x14d   : > { %1945 = vmatprep.subr.bf16.mxu0 %v2877_v62  ;;  %v1751_v14 = vsel %vm670_vm15, %v1749_v31, %v1750_v37  ;;  %1232 = vmatpush1.bf16.msra.mxu1 %v2614_v55  ;;  %v2881_v54 = vld [vmem:[#allocation2 + $0x94] ss:$8 sps:$4 sm:$0xff]  }
 0x14e   : > { %1753 = vst.msk [vmem:[#allocation2 + $0xb8] sm:$0xff] %vm3084_vm2, %v1751_v14  ;;  %1233 = vmatprep.subr.bf16.mxu1 %v2617_v1  ;;  %v1757_v20 = vsel %vm677_vm1, %v1755_v43, %v1756_v13  ;;  %v1978_v58 = vpop.permute.xlu0 %1977  ;;  %v1781_v46 = vld [vmem:[#allocation2 + $0x98] sm:$0xff]  ;;  %v1782_v32 = vld [vmem:[#allocation2 + $0xa0] sm:$0xff] }
 0x14f   : > { %1759 = vst.msk [vmem:[#allocation2 + $0xc0] sm:$0xff] %vm3084_vm2, %v1757_v20  ;;  %v1979_v36 = vrot.slane %v1978_v58, 4  ;;  %v1984_v7 = vpop.permute.xlu1 %1983  ;;  %v2672_v53 = vcombine.low %v1780_v49, %v1781_v46 }
 0x150   : > { %1946 = vmatpush1.bf16.msra.mxu0 %v2668_v35  ;;  %v1985_v55 = vrot.slane %v1984_v7, 4 }
 0x151   : > { %1947 = vmatprep.subr.bf16.mxu0 %v2879_v47  ;;  %1234 = vmatpush1.bf16.msra.mxu1 %v2616_v10  ;;  %v1980_v3 = vsel %vm4118_vm3, %v1978_v58, %v1979_v36  ;;  %v2883_v52 = vld [vmem:[#allocation2 + $0xa4] ss:$8 sps:$4 sm:$0xff]   ;;  %v1206_v10 = vsel %vm508_vm0, %v2618_v41, 0  ;;  %vm4121_vm3 = vcmask 1014784  }
 0x152   : > { %2620 = vmatprep.subr.msk.bf16.mxu1 %vm508_vm0, %v2619_v40  ;;  %1982 = vst.msk [vmem:[#allocation2 + $0x8] sm:$0xff] %vm3084_vm2, %v1980_v3  ;;  %v1986_v59 = vsel %vm4119_vm6, %v1984_v7, %v1985_v55  ;;  %v1990_v21 = vpop.permute.xlu0 %1989  ;;  %v1783_v11 = vld [vmem:[#allocation2 + $0xa8] sm:$0xff]  ;;  %v1784_v33 = vld [vmem:[#allocation2 + $0xb0] sm:$0xff]  ;;  %vm4122_vm6 = vcmask 949248  }
 0x153   : > { %1988 = vst.msk [vmem:[#allocation2 + $0x10] sm:$0xff] %vm3084_vm2, %v1986_v59  ;;  %v1991_v2 = vrot.slane %v1990_v21, 4  ;;  %v1996_v5 = vpop.permute.xlu1 %1995  ;;  %v2674_v50 = vcombine.low %v1782_v32, %v1783_v11 }
 0x154   : > { %1948 = vmatpush1.bf16.msra.mxu0 %v2670_v6  ;;  %v1997_v15 = vrot.slane %v1996_v5, 4 }
 0x155   : > { %1949 = vmatprep.subr.bf16.mxu0 %v2881_v54  ;;  %1236 = vmatpush1.bf16.msra.mxu1 %v1206_v10  ;;  %v1992_v39 = vsel %vm4120_vm4, %v1990_v21, %v1991_v2  ;;  %v2885_v44 = vld [vmem:[#allocation2 + $0xb4] ss:$8 sps:$4 sm:$0xff]   ;;  %vm4123_vm4 = vcmask 941056  }
 0x156   : > { %1994 = vst.msk [vmem:[#allocation2 + $0x18] sm:$0xff] %vm3084_vm2, %v1992_v39  ;;  %v1998_v16 = vsel %vm4121_vm3, %v1996_v5, %v1997_v15  ;;  %v2002_v26 = vpop.permute.xlu0 %2001  ;;  %v1786_v27 = vld [vmem:[#allocation2 + $0xc0] sm:$0xff]  ;;  %v1785_v17 = vld [vmem:[#allocation2 + $0xb8] sm:$0xff]  ;;  %vm4124_vm3 = vcmask 932864  }
 0x157   : > { %2000 = vst.msk [vmem:[#allocation2 + $0x20] sm:$0xff] %vm3084_vm2, %v1998_v16  ;;  %v2003_v4 = vrot.slane %v2002_v26, 4  ;;  %v2008_v60 = vpop.permute.xlu1 %2007  ;;  %v2679_v24 = vcombine.high %v1786_v27, %v1786_v27  ;;  %v2676_v23 = vcombine.low %v1784_v33, %v1785_v17  ;;  %v2678_v34 = vcombine.low %v1786_v27, %v1786_v27 }
 0x158   : > { %1950 = vmatpush1.bf16.msra.mxu0 %v2672_v53  ;;  %v2009_v18 = vrot.slane %v2008_v60, 4  ;;  %1244 = vmatmul.mubr.bf16.vlgmr.msra.gmra.mrb[0].mxu1 %v3712_v38  ;;  %v3907_v38 = vld.sshfl [vmem:[%s3998_s5 + $0x10] sm:$0x33 pattern:$0x76325410] }
 0x159   : > { %1951 = vmatprep.subr.bf16.mxu0 %v2883_v52  ;;  %v2004_v22 = vsel %vm4122_vm6, %v2002_v26, %v2003_v4  ;;  %v2890_v57 = vld [vmem:[#allocation2 + $0x4] ss:$8 sps:$4 sm:$0xff]   ;;  %vm4125_vm6 = vcmask 924672   ;;  %v1926_v48 = vsel %vm508_vm0, %v2678_v34, 0  ;;  %v2156_v47 = vcombine.high %v3907_v38, %v3907_v38  ;;  %v2888_v35 = vld [vmem:[#allocation2] ss:$8 sps:$4 sm:$0xff]  }
 0x15a   : > { %2006 = vst.msk [vmem:[#allocation2 + $0x28] sm:$0xff] %vm3084_vm2, %v2004_v22  ;;  %v2010_v8 = vsel %vm4123_vm4, %v2008_v60, %v2009_v18  ;;  %v2014_v9 = vpop.permute.xlu0 %2013  ;;  %vm4126_vm4 = vcmask 916480  }
 0x15b   : > { %2012 = vst.msk [vmem:[#allocation2 + $0x30] sm:$0xff] %vm3084_vm2, %v2010_v8  ;;  %v2015_v12 = vrot.slane %v2014_v9, 4  ;;  %v2020_v62 = vpop.permute.xlu1 %2019 }
 0x15c   : > { %1952 = vmatpush1.bf16.msra.mxu0 %v2674_v50  ;;  %v2021_v28 = vrot.slane %v2020_v62, 4 }
 0x15d   : > { %1953 = vmatprep.subr.bf16.mxu0 %v2885_v44  ;;  %v2016_v56 = vsel %vm4124_vm3, %v2014_v9, %v2015_v12  ;;  %v2893_v31 = vld [vmem:[#allocation2 + $0x14] ss:$8 sps:$4 sm:$0xff]   ;;  %vm4127_vm3 = vcmask 850944   ;;  %v2891_v54 = vld [vmem:[#allocation2 + $0x10] ss:$8 sps:$4 sm:$0xff]  }
 0x15e   : > { %2018 = vst.msk [vmem:[#allocation2 + $0x38] sm:$0xff] %vm3084_vm2, %v2016_v56  ;;  %v2022_v61 = vsel %vm4125_vm6, %v2020_v62, %v2021_v28  ;;  %v2026_v29 = vpop.permute.xlu0 %2025  ;;  %vm4128_vm6 = vcmask 588800  }
 0x15f   : > { %2024 = vst.msk [vmem:[#allocation2 + $0x40] sm:$0xff] %vm3084_vm2, %v2022_v61  ;;  %v2027_v51 = vrot.slane %v2026_v29, 4  ;;  %v2032_v63 = vpop.permute.xlu1 %2031 }
 0x160   : > { %1954 = vmatpush1.bf16.msra.mxu0 %v2676_v23  ;;  %v2033_v19 = vrot.slane %v2032_v63, 4 }
 0x161   : > { %2680 = vmatprep.subr.msk.bf16.mxu0 %vm508_vm0, %v2679_v24  ;;  %v2028_v30 = vsel %vm4126_vm4, %v2026_v29, %v2027_v51  ;;  %vm4129_vm4 = vcmask 842752   ;;  %v2896_v14 = vld [vmem:[#allocation2 + $0x24] ss:$8 sps:$4 sm:$0xff]   ;;  %v2894_v7 = vld [vmem:[#allocation2 + $0x20] ss:$8 sps:$4 sm:$0xff]  }
 0x162   : > { %2030 = vst.msk [vmem:[#allocation2 + $0x48] sm:$0xff] %vm3084_vm2, %v2028_v30  ;;  %v2034_v37 = vsel %vm4127_vm3, %v2032_v63, %v2033_v19  ;;  %v2038_v45 = vpop.permute.xlu0 %2037  ;;  %vm4130_vm3 = vcmask 834560  }
 0x163   : > { %2036 = vst.msk [vmem:[#allocation2 + $0x50] sm:$0xff] %vm3084_vm2, %v2034_v37  ;;  %v2039_v42 = vrot.slane %v2038_v45, 4  ;;  %v2044_v43 = vpop.permute.xlu1 %2043 }
 0x164   : > { %1956 = vmatpush1.bf16.msra.mxu0 %v1926_v48  ;;  %v2045_v1 = vrot.slane %v2044_v43, 4 }
 0x165   : > { %2292 = vmatprep.subr.bf16.mxu0 %v2890_v57  ;;  %v2040_v13 = vsel %vm4129_vm4, %v2038_v45, %v2039_v42  ;;  %v2899_v36 = vld [vmem:[#allocation2 + $0x34] ss:$8 sps:$4 sm:$0xff]   ;;  %v2897_v21 = vld [vmem:[#allocation2 + $0x30] ss:$8 sps:$4 sm:$0xff]  }
 0x166   : > { %2042 = vst.msk [vmem:[#allocation2 + $0x58] sm:$0xff] %vm3084_vm2, %v2040_v13  ;;  %v2046_v20 = vsel %vm4130_vm3, %v2044_v43, %v2045_v1 }
 0x167   : > { %1964 = vmatmul.mubr.bf16.vlgmr.msra.gmra.mrb[0].mxu0 %v3749_v25  ;;  %v2050_v25 = vpop.permute.xlu0 %2049  ;;  %2048 = vst.msk [vmem:[#allocation2 + $0x60] sm:$0xff] %vm3084_vm2, %v2046_v20  ;;  %v2056_v58 = vpop.permute.xlu1 %2055 }
 0x168   : > { %2293 = vmatpush1.bf16.msra.mxu0 %v2888_v35  ;;  %2711 = vmatprep.mubr.msk.bf16.mxu0 %vm4128_vm6, %v2156_v47  ;;  %v2051_v6 = vrot.slane %v2050_v25, 4  ;;  %v2057_v49 = vrot.slane %v2056_v58, 4  ;;  %vm4131_vm6 = vcmask 826368  }
 0x169   : > { %2294 = vmatprep.subr.bf16.mxu0 %v2893_v31  ;;  %v2902_v59 = vld [vmem:[#allocation2 + $0x44] ss:$8 sps:$4 sm:$0xff]   ;;  %v2900_v44 = vld [vmem:[#allocation2 + $0x40] ss:$8 sps:$4 sm:$0xff]  }
 0x16a   : > { %v2052_v46 = vsel %vm4131_vm6, %v2050_v25, %v2051_v6  ;;  %v2058_v40 = vsel %vm607_vm12, %v2056_v58, %v2057_v49 }
 0x16b   : > { %2054 = vst.msk [vmem:[#allocation2 + $0x68] sm:$0xff] %vm3084_vm2, %v2052_v46  ;;  %v2062_v41 = vpop.permute.xlu0 %2061  ;;  %2060 = vst.msk [vmem:[#allocation2 + $0x70] sm:$0xff] %vm3084_vm2, %v2058_v40  ;;  %v2068_v3 = vpop.permute.xlu1 %2067 }
 0x16c   : > { %2295 = vmatpush1.bf16.msra.mxu0 %v2891_v54  ;;  %v2063_v55 = vrot.slane %v2062_v41, 4  ;;  %v2069_v52 = vrot.slane %v2068_v3, 4 }
 0x16d   : > { %2296 = vmatprep.subr.bf16.mxu0 %v2896_v14  ;;  %v2905_v39 = vld [vmem:[#allocation2 + $0x54] ss:$8 sps:$4 sm:$0xff]   ;;  %v2903_v60 = vld [vmem:[#allocation2 + $0x50] ss:$8 sps:$4 sm:$0xff]  }
 0x16e   : > { %v2064_v53 = vsel %vm614_vm5, %v2062_v41, %v2063_v55  ;;  %v2070_v32 = vsel %vm621_vm7, %v2068_v3, %v2069_v52 }
 0x16f   : > { %2066 = vst.msk [vmem:[#allocation2 + $0x78] sm:$0xff] %vm3084_vm2, %v2064_v53  ;;  %v2074_v11 = vpop.permute.xlu0 %2073  ;;  %2072 = vst.msk [vmem:[#allocation2 + $0x80] sm:$0xff] %vm3084_vm2, %v2070_v32  ;;  %v2080_v5 = vpop.permute.xlu1 %2079 }
 0x170   : > { %2297 = vmatpush1.bf16.msra.mxu0 %v2894_v7  ;;  %v2075_v2 = vrot.slane %v2074_v11, 4  ;;  %v2081_v10 = vrot.slane %v2080_v5, 4 }
 0x171   : > { %2298 = vmatprep.subr.bf16.mxu0 %v2899_v36 }
 0x172   : > { %v2076_v15 = vsel %vm628_vm9, %v2074_v11, %v2075_v2  ;;  %v2082_v50 = vsel %vm635_vm8, %v2080_v5, %v2081_v10  ;;  %v2908_v4 = vld [vmem:[#allocation2 + $0x64] ss:$8 sps:$4 sm:$0xff]   ;;  %v2906_v34 = vld [vmem:[#allocation2 + $0x60] ss:$8 sps:$4 sm:$0xff]  }
 0x173   : > { %2078 = vst.msk [vmem:[#allocation2 + $0x88] sm:$0xff] %vm3084_vm2, %v2076_v15  ;;  %v2086_v16 = vpop.permute.xlu0 %2085  ;;  %2084 = vst.msk [vmem:[#allocation2 + $0x90] sm:$0xff] %vm3084_vm2, %v2082_v50  ;;  %v2092_v27 = vpop.permute.xlu1 %2091 }
 0x174   : > { %2299 = vmatpush1.bf16.msra.mxu0 %v2897_v21  ;;  %v2087_v26 = vrot.slane %v2086_v16, 4  ;;  %v2093_v33 = vrot.slane %v2092_v27, 4 }
 0x175   : > { %2300 = vmatprep.subr.bf16.mxu0 %v2902_v59 }
 0x176   : > { %v2088_v17 = vsel %vm642_vm11, %v2086_v16, %v2087_v26  ;;  %v2094_v18 = vsel %vm649_vm10, %v2092_v27, %v2093_v33  ;;  %v2911_v12 = vld [vmem:[#allocation2 + $0x74] ss:$8 sps:$4 sm:$0xff]   ;;  %v2909_v51 = vld [vmem:[#allocation2 + $0x70] ss:$8 sps:$4 sm:$0xff]  }
 0x177   : > { %2090 = vst.msk [vmem:[#allocation2 + $0x98] sm:$0xff] %vm3084_vm2, %v2088_v17  ;;  %v2098_v22 = vpop.permute.xlu0 %2097  ;;  %2096 = vst.msk [vmem:[#allocation2 + $0xa0] sm:$0xff] %vm3084_vm2, %v2094_v18  ;;  %v2104_v23 = vpop.permute.xlu1 %2103 }
 0x178   : > { %2301 = vmatpush1.bf16.msra.mxu0 %v2900_v44  ;;  %v2099_v24 = vrot.slane %v2098_v22, 4  ;;  %v2105_v8 = vrot.slane %v2104_v23, 4 }
 0x179   : > { %2302 = vmatprep.subr.bf16.mxu0 %v2905_v39 }
 0x17a   : > { %v2100_v9 = vsel %vm656_vm13, %v2098_v22, %v2099_v24  ;;  %v2106_v62 = vsel %vm663_vm14, %v2104_v23, %v2105_v8  ;;  %v2914_v48 = vld [vmem:[#allocation2 + $0x84] ss:$8 sps:$4 sm:$0xff]   ;;  %v2912_v47 = vld [vmem:[#allocation2 + $0x80] ss:$8 sps:$4 sm:$0xff]  }
 0x17b   : > { %2102 = vst.msk [vmem:[#allocation2 + $0xa8] sm:$0xff] %vm3084_vm2, %v2100_v9  ;;  %v2110_v28 = vpop.permute.xlu0 %2109  ;;  %2108 = vst.msk [vmem:[#allocation2 + $0xb0] sm:$0xff] %vm3084_vm2, %v2106_v62  ;;  %v2116_v57 = vpop.permute.xlu1 %2115 }
 0x17c   : > { %2303 = vmatpush1.bf16.msra.mxu0 %v2903_v60  ;;  %v2111_v56 = vrot.slane %v2110_v28, 4  ;;  %v2117_v61 = vrot.slane %v2116_v57, 4 }
 0x17d   : > { %2304 = vmatprep.subr.bf16.mxu0 %v2908_v4 }
 0x17e   : > { %v2112_v29 = vsel %vm670_vm15, %v2110_v28, %v2111_v56  ;;  %v2118_v63 = vsel %vm677_vm1, %v2116_v57, %v2117_v61  ;;  %v2917_v19 = vld [vmem:[#allocation2 + $0x94] ss:$8 sps:$4 sm:$0xff]   ;;  %v2915_v31 = vld [vmem:[#allocation2 + $0x90] ss:$8 sps:$4 sm:$0xff]  }
 0x17f   : > { %2114 = vst.msk [vmem:[#allocation2 + $0xb8] sm:$0xff] %vm3084_vm2, %v2112_v29  ;;  %2120 = vst.msk [vmem:[#allocation2 + $0xc0] sm:$0xff] %vm3084_vm2, %v2118_v63  ;;  %vm2358_vm2 = vcmask 129028  }
 0x180   : > { %2305 = vmatpush1.bf16.msra.mxu0 %v2906_v34 }
 0x181   : > { %2306 = vmatprep.subr.bf16.mxu0 %v2911_v12 }
 0x182   : > { %v2920_v30 = vld [vmem:[#allocation2 + $0xa4] ss:$8 sps:$4 sm:$0xff]   ;;  %v2918_v37 = vld [vmem:[#allocation2 + $0xa0] ss:$8 sps:$4 sm:$0xff]  }
 0x184   : > { %2307 = vmatpush1.bf16.msra.mxu0 %v2909_v51 }
 0x185   : > { %2308 = vmatprep.subr.bf16.mxu0 %v2914_v48 }
 0x186   : > { %v2923_v35 = vld [vmem:[#allocation2 + $0xb4] ss:$8 sps:$4 sm:$0xff]   ;;  %v2147_v45 = vld [vmem:[#allocation2 + $0xc0] sm:$0xff]  ;;  %v2921_v43 = vld [vmem:[#allocation2 + $0xb0] ss:$8 sps:$4 sm:$0xff]  }
 0x187   : > { %v2709_v42 = vcombine.high %v2147_v45, %v2147_v45  ;;  %v2708_v0 = vcombine.low %v2147_v45, %v2147_v45 }
 0x188   : > { %2309 = vmatpush1.bf16.msra.mxu0 %v2912_v47 }
 0x189   : > { %2310 = vmatprep.subr.bf16.mxu0 %v2917_v19  ;;  %v2287_v1 = vsel %vm508_vm0, %v2708_v0, 0 }
 0x18c   : > { %2311 = vmatpush1.bf16.msra.mxu0 %v2915_v31 }
 0x18d   : > { %2312 = vmatprep.subr.bf16.mxu0 %v2920_v30 }
 0x190   : > { %2313 = vmatpush1.bf16.msra.mxu0 %v2918_v37 }
 0x191   : > { %2314 = vmatprep.subr.bf16.mxu0 %v2923_v35 }
 0x194   : > { %2315 = vmatpush1.bf16.msra.mxu0 %v2921_v43 }
 0x195   : > { %2710 = vmatprep.subr.msk.bf16.mxu0 %vm508_vm0, %v2709_v42  ;;  %vm2357_vm0 = vcmask 1042432  }
 0x196   : > { %v2339_v6 = vpop.permute.xlu0 %2338  ;;  %v2347_v7 = vpop.permute.xlu1 %2346  ;;  %vm2359_vm5 = vmor %vm2358_vm2, %vm2357_vm0 }
 0x198   : > { %2317 = vmatpush1.bf16.msra.mxu0 %v2287_v1 }
 0x19b   : > { %2325 = vmatmul.mubr.bf16.vlgmr.msra.gmra.mrb[0].mxu0 %v3907_v38 }
 0x22b   : > { %v1245_v13 = vpop.f32.mrb[0].mxu1 }
 0x22c   : > { %v1247_v14 = vpop.f32.mrb[1].mxu1 }
 0x22d   : > { %v1249_v54 = vpop.f32.mrb[2].mxu1 }
 0x22e   : > { %v1250_v20 = vpop.f32.mrb[3].mxu1 }
 0x26e   : > { %v2326_v25 = vpop.f32.mrb[0].mxu0 }
 0x26f   : > { %v2714_v58 = vadd.f32 %v2326_v25, %v1245_v13  ;;  %v2328_v49 = vpop.f32.mrb[1].mxu0 }
 0x270   : > { %v2715_v46 = vadd.f32 %v2328_v49, %v1247_v14  ;;  %v2330_v36 = vpop.f32.mrb[2].mxu0 }
 0x271   : > { %v2341_v40 = vmul.f32 %v2714_v58, %v2339_v6  ;;  %v2331_v41 = vpop.f32.mrb[3].mxu0 }
 0x272   : > { %v2342_v55 = vmul.f32 %v2715_v46, %v2339_v6 }
 0x273   : > { %v2349_v3 = vadd.f32 %v2347_v7, %v2341_v40 }
 0x274   : > { %v2350_v38 = vadd.f32 %v2347_v7, %v2342_v55 }
 0x275   : > { %2926 = vtanh.f32 %v2349_v3 }
 0x276   : > { %2928 = vtanh.f32 %v2350_v38 }
 0x27f   : > { %v2927_v52 = vpop.eup %2926 }
 0x280   : > { %v2929_v53 = vpop.eup %2928 }
 0x281   : > { %v2355_v59 = vcombine.low %v2927_v52, %v2929_v53 }
 0x283   : > { %2360 = vst.msk [vmem:[%s505_s26] sm:$0x77] %vm2359_vm5, %v2355_v59 }
 0x284 PF: > { %s4133_s29 = sld [smem:[#allocation5_spill]]  ;;  %s4134_s27 = sld [smem:[#allocation3_spill]] }
 0x285   : > { %s4135_s28 = sld [smem:[#allocation4_spill]]  ;;  %s4137_s30 = sld [smem:[#allocation7_spill]] }
 0x28a   : > { %s18_s9 = sadd.s32 1, %s4133_s29   ;;  %s4136_s29 = sld [smem:[#allocation6_spill]] }
 0x28b   : > { %p15_p12 = scmp.ge.s32.totalorder %s18_s9, 10  }
 0x28d   :  { %17 = sbr.rel (!%p15_p12) target bundleno = 6 (0x6), region = 98 }

</bundles_post_ra>
